<compile_context>
chip_gen: v7x
topology: tpu7x:2x2x1
jax: 0.10.0
libtpu: 0.0.40
codegen_flags: <defaults>
</compile_context>

<pallas_src>
import jax
import jax.numpy as jnp
from jax.experimental import pallas as pl
from jax.experimental.pallas import tpu as pltpu


# ----------------------------- Pallas kernels ------------------------------

def _conv_pool_kernel(p_ref, w_ref, b_ref, o_ref):
    """Fused 3x3 conv (im2col GEMM) + bias + ReLU + 2x2 max-pool.

    p_ref: [4, TR, Kg] bf16  -- 4 = 2x2 pool-window member; each row packs the
                                patches of g = 128//Cout pooled pixels
                                (Kg = g * 9*Cin).
    w_ref: [Kg, g*Cout] bf16 -- block-diagonal folded conv weight (g copies of
                                the [9*Cin, Cout] matrix on the diagonal).
    b_ref: [1, g*Cout] f32   -- bias tiled g times.
    o_ref: [TR, g*Cout] bf16 -- lane-dense (128-wide) pooled+ReLU output, rows
                                already in NHWC-flatten order.
    """
    tr, kg = p_ref.shape[1], p_ref.shape[2]
    # One MXU dot over all 4 pool-window members (M = 4*TR), then 3 VPU maxima
    # on sublane-aligned row slices (TR is a multiple of 8 by construction).
    p = p_ref[...].reshape(4 * tr, kg)
    m = jnp.dot(p, w_ref[...], preferred_element_type=jnp.float32)
    m = jnp.maximum(jnp.maximum(m[0 * tr:1 * tr], m[1 * tr:2 * tr]),
                    jnp.maximum(m[2 * tr:3 * tr], m[3 * tr:4 * tr]))
    # Bias is shared by the 4 window members and ReLU is monotone, so
    # relu(max(conv) + b) == max(relu(conv + b)): apply bias/ReLU once.
    o_ref[...] = jnp.maximum(m + b_ref[...], 0.0).astype(o_ref.dtype)


def _fc_fused_kernel(x_ref, w1_ref, b1_ref, w2_ref, o_ref):
    """Fused fc1-chunk + ReLU + fc2-chunk -> partial logits.

    The grid axis j splits fc1's N (=1024) axis; each step computes
    h_j = relu(x @ w1[:, chunk_j] + b1[chunk_j]) and the partial logits
    h_j @ w2[chunk_j, :].  The [B, 512] hidden chunk never leaves VMEM.
    """
    h = jnp.dot(x_ref[...], w1_ref[...], preferred_element_type=jnp.float32)
    h = jnp.maximum(h + b1_ref[...], 0.0).astype(jnp.bfloat16)
    o_ref[0] = jnp.dot(h, w2_ref[...], preferred_element_type=jnp.float32)


# ------------------------------ Stage wrappers ------------------------------

def conv3x3_relu_pool2(x_nhwc, w_folded, b_folded, *, block_rows=256):
    """Fused: 3x3 conv (padding=1) + bias + ReLU + 2x2 max-pool (stride 2)."""
    B, H, W, Cin = x_nhwc.shape
    Ho, Wo = H // 2, W // 2
    K = 9 * Cin
    Kg, lanes = w_folded.shape        # (g*K, g*Cout), g*Cout == 128
    g = Kg // K                       # pooled pixels folded per lane-dense row
    Cout = lanes // g
    P = B * Ho * Wo                   # pooled output pixels
    Ppad = ((P + 8 * g - 1) // (8 * g)) * (8 * g)
    R = Ppad // g                     # output rows (multiple of 8)

    # Thin wrapper glue: one zero-pad, then the pool-member-grouped im2col
    # patches built with stride-2 slices (single materialization of the patch
    # tensor; no 6-D transpose).
    xp = jnp.pad(x_nhwc, ((0, 0), (1, 1), (1, 1), (0, 0)))
    members = []
    for wy in range(2):
        for wx in range(2):
            taps = [xp[:, wy + ky: wy + ky + 2 * Ho - 1: 2,
                       wx + kx: wx + kx + 2 * Wo - 1: 2, :]
                    for ky in range(3) for kx in range(3)]
            members.append(jnp.concatenate(taps, axis=-1).reshape(P, K))
    pat = jnp.stack(members, axis=0)                       # [4, P, K]
    if Ppad != P:
        pat = jnp.pad(pat, ((0, 0), (0, Ppad - P), (0, 0)))
    pat = pat.reshape(4, R, Kg)       # fold g pixels into lanes (free reshape)

    tr = R if R <= block_rows else block_rows              # block_rows % 8 == 0
    out = pl.pallas_call(
        _conv_pool_kernel,
        out_shape=jax.ShapeDtypeStruct((R, lanes), jnp.bfloat16),
        grid=(pl.cdiv(R, tr),),
        in_specs=[
            pl.BlockSpec((4, tr, Kg), lambda i: (0, i, 0)),
            pl.BlockSpec((Kg, lanes), lambda i: (0, 0)),
            pl.BlockSpec((1, lanes), lambda i: (0, 0)),
        ],
        out_specs=pl.BlockSpec((tr, lanes), lambda i: (i, 0)),
        compiler_params=pltpu.CompilerParams(
            dimension_semantics=("parallel",)),
    )(pat, w_folded, b_folded)

    out = out.reshape(-1)
    if Ppad != P:
        out = out[: P * Cout]
    return out.reshape(B, Ho, Wo, Cout)


def fc1_relu_fc2(x_flat, w1, b1, w2, b2, *, n_split=2):
    """Fused fc1+ReLU+fc2, gridded over fc1's N axis (n_split chunks).

    n_split=2 lets v7x shard the chunks across its two TensorCores
    ("parallel" grid) and lets v5e/v6e overlap the second w1-chunk DMA with
    the first chunk's compute.  Partial logits are summed in the wrapper and
    fc2's bias is added once there.
    """
    B, D = x_flat.shape
    N1 = w1.shape[1]
    N2 = w2.shape[1]
    assert N1 % n_split == 0
    nb = N1 // n_split
    partial = pl.pallas_call(
        _fc_fused_kernel,
        out_shape=jax.ShapeDtypeStruct((n_split, B, N2), jnp.float32),
        grid=(n_split,),
        in_specs=[
            pl.BlockSpec((B, D), lambda j: (0, 0)),
            pl.BlockSpec((D, nb), lambda j: (0, j)),
            pl.BlockSpec((1, nb), lambda j: (0, j)),
            pl.BlockSpec((nb, N2), lambda j: (j, 0)),
        ],
        out_specs=pl.BlockSpec((1, B, N2), lambda j: (j, 0, 0)),
        compiler_params=pltpu.CompilerParams(
            dimension_semantics=("parallel",)),
    )(x_flat, w1, b1, w2)
    return jnp.sum(partial, axis=0) + b2


# ------------------------------ Parameters ----------------------------------

def init_params(key):
    """Raw f32 parameters (PyTorch-equivalent values).

    Conv weights are HWIO; fc weights are [in, out].  fc1_w rows are in
    NHWC-flatten (h, w, c) order; a real PyTorch fc1.weight ([1024, 3136] with
    columns in (c, h, w) order) would be permuted once at load time:
      w1 = W.T.reshape(64, 7, 7, 1024).transpose(1, 2, 0, 3).reshape(3136, 1024)
    """
    ks = jax.random.split(key, 8)
    return {
        "conv1_w": jax.random.normal(ks[0], (3, 3, 1, 32), jnp.float32) * 0.1,
        "conv1_b": jax.random.normal(ks[1], (32,), jnp.float32) * 0.01,
        "conv2_w": jax.random.normal(ks[2], (3, 3, 32, 64), jnp.float32) * 0.05,
        "conv2_b": jax.random.normal(ks[3], (64,), jnp.float32) * 0.01,
        "fc1_w": jax.random.normal(ks[4], (7 * 7 * 64, 1024), jnp.float32) * 0.02,
        "fc1_b": jax.random.normal(ks[5], (1024,), jnp.float32) * 0.01,
        "fc2_w": jax.random.normal(ks[6], (1024, 10), jnp.float32) * 0.02,
        "fc2_b": jax.random.normal(ks[7], (10,), jnp.float32) * 0.01,
    }


def _fold_conv_weight(w, b):
    """Fold a [3,3,Cin,Cout] conv weight into the block-diagonal [g*K, 128]
    form used by _conv_pool_kernel (g = 128 // Cout pooled pixels per
    lane-dense output row) and tile the bias g times."""
    kh, kw, cin, cout = w.shape
    K = kh * kw * cin
    g = 128 // cout
    wm = w.reshape(K, cout)
    wf = jnp.zeros((g * K, g * cout), w.dtype)
    for j in range(g):
        wf = wf.at[j * K:(j + 1) * K, j * cout:(j + 1) * cout].set(wm)
    bf = jnp.tile(b, g).reshape(1, g * cout)
    return wf.astype(jnp.bfloat16), bf.astype(jnp.float32)


def prepare_params(p):
    """One-time conversion to kernel-ready dtypes/layouts (done at load time,
    NOT per forward call): bf16 matmul operands, folded conv weights/biases.
    Optional further step (not done here): int8 fc1_w on v5e/v6e or fp8 on
    v7x with per-channel scales, if the accuracy hit is acceptable."""
    c1w, c1b = _fold_conv_weight(p["conv1_w"], p["conv1_b"])
    c2w, c2b = _fold_conv_weight(p["conv2_w"], p["conv2_b"])
    return {
        "conv1_wf": c1w, "conv1_bf": c1b,
        "conv2_wf": c2w, "conv2_bf": c2b,
        "fc1_w": p["fc1_w"].astype(jnp.bfloat16),
        "fc1_b": p["fc1_b"].reshape(1, -1).astype(jnp.float32),
        "fc2_w": p["fc2_w"].astype(jnp.bfloat16),
        "fc2_b": p["fc2_b"].reshape(1, -1).astype(jnp.float32),
    }


# ------------------------------ Model forward -------------------------------

def net_mnist_forward(x_nchw, kp):
    # x_nchw: [B, 1, 28, 28] (PyTorch layout) -> NHWC bf16 activations.
    x = jnp.transpose(x_nchw, (0, 2, 3, 1)).astype(jnp.bfloat16)
    x = conv3x3_relu_pool2(x, kp["conv1_wf"], kp["conv1_bf"])   # [B,14,14,32]
    x = conv3x3_relu_pool2(x, kp["conv2_wf"], kp["conv2_bf"])   # [B, 7, 7,64]
    B = x.shape[0]
    x = x.reshape(B, -1)           # NHWC flatten; matches fc1_w row order.
    return fc1_relu_fc2(x, kp["fc1_w"], kp["fc1_b"],
                        kp["fc2_w"], kp["fc2_b"])               # [B, 10]


def reference_forward(x_nchw, p):
    """Pure-JAX f32 reference of the PyTorch NetMnist forward (eval mode)."""
    x = jnp.transpose(x_nchw, (0, 2, 3, 1))

    def conv_relu(x, w, b):
        y = jax.lax.conv_general_dilated(
            x, w, window_strides=(1, 1), padding="SAME",
            dimension_numbers=("NHWC", "HWIO", "NHWC"))
        return jax.nn.relu(y + b)

    def pool2(x):
        return jax.lax.reduce_window(
            x, -jnp.inf, jax.lax.max, (1, 2, 2, 1), (1, 2, 2, 1), "VALID")

    x = pool2(conv_relu(x, p["conv1_w"], p["conv1_b"]))
    x = pool2(conv_relu(x, p["conv2_w"], p["conv2_b"]))
    x = x.reshape(x.shape[0], -1)
    x = jax.nn.relu(x @ p["fc1_w"] + p["fc1_b"])
    return x @ p["fc2_w"] + p["fc2_b"]


if __name__ == "__main__":
    key = jax.random.PRNGKey(0)
    kx, kparam = jax.random.split(key)
    # 28x28 input is required by fc1 (7*7*64 after two 2x pools); batch = 2.
    x = jax.random.normal(kx, (2, 1, 28, 28), jnp.float32)
    raw_params = init_params(kparam)
    kparams = prepare_params(raw_params)   # one-time bf16 / folded-weight prep

    fwd = jax.jit(net_mnist_forward)
    out = fwd(x, kparams)
    jax.block_until_ready(out)

    assert out.shape == (2, 10), out.shape
    assert bool(jnp.all(jnp.isfinite(out)))
    ref = reference_forward(x, raw_params)
    assert bool(jnp.allclose(out, ref, atol=1e-1, rtol=1e-1)), (out, ref)
    print("KERNEL_OK")
</pallas_src>

<mosaic_0001>
module attributes {stable_mosaic.version = 11 : i64} {
  func.func @_conv_pool_kernel(%arg0: i32, %arg1: memref<4x104x36xbf16, #tpu.memory_space<vmem>>, %arg2: memref<36x128xbf16, #tpu.memory_space<vmem>>, %arg3: memref<1x128xf32, #tpu.memory_space<vmem>>, %arg4: memref<104x128xbf16, #tpu.memory_space<vmem>>) attributes {dimension_semantics = [#tpu.dimension_semantics<parallel>], iteration_bounds = array<i64: 1>, scalar_prefetch = 0 : i64, scratch_operands = 0 : i64, tpu.core_type = #tpu.core_type<tc>, window_params = [{transform_indices = @transform_0, window_bounds = array<i64: 4, 104, 36>}, {pipeline_mode = #tpu.pipeline_mode<synchronous>, transform_indices = @transform_1, window_bounds = array<i64: 36, 128>}, {pipeline_mode = #tpu.pipeline_mode<synchronous>, transform_indices = @transform_2, window_bounds = array<i64: 1, 128>}, {transform_indices = @transform_3, window_bounds = array<i64: 104, 128>}]} {
    %c0 = arith.constant 0 : index
    %c0_0 = arith.constant 0 : index
    %c0_1 = arith.constant 0 : index
    %0 = vector.load %arg1[%c0, %c0_0, %c0_1] : memref<4x104x36xbf16, #tpu.memory_space<vmem>>, vector<4x104x36xbf16>
    %1 = vector.shape_cast %0 : vector<4x104x36xbf16> to vector<416x36xbf16>
    %c0_2 = arith.constant 0 : index
    %c0_3 = arith.constant 0 : index
    %2 = vector.load %arg2[%c0_2, %c0_3] : memref<36x128xbf16, #tpu.memory_space<vmem>>, vector<36x128xbf16>
    %cst = arith.constant dense<0.000000e+00> : vector<416x128xf32>
    %3 = tpu.matmul %1, %2, %cst {dimension_numbers = #tpu.dot_dimension_numbers<[1], [0], [0], [1], [0, 0, 1, 1], [], []>} : vector<416x36xbf16>, vector<36x128xbf16>, vector<416x128xf32> -> vector<416x128xf32>
    %4 = vector.extract_strided_slice %3 {offsets = [0, 0], sizes = [104, 128], strides = [1, 1]} : vector<416x128xf32> to vector<104x128xf32>
    %5 = vector.extract_strided_slice %3 {offsets = [104, 0], sizes = [104, 128], strides = [1, 1]} : vector<416x128xf32> to vector<104x128xf32>
    %6 = arith.maximumf %4, %5 : vector<104x128xf32>
    %7 = vector.extract_strided_slice %3 {offsets = [208, 0], sizes = [104, 128], strides = [1, 1]} : vector<416x128xf32> to vector<104x128xf32>
    %8 = vector.extract_strided_slice %3 {offsets = [312, 0], sizes = [104, 128], strides = [1, 1]} : vector<416x128xf32> to vector<104x128xf32>
    %9 = arith.maximumf %7, %8 : vector<104x128xf32>
    %10 = arith.maximumf %6, %9 : vector<104x128xf32>
    %c0_4 = arith.constant 0 : index
    %c0_5 = arith.constant 0 : index
    %11 = vector.load %arg3[%c0_4, %c0_5] : memref<1x128xf32, #tpu.memory_space<vmem>>, vector<1x128xf32>
    %12 = vector.broadcast %11 : vector<1x128xf32> to vector<104x128xf32>
    %13 = arith.addf %10, %12 : vector<104x128xf32>
    %cst_6 = arith.constant 0.000000e+00 : f32
    %14 = vector.broadcast %cst_6 : f32 to vector<104x128xf32>
    %15 = arith.maximumf %13, %14 : vector<104x128xf32>
    %16 = arith.truncf %15 : vector<104x128xf32> to vector<104x128xbf16>
    %c0_7 = arith.constant 0 : index
    %c0_8 = arith.constant 0 : index
    %17 = vector.load %arg4[%c0_7, %c0_8] : memref<104x128xbf16, #tpu.memory_space<vmem>>, vector<104x128xbf16>
    tpu.vector_store %arg4[%c0_7, %c0_8], %16 {strides = array<i32>} : memref<104x128xbf16, #tpu.memory_space<vmem>>, vector<104x128xbf16>,
    return
  }
  func.func @transform_0(%arg0: i32) -> (i32, i32, i32) {
    %c0_i32 = arith.constant 0 : i32
    %c0_i32_0 = arith.constant 0 : i32
    %c0_i32_1 = arith.constant 0 : i32
    return %c0_i32, %arg0, %c0_i32_0 : i32, i32, i32
  }
  func.func @transform_1(%arg0: i32) -> (i32, i32) {
    %c0_i32 = arith.constant 0 : i32
    %c0_i32_0 = arith.constant 0 : i32
    %c0_i32_1 = arith.constant 0 : i32
    return %c0_i32, %c0_i32_0 : i32, i32
  }
  func.func @transform_2(%arg0: i32) -> (i32, i32) {
    %c0_i32 = arith.constant 0 : i32
    %c0_i32_0 = arith.constant 0 : i32
    %c0_i32_1 = arith.constant 0 : i32
    return %c0_i32, %c0_i32_0 : i32, i32
  }
  func.func @transform_3(%arg0: i32) -> (i32, i32) {
    %c0_i32 = arith.constant 0 : i32
    %c0_i32_0 = arith.constant 0 : i32
    return %arg0, %c0_i32 : i32, i32
  }
}

module attributes {stable_mosaic.version = 11 : i64} {
  func.func @_conv_pool_kernel(%arg0: i32, %arg1: memref<4x56x576xbf16, #tpu.memory_space<vmem>>, %arg2: memref<576x128xbf16, #tpu.memory_space<vmem>>, %arg3: memref<1x128xf32, #tpu.memory_space<vmem>>, %arg4: memref<56x128xbf16, #tpu.memory_space<vmem>>) attributes {dimension_semantics = [#tpu.dimension_semantics<parallel>], iteration_bounds = array<i64: 1>, scalar_prefetch = 0 : i64, scratch_operands = 0 : i64, tpu.core_type = #tpu.core_type<tc>, window_params = [{transform_indices = @transform_0, window_bounds = array<i64: 4, 56, 576>}, {pipeline_mode = #tpu.pipeline_mode<synchronous>, transform_indices = @transform_1, window_bounds = array<i64: 576, 128>}, {pipeline_mode = #tpu.pipeline_mode<synchronous>, transform_indices = @transform_2, window_bounds = array<i64: 1, 128>}, {transform_indices = @transform_3, window_bounds = array<i64: 56, 128>}]} {
    %c0 = arith.constant 0 : index
    %c0_0 = arith.constant 0 : index
    %c0_1 = arith.constant 0 : index
    %0 = vector.load %arg1[%c0, %c0_0, %c0_1] : memref<4x56x576xbf16, #tpu.memory_space<vmem>>, vector<4x56x576xbf16>
    %1 = vector.shape_cast %0 : vector<4x56x576xbf16> to vector<224x576xbf16>
    %c0_2 = arith.constant 0 : index
    %c0_3 = arith.constant 0 : index
    %2 = vector.load %arg2[%c0_2, %c0_3] : memref<576x128xbf16, #tpu.memory_space<vmem>>, vector<576x128xbf16>
    %cst = arith.constant dense<0.000000e+00> : vector<224x128xf32>
    %3 = tpu.matmul %1, %2, %cst {dimension_numbers = #tpu.dot_dimension_numbers<[1], [0], [0], [1], [0, 0, 1, 1], [], []>} : vector<224x576xbf16>, vector<576x128xbf16>, vector<224x128xf32> -> vector<224x128xf32>
    %4 = vector.extract_strided_slice %3 {offsets = [0, 0], sizes = [56, 128], strides = [1, 1]} : vector<224x128xf32> to vector<56x128xf32>
    %5 = vector.extract_strided_slice %3 {offsets = [56, 0], sizes = [56, 128], strides = [1, 1]} : vector<224x128xf32> to vector<56x128xf32>
    %6 = arith.maximumf %4, %5 : vector<56x128xf32>
    %7 = vector.extract_strided_slice %3 {offsets = [112, 0], sizes = [56, 128], strides = [1, 1]} : vector<224x128xf32> to vector<56x128xf32>
    %8 = vector.extract_strided_slice %3 {offsets = [168, 0], sizes = [56, 128], strides = [1, 1]} : vector<224x128xf32> to vector<56x128xf32>
    %9 = arith.maximumf %7, %8 : vector<56x128xf32>
    %10 = arith.maximumf %6, %9 : vector<56x128xf32>
    %c0_4 = arith.constant 0 : index
    %c0_5 = arith.constant 0 : index
    %11 = vector.load %arg3[%c0_4, %c0_5] : memref<1x128xf32, #tpu.memory_space<vmem>>, vector<1x128xf32>
    %12 = vector.broadcast %11 : vector<1x128xf32> to vector<56x128xf32>
    %13 = arith.addf %10, %12 : vector<56x128xf32>
    %cst_6 = arith.constant 0.000000e+00 : f32
    %14 = vector.broadcast %cst_6 : f32 to vector<56x128xf32>
    %15 = arith.maximumf %13, %14 : vector<56x128xf32>
    %16 = arith.truncf %15 : vector<56x128xf32> to vector<56x128xbf16>
    %c0_7 = arith.constant 0 : index
    %c0_8 = arith.constant 0 : index
    %17 = vector.load %arg4[%c0_7, %c0_8] : memref<56x128xbf16, #tpu.memory_space<vmem>>, vector<56x128xbf16>
    tpu.vector_store %arg4[%c0_7, %c0_8], %16 {strides = array<i32>} : memref<56x128xbf16, #tpu.memory_space<vmem>>, vector<56x128xbf16>,
    return
  }
  func.func @transform_0(%arg0: i32) -> (i32, i32, i32) {
    %c0_i32 = arith.constant 0 : i32
    %c0_i32_0 = arith.constant 0 : i32
    %c0_i32_1 = arith.constant 0 : i32
    return %c0_i32, %arg0, %c0_i32_0 : i32, i32, i32
  }
  func.func @transform_1(%arg0: i32) -> (i32, i32) {
    %c0_i32 = arith.constant 0 : i32
    %c0_i32_0 = arith.constant 0 : i32
    %c0_i32_1 = arith.constant 0 : i32
    return %c0_i32, %c0_i32_0 : i32, i32
  }
  func.func @transform_2(%arg0: i32) -> (i32, i32) {
    %c0_i32 = arith.constant 0 : i32
    %c0_i32_0 = arith.constant 0 : i32
    %c0_i32_1 = arith.constant 0 : i32
    return %c0_i32, %c0_i32_0 : i32, i32
  }
  func.func @transform_3(%arg0: i32) -> (i32, i32) {
    %c0_i32 = arith.constant 0 : i32
    %c0_i32_0 = arith.constant 0 : i32
    return %arg0, %c0_i32 : i32, i32
  }
}

module attributes {stable_mosaic.version = 11 : i64} {
  func.func @_fc_fused_kernel(%arg0: i32, %arg1: memref<2x3136xbf16, #tpu.memory_space<vmem>>, %arg2: memref<3136x512xbf16, #tpu.memory_space<vmem>>, %arg3: memref<1x512xf32, #tpu.memory_space<vmem>>, %arg4: memref<512x10xbf16, #tpu.memory_space<vmem>>, %arg5: memref<1x2x10xf32, #tpu.memory_space<vmem>>) attributes {dimension_semantics = [#tpu.dimension_semantics<parallel>], iteration_bounds = array<i64: 2>, scalar_prefetch = 0 : i64, scratch_operands = 0 : i64, tpu.core_type = #tpu.core_type<tc>, window_params = [{pipeline_mode = #tpu.pipeline_mode<synchronous>, transform_indices = @transform_0, window_bounds = array<i64: 2, 3136>}, {transform_indices = @transform_1, window_bounds = array<i64: 3136, 512>}, {transform_indices = @transform_2, window_bounds = array<i64: 1, 512>}, {transform_indices = @transform_3, window_bounds = array<i64: 512, 10>}, {transform_indices = @transform_4, window_bounds = array<i64: 1, 2, 10>}]} {
    %c0 = arith.constant 0 : index
    %c0_0 = arith.constant 0 : index
    %0 = vector.load %arg1[%c0, %c0_0] : memref<2x3136xbf16, #tpu.memory_space<vmem>>, vector<2x3136xbf16>
    %c0_1 = arith.constant 0 : index
    %c0_2 = arith.constant 0 : index
    %1 = vector.load %arg2[%c0_1, %c0_2] : memref<3136x512xbf16, #tpu.memory_space<vmem>>, vector<3136x512xbf16>
    %cst = arith.constant dense<0.000000e+00> : vector<2x512xf32>
    %2 = tpu.matmul %0, %1, %cst {dimension_numbers = #tpu.dot_dimension_numbers<[1], [0], [0], [1], [0, 0, 1, 1], [], []>} : vector<2x3136xbf16>, vector<3136x512xbf16>, vector<2x512xf32> -> vector<2x512xf32>
    %c0_3 = arith.constant 0 : index
    %c0_4 = arith.constant 0 : index
    %3 = vector.load %arg3[%c0_3, %c0_4] : memref<1x512xf32, #tpu.memory_space<vmem>>, vector<1x512xf32>
    %4 = vector.broadcast %3 : vector<1x512xf32> to vector<2x512xf32>
    %5 = arith.addf %2, %4 : vector<2x512xf32>
    %cst_5 = arith.constant 0.000000e+00 : f32
    %6 = vector.broadcast %cst_5 : f32 to vector<2x512xf32>
    %7 = arith.maximumf %5, %6 : vector<2x512xf32>
    %8 = arith.truncf %7 : vector<2x512xf32> to vector<2x512xbf16>
    %c0_6 = arith.constant 0 : index
    %c0_7 = arith.constant 0 : index
    %9 = vector.load %arg4[%c0_6, %c0_7] : memref<512x10xbf16, #tpu.memory_space<vmem>>, vector<512x10xbf16>
    %cst_8 = arith.constant dense<0.000000e+00> : vector<2x10xf32>
    %10 = tpu.matmul %8, %9, %cst_8 {dimension_numbers = #tpu.dot_dimension_numbers<[1], [0], [0], [1], [0, 0, 1, 1], [], []>} : vector<2x512xbf16>, vector<512x10xbf16>, vector<2x10xf32> -> vector<2x10xf32>
    %c0_9 = arith.constant 0 : index
    %c0_10 = arith.constant 0 : index
    %c0_11 = arith.constant 0 : index
    %11 = vector.load %arg5[%c0_9, %c0_10, %c0_11] : memref<1x2x10xf32, #tpu.memory_space<vmem>>, vector<1x2x10xf32>
    %12 = vector.shape_cast %11 : vector<1x2x10xf32> to vector<2x10xf32>
    %13 = vector.shape_cast %10 : vector<2x10xf32> to vector<1x2x10xf32>
    tpu.vector_store %arg5[%c0_9, %c0_10, %c0_11], %13 {strides = array<i32>} : memref<1x2x10xf32, #tpu.memory_space<vmem>>, vector<1x2x10xf32>,
    return
  }
  func.func @transform_0(%arg0: i32) -> (i32, i32) {
    %c0_i32 = arith.constant 0 : i32
    %c0_i32_0 = arith.constant 0 : i32
    %c0_i32_1 = arith.constant 0 : i32
    return %c0_i32, %c0_i32_0 : i32, i32
  }
  func.func @transform_1(%arg0: i32) -> (i32, i32) {
    %c0_i32 = arith.constant 0 : i32
    %c0_i32_0 = arith.constant 0 : i32
    return %c0_i32, %arg0 : i32, i32
  }
  func.func @transform_2(%arg0: i32) -> (i32, i32) {
    %c0_i32 = arith.constant 0 : i32
    %c0_i32_0 = arith.constant 0 : i32
    return %c0_i32, %arg0 : i32, i32
  }
  func.func @transform_3(%arg0: i32) -> (i32, i32) {
    %c0_i32 = arith.constant 0 : i32
    %c0_i32_0 = arith.constant 0 : i32
    return %arg0, %c0_i32 : i32, i32
  }
  func.func @transform_4(%arg0: i32) -> (i32, i32, i32) {
    %c0_i32 = arith.constant 0 : i32
    %c0_i32_0 = arith.constant 0 : i32
    %c0_i32_1 = arith.constant 0 : i32
    return %arg0, %c0_i32, %c0_i32_0 : i32, i32, i32
  }
}

</mosaic_0001>

<bundles_post_ra>
// kernel: net_mnist_forward.3
= control target key start
LH: loop header
LB: loop body
LE: loop exit
PB: predicated region body
PF: predicated region fallthrough
CT: control target
= control target key end

     0   :  { %8 = vsyncpa [#allocation3], 0  ;;  %s1252_s0 = inlined_call_operand.vmem [shape: bf16[4,104,36], index: 0, kind: input, shape index: {}]   ;;  %s1253_s1 = inlined_call_operand.hbm [shape: bf16[36,128], index: 1, kind: input, shape index: {}]   ;;  %s1254_s2 = inlined_call_operand.hbm [shape: f32[1,128], index: 2, kind: input, shape index: {}]   ;;  %s1255_s3 = inlined_call_operand.vmem [shape: bf16[104,128], index: 3, kind: output, shape index: {}]  }
   0x1   :  { %9 = vsyncpa [#allocation5], 0  ;;  %s1004_s12 = smov [#allocation2]   ;;  %s956_s16 = scalar_lea.hbm %s1253_s1, 320 }
   0x2   :  { %s17_s13 = sshll.u32 %s1004_s12, 4  ;;  %p957_p0 = scmp.ne.s32.totalorder %s1253_s1, %s956_s16  ;;  %s18_s13 = int_to_ptr.vmem [resolvable:$true] %s17_s13 }
   0x3   :  { %p960_p1 = scmp.lt.u32.totalorder %s956_s16, %s1253_s1 }
   0x5   :  { %p962_p2 = pnand %p960_p1, %p957_p0 }
   0x7   :  { %965 = shalt.err (!%p962_p2)
}
   0x8   :  { %s966_s21 = scalar_lea.vmem %s18_s13, 320  ;;  %p971_p4 = scmp.lt.s32.totalorder %s18_s13, %s18_s13 }
   0x9   :  { %p967_p3 = scmp.ne.s32.totalorder %s18_s13, %s966_s21  ;;  %p972_p5 = scmp.lt.s32.totalorder %s966_s21, %s966_s21 }
   0xb   :  { %p973_p6 = por %p972_p5, %p971_p4 }
   0xd   :  { %p974_p7 = pnand %p973_p6, %p967_p3 }
   0xf   :  { %977 = shalt.err (!%p974_p7)
}
  0x10   :  { %s1005_s22 = smov 64   ;;  %s1006_s23 = smov 4  }
  0x11   :  { %23 = dma.hbm_to_vmem [thread:$0]  %s1253_s1, 320, %s18_s13, [#allocation3], %s1005_s22, %s1005_s22, %s1006_s23  }
  0x12   :  { %s1007_s26 = smov [#allocation4]   ;;  %s978_s30 = scalar_lea.hbm %s1254_s2, 16 }
  0x13   :  { %s30_s27 = sshll.u32 %s1007_s26, 4  ;;  %p979_p8 = scmp.ne.s32.totalorder %s1254_s2, %s978_s30  ;;  %s31_s27 = int_to_ptr.vmem [resolvable:$true] %s30_s27 }
  0x14   :  { %p982_p9 = scmp.lt.u32.totalorder %s978_s30, %s1254_s2 }
  0x16   :  { %p984_p10 = pnand %p982_p9, %p979_p8 }
  0x18   :  { %987 = shalt.err (!%p984_p10)
}
  0x19   :  { %s988_s8 = scalar_lea.vmem %s31_s27, 16  ;;  %s992_s1 = scalar_lea.vmem %s31_s27, 32 }
  0x1a   :  { %p989_p11 = scmp.ne.s32.totalorder %s31_s27, %s988_s8  ;;  %p993_p12 = scmp.lt.s32.totalorder %s31_s27, %s31_s27 }
  0x1b   :  { %p994_p13 = scmp.lt.s32.totalorder %s992_s1, %s988_s8 }
  0x1d   :  { %p995_p0 = por %p994_p13, %p993_p12 }
  0x1f   :  { %p996_p1 = pnand %p995_p0, %p989_p11 }
  0x21   :  { %999 = shalt.err (!%p996_p1)
}
  0x22   :  { %33 = dma.hbm_to_vmem [thread:$0]  %s1254_s2, 16, %s31_s27, [#allocation5]  }
  0x23   :  { %1000 = dma.done.wait [#allocation3], 320  }
  0x24   :  { %1001 = vsyncadd [#allocation3], 4294966976 }
  0x25   :  { %1002 = dma.done.wait [#allocation5], 16  }
  0x26   :  { %1003 = vsyncadd [#allocation5], 4294967280  ;;  %v927_v0 = vld [vmem:[#allocation2] sm:$0xff]   ;;  %v928_v1 = vld [vmem:[#allocation2 + $0x8] sm:$0xff]   ;;  %vm243_vm0 = vcmask 293888   ;;  %vm322_vm1 = vcmask 1041408  }
  0x27   :  { %857 = vmatprep.subr.bf16.mxu0 %v927_v0  ;;  %915 = vmatprep.subr.bf16.mxu1 %v927_v0  ;;  %v929_v2 = vld [vmem:[#allocation2 + $0x10] ss:$0 sps:$4 sm:$0x33]   ;;  %v930_v3 = vld [vmem:[%s1252_s0] sm:$0xff]   ;;  %v932_v6 = vld [vmem:[%s1252_s0 + $0x8] sm:$0xff]  }
  0x28   :  { %858 = vmatpush3.bf16.msra.mxu0 %v927_v0  ;;  %918 = vmatpush3.bf16.msra.mxu1 %v927_v0  ;;  %v931_v4 = vld [vmem:[%s1252_s0 + $0x70] sm:$0xff]   ;;  %v324_v5 = vsel %vm322_vm1, %v929_v2, 0  ;;  %v933_v7 = vld [vmem:[%s1252_s0 + $0x78] sm:$0xff]   ;;  %v935_v9 = vld [vmem:[%s1252_s0 + $0x80] sm:$0xff]  }
  0x29   :  { %859 = vmatprep.subr.bf16.mxu0 %v928_v1  ;;  %916 = vmatprep.subr.bf16.mxu1 %v928_v1  ;;  %v934_v8 = vld [vmem:[%s1252_s0 + $0x10] sm:$0xff]   ;;  %v936_v10 = vld [vmem:[%s1252_s0 + $0x18] sm:$0xff]   ;;  %v937_v11 = vld [vmem:[%s1252_s0 + $0x88] sm:$0xff]  }
  0x2a   :  { %863 = vmatprep.mubr.msk.bf16.mxu0 %vm243_vm0, %v930_v3  ;;  %891 = vmatprep.mubr.msk.bf16.mxu1 %vm243_vm0, %v931_v4  ;;  %v938_v12 = vld [vmem:[%s1252_s0 + $0x20] sm:$0xff]   ;;  %v939_v13 = vld [vmem:[%s1252_s0 + $0x90] sm:$0xff]   ;;  %v940_v14 = vld [vmem:[%s1252_s0 + $0x28] sm:$0xff]  }
  0x2b   :  { %v941_v15 = vld [vmem:[%s1252_s0 + $0x98] sm:$0xff]   ;;  %v942_v16 = vld [vmem:[%s1252_s0 + $0x30] sm:$0xff]   ;;  %v943_v17 = vld [vmem:[%s1252_s0 + $0xa0] sm:$0xff]  }
  0x2c   :  { %860 = vmatpush3.bf16.msra.mxu0 %v928_v1  ;;  %919 = vmatpush3.bf16.msra.mxu1 %v928_v1  ;;  %v944_v18 = vld [vmem:[%s1252_s0 + $0x38] sm:$0xff]   ;;  %v945_v19 = vld [vmem:[%s1252_s0 + $0xa8] sm:$0xff]   ;;  %v946_v20 = vld [vmem:[%s1252_s0 + $0x40] sm:$0xff]  }
  0x2d   :  { %921 = vmatprep.subr.msk.bf16.mxu0 %vm322_vm1, %v929_v2  ;;  %922 = vmatprep.subr.msk.bf16.mxu1 %vm322_vm1, %v929_v2  ;;  %v947_v21 = vld [vmem:[%s1252_s0 + $0xb0] sm:$0xff]   ;;  %v948_v22 = vld [vmem:[%s1252_s0 + $0x48] sm:$0xff]   ;;  %v949_v23 = vld [vmem:[%s1252_s0 + $0xb8] sm:$0xff]  }
  0x2e   :  { %v950_v24 = vld [vmem:[%s1252_s0 + $0x50] sm:$0xff]   ;;  %v951_v25 = vld [vmem:[%s1252_s0 + $0xc0] sm:$0xff]   ;;  %v952_v26 = vld [vmem:[%s1252_s0 + $0x58] sm:$0xff]  }
  0x2f   :  { %v953_v27 = vld [vmem:[%s1252_s0 + $0xc8] sm:$0xff]   ;;  %v954_v28 = vld [vmem:[%s1252_s0 + $0x60] sm:$0xff]  }
  0x30   :  { %862 = vmatpush3.bf16.msra.mxu0 %v324_v5  ;;  %920 = vmatpush3.bf16.msra.mxu1 %v324_v5  ;;  %v955_v29 = vld [vmem:[%s1252_s0 + $0x68] sm:$0xff]   ;;  %v1196_v5 = vld [vmem:[#allocation4] ss:$0 sm:$0xff] }
  0x33   :  { %864 = vmatmul.mubr.msk.bf16.vlgmr.msra.gmra.mrb[0].mxu0 %vm243_vm0, %v932_v6  ;;  %892 = vmatmul.mubr.msk.bf16.vlgmr.msra.gmra.mrb[0].mxu1 %vm243_vm0, %v933_v7 }
  0x34   :  { %867 = vmatprep.mubr.msk.bf16.mxu0 %vm243_vm0, %v934_v8  ;;  %895 = vmatprep.mubr.msk.bf16.mxu1 %vm243_vm0, %v935_v9 }
  0x3b   :  { %868 = vmatmul.mubr.msk.bf16.gmra.mrb[4].mxu0 %vm243_vm0, %v936_v10  ;;  %896 = vmatmul.mubr.msk.bf16.gmra.mrb[4].mxu1 %vm243_vm0, %v937_v11 }
  0x3c   :  { %871 = vmatprep.mubr.msk.bf16.mxu0 %vm243_vm0, %v938_v12  ;;  %899 = vmatprep.mubr.msk.bf16.mxu1 %vm243_vm0, %v939_v13 }
  0x43   :  { %872 = vmatmul.mubr.msk.bf16.gmra.mrb[8].mxu0 %vm243_vm0, %v940_v14  ;;  %900 = vmatmul.mubr.msk.bf16.gmra.mrb[8].mxu1 %vm243_vm0, %v941_v15 }
  0x44   :  { %875 = vmatprep.mubr.msk.bf16.mxu0 %vm243_vm0, %v942_v16  ;;  %903 = vmatprep.mubr.msk.bf16.mxu1 %vm243_vm0, %v943_v17 }
  0x4b   :  { %876 = vmatmul.mubr.msk.bf16.gmra.mrb[12].mxu0 %vm243_vm0, %v944_v18  ;;  %904 = vmatmul.mubr.msk.bf16.gmra.mrb[12].mxu1 %vm243_vm0, %v945_v19 }
  0x4c   :  { %879 = vmatprep.mubr.msk.bf16.mxu0 %vm243_vm0, %v946_v20  ;;  %907 = vmatprep.mubr.msk.bf16.mxu1 %vm243_vm0, %v947_v21 }
  0x53   :  { %880 = vmatmul.mubr.msk.bf16.gmra.mrb[16].mxu0 %vm243_vm0, %v948_v22  ;;  %908 = vmatmul.mubr.msk.bf16.gmra.mrb[16].mxu1 %vm243_vm0, %v949_v23 }
  0x54   :  { %883 = vmatprep.mubr.msk.bf16.mxu0 %vm243_vm0, %v950_v24  ;;  %911 = vmatprep.mubr.msk.bf16.mxu1 %vm243_vm0, %v951_v25 }
  0x5b   :  { %884 = vmatmul.mubr.msk.bf16.gmra.mrb[20].mxu0 %vm243_vm0, %v952_v26  ;;  %912 = vmatmul.mubr.msk.bf16.gmra.mrb[20].mxu1 %vm243_vm0, %v953_v27 }
  0x5c   :  { %887 = vmatprep.mubr.msk.bf16.mxu0 %vm243_vm0, %v954_v28 }
  0x63   :  { %888 = vmatmul.mubr.msk.bf16.gmra.mrb[24].mxu0 %vm243_vm0, %v955_v29 }
 0x106   :  { %v865_v30 = vpop.f32.mrb[0].mxu0  ;;  %v893_v31 = vpop.f32.mrb[0].mxu1 }
 0x107   :  { %v1156_v32 = vpop.f32.mrb[1].mxu0  ;;  %v472_v33 = vpop.f32.mrb[1].mxu1 }
 0x108   :  { %v866_v34 = vpop.f32.mrb[2].mxu0  ;;  %v894_v35 = vpop.f32.mrb[2].mxu1 }
 0x109   :  { %v1158_v36 = vpop.f32.mrb[3].mxu0  ;;  %v475_v37 = vpop.f32.mrb[3].mxu1 }
 0x10e   :  { %v869_v38 = vpop.f32.mrb[4].mxu0  ;;  %v1160_v39 = vpop.f32.mrb[4].mxu1 }
 0x10f   :  { %v376_v40 = vpop.f32.mrb[5].mxu0  ;;  %v488_v41 = vpop.f32.mrb[5].mxu1 }
 0x110   :  { %v1162_v42 = vpop.f32.mrb[6].mxu0  ;;  %v1164_v43 = vpop.f32.mrb[6].mxu1 }
 0x111   :  { %v379_v44 = vpop.f32.mrb[7].mxu0  ;;  %v1166_v45 = vpop.f32.mrb[7].mxu1 }
 0x116   :  { %v1168_v46 = vpop.f32.mrb[8].mxu0  ;;  %v1170_v47 = vpop.f32.mrb[8].mxu1 }
 0x117   :  { %v1172_v48 = vpop.f32.mrb[9].mxu0  ;;  %v1174_v49 = vpop.f32.mrb[9].mxu1 }
 0x118   :  { %v1176_v50 = vpop.f32.mrb[10].mxu0  ;;  %v1178_v51 = vpop.f32.mrb[10].mxu1 }
 0x119   :  { %v1180_v52 = vpop.f32.mrb[11].mxu0  ;;  %v1182_v53 = vpop.f32.mrb[11].mxu1 }
 0x11e   :  { %v1184_v54 = vpop.f32.mrb[12].mxu0  ;;  %v905_v55 = vpop.f32.mrb[12].mxu1 }
 0x11f   :  { %v568_v56 = vmax.f32 %v1158_v36, %v1184_v54  ;;  %v583_v57 = vmax.f32 %v475_v37, %v905_v55  ;;  %v1188_v58 = vpop.f32.mrb[13].mxu0  ;;  %v1190_v59 = vpop.f32.mrb[13].mxu1 }
 0x120   :  { %v878_v60 = vpop.f32.mrb[14].mxu0  ;;  %v906_v61 = vpop.f32.mrb[14].mxu1 }
 0x121   :  { %v569_v62 = vmax.f32 %v865_v30, %v878_v60  ;;  %v584_v63 = vmax.f32 %v893_v31, %v906_v61  ;;  %v1192_v0 = vpop.f32.mrb[15].mxu0  ;;  %v523_v1 = vpop.f32.mrb[15].mxu1 }
 0x122   :  { %v567_v2 = vmax.f32 %v1156_v32, %v1192_v0  ;;  %v582_v3 = vmax.f32 %v472_v33, %v523_v1 }
 0x124   :  { %v595_v4 = vmax.f32 %v569_v62, %v582_v3 }
 0x126   :  { %v881_v6 = vpop.f32.mrb[16].mxu0  ;;  %v909_v7 = vpop.f32.mrb[16].mxu1  ;;  %v615_v16 = vadd.f32 %v1196_v5, %v595_v4 }
 0x127   :  { %v572_v8 = vmax.f32 %v379_v44, %v881_v6  ;;  %v587_v9 = vmax.f32 %v1166_v45, %v909_v7  ;;  %v424_v10 = vpop.f32.mrb[17].mxu0  ;;  %v536_v11 = vpop.f32.mrb[17].mxu1 }
 0x128   :  { %v570_v12 = vmax.f32 %v866_v34, %v424_v10  ;;  %v585_v13 = vmax.f32 %v894_v35, %v536_v11  ;;  %v882_v14 = vpop.f32.mrb[18].mxu0  ;;  %v910_v15 = vpop.f32.mrb[18].mxu1  ;;  %v628_v29 = vmax.f32 %v615_v16, 0.0 }
 0x129   :  { %v573_v17 = vmax.f32 %v869_v38, %v882_v14  ;;  %v588_v18 = vmax.f32 %v1160_v39, %v910_v15  ;;  %v427_v19 = vpop.f32.mrb[19].mxu0  ;;  %v539_v20 = vpop.f32.mrb[19].mxu1 }
 0x12a   :  { %v596_v21 = vmax.f32 %v570_v12, %v583_v57  ;;  %v598_v22 = vmax.f32 %v572_v8, %v585_v13  ;;  %v571_v23 = vmax.f32 %v376_v40, %v427_v19  ;;  %v586_v24 = vmax.f32 %v488_v41, %v539_v20 }
 0x12c   :  { %v616_v25 = vadd.f32 %v1196_v5, %v596_v21  ;;  %v618_v26 = vadd.f32 %v1196_v5, %v598_v22  ;;  %v597_v27 = vmax.f32 %v571_v23, %v584_v63  ;;  %v599_v28 = vmax.f32 %v573_v17, %v586_v24 }
 0x12e   :  { %v629_v30 = vmax.f32 %v616_v25, 0.0  ;;  %v617_v31 = vadd.f32 %v1196_v5, %v597_v27  ;;  %v885_v33 = vpop.f32.mrb[20].mxu0  ;;  %v913_v34 = vpop.f32.mrb[20].mxu1  ;;  %v631_v41 = vmax.f32 %v618_v26, 0.0  ;;  %v619_v60 = vadd.f32 %v1196_v5, %v599_v28 }
 0x12f   :  { %v576_v35 = vmax.f32 %v1180_v52, %v885_v33  ;;  %v591_v37 = vmax.f32 %v1182_v53, %v913_v34  ;;  %v440_v38 = vpop.f32.mrb[21].mxu0  ;;  %v552_v39 = vpop.f32.mrb[21].mxu1 }
 0x130   :  { %v801_v40 = vpack.c.bf16 %v629_v30, %v628_v29  ;;  %v630_v44 = vmax.f32 %v617_v31, 0.0  ;;  %v574_v45 = vmax.f32 %v1162_v42, %v440_v38  ;;  %v886_v55 = vpop.f32.mrb[22].mxu0  ;;  %v914_v57 = vpop.f32.mrb[22].mxu1  ;;  %v589_v61 = vmax.f32 %v1164_v43, %v552_v39 }
 0x131   :  { %v577_v62 = vmax.f32 %v1168_v46, %v886_v55  ;;  %v592_v63 = vmax.f32 %v1170_v47, %v914_v57  ;;  %v443_v52 = vpop.f32.mrb[23].mxu0  ;;  %v555_v1 = vpop.f32.mrb[23].mxu1  ;;  %v632_v8 = vmax.f32 %v619_v60, 0.0 }
 0x132   :  { %823 = vst [vmem:[%s1255_s3 + $0x8] sm:$0xff] %v801_v40   ;;  %v806_v53 = vpack.c.bf16 %v631_v41, %v630_v44  ;;  %v600_v3 = vmax.f32 %v574_v45, %v587_v9  ;;  %v575_v42 = vmax.f32 %v1172_v48, %v443_v52  ;;  %v590_v4 = vmax.f32 %v1174_v49, %v555_v1 }
 0x133   :  { %v602_v6 = vmax.f32 %v576_v35, %v589_v61 }
 0x134   :  { %824 = vst [vmem:[%s1255_s3 + $0x10] sm:$0xff] %v806_v53   ;;  %v620_v43 = vadd.f32 %v1196_v5, %v600_v3  ;;  %v601_v46 = vmax.f32 %v575_v42, %v588_v18  ;;  %v603_v47 = vmax.f32 %v577_v62, %v590_v4 }
 0x135   :  { %v622_v7 = vadd.f32 %v1196_v5, %v602_v6 }
 0x136   :  { %v633_v10 = vmax.f32 %v620_v43, 0.0  ;;  %v621_v11 = vadd.f32 %v1196_v5, %v601_v46  ;;  %v889_v9 = vpop.f32.mrb[24].mxu0 }
 0x137   :  { %v580_v48 = vmax.f32 %v889_v9, %v1178_v51  ;;  %v456_v12 = vpop.f32.mrb[25].mxu0  ;;  %v635_v13 = vmax.f32 %v622_v7, 0.0  ;;  %v623_v51 = vadd.f32 %v1196_v5, %v603_v47 }
 0x138   :  { %v811_v49 = vpack.c.bf16 %v633_v10, %v632_v8  ;;  %v634_v14 = vmax.f32 %v621_v11, 0.0  ;;  %v578_v15 = vmax.f32 %v1176_v50, %v456_v12  ;;  %v890_v16 = vpop.f32.mrb[26].mxu0 }
 0x139   :  { %v593_v17 = vmax.f32 %v567_v2, %v580_v48  ;;  %v581_v18 = vmax.f32 %v890_v16, %v1190_v59  ;;  %v459_v19 = vpop.f32.mrb[27].mxu0  ;;  %v636_v23 = vmax.f32 %v623_v51, 0.0 }
 0x13a   :  { %825 = vst [vmem:[%s1255_s3 + $0x18] sm:$0xff] %v811_v49   ;;  %v816_v20 = vpack.c.bf16 %v635_v13, %v634_v14  ;;  %v604_v21 = vmax.f32 %v578_v15, %v591_v37  ;;  %v579_v22 = vmax.f32 %v1188_v58, %v459_v19 }
 0x13b   :  { %v613_v50 = vadd.f32 %v1196_v5, %v593_v17  ;;  %v594_v32 = vmax.f32 %v568_v56, %v581_v18 }
 0x13c   :  { %826 = vst [vmem:[%s1255_s3 + $0x20] sm:$0xff] %v816_v20   ;;  %v624_v59 = vadd.f32 %v1196_v5, %v604_v21  ;;  %v605_v0 = vmax.f32 %v579_v22, %v592_v63 }
 0x13d   :  { %v614_v2 = vadd.f32 %v1196_v5, %v594_v32  ;;  %v626_v58 = vmax.f32 %v613_v50, 0.0 }
 0x13e   :  { %v637_v24 = vmax.f32 %v624_v59, 0.0  ;;  %v625_v25 = vadd.f32 %v1196_v5, %v605_v0 }
 0x13f   :  { %v627_v26 = vmax.f32 %v614_v2, 0.0 }
 0x140   :  { %v821_v27 = vpack.c.bf16 %v637_v24, %v636_v23  ;;  %v638_v28 = vmax.f32 %v625_v25, 0.0 }
 0x141   :  { %v796_v29 = vpack.c.bf16 %v627_v26, %v626_v58 }
 0x142   :  { %827 = vst [vmem:[%s1255_s3 + $0x28] sm:$0xff] %v821_v27   ;;  %v792_v36 = vpack.c.bf16 %v638_v28, %v638_v28 }
 0x143   :  { %797 = vst [vmem:[%s1255_s3] sm:$0xff] %v796_v29  }
 0x144   :  { %704 = vst [vmem:[%s1255_s3 + $0x30] sm:$0xf] %v792_v36 }
 0x145   :  { %709 = vsyncpa [#allocation3], 1 }
 0x146   :  { %710 = vsyncpa [#allocation5], 1 }

// kernel: net_mnist_forward.4
= control target key start
LH: loop header
LB: loop body
LE: loop exit
PB: predicated region body
PF: predicated region fallthrough
CT: control target
= control target key end

     0   :  { %vm737_vm0 = vcmask 523264   ;;  %s2296_s1 = inlined_call_operand.vmem [shape: bf16[576,128], index: 1, kind: input, shape index: {}]   ;;  %s2297_s0 = inlined_call_operand.vmem [shape: bf16[4,56,576], index: 0, kind: input, shape index: {}]   ;;  %s2298_s2 = inlined_call_operand.vmem [shape: f32[1,128], index: 2, kind: input, shape index: {}]   ;;  %s2299_s3 = inlined_call_operand.vmem [shape: bf16[56,128], index: 3, kind: output, shape index: {}]  }
   0x1   :  { %v1711_v0 = vld [vmem:[%s2296_s1 + $0x40] sm:$0xff]   ;;  %v1715_v4 = vld [vmem:[%s2296_s1 + $0x48] sm:$0xff]   ;;  %v1719_v8 = vld [vmem:[%s2296_s1 + $0x50] sm:$0xff]  }
   0x2   :  { %v1712_v1 = vld [vmem:[%s2296_s1 + $0xc0] sm:$0xff]   ;;  %1449 = vmatprep.subr.bf16.mxu0 %v1711_v0  ;;  %v1716_v5 = vld [vmem:[%s2296_s1 + $0xc8] sm:$0xff]   ;;  %v1720_v9 = vld [vmem:[%s2296_s1 + $0xd0] sm:$0xff]  }
   0x3   :  { %v1713_v2 = vld [vmem:[%s2296_s1] sm:$0xff]   ;;  %1549 = vmatprep.subr.bf16.mxu1 %v1712_v1  ;;  %v1717_v6 = vld [vmem:[%s2296_s1 + $0x8] sm:$0xff]   ;;  %v1721_v10 = vld [vmem:[%s2296_s1 + $0x10] sm:$0xff]  }
   0x4   :  { %v1714_v3 = vld [vmem:[%s2296_s1 + $0x80] sm:$0xff]   ;;  %1450 = vmatpush3.bf16.msra.mxu0 %v1713_v2  ;;  %v1718_v7 = vld [vmem:[%s2296_s1 + $0x88] sm:$0xff]   ;;  %v1722_v11 = vld [vmem:[%s2296_s1 + $0x90] sm:$0xff]  }
   0x5   :  { %1550 = vmatpush3.bf16.msra.mxu1 %v1714_v3  ;;  %1451 = vmatprep.subr.bf16.mxu0 %v1715_v4  ;;  %v1723_v12 = vld [vmem:[%s2296_s1 + $0x58] sm:$0xff]   ;;  %v1727_v16 = vld [vmem:[%s2296_s1 + $0x60] sm:$0xff]   ;;  %v1731_v20 = vld [vmem:[%s2296_s1 + $0x68] sm:$0xff]  }
   0x6   :  { %1551 = vmatprep.subr.bf16.mxu1 %v1716_v5  ;;  %v1724_v13 = vld [vmem:[%s2296_s1 + $0xd8] sm:$0xff]   ;;  %v1728_v17 = vld [vmem:[%s2296_s1 + $0xe0] sm:$0xff]   ;;  %v1732_v21 = vld [vmem:[%s2296_s1 + $0xe8] sm:$0xff]  }
   0x7   :  { %v1725_v14 = vld [vmem:[%s2296_s1 + $0x18] sm:$0xff]   ;;  %v1729_v18 = vld [vmem:[%s2296_s1 + $0x20] sm:$0xff]   ;;  %v1733_v22 = vld [vmem:[%s2296_s1 + $0x28] sm:$0xff]  }
   0x8   :  { %1452 = vmatpush3.bf16.msra.mxu0 %v1717_v6  ;;  %v1726_v15 = vld [vmem:[%s2296_s1 + $0x98] sm:$0xff]   ;;  %v1730_v19 = vld [vmem:[%s2296_s1 + $0xa0] sm:$0xff]   ;;  %v1734_v23 = vld [vmem:[%s2296_s1 + $0xa8] sm:$0xff]  }
   0x9   :  { %1552 = vmatpush3.bf16.msra.mxu1 %v1718_v7  ;;  %1453 = vmatprep.subr.bf16.mxu0 %v1719_v8  ;;  %v1735_v24 = vld [vmem:[%s2296_s1 + $0x70] sm:$0xff]   ;;  %v1739_v28 = vld [vmem:[%s2296_s1 + $0x78] sm:$0xff]   ;;  %v1748_v35 = vld [vmem:[%s2297_s0 + $0xc] ss:$20 sps:$4 sm:$0xff]  }
   0xa   :  { %1553 = vmatprep.subr.bf16.mxu1 %v1720_v9  ;;  %v1736_v25 = vld [vmem:[%s2296_s1 + $0xf0] sm:$0xff]   ;;  %v1740_v29 = vld [vmem:[%s2296_s1 + $0xf8] sm:$0xff]   ;;  %v1749_v36 = vld [vmem:[%s2296_s1 + $0x100] sm:$0xff]   ;;  %957 = vmatprep.mubr.bf16.mxu1 %v1748_v35 }
   0xb   :  { %v1737_v26 = vld [vmem:[%s2296_s1 + $0x30] sm:$0xff]   ;;  %v1741_v30 = vld [vmem:[%s2296_s1 + $0x38] sm:$0xff]   ;;  %v1750_v37 = vld [vmem:[%s2297_s0 + $0x2c] ss:$20 sps:$4 sm:$0xff]  }
   0xc   :  { %1454 = vmatpush3.bf16.msra.mxu0 %v1721_v10  ;;  %v1738_v27 = vld [vmem:[%s2296_s1 + $0xb0] sm:$0xff]   ;;  %v1742_v31 = vld [vmem:[%s2296_s1 + $0xb8] sm:$0xff]   ;;  %v1768_v43 = vld [vmem:[%s2296_s1 + $0x108] sm:$0xff]  }
   0xd   :  { %1554 = vmatpush3.bf16.msra.mxu1 %v1722_v11  ;;  %1455 = vmatprep.subr.bf16.mxu0 %v1723_v12  ;;  %v1743_v32 = vld [vmem:[%s2297_s0] ss:$20 sps:$4 sm:$0xff]   ;;  %v1745_v33 = vld [vmem:[%s2297_s0 + $0x4] ss:$20 sps:$4 sm:$0xff]   ;;  %v1746_v34 = vld [vmem:[%s2297_s0 + $0x8] ss:$20 sps:$4 sm:$0xff]  }
   0xe   :  { %1555 = vmatprep.subr.bf16.mxu1 %v1724_v13  ;;  %812 = vmatprep.mubr.bf16.mxu0 %v1745_v33  ;;  %v1752_v38 = vld [vmem:[%s2297_s0 + $0x34] ss:$20 sps:$4 sm:$0xff]   ;;  %v1755_v40 = vld [vmem:[%s2297_s0 + $0x30] ss:$20 sps:$4 sm:$0xff]   ;;  %v1761_v45 = vld [vmem:[%s2297_s0 + $0x58] ss:$20 sps:$4 sm:$0xff]  }
   0xf   :  { %v1754_v39 = vld [vmem:[%s2297_s0 + $0x28] ss:$20 sps:$4 sm:$0xff]   ;;  %v1760_v44 = vld [vmem:[%s2297_s0 + $0x50] ss:$20 sps:$4 sm:$0xff]   ;;  %v1766_v48 = vld [vmem:[%s2297_s0 + $0x78] ss:$20 sps:$4 sm:$0xff]  }
  0x10   :  { %1456 = vmatpush3.bf16.msra.mxu0 %v1725_v14  ;;  %v1756_v41 = vld [vmem:[%s2297_s0 + $0x54] ss:$20 sps:$4 sm:$0xff]   ;;  %v1758_v42 = vld [vmem:[%s2297_s0 + $0x5c] ss:$20 sps:$4 sm:$0xff]   ;;  %v1764_v47 = vld [vmem:[%s2297_s0 + $0x84] ss:$20 sps:$4 sm:$0xff]  }
  0x11   :  { %1556 = vmatpush3.bf16.msra.mxu1 %v1726_v15  ;;  %1457 = vmatprep.subr.bf16.mxu0 %v1727_v16  ;;  %v1762_v46 = vld [vmem:[%s2297_s0 + $0x7c] ss:$20 sps:$4 sm:$0xff]   ;;  %v1767_v49 = vld [vmem:[%s2297_s0 + $0x80] ss:$20 sps:$4 sm:$0xff]   ;;  %v1769_v51 = vld [vmem:[%s2297_s0 + $0xa4] ss:$20 sps:$4 sm:$0xff]  }
  0x12   :  { %1557 = vmatprep.subr.bf16.mxu1 %v1728_v17  ;;  %v1793_v50 = vld [vmem:[%s2296_s1 + $0x110] sm:$0xff]   ;;  %v1771_v52 = vld [vmem:[%s2297_s0 + $0xac] ss:$20 sps:$4 sm:$0xff]   ;;  %v1774_v54 = vld [vmem:[%s2297_s0 + $0xa8] ss:$20 sps:$4 sm:$0xff]  }
  0x13   :  { %v1773_v53 = vld [vmem:[%s2297_s0 + $0xa0] ss:$20 sps:$4 sm:$0xff]   ;;  %v1812_v56 = vld [vmem:[%s2296_s1 + $0x118] sm:$0xff]   ;;  %v1780_v59 = vld [vmem:[%s2297_s0 + $0xd0] ss:$20 sps:$4 sm:$0xff]  }
  0x14   :  { %1458 = vmatpush3.bf16.msra.mxu0 %v1729_v18  ;;  %v1775_v55 = vld [vmem:[%s2297_s0 + $0xcc] ss:$20 sps:$4 sm:$0xff]   ;;  %v1777_v57 = vld [vmem:[%s2297_s0 + $0xd4] ss:$20 sps:$4 sm:$0xff]   ;;  %v1783_v61 = vld [vmem:[%s2297_s0 + $0xfc] ss:$20 sps:$4 sm:$0xff]  }
  0x15   :  { %1558 = vmatpush3.bf16.msra.mxu1 %v1730_v19  ;;  %1459 = vmatprep.subr.bf16.mxu0 %v1731_v20  ;;  %v1779_v58 = vld [vmem:[%s2297_s0 + $0xc8] ss:$20 sps:$4 sm:$0xff]   ;;  %v1785_v62 = vld [vmem:[%s2297_s0 + $0xf0] ss:$20 sps:$4 sm:$0xff]   ;;  %v1786_v63 = vld [vmem:[%s2297_s0 + $0xf8] ss:$20 sps:$4 sm:$0xff]  }
  0x16   :  { %1559 = vmatprep.subr.bf16.mxu1 %v1732_v21  ;;  %v1781_v60 = vld [vmem:[%s2297_s0 + $0xf4] ss:$20 sps:$4 sm:$0xff]   ;;  %v1787_v0 = vld [vmem:[%s2297_s0 + $0x11c] ss:$20 sps:$4 sm:$0xff]   ;;  %v1789_v1 = vld [vmem:[%s2297_s0 + $0x124] ss:$20 sps:$4 sm:$0xff]  }
  0x17   :  { %v1791_v2 = vld [vmem:[%s2297_s0 + $0x118] ss:$20 sps:$4 sm:$0xff]   ;;  %v1792_v3 = vld [vmem:[%s2297_s0 + $0x120] ss:$20 sps:$4 sm:$0xff]   ;;  %v1799_v7 = vld [vmem:[%s2297_s0 + $0x148] ss:$20 sps:$4 sm:$0xff]  }
  0x18   :  { %1460 = vmatpush3.bf16.msra.mxu0 %v1733_v22  ;;  %v1794_v4 = vld [vmem:[%s2297_s0 + $0x144] ss:$20 sps:$4 sm:$0xff]   ;;  %v1796_v5 = vld [vmem:[%s2297_s0 + $0x14c] ss:$20 sps:$4 sm:$0xff]   ;;  %v1802_v9 = vld [vmem:[%s2297_s0 + $0x174] ss:$20 sps:$4 sm:$0xff]  }
  0x19   :  { %1560 = vmatpush3.bf16.msra.mxu1 %v1734_v23  ;;  %1461 = vmatprep.subr.bf16.mxu0 %v1735_v24  ;;  %v1798_v6 = vld [vmem:[%s2297_s0 + $0x140] ss:$20 sps:$4 sm:$0xff]   ;;  %v1804_v10 = vld [vmem:[%s2297_s0 + $0x168] ss:$20 sps:$4 sm:$0xff]   ;;  %v1805_v11 = vld [vmem:[%s2297_s0 + $0x170] ss:$20 sps:$4 sm:$0xff]  }
  0x1a   :  { %1561 = vmatprep.subr.bf16.mxu1 %v1736_v25  ;;  %v1800_v8 = vld [vmem:[%s2297_s0 + $0x16c] ss:$20 sps:$4 sm:$0xff]   ;;  %v1806_v12 = vld [vmem:[%s2297_s0 + $0x194] ss:$20 sps:$4 sm:$0xff]   ;;  %v1808_v13 = vld [vmem:[%s2297_s0 + $0x19c] ss:$20 sps:$4 sm:$0xff]  }
  0x1b   :  { %v1810_v14 = vld [vmem:[%s2297_s0 + $0x190] ss:$20 sps:$4 sm:$0xff]   ;;  %v1811_v15 = vld [vmem:[%s2297_s0 + $0x198] ss:$20 sps:$4 sm:$0xff]   ;;  %v1818_v19 = vld [vmem:[%s2297_s0 + $0x1c0] ss:$20 sps:$4 sm:$0xff]  }
  0x1c   :  { %1462 = vmatpush3.bf16.msra.mxu0 %v1737_v26  ;;  %v1813_v16 = vld [vmem:[%s2297_s0 + $0x1bc] ss:$20 sps:$4 sm:$0xff]   ;;  %v1815_v17 = vld [vmem:[%s2297_s0 + $0x1c4] ss:$20 sps:$4 sm:$0xff]   ;;  %v1821_v21 = vld [vmem:[%s2297_s0 + $0x1ec] ss:$20 sps:$4 sm:$0xff]  }
  0x1d   :  { %1562 = vmatpush3.bf16.msra.mxu1 %v1738_v27  ;;  %1463 = vmatprep.subr.bf16.mxu0 %v1739_v28  ;;  %v1817_v18 = vld [vmem:[%s2297_s0 + $0x1b8] ss:$20 sps:$4 sm:$0xff]   ;;  %v1823_v22 = vld [vmem:[%s2297_s0 + $0x1e0] ss:$20 sps:$4 sm:$0xff]   ;;  %v1824_v23 = vld [vmem:[%s2297_s0 + $0x1e8] ss:$20 sps:$4 sm:$0xff]  }
  0x1e   :  { %1563 = vmatprep.subr.bf16.mxu1 %v1740_v29  ;;  %v1819_v20 = vld [vmem:[%s2297_s0 + $0x1e4] ss:$20 sps:$4 sm:$0xff]   ;;  %v1825_v24 = vld [vmem:[%s2297_s0 + $0x20c] ss:$20 sps:$4 sm:$0xff]   ;;  %v1827_v25 = vld [vmem:[%s2297_s0 + $0x214] ss:$20 sps:$4 sm:$0xff]  }
  0x1f   :  { %v1829_v26 = vld [vmem:[%s2297_s0 + $0x208] ss:$20 sps:$4 sm:$0xff]   ;;  %v1830_v27 = vld [vmem:[%s2297_s0 + $0x210] ss:$20 sps:$4 sm:$0xff]   ;;  %v1836_v33 = vld [vmem:[%s2297_s0 + $0x1a0] ss:$20 sps:$4 sm:$0xff]  }
  0x20   :  { %1464 = vmatpush3.bf16.msra.mxu0 %v1741_v30  ;;  %v1831_v28 = vld [vmem:[%s2297_s0 + $0x10] ss:$20 sps:$4 sm:$0xff]   ;;  %v1833_v30 = vld [vmem:[%s2297_s0 + $0x38] ss:$20 sps:$4 sm:$0xff]   ;;  %v1838_v35 = vld [vmem:[%s2297_s0 + $0x1c8] ss:$20 sps:$4 sm:$0xff]  }
  0x21   :  { %1564 = vmatpush3.bf16.msra.mxu1 %v1742_v31  ;;  %1667 = vmatprep.subr.bf16.mxu0 %v1749_v36  ;;  %v1832_v29 = vld [vmem:[%s2297_s0 + $0x150] ss:$20 sps:$4 sm:$0xff]   ;;  %v1834_v31 = vld [vmem:[%s2297_s0 + $0x178] ss:$20 sps:$4 sm:$0xff]  }
  0x22   :  { %1703 = vmatprep.subr.bf16.mxu1 %v1749_v36 }
  0x23   :  { %813 = vmatmul.mubr.bf16.vlgmr.msra.gmra.mrb[0].mxu0 %v1743_v32  ;;  %v1835_v32 = vld [vmem:[%s2297_s0 + $0x60] ss:$20 sps:$4 sm:$0xff]  }
  0x24   :  { %958 = vmatmul.mubr.bf16.vlgmr.msra.gmra.mrb[0].mxu1 %v1746_v34  ;;  %1668 = vmatpush3.bf16.msra.mxu0 %v1749_v36  ;;  %v1837_v34 = vld [vmem:[%s2297_s0 + $0x88] ss:$20 sps:$4 sm:$0xff]  }
  0x25   :  { %820 = vmatprep.mubr.bf16.mxu0 %v1750_v37  ;;  %965 = vmatprep.mubr.bf16.mxu1 %v1752_v38  ;;  %v1840_v37 = vld [vmem:[%s2297_s0 + $0x1f0] ss:$20 sps:$4 sm:$0xff]   ;;  %v1841_v38 = vld [vmem:[%s2297_s0 + $0xd8] ss:$20 sps:$4 sm:$0xff]  }
  0x26   :  { %1707 = vmatpush3.bf16.msra.mxu1 %v1749_v36  ;;  %1669 = vmatprep.subr.bf16.mxu0 %v1768_v43  ;;  %v1839_v36 = vld [vmem:[%s2297_s0 + $0xb0] ss:$20 sps:$4 sm:$0xff]  }
  0x27   :  { %1704 = vmatprep.subr.bf16.mxu1 %v1768_v43 }
  0x28   :  { %1670 = vmatpush3.bf16.msra.mxu0 %v1768_v43 }
  0x29   :  { %1671 = vmatprep.subr.bf16.mxu0 %v1793_v50 }
  0x2a   :  { %1708 = vmatpush3.bf16.msra.mxu1 %v1768_v43 }
  0x2b   :  { %821 = vmatmul.mubr.bf16.gmra.mrb[4].mxu0 %v1754_v39  ;;  %1705 = vmatprep.subr.bf16.mxu1 %v1793_v50  ;;  %v1842_v39 = vld [vmem:[%s2297_s0 + $0x218] ss:$20 sps:$4 sm:$0xff]  }
  0x2c   :  { %966 = vmatmul.mubr.bf16.gmra.mrb[4].mxu1 %v1755_v40  ;;  %828 = vmatprep.mubr.bf16.mxu0 %v1756_v41  ;;  %v1843_v40 = vld [vmem:[%s2297_s0 + $0x100] ss:$20 sps:$4 sm:$0xff]   ;;  %v1844_v41 = vld [vmem:[%s2297_s0 + $0x128] ss:$20 sps:$4 sm:$0xff]  }
  0x2d   :  { %973 = vmatprep.mubr.bf16.mxu1 %v1758_v42  ;;  %1672 = vmatpush3.bf16.msra.mxu0 %v1793_v50 }
  0x2e   :  { %1709 = vmatpush3.bf16.msra.mxu1 %v1793_v50  ;;  %1673 = vmatprep.subr.bf16.mxu0 %v1812_v56 }
  0x2f   :  { %1706 = vmatprep.subr.bf16.mxu1 %v1812_v56 }
  0x31   :  { %1674 = vmatpush3.bf16.msra.mxu0 %v1812_v56 }
  0x32   :  { %1710 = vmatpush3.bf16.msra.mxu1 %v1812_v56 }
  0x33   :  { %829 = vmatmul.mubr.bf16.gmra.mrb[8].mxu0 %v1760_v44 }
  0x34   :  { %974 = vmatmul.mubr.bf16.gmra.mrb[8].mxu1 %v1761_v45  ;;  %836 = vmatprep.mubr.bf16.mxu0 %v1762_v46 }
  0x35   :  { %981 = vmatprep.mubr.bf16.mxu1 %v1764_v47 }
  0x3b   :  { %837 = vmatmul.mubr.bf16.gmra.mrb[12].mxu0 %v1766_v48 }
  0x3c   :  { %982 = vmatmul.mubr.bf16.gmra.mrb[12].mxu1 %v1767_v49  ;;  %844 = vmatprep.mubr.bf16.mxu0 %v1769_v51 }
  0x3d   :  { %989 = vmatprep.mubr.bf16.mxu1 %v1771_v52 }
  0x43   :  { %845 = vmatmul.mubr.bf16.gmra.mrb[16].mxu0 %v1773_v53 }
  0x44   :  { %990 = vmatmul.mubr.bf16.gmra.mrb[16].mxu1 %v1774_v54  ;;  %852 = vmatprep.mubr.bf16.mxu0 %v1775_v55 }
  0x45   :  { %997 = vmatprep.mubr.bf16.mxu1 %v1777_v57 }
  0x4b   :  { %853 = vmatmul.mubr.bf16.gmra.mrb[20].mxu0 %v1779_v58 }
  0x4c   :  { %998 = vmatmul.mubr.bf16.gmra.mrb[20].mxu1 %v1780_v59  ;;  %860 = vmatprep.mubr.bf16.mxu0 %v1781_v60 }
  0x4d   :  { %1005 = vmatprep.mubr.bf16.mxu1 %v1783_v61 }
  0x53   :  { %861 = vmatmul.mubr.bf16.gmra.mrb[24].mxu0 %v1785_v62 }
  0x54   :  { %1006 = vmatmul.mubr.bf16.gmra.mrb[24].mxu1 %v1786_v63  ;;  %868 = vmatprep.mubr.bf16.mxu0 %v1787_v0 }
  0x55   :  { %1013 = vmatprep.mubr.bf16.mxu1 %v1789_v1 }
  0x5b   :  { %869 = vmatmul.mubr.bf16.gmra.mrb[28].mxu0 %v1791_v2 }
  0x5c   :  { %1014 = vmatmul.mubr.bf16.gmra.mrb[28].mxu1 %v1792_v3  ;;  %876 = vmatprep.mubr.bf16.mxu0 %v1794_v4 }
  0x5d   :  { %1021 = vmatprep.mubr.bf16.mxu1 %v1796_v5 }
  0x63   :  { %877 = vmatmul.mubr.bf16.gmra.mrb[32].mxu0 %v1798_v6 }
  0x64   :  { %1022 = vmatmul.mubr.bf16.gmra.mrb[32].mxu1 %v1799_v7  ;;  %884 = vmatprep.mubr.bf16.mxu0 %v1800_v8 }
  0x65   :  { %1029 = vmatprep.mubr.bf16.mxu1 %v1802_v9 }
  0x6b   :  { %885 = vmatmul.mubr.bf16.gmra.mrb[36].mxu0 %v1804_v10 }
  0x6c   :  { %1030 = vmatmul.mubr.bf16.gmra.mrb[36].mxu1 %v1805_v11  ;;  %892 = vmatprep.mubr.bf16.mxu0 %v1806_v12 }
  0x6d   :  { %1037 = vmatprep.mubr.bf16.mxu1 %v1808_v13 }
  0x73   :  { %893 = vmatmul.mubr.bf16.gmra.mrb[40].mxu0 %v1810_v14 }
  0x74   :  { %1038 = vmatmul.mubr.bf16.gmra.mrb[40].mxu1 %v1811_v15  ;;  %900 = vmatprep.mubr.bf16.mxu0 %v1813_v16 }
  0x75   :  { %1045 = vmatprep.mubr.bf16.mxu1 %v1815_v17 }
  0x7b   :  { %901 = vmatmul.mubr.bf16.gmra.mrb[44].mxu0 %v1817_v18 }
  0x7c   :  { %1046 = vmatmul.mubr.bf16.gmra.mrb[44].mxu1 %v1818_v19  ;;  %908 = vmatprep.mubr.bf16.mxu0 %v1819_v20 }
  0x7d   :  { %1053 = vmatprep.mubr.bf16.mxu1 %v1821_v21 }
  0x83   :  { %909 = vmatmul.mubr.bf16.gmra.mrb[48].mxu0 %v1823_v22 }
  0x84   :  { %1054 = vmatmul.mubr.bf16.gmra.mrb[48].mxu1 %v1824_v23  ;;  %916 = vmatprep.mubr.bf16.mxu0 %v1825_v24 }
  0x85   :  { %1061 = vmatprep.mubr.bf16.mxu1 %v1827_v25 }
  0x8b   :  { %917 = vmatmul.mubr.bf16.gmra.mrb[52].mxu0 %v1829_v26 }
  0x8c   :  { %1062 = vmatmul.mubr.bf16.gmra.mrb[52].mxu1 %v1830_v27  ;;  %1675 = vmatprep.mubr.msk.bf16.mxu0 %vm737_vm0, %v1831_v28 }
  0x8d   :  { %1691 = vmatprep.mubr.msk.bf16.mxu1 %vm737_vm0, %v1832_v29 }
  0x93   :  { %1676 = vmatmul.mubr.msk.bf16.vlgmr.msra.gmra.mrb[56].mxu0 %vm737_vm0, %v1833_v30 }
  0x94   :  { %1692 = vmatmul.mubr.msk.bf16.vlgmr.msra.gmra.mrb[56].mxu1 %vm737_vm0, %v1834_v31  ;;  %1679 = vmatprep.mubr.msk.bf16.mxu0 %vm737_vm0, %v1835_v32 }
  0x95   :  { %1695 = vmatprep.mubr.msk.bf16.mxu1 %vm737_vm0, %v1836_v33 }
  0x9b   :  { %1680 = vmatmul.mubr.msk.bf16.gmra.mrb[60].mxu0 %vm737_vm0, %v1837_v34 }
  0x9c   :  { %1696 = vmatmul.mubr.msk.bf16.gmra.mrb[60].mxu1 %vm737_vm0, %v1838_v35  ;;  %1683 = vmatprep.mubr.msk.bf16.mxu0 %vm737_vm0, %v1839_v36 }
  0x9d   :  { %1699 = vmatprep.mubr.msk.bf16.mxu1 %vm737_vm0, %v1840_v37 }
  0xa3   :  { %1684 = vmatmul.mubr.msk.bf16.gmra.mrb[64].mxu0 %vm737_vm0, %v1841_v38 }
  0xa4   :  { %1700 = vmatmul.mubr.msk.bf16.gmra.mrb[64].mxu1 %vm737_vm0, %v1842_v39  ;;  %1687 = vmatprep.mubr.msk.bf16.mxu0 %vm737_vm0, %v1843_v40 }
  0xab   :  { %1688 = vmatmul.mubr.msk.bf16.gmra.mrb[68].mxu0 %vm737_vm0, %v1844_v41 }
  0xf6   :  { %v1465_v42 = vpop.f32.mrb[0].mxu0 }
  0xf7   :  { %v1565_v43 = vpop.f32.mrb[0].mxu1  ;;  %v1466_v44 = vpop.f32.mrb[1].mxu0 }
  0xf8   :  { %v1467_v45 = vadd.f32 %v1466_v44, %v1465_v42  ;;  %v1566_v46 = vpop.f32.mrb[1].mxu1  ;;  %v1468_v47 = vpop.f32.mrb[2].mxu0 }
  0xf9   :  { %v1567_v48 = vadd.f32 %v1566_v46, %v1565_v43  ;;  %v1568_v49 = vpop.f32.mrb[2].mxu1  ;;  %v1469_v50 = vpop.f32.mrb[3].mxu0 }
  0xfa   :  { %v1470_v51 = vadd.f32 %v1469_v50, %v1468_v47  ;;  %v1569_v52 = vpop.f32.mrb[3].mxu1 }
  0xfb   :  { %v1570_v53 = vadd.f32 %v1569_v52, %v1568_v49  ;;  %v2197_v54 = vadd.f32 %v1567_v48, %v1467_v45 }
  0xfd   :  { %v2199_v55 = vadd.f32 %v1570_v53, %v1470_v51 }
  0xfe   :  { %v1471_v56 = vpop.f32.mrb[4].mxu0 }
  0xff   :  { %v1571_v57 = vpop.f32.mrb[4].mxu1  ;;  %v1472_v58 = vpop.f32.mrb[5].mxu0 }
 0x100   :  { %v1473_v59 = vadd.f32 %v1472_v58, %v1471_v56  ;;  %v1572_v60 = vpop.f32.mrb[5].mxu1  ;;  %v1474_v61 = vpop.f32.mrb[6].mxu0 }
 0x101   :  { %v1573_v62 = vadd.f32 %v1572_v60, %v1571_v57  ;;  %v1574_v63 = vpop.f32.mrb[6].mxu1  ;;  %v1475_v0 = vpop.f32.mrb[7].mxu0 }
 0x102   :  { %v1476_v1 = vadd.f32 %v1475_v0, %v1474_v61  ;;  %v1575_v2 = vpop.f32.mrb[7].mxu1 }
 0x103   :  { %v1576_v3 = vadd.f32 %v1575_v2, %v1574_v63  ;;  %v2201_v4 = vadd.f32 %v1573_v62, %v1473_v59 }
 0x105   :  { %v2203_v5 = vadd.f32 %v1576_v3, %v1476_v1 }
 0x106   :  { %v1477_v6 = vpop.f32.mrb[8].mxu0 }
 0x107   :  { %v1577_v7 = vpop.f32.mrb[8].mxu1  ;;  %v1478_v8 = vpop.f32.mrb[9].mxu0 }
 0x108   :  { %v1479_v9 = vadd.f32 %v1478_v8, %v1477_v6  ;;  %v1578_v10 = vpop.f32.mrb[9].mxu1  ;;  %v1480_v11 = vpop.f32.mrb[10].mxu0 }
 0x109   :  { %v1579_v12 = vadd.f32 %v1578_v10, %v1577_v7  ;;  %v1580_v13 = vpop.f32.mrb[10].mxu1  ;;  %v1481_v14 = vpop.f32.mrb[11].mxu0 }
 0x10a   :  { %v1482_v15 = vadd.f32 %v1481_v14, %v1480_v11  ;;  %v1581_v16 = vpop.f32.mrb[11].mxu1 }
 0x10b   :  { %v1582_v17 = vadd.f32 %v1581_v16, %v1580_v13  ;;  %v2205_v18 = vadd.f32 %v1579_v12, %v1479_v9 }
 0x10d   :  { %v2207_v19 = vadd.f32 %v1582_v17, %v1482_v15 }
 0x10e   :  { %v1483_v20 = vpop.f32.mrb[12].mxu0 }
 0x10f   :  { %v1583_v21 = vpop.f32.mrb[12].mxu1  ;;  %v1484_v22 = vpop.f32.mrb[13].mxu0 }
 0x110   :  { %v1485_v23 = vadd.f32 %v1484_v22, %v1483_v20  ;;  %v1584_v24 = vpop.f32.mrb[13].mxu1  ;;  %v1486_v25 = vpop.f32.mrb[14].mxu0 }
 0x111   :  { %v1585_v26 = vadd.f32 %v1584_v24, %v1583_v21  ;;  %v1586_v27 = vpop.f32.mrb[14].mxu1  ;;  %v1487_v28 = vpop.f32.mrb[15].mxu0 }
 0x112   :  { %v1488_v29 = vadd.f32 %v1487_v28, %v1486_v25  ;;  %v1587_v30 = vpop.f32.mrb[15].mxu1 }
 0x113   :  { %v1588_v31 = vadd.f32 %v1587_v30, %v1586_v27  ;;  %v2209_v32 = vadd.f32 %v1585_v26, %v1485_v23 }
 0x115   :  { %v2211_v33 = vadd.f32 %v1588_v31, %v1488_v29 }
 0x116   :  { %v1489_v34 = vpop.f32.mrb[16].mxu0 }
 0x117   :  { %v1589_v35 = vpop.f32.mrb[16].mxu1  ;;  %v1490_v36 = vpop.f32.mrb[17].mxu0 }
 0x118   :  { %v1491_v37 = vadd.f32 %v1490_v36, %v1489_v34  ;;  %v1590_v38 = vpop.f32.mrb[17].mxu1  ;;  %v1492_v39 = vpop.f32.mrb[18].mxu0 }
 0x119   :  { %v1591_v40 = vadd.f32 %v1590_v38, %v1589_v35  ;;  %v1592_v41 = vpop.f32.mrb[18].mxu1  ;;  %v1493_v42 = vpop.f32.mrb[19].mxu0 }
 0x11a   :  { %v1494_v43 = vadd.f32 %v1493_v42, %v1492_v39  ;;  %v1593_v44 = vpop.f32.mrb[19].mxu1 }
 0x11b   :  { %v1594_v45 = vadd.f32 %v1593_v44, %v1592_v41  ;;  %v2213_v46 = vadd.f32 %v1591_v40, %v1491_v37 }
 0x11d   :  { %v2215_v47 = vadd.f32 %v1594_v45, %v1494_v43 }
 0x11e   :  { %v1495_v48 = vpop.f32.mrb[20].mxu0 }
 0x11f   :  { %v1595_v49 = vpop.f32.mrb[20].mxu1  ;;  %v1496_v50 = vpop.f32.mrb[21].mxu0 }
 0x120   :  { %v1497_v51 = vadd.f32 %v1496_v50, %v1495_v48  ;;  %v1596_v52 = vpop.f32.mrb[21].mxu1  ;;  %v1498_v53 = vpop.f32.mrb[22].mxu0 }
 0x121   :  { %v1597_v56 = vadd.f32 %v1596_v52, %v1595_v49  ;;  %v1598_v57 = vpop.f32.mrb[22].mxu1  ;;  %v1499_v58 = vpop.f32.mrb[23].mxu0 }
 0x122   :  { %v1500_v59 = vadd.f32 %v1499_v58, %v1498_v53  ;;  %v1599_v60 = vpop.f32.mrb[23].mxu1 }
 0x123   :  { %v1600_v61 = vadd.f32 %v1599_v60, %v1598_v57  ;;  %v2217_v62 = vadd.f32 %v1597_v56, %v1497_v51 }
 0x125   :  { %v2219_v63 = vadd.f32 %v1600_v61, %v1500_v59 }
 0x126   :  { %v1501_v0 = vpop.f32.mrb[24].mxu0 }
 0x127   :  { %v1601_v1 = vpop.f32.mrb[24].mxu1  ;;  %v1502_v2 = vpop.f32.mrb[25].mxu0 }
 0x128   :  { %v1503_v3 = vadd.f32 %v1502_v2, %v1501_v0  ;;  %v1602_v6 = vpop.f32.mrb[25].mxu1  ;;  %v1504_v7 = vpop.f32.mrb[26].mxu0 }
 0x129   :  { %v1603_v8 = vadd.f32 %v1602_v6, %v1601_v1  ;;  %v1604_v9 = vpop.f32.mrb[26].mxu1  ;;  %v1505_v10 = vpop.f32.mrb[27].mxu0 }
 0x12a   :  { %v1506_v11 = vadd.f32 %v1505_v10, %v1504_v7  ;;  %v1605_v12 = vpop.f32.mrb[27].mxu1 }
 0x12b   :  { %v1606_v13 = vadd.f32 %v1605_v12, %v1604_v9  ;;  %v2221_v14 = vadd.f32 %v1603_v8, %v1503_v3 }
 0x12d   :  { %v2223_v15 = vadd.f32 %v1606_v13, %v1506_v11 }
 0x12e   :  { %v1507_v16 = vpop.f32.mrb[28].mxu0 }
 0x12f   :  { %v1607_v17 = vpop.f32.mrb[28].mxu1  ;;  %v1508_v20 = vpop.f32.mrb[29].mxu0 }
 0x130   :  { %v1509_v21 = vadd.f32 %v1508_v20, %v1507_v16  ;;  %v1608_v22 = vpop.f32.mrb[29].mxu1  ;;  %v1510_v23 = vpop.f32.mrb[30].mxu0 }
 0x131   :  { %v1609_v24 = vadd.f32 %v1608_v22, %v1607_v17  ;;  %v1610_v25 = vpop.f32.mrb[30].mxu1  ;;  %v1511_v26 = vpop.f32.mrb[31].mxu0 }
 0x132   :  { %v1512_v27 = vadd.f32 %v1511_v26, %v1510_v23  ;;  %v1611_v28 = vpop.f32.mrb[31].mxu1 }
 0x133   :  { %v1612_v29 = vadd.f32 %v1611_v28, %v1610_v25  ;;  %v2225_v30 = vadd.f32 %v1609_v24, %v1509_v21 }
 0x135   :  { %v2227_v31 = vadd.f32 %v1612_v29, %v1512_v27 }
 0x136   :  { %v1513_v34 = vpop.f32.mrb[32].mxu0 }
 0x137   :  { %v1613_v35 = vpop.f32.mrb[32].mxu1  ;;  %v1514_v36 = vpop.f32.mrb[33].mxu0 }
 0x138   :  { %v1515_v37 = vadd.f32 %v1514_v36, %v1513_v34  ;;  %v1614_v38 = vpop.f32.mrb[33].mxu1  ;;  %v1516_v39 = vpop.f32.mrb[34].mxu0 }
 0x139   :  { %v1615_v40 = vadd.f32 %v1614_v38, %v1613_v35  ;;  %v1616_v41 = vpop.f32.mrb[34].mxu1  ;;  %v1517_v42 = vpop.f32.mrb[35].mxu0 }
 0x13a   :  { %v1518_v43 = vadd.f32 %v1517_v42, %v1516_v39  ;;  %v1617_v44 = vpop.f32.mrb[35].mxu1 }
 0x13b   :  { %v1618_v45 = vadd.f32 %v1617_v44, %v1616_v41  ;;  %v2229_v48 = vadd.f32 %v1615_v40, %v1515_v37 }
 0x13d   :  { %v2231_v49 = vadd.f32 %v1618_v45, %v1518_v43 }
 0x13e   :  { %v1519_v50 = vpop.f32.mrb[36].mxu0 }
 0x13f   :  { %v1619_v51 = vpop.f32.mrb[36].mxu1  ;;  %v1520_v52 = vpop.f32.mrb[37].mxu0 }
 0x140   :  { %v1521_v53 = vadd.f32 %v1520_v52, %v1519_v50  ;;  %v1620_v56 = vpop.f32.mrb[37].mxu1  ;;  %v1522_v57 = vpop.f32.mrb[38].mxu0 }
 0x141   :  { %v1621_v58 = vadd.f32 %v1620_v56, %v1619_v51  ;;  %v1622_v59 = vpop.f32.mrb[38].mxu1  ;;  %v1523_v60 = vpop.f32.mrb[39].mxu0 }
 0x142   :  { %v1524_v61 = vadd.f32 %v1523_v60, %v1522_v57  ;;  %v1623_v0 = vpop.f32.mrb[39].mxu1 }
 0x143   :  { %v1624_v1 = vadd.f32 %v1623_v0, %v1622_v59  ;;  %v1032_v2 = vadd.f32 %v1621_v58, %v1521_v53 }
 0x145   :  { %v2233_v3 = vadd.f32 %v1624_v1, %v1524_v61 }
 0x146   :  { %v1525_v6 = vpop.f32.mrb[40].mxu0 }
 0x147   :  { %v1625_v7 = vpop.f32.mrb[40].mxu1  ;;  %v1526_v8 = vpop.f32.mrb[41].mxu0 }
 0x148   :  { %v1527_v9 = vadd.f32 %v1526_v8, %v1525_v6  ;;  %v1626_v10 = vpop.f32.mrb[41].mxu1  ;;  %v1528_v11 = vpop.f32.mrb[42].mxu0 }
 0x149   :  { %v1627_v12 = vadd.f32 %v1626_v10, %v1625_v7  ;;  %v1628_v13 = vpop.f32.mrb[42].mxu1  ;;  %v1529_v16 = vpop.f32.mrb[43].mxu0 }
 0x14a   :  { %v1530_v17 = vadd.f32 %v1529_v16, %v1528_v11  ;;  %v1629_v20 = vpop.f32.mrb[43].mxu1 }
 0x14b   :  { %v1630_v21 = vadd.f32 %v1629_v20, %v1628_v13  ;;  %v2235_v22 = vadd.f32 %v1627_v12, %v1527_v9 }
 0x14d   :  { %v2237_v23 = vadd.f32 %v1630_v21, %v1530_v17 }
 0x14e   :  { %v1531_v24 = vpop.f32.mrb[44].mxu0 }
 0x14f   :  { %v1631_v25 = vpop.f32.mrb[44].mxu1  ;;  %v1532_v26 = vpop.f32.mrb[45].mxu0 }
 0x150   :  { %v1533_v27 = vadd.f32 %v1532_v26, %v1531_v24  ;;  %v1632_v28 = vpop.f32.mrb[45].mxu1  ;;  %v1534_v29 = vpop.f32.mrb[46].mxu0 }
 0x151   :  { %v1633_v34 = vadd.f32 %v1632_v28, %v1631_v25  ;;  %v1634_v35 = vpop.f32.mrb[46].mxu1  ;;  %v1535_v36 = vpop.f32.mrb[47].mxu0 }
 0x152   :  { %v1536_v37 = vadd.f32 %v1535_v36, %v1534_v29  ;;  %v1635_v38 = vpop.f32.mrb[47].mxu1 }
 0x153   :  { %v1636_v39 = vadd.f32 %v1635_v38, %v1634_v35  ;;  %v1048_v40 = vadd.f32 %v1633_v34, %v1533_v27 }
 0x155   :  { %v1051_v41 = vadd.f32 %v1636_v39, %v1536_v37 }
 0x156   :  { %v1537_v42 = vpop.f32.mrb[48].mxu0 }
 0x157   :  { %v1637_v43 = vpop.f32.mrb[48].mxu1  ;;  %v1538_v44 = vpop.f32.mrb[49].mxu0 }
 0x158   :  { %v1539_v45 = vadd.f32 %v1538_v44, %v1537_v42  ;;  %v1638_v50 = vpop.f32.mrb[49].mxu1  ;;  %v1540_v51 = vpop.f32.mrb[50].mxu0 }
 0x159   :  { %v1639_v52 = vadd.f32 %v1638_v50, %v1637_v43  ;;  %v1640_v53 = vpop.f32.mrb[50].mxu1  ;;  %v1541_v56 = vpop.f32.mrb[51].mxu0 }
 0x15a   :  { %v1542_v57 = vadd.f32 %v1541_v56, %v1540_v51  ;;  %v1641_v58 = vpop.f32.mrb[51].mxu1 }
 0x15b   :  { %v1642_v59 = vadd.f32 %v1641_v58, %v1640_v53  ;;  %v1056_v60 = vadd.f32 %v1639_v52, %v1539_v45 }
 0x15d   :  { %v2239_v61 = vadd.f32 %v1642_v59, %v1542_v57 }
 0x15e   :  { %v1543_v0 = vpop.f32.mrb[52].mxu0 }
 0x15f   :  { %v1643_v1 = vpop.f32.mrb[52].mxu1  ;;  %v1544_v6 = vpop.f32.mrb[53].mxu0 }
 0x160   :  { %v1545_v7 = vadd.f32 %v1544_v6, %v1543_v0  ;;  %v1644_v8 = vpop.f32.mrb[53].mxu1  ;;  %v1546_v9 = vpop.f32.mrb[54].mxu0 }
 0x161   :  { %v1645_v10 = vadd.f32 %v1644_v8, %v1643_v1  ;;  %v1646_v11 = vpop.f32.mrb[54].mxu1  ;;  %v1547_v12 = vpop.f32.mrb[55].mxu0 }
 0x162   :  { %v1548_v13 = vadd.f32 %v1547_v12, %v1546_v9  ;;  %v1647_v16 = vpop.f32.mrb[55].mxu1 }
 0x163   :  { %v1648_v17 = vadd.f32 %v1647_v16, %v1646_v11  ;;  %v1064_v20 = vadd.f32 %v1645_v10, %v1545_v7 }
 0x165   :  { %v1067_v21 = vadd.f32 %v1648_v17, %v1548_v13 }
 0x166   :  { %v1677_v24 = vpop.f32.mrb[56].mxu0 }
 0x167   :  { %v1113_v25 = vadd.f32 %v1677_v24, %v2201_v4  ;;  %v1693_v26 = vpop.f32.mrb[56].mxu1  ;;  %v1104_v27 = vpop.f32.mrb[57].mxu0 }
 0x168   :  { %v1177_v28 = vadd.f32 %v1693_v26, %v1032_v2  ;;  %v2243_v29 = vadd.f32 %v1104_v27, %v2197_v54  ;;  %v1168_v34 = vpop.f32.mrb[57].mxu1  ;;  %v1678_v35 = vpop.f32.mrb[58].mxu0 }
 0x169   :  { %v1169_v36 = vadd.f32 %v1168_v34, %v2229_v48  ;;  %v1116_v37 = vadd.f32 %v1678_v35, %v2203_v5  ;;  %v1694_v38 = vpop.f32.mrb[58].mxu1  ;;  %v1107_v39 = vpop.f32.mrb[59].mxu0 }
 0x16a   :  { %v2248_v42 = vadd.f32 %v1694_v38, %v2233_v3  ;;  %v2251_v43 = vadd.f32 %v1107_v39, %v2199_v55  ;;  %v1171_v4 = vpop.f32.mrb[59].mxu1 }
 0x16b   :  { %v1172_v2 = vadd.f32 %v1171_v4, %v2231_v49 }
 0x16e   :  { %v1681_v44 = vpop.f32.mrb[60].mxu0 }
 0x16f   :  { %v2255_v54 = vadd.f32 %v1681_v44, %v2209_v32  ;;  %v1697_v45 = vpop.f32.mrb[60].mxu1  ;;  %v1120_v50 = vpop.f32.mrb[61].mxu0 }
 0x170   :  { %v2257_v48 = vadd.f32 %v1697_v45, %v1048_v40  ;;  %v1121_v5 = vadd.f32 %v1120_v50, %v2205_v18  ;;  %v1184_v51 = vpop.f32.mrb[61].mxu1  ;;  %v1682_v52 = vpop.f32.mrb[62].mxu0 }
 0x171   :  { %v2261_v3 = vadd.f32 %v1184_v51, %v2235_v22  ;;  %v1132_v55 = vadd.f32 %v1682_v52, %v2211_v33  ;;  %v1698_v53 = vpop.f32.mrb[62].mxu1  ;;  %v1123_v56 = vpop.f32.mrb[63].mxu0 }
 0x172   :  { %v1196_v49 = vadd.f32 %v1698_v53, %v1051_v41  ;;  %v1124_v57 = vadd.f32 %v1123_v56, %v2207_v19  ;;  %v1187_v32 = vpop.f32.mrb[63].mxu1 }
 0x173   :  { %v1215_v58 = vmax.f32 %v2243_v29, %v1132_v55  ;;  %v1188_v40 = vadd.f32 %v1187_v32, %v2237_v23 }
 0x174   :  { %v1224_v59 = vmax.f32 %v1169_v36, %v1196_v49 }
 0x176   :  { %v1685_v0 = vpop.f32.mrb[64].mxu0 }
 0x177   :  { %v1145_v18 = vadd.f32 %v1685_v0, %v2217_v62  ;;  %v1701_v1 = vpop.f32.mrb[64].mxu1  ;;  %v1136_v6 = vpop.f32.mrb[65].mxu0 }
 0x178   :  { %v1209_v22 = vadd.f32 %v1701_v1, %v1064_v20  ;;  %v1137_v7 = vadd.f32 %v1136_v6, %v2213_v46  ;;  %v1200_v33 = vpop.f32.mrb[65].mxu1  ;;  %v1686_v8 = vpop.f32.mrb[66].mxu0 }
 0x179   :  { %v1218_v9 = vmax.f32 %v1116_v37, %v1145_v18  ;;  %v1201_v41 = vadd.f32 %v1200_v33, %v1056_v60  ;;  %v1148_v19 = vadd.f32 %v1686_v8, %v2219_v63  ;;  %v1702_v10 = vpop.f32.mrb[66].mxu1  ;;  %v1139_v11 = vpop.f32.mrb[67].mxu0  ;;  %v1417_v60 = vld [vmem:[%s2298_s2] ss:$0 sm:$0xff] }
 0x17a   :  { %v1227_v12 = vmax.f32 %v2248_v42, %v1209_v22  ;;  %v1216_v23 = vmax.f32 %v2251_v43, %v1137_v7  ;;  %v1212_v13 = vadd.f32 %v1702_v10, %v1067_v21  ;;  %v1140_v62 = vadd.f32 %v1139_v11, %v2215_v47  ;;  %v1203_v16 = vpop.f32.mrb[67].mxu1 }
 0x17b   :  { %v1225_v17 = vmax.f32 %v1172_v2, %v1201_v41  ;;  %v1219_v20 = vmax.f32 %v1121_v5, %v1148_v19  ;;  %v1204_v46 = vadd.f32 %v1203_v16, %v2239_v61 }
 0x17c   :  { %v1228_v63 = vmax.f32 %v2261_v3, %v1212_v13  ;;  %v1217_v24 = vmax.f32 %v1113_v25, %v1140_v62 }
 0x17d   :  { %v1232_v26 = vmax.f32 %v1218_v9, %v1225_v17  ;;  %v1226_v27 = vmax.f32 %v1177_v28, %v1204_v46 }
 0x17e   :  { %v1231_v29 = vmax.f32 %v1217_v24, %v1224_v59  ;;  %v1689_v34 = vpop.f32.mrb[68].mxu0 }
 0x17f   :  { %v1246_v35 = vadd.f32 %v1417_v60, %v1232_v26  ;;  %v1233_v21 = vmax.f32 %v1219_v20, %v1226_v27  ;;  %v1161_v47 = vadd.f32 %v1689_v34, %v2225_v30  ;;  %v1152_v36 = vpop.f32.mrb[69].mxu0 }
 0x180   :  { %v1245_v37 = vadd.f32 %v1417_v60, %v1231_v29  ;;  %v1153_v38 = vadd.f32 %v1152_v36, %v2221_v14  ;;  %v1690_v61 = vpop.f32.mrb[70].mxu0 }
 0x181   :  { %v1222_v39 = vmax.f32 %v1161_v47, %v1188_v40  ;;  %v1164_v42 = vadd.f32 %v1690_v61, %v2227_v31  ;;  %v1155_v43 = vpop.f32.mrb[71].mxu0  ;;  %v1253_v4 = vmax.f32 %v1246_v35, 0.0  ;;  %v1247_v5 = vadd.f32 %v1417_v60, %v1233_v21 }
 0x182   :  { %v1252_v2 = vmax.f32 %v1245_v37, 0.0  ;;  %v1220_v25 = vmax.f32 %v1124_v57, %v1153_v38  ;;  %v1156_v28 = vadd.f32 %v1155_v43, %v2223_v15 }
 0x183   :  { %v1229_v44 = vmax.f32 %v1215_v58, %v1222_v39  ;;  %v1223_v45 = vmax.f32 %v1164_v42, %v2257_v48  ;;  %v1254_v53 = vmax.f32 %v1247_v5, 0.0 }
 0x184   :  { %v1440_v50 = vpack.c.bf16 %v1253_v4, %v1252_v2  ;;  %v1234_v30 = vmax.f32 %v1220_v25, %v1227_v12  ;;  %v1221_v51 = vmax.f32 %v2255_v54, %v1156_v28 }
 0x185   :  { %v1243_v52 = vadd.f32 %v1417_v60, %v1229_v44  ;;  %v1230_v14 = vmax.f32 %v1216_v23, %v1223_v45 }
 0x186   :  { %1447 = vst [vmem:[%s2299_s3 + $0x8] sm:$0xff] %v1440_v50   ;;  %v1248_v31 = vadd.f32 %v1417_v60, %v1234_v30  ;;  %v1235_v3 = vmax.f32 %v1221_v51, %v1228_v63 }
 0x187   :  { %v1244_v55 = vadd.f32 %v1417_v60, %v1230_v14  ;;  %v1250_v49 = vmax.f32 %v1243_v52, 0.0 }
 0x188   :  { %v1255_v56 = vmax.f32 %v1248_v31, 0.0  ;;  %v1249_v15 = vadd.f32 %v1417_v60, %v1235_v3 }
 0x189   :  { %v1251_v57 = vmax.f32 %v1244_v55, 0.0 }
 0x18a   :  { %v1445_v48 = vpack.c.bf16 %v1255_v56, %v1254_v53  ;;  %v1256_v32 = vmax.f32 %v1249_v15, 0.0 }
 0x18b   :  { %v1435_v58 = vpack.c.bf16 %v1251_v57, %v1250_v49 }
 0x18c   :  { %1448 = vst [vmem:[%s2299_s3 + $0x10] sm:$0xff] %v1445_v48   ;;  %v1431_v54 = vpack.c.bf16 %v1256_v32, %v1256_v32 }
 0x18d   :  { %1436 = vst [vmem:[%s2299_s3] sm:$0xff] %v1435_v58  }
 0x18e   :  { %1292 = vst [vmem:[%s2299_s3 + $0x18] sm:$0xf] %v1431_v54 }

// kernel: net_mnist_forward.5
= control target key start
LH: loop header
LB: loop body
LE: loop exit
PB: predicated region body
PF: predicated region fallthrough
CT: control target
= control target key end

     0   :  { %s10509_s15 = smov 0   ;;  %s10511_s16 = smov 0   ;;  %s13117_s0 = inlined_call_operand.vmem [shape: bf16[2,3136], index: 0, kind: input, shape index: {}]   ;;  %s13118_s1 = inlined_call_operand.vmem [shape: bf16[3136,1024], index: 1, kind: input, shape index: {}]   ;;  %s13119_s2 = inlined_call_operand.vmem [shape: f32[1,1024], index: 2, kind: input, shape index: {}]   ;;  %s13120_s3 = inlined_call_operand.vmem [shape: bf16[1024,10], index: 3, kind: input, shape index: {}]   ;;  %s13121_s4 = inlined_call_operand.vmem [shape: f32[2,2,10], index: 4, kind: output, shape index: {}]  }
   0x1   :  { %s10513_s17 = smov 0  }
   0x2 LB: > { %s10525_s18 = sadd.s32 4294967295, %s10480_s17   ;;  %s10528_s19 = sadd.s32 1, %s10480_s17   ;;  %s10480_s17 = sphi %s10513_s17, %s13124_s17   ;;  %s10476_s16 = sphi %s10511_s16, %s13123_s16   ;;  %s10472_s15 = sphi %s10509_s15, %s13122_s15  }
   0x3   : > { %s39_s20 = ssub.s32 %s10480_s17, %s10528_s19  ;;  %s42_s21 = sadd.s32 1, %s10476_s16 }
   0x4   : > { %p40_p0 = scmp.eq.s32.totalorder %s39_s20, 0  ;;  %p49_p1 = scmp.ne.s32.totalorder %s10476_s16, %s10472_s15 }
   0x5   : > { %p50_p2 = scmp.eq.s32.totalorder %s10480_s17, 0  ;;  %p8243_p4 = scmp.ge.s32.totalorder %s10480_s17, 2 }
   0x6   : > { %s10537_s22 = scalar_select %p40_p0, %s10476_s16, %s42_s21  }
   0x7   : > { %p51_p3 = por %p50_p2, %p49_p1  ;;  %156 = sbr.rel (%p8243_p4) target bundleno = 410 (0x19a), region = 20 }
   0xe   : > { %159 = sbr.rel (!%p51_p3) target bundleno = 410 (0x19a), region = 24  ;;  %s161_s23 = sand.u32 (%p51_p3), 1, %s10476_s16  }
   0xf   : > { %s9072_s24 = sshll.u32 (%p51_p3), %s10480_s17, 4  ;;  %s9217_s25 = smul.u32 (%p51_p3), 6272, %s161_s23 }
  0x10   : > { %s10545_s28 = scalar_lea.vmem (%p51_p3), %s13118_s1, %s9072_s24 }
  0x11   : > { %v179_v0 = vld [vmem:[%s10545_s28] sm:$0xff] (%p51_p3)  ;;  %v181_v1 = vld [vmem:[%s10545_s28 + $0x8] sm:$0xff] (%p51_p3)  ;;  %s10553_s29 = scalar_lea.vmem (%p51_p3), [#allocation2], %s9217_s25 }
  0x12   : > { %v183_v2 = vld [vmem:[%s10545_s28 + $0x20] sm:$0xff] (%p51_p3)  ;;  %v185_v3 = vld [vmem:[%s10545_s28 + $0x28] sm:$0xff] (%p51_p3)  ;;  %180 = vst [vmem:[%s10553_s29] sm:$0xff] (%p51_p3), %v179_v0  ;;  %182 = vst [vmem:[%s10553_s29 + $0x8] sm:$0xff] (%p51_p3), %v181_v1 }
  0x13   : > { %v187_v4 = vld [vmem:[%s10545_s28 + $0x40] sm:$0xff] (%p51_p3)  ;;  %v189_v5 = vld [vmem:[%s10545_s28 + $0x48] sm:$0xff] (%p51_p3)  ;;  %184 = vst [vmem:[%s10553_s29 + $0x10] sm:$0xff] (%p51_p3), %v183_v2  ;;  %186 = vst [vmem:[%s10553_s29 + $0x18] sm:$0xff] (%p51_p3), %v185_v3 }
  0x14   : > { %188 = vst [vmem:[%s10553_s29 + $0x20] sm:$0xff] (%p51_p3), %v187_v4  ;;  %190 = vst [vmem:[%s10553_s29 + $0x28] sm:$0xff] (%p51_p3), %v189_v5  ;;  %v191_v6 = vld [vmem:[%s10545_s28 + $0x60] sm:$0xff] (%p51_p3)  ;;  %v193_v7 = vld [vmem:[%s10545_s28 + $0x68] sm:$0xff] (%p51_p3) }
  0x15   : > { %v195_v8 = vld [vmem:[%s10545_s28 + $0x80] sm:$0xff]  ;;  %192 = vst [vmem:[%s10553_s29 + $0x30] sm:$0xff] %v191_v6  ;;  %194 = vst [vmem:[%s10553_s29 + $0x38] sm:$0xff] %v193_v7  ;;  %v197_v9 = vld [vmem:[%s10545_s28 + $0x88] sm:$0xff] }
  0x16   : > { %196 = vst [vmem:[%s10553_s29 + $0x40] sm:$0xff] %v195_v8  ;;  %v199_v10 = vld [vmem:[%s10545_s28 + $0xa0] sm:$0xff]  ;;  %v201_v11 = vld [vmem:[%s10545_s28 + $0xa8] sm:$0xff]  ;;  %198 = vst [vmem:[%s10553_s29 + $0x48] sm:$0xff] %v197_v9 }
  0x17   : > { %200 = vst [vmem:[%s10553_s29 + $0x50] sm:$0xff] %v199_v10  ;;  %202 = vst [vmem:[%s10553_s29 + $0x58] sm:$0xff] %v201_v11  ;;  %v203_v12 = vld [vmem:[%s10545_s28 + $0xc0] sm:$0xff]  ;;  %v205_v13 = vld [vmem:[%s10545_s28 + $0xc8] sm:$0xff] }
  0x18   : > { %v207_v14 = vld [vmem:[%s10545_s28 + $0xe0] sm:$0xff]  ;;  %204 = vst [vmem:[%s10553_s29 + $0x60] sm:$0xff] %v203_v12  ;;  %206 = vst [vmem:[%s10553_s29 + $0x68] sm:$0xff] %v205_v13  ;;  %v209_v15 = vld [vmem:[%s10545_s28 + $0xe8] sm:$0xff] }
  0x19   : > { %208 = vst [vmem:[%s10553_s29 + $0x70] sm:$0xff] %v207_v14  ;;  %v211_v16 = vld [vmem:[%s10545_s28 + $0x100] sm:$0xff]  ;;  %v213_v17 = vld [vmem:[%s10545_s28 + $0x108] sm:$0xff]  ;;  %210 = vst [vmem:[%s10553_s29 + $0x78] sm:$0xff] %v209_v15 }
  0x1a   : > { %212 = vst [vmem:[%s10553_s29 + $0x80] sm:$0xff] %v211_v16  ;;  %214 = vst [vmem:[%s10553_s29 + $0x88] sm:$0xff] %v213_v17  ;;  %v215_v18 = vld [vmem:[%s10545_s28 + $0x120] sm:$0xff]  ;;  %v217_v19 = vld [vmem:[%s10545_s28 + $0x128] sm:$0xff] }
  0x1b   : > { %v219_v20 = vld [vmem:[%s10545_s28 + $0x140] sm:$0xff]  ;;  %216 = vst [vmem:[%s10553_s29 + $0x90] sm:$0xff] %v215_v18  ;;  %218 = vst [vmem:[%s10553_s29 + $0x98] sm:$0xff] %v217_v19  ;;  %v221_v21 = vld [vmem:[%s10545_s28 + $0x148] sm:$0xff] }
  0x1c   : > { %220 = vst [vmem:[%s10553_s29 + $0xa0] sm:$0xff] %v219_v20  ;;  %v223_v22 = vld [vmem:[%s10545_s28 + $0x160] sm:$0xff]  ;;  %v225_v23 = vld [vmem:[%s10545_s28 + $0x168] sm:$0xff]  ;;  %222 = vst [vmem:[%s10553_s29 + $0xa8] sm:$0xff] %v221_v21 }
  0x1d   : > { %224 = vst [vmem:[%s10553_s29 + $0xb0] sm:$0xff] %v223_v22  ;;  %226 = vst [vmem:[%s10553_s29 + $0xb8] sm:$0xff] %v225_v23  ;;  %v227_v24 = vld [vmem:[%s10545_s28 + $0x180] sm:$0xff]  ;;  %v229_v25 = vld [vmem:[%s10545_s28 + $0x188] sm:$0xff] }
  0x1e   : > { %v231_v26 = vld [vmem:[%s10545_s28 + $0x1a0] sm:$0xff]  ;;  %228 = vst [vmem:[%s10553_s29 + $0xc0] sm:$0xff] %v227_v24  ;;  %230 = vst [vmem:[%s10553_s29 + $0xc8] sm:$0xff] %v229_v25  ;;  %v233_v27 = vld [vmem:[%s10545_s28 + $0x1a8] sm:$0xff] }
  0x1f   : > { %232 = vst [vmem:[%s10553_s29 + $0xd0] sm:$0xff] %v231_v26  ;;  %v235_v28 = vld [vmem:[%s10545_s28 + $0x1c0] sm:$0xff]  ;;  %v237_v29 = vld [vmem:[%s10545_s28 + $0x1c8] sm:$0xff]  ;;  %234 = vst [vmem:[%s10553_s29 + $0xd8] sm:$0xff] %v233_v27 }
  0x20   : > { %236 = vst [vmem:[%s10553_s29 + $0xe0] sm:$0xff] %v235_v28  ;;  %238 = vst [vmem:[%s10553_s29 + $0xe8] sm:$0xff] %v237_v29  ;;  %v239_v30 = vld [vmem:[%s10545_s28 + $0x1e0] sm:$0xff]  ;;  %v241_v31 = vld [vmem:[%s10545_s28 + $0x1e8] sm:$0xff] }
  0x21   : > { %v243_v32 = vld [vmem:[%s10545_s28 + $0x200] sm:$0xff]  ;;  %240 = vst [vmem:[%s10553_s29 + $0xf0] sm:$0xff] %v239_v30  ;;  %242 = vst [vmem:[%s10553_s29 + $0xf8] sm:$0xff] %v241_v31  ;;  %v245_v33 = vld [vmem:[%s10545_s28 + $0x208] sm:$0xff] }
  0x22   : > { %244 = vst [vmem:[%s10553_s29 + $0x100] sm:$0xff] %v243_v32  ;;  %v247_v34 = vld [vmem:[%s10545_s28 + $0x220] sm:$0xff]  ;;  %v249_v35 = vld [vmem:[%s10545_s28 + $0x228] sm:$0xff]  ;;  %246 = vst [vmem:[%s10553_s29 + $0x108] sm:$0xff] %v245_v33 }
  0x23   : > { %248 = vst [vmem:[%s10553_s29 + $0x110] sm:$0xff] %v247_v34  ;;  %250 = vst [vmem:[%s10553_s29 + $0x118] sm:$0xff] %v249_v35  ;;  %v251_v36 = vld [vmem:[%s10545_s28 + $0x240] sm:$0xff]  ;;  %v253_v37 = vld [vmem:[%s10545_s28 + $0x248] sm:$0xff] }
  0x24   : > { %v255_v38 = vld [vmem:[%s10545_s28 + $0x260] sm:$0xff]  ;;  %252 = vst [vmem:[%s10553_s29 + $0x120] sm:$0xff] %v251_v36  ;;  %254 = vst [vmem:[%s10553_s29 + $0x128] sm:$0xff] %v253_v37  ;;  %v257_v39 = vld [vmem:[%s10545_s28 + $0x268] sm:$0xff] }
  0x25   : > { %256 = vst [vmem:[%s10553_s29 + $0x130] sm:$0xff] %v255_v38  ;;  %v259_v40 = vld [vmem:[%s10545_s28 + $0x280] sm:$0xff]  ;;  %v261_v41 = vld [vmem:[%s10545_s28 + $0x288] sm:$0xff]  ;;  %258 = vst [vmem:[%s10553_s29 + $0x138] sm:$0xff] %v257_v39 }
  0x26   : > { %260 = vst [vmem:[%s10553_s29 + $0x140] sm:$0xff] %v259_v40  ;;  %262 = vst [vmem:[%s10553_s29 + $0x148] sm:$0xff] %v261_v41  ;;  %v263_v42 = vld [vmem:[%s10545_s28 + $0x2a0] sm:$0xff]  ;;  %v265_v43 = vld [vmem:[%s10545_s28 + $0x2a8] sm:$0xff] }
  0x27   : > { %v267_v44 = vld [vmem:[%s10545_s28 + $0x2c0] sm:$0xff]  ;;  %264 = vst [vmem:[%s10553_s29 + $0x150] sm:$0xff] %v263_v42  ;;  %266 = vst [vmem:[%s10553_s29 + $0x158] sm:$0xff] %v265_v43  ;;  %v269_v45 = vld [vmem:[%s10545_s28 + $0x2c8] sm:$0xff] }
  0x28   : > { %268 = vst [vmem:[%s10553_s29 + $0x160] sm:$0xff] %v267_v44  ;;  %v271_v46 = vld [vmem:[%s10545_s28 + $0x2e0] sm:$0xff]  ;;  %v273_v47 = vld [vmem:[%s10545_s28 + $0x2e8] sm:$0xff]  ;;  %270 = vst [vmem:[%s10553_s29 + $0x168] sm:$0xff] %v269_v45 }
  0x29   : > { %272 = vst [vmem:[%s10553_s29 + $0x170] sm:$0xff] %v271_v46  ;;  %274 = vst [vmem:[%s10553_s29 + $0x178] sm:$0xff] %v273_v47  ;;  %v275_v48 = vld [vmem:[%s10545_s28 + $0x300] sm:$0xff]  ;;  %v277_v49 = vld [vmem:[%s10545_s28 + $0x308] sm:$0xff] }
  0x2a   : > { %v279_v50 = vld [vmem:[%s10545_s28 + $0x320] sm:$0xff]  ;;  %276 = vst [vmem:[%s10553_s29 + $0x180] sm:$0xff] %v275_v48  ;;  %278 = vst [vmem:[%s10553_s29 + $0x188] sm:$0xff] %v277_v49  ;;  %v281_v51 = vld [vmem:[%s10545_s28 + $0x328] sm:$0xff] }
  0x2b   : > { %280 = vst [vmem:[%s10553_s29 + $0x190] sm:$0xff] %v279_v50  ;;  %v283_v52 = vld [vmem:[%s10545_s28 + $0x340] sm:$0xff]  ;;  %v285_v53 = vld [vmem:[%s10545_s28 + $0x348] sm:$0xff]  ;;  %282 = vst [vmem:[%s10553_s29 + $0x198] sm:$0xff] %v281_v51 }
  0x2c   : > { %284 = vst [vmem:[%s10553_s29 + $0x1a0] sm:$0xff] %v283_v52  ;;  %286 = vst [vmem:[%s10553_s29 + $0x1a8] sm:$0xff] %v285_v53  ;;  %v287_v54 = vld [vmem:[%s10545_s28 + $0x360] sm:$0xff]  ;;  %v289_v55 = vld [vmem:[%s10545_s28 + $0x368] sm:$0xff] }
  0x2d   : > { %v291_v56 = vld [vmem:[%s10545_s28 + $0x380] sm:$0xff]  ;;  %288 = vst [vmem:[%s10553_s29 + $0x1b0] sm:$0xff] %v287_v54  ;;  %290 = vst [vmem:[%s10553_s29 + $0x1b8] sm:$0xff] %v289_v55  ;;  %v293_v57 = vld [vmem:[%s10545_s28 + $0x388] sm:$0xff] }
  0x2e   : > { %292 = vst [vmem:[%s10553_s29 + $0x1c0] sm:$0xff] %v291_v56  ;;  %v295_v58 = vld [vmem:[%s10545_s28 + $0x3a0] sm:$0xff]  ;;  %v297_v59 = vld [vmem:[%s10545_s28 + $0x3a8] sm:$0xff]  ;;  %294 = vst [vmem:[%s10553_s29 + $0x1c8] sm:$0xff] %v293_v57 }
  0x2f   : > { %296 = vst [vmem:[%s10553_s29 + $0x1d0] sm:$0xff] %v295_v58  ;;  %298 = vst [vmem:[%s10553_s29 + $0x1d8] sm:$0xff] %v297_v59  ;;  %v299_v60 = vld [vmem:[%s10545_s28 + $0x3c0] sm:$0xff]  ;;  %v301_v61 = vld [vmem:[%s10545_s28 + $0x3c8] sm:$0xff] }
  0x30   : > { %v303_v62 = vld [vmem:[%s10545_s28 + $0x3e0] sm:$0xff]  ;;  %300 = vst [vmem:[%s10553_s29 + $0x1e0] sm:$0xff] %v299_v60  ;;  %302 = vst [vmem:[%s10553_s29 + $0x1e8] sm:$0xff] %v301_v61  ;;  %v305_v63 = vld [vmem:[%s10545_s28 + $0x3e8] sm:$0xff] }
  0x31   : > { %304 = vst [vmem:[%s10553_s29 + $0x1f0] sm:$0xff] %v303_v62  ;;  %v307_v0 = vld [vmem:[%s10545_s28 + $0x400] sm:$0xff]  ;;  %v309_v1 = vld [vmem:[%s10545_s28 + $0x408] sm:$0xff]  ;;  %306 = vst [vmem:[%s10553_s29 + $0x1f8] sm:$0xff] %v305_v63 }
  0x32   : > { %308 = vst [vmem:[%s10553_s29 + $0x200] sm:$0xff] %v307_v0  ;;  %310 = vst [vmem:[%s10553_s29 + $0x208] sm:$0xff] %v309_v1  ;;  %v311_v2 = vld [vmem:[%s10545_s28 + $0x420] sm:$0xff]  ;;  %v313_v3 = vld [vmem:[%s10545_s28 + $0x428] sm:$0xff] }
  0x33   : > { %v315_v4 = vld [vmem:[%s10545_s28 + $0x440] sm:$0xff]  ;;  %312 = vst [vmem:[%s10553_s29 + $0x210] sm:$0xff] %v311_v2  ;;  %314 = vst [vmem:[%s10553_s29 + $0x218] sm:$0xff] %v313_v3  ;;  %v317_v5 = vld [vmem:[%s10545_s28 + $0x448] sm:$0xff] }
  0x34   : > { %316 = vst [vmem:[%s10553_s29 + $0x220] sm:$0xff] %v315_v4  ;;  %v319_v6 = vld [vmem:[%s10545_s28 + $0x460] sm:$0xff]  ;;  %v321_v7 = vld [vmem:[%s10545_s28 + $0x468] sm:$0xff]  ;;  %318 = vst [vmem:[%s10553_s29 + $0x228] sm:$0xff] %v317_v5 }
  0x35   : > { %320 = vst [vmem:[%s10553_s29 + $0x230] sm:$0xff] %v319_v6  ;;  %322 = vst [vmem:[%s10553_s29 + $0x238] sm:$0xff] %v321_v7  ;;  %v323_v8 = vld [vmem:[%s10545_s28 + $0x480] sm:$0xff]  ;;  %v325_v9 = vld [vmem:[%s10545_s28 + $0x488] sm:$0xff] }
  0x36   : > { %v327_v10 = vld [vmem:[%s10545_s28 + $0x4a0] sm:$0xff]  ;;  %324 = vst [vmem:[%s10553_s29 + $0x240] sm:$0xff] %v323_v8  ;;  %326 = vst [vmem:[%s10553_s29 + $0x248] sm:$0xff] %v325_v9  ;;  %v329_v11 = vld [vmem:[%s10545_s28 + $0x4a8] sm:$0xff] }
  0x37   : > { %328 = vst [vmem:[%s10553_s29 + $0x250] sm:$0xff] %v327_v10  ;;  %v331_v12 = vld [vmem:[%s10545_s28 + $0x4c0] sm:$0xff]  ;;  %v333_v13 = vld [vmem:[%s10545_s28 + $0x4c8] sm:$0xff]  ;;  %330 = vst [vmem:[%s10553_s29 + $0x258] sm:$0xff] %v329_v11 }
  0x38   : > { %332 = vst [vmem:[%s10553_s29 + $0x260] sm:$0xff] %v331_v12  ;;  %334 = vst [vmem:[%s10553_s29 + $0x268] sm:$0xff] %v333_v13  ;;  %v335_v14 = vld [vmem:[%s10545_s28 + $0x4e0] sm:$0xff]  ;;  %v337_v15 = vld [vmem:[%s10545_s28 + $0x4e8] sm:$0xff] }
  0x39   : > { %v339_v16 = vld [vmem:[%s10545_s28 + $0x500] sm:$0xff]  ;;  %336 = vst [vmem:[%s10553_s29 + $0x270] sm:$0xff] %v335_v14  ;;  %338 = vst [vmem:[%s10553_s29 + $0x278] sm:$0xff] %v337_v15  ;;  %v341_v17 = vld [vmem:[%s10545_s28 + $0x508] sm:$0xff] }
  0x3a   : > { %340 = vst [vmem:[%s10553_s29 + $0x280] sm:$0xff] %v339_v16  ;;  %v343_v18 = vld [vmem:[%s10545_s28 + $0x520] sm:$0xff]  ;;  %v345_v19 = vld [vmem:[%s10545_s28 + $0x528] sm:$0xff]  ;;  %342 = vst [vmem:[%s10553_s29 + $0x288] sm:$0xff] %v341_v17 }
  0x3b   : > { %344 = vst [vmem:[%s10553_s29 + $0x290] sm:$0xff] %v343_v18  ;;  %346 = vst [vmem:[%s10553_s29 + $0x298] sm:$0xff] %v345_v19  ;;  %v347_v20 = vld [vmem:[%s10545_s28 + $0x540] sm:$0xff]  ;;  %v349_v21 = vld [vmem:[%s10545_s28 + $0x548] sm:$0xff] }
  0x3c   : > { %v351_v22 = vld [vmem:[%s10545_s28 + $0x560] sm:$0xff]  ;;  %348 = vst [vmem:[%s10553_s29 + $0x2a0] sm:$0xff] %v347_v20  ;;  %350 = vst [vmem:[%s10553_s29 + $0x2a8] sm:$0xff] %v349_v21  ;;  %v353_v23 = vld [vmem:[%s10545_s28 + $0x568] sm:$0xff] }
  0x3d   : > { %352 = vst [vmem:[%s10553_s29 + $0x2b0] sm:$0xff] %v351_v22  ;;  %v355_v24 = vld [vmem:[%s10545_s28 + $0x580] sm:$0xff]  ;;  %v357_v25 = vld [vmem:[%s10545_s28 + $0x588] sm:$0xff]  ;;  %354 = vst [vmem:[%s10553_s29 + $0x2b8] sm:$0xff] %v353_v23 }
  0x3e   : > { %356 = vst [vmem:[%s10553_s29 + $0x2c0] sm:$0xff] %v355_v24  ;;  %358 = vst [vmem:[%s10553_s29 + $0x2c8] sm:$0xff] %v357_v25  ;;  %v359_v26 = vld [vmem:[%s10545_s28 + $0x5a0] sm:$0xff]  ;;  %v361_v27 = vld [vmem:[%s10545_s28 + $0x5a8] sm:$0xff] }
  0x3f   : > { %v363_v28 = vld [vmem:[%s10545_s28 + $0x5c0] sm:$0xff]  ;;  %360 = vst [vmem:[%s10553_s29 + $0x2d0] sm:$0xff] %v359_v26  ;;  %362 = vst [vmem:[%s10553_s29 + $0x2d8] sm:$0xff] %v361_v27  ;;  %v365_v29 = vld [vmem:[%s10545_s28 + $0x5c8] sm:$0xff] }
  0x40   : > { %364 = vst [vmem:[%s10553_s29 + $0x2e0] sm:$0xff] %v363_v28  ;;  %v367_v30 = vld [vmem:[%s10545_s28 + $0x5e0] sm:$0xff]  ;;  %v369_v31 = vld [vmem:[%s10545_s28 + $0x5e8] sm:$0xff]  ;;  %366 = vst [vmem:[%s10553_s29 + $0x2e8] sm:$0xff] %v365_v29 }
  0x41   : > { %368 = vst [vmem:[%s10553_s29 + $0x2f0] sm:$0xff] %v367_v30  ;;  %370 = vst [vmem:[%s10553_s29 + $0x2f8] sm:$0xff] %v369_v31  ;;  %v371_v32 = vld [vmem:[%s10545_s28 + $0x600] sm:$0xff]  ;;  %v373_v33 = vld [vmem:[%s10545_s28 + $0x608] sm:$0xff] }
  0x42   : > { %v375_v34 = vld [vmem:[%s10545_s28 + $0x620] sm:$0xff]  ;;  %372 = vst [vmem:[%s10553_s29 + $0x300] sm:$0xff] %v371_v32  ;;  %374 = vst [vmem:[%s10553_s29 + $0x308] sm:$0xff] %v373_v33  ;;  %v377_v35 = vld [vmem:[%s10545_s28 + $0x628] sm:$0xff] }
  0x43   : > { %376 = vst [vmem:[%s10553_s29 + $0x310] sm:$0xff] %v375_v34  ;;  %v379_v36 = vld [vmem:[%s10545_s28 + $0x640] sm:$0xff]  ;;  %v381_v37 = vld [vmem:[%s10545_s28 + $0x648] sm:$0xff]  ;;  %378 = vst [vmem:[%s10553_s29 + $0x318] sm:$0xff] %v377_v35 }
  0x44   : > { %380 = vst [vmem:[%s10553_s29 + $0x320] sm:$0xff] %v379_v36  ;;  %382 = vst [vmem:[%s10553_s29 + $0x328] sm:$0xff] %v381_v37  ;;  %v383_v38 = vld [vmem:[%s10545_s28 + $0x660] sm:$0xff]  ;;  %v385_v39 = vld [vmem:[%s10545_s28 + $0x668] sm:$0xff] }
  0x45   : > { %v387_v40 = vld [vmem:[%s10545_s28 + $0x680] sm:$0xff]  ;;  %384 = vst [vmem:[%s10553_s29 + $0x330] sm:$0xff] %v383_v38  ;;  %386 = vst [vmem:[%s10553_s29 + $0x338] sm:$0xff] %v385_v39  ;;  %v389_v41 = vld [vmem:[%s10545_s28 + $0x688] sm:$0xff] }
  0x46   : > { %388 = vst [vmem:[%s10553_s29 + $0x340] sm:$0xff] %v387_v40  ;;  %v391_v42 = vld [vmem:[%s10545_s28 + $0x6a0] sm:$0xff]  ;;  %v393_v43 = vld [vmem:[%s10545_s28 + $0x6a8] sm:$0xff]  ;;  %390 = vst [vmem:[%s10553_s29 + $0x348] sm:$0xff] %v389_v41 }
  0x47   : > { %392 = vst [vmem:[%s10553_s29 + $0x350] sm:$0xff] %v391_v42  ;;  %394 = vst [vmem:[%s10553_s29 + $0x358] sm:$0xff] %v393_v43  ;;  %v395_v44 = vld [vmem:[%s10545_s28 + $0x6c0] sm:$0xff]  ;;  %v397_v45 = vld [vmem:[%s10545_s28 + $0x6c8] sm:$0xff] }
  0x48   : > { %v399_v46 = vld [vmem:[%s10545_s28 + $0x6e0] sm:$0xff]  ;;  %396 = vst [vmem:[%s10553_s29 + $0x360] sm:$0xff] %v395_v44  ;;  %398 = vst [vmem:[%s10553_s29 + $0x368] sm:$0xff] %v397_v45  ;;  %v401_v47 = vld [vmem:[%s10545_s28 + $0x6e8] sm:$0xff] }
  0x49   : > { %400 = vst [vmem:[%s10553_s29 + $0x370] sm:$0xff] %v399_v46  ;;  %v403_v48 = vld [vmem:[%s10545_s28 + $0x700] sm:$0xff]  ;;  %v405_v49 = vld [vmem:[%s10545_s28 + $0x708] sm:$0xff]  ;;  %402 = vst [vmem:[%s10553_s29 + $0x378] sm:$0xff] %v401_v47 }
  0x4a   : > { %404 = vst [vmem:[%s10553_s29 + $0x380] sm:$0xff] %v403_v48  ;;  %406 = vst [vmem:[%s10553_s29 + $0x388] sm:$0xff] %v405_v49  ;;  %v407_v50 = vld [vmem:[%s10545_s28 + $0x720] sm:$0xff]  ;;  %v409_v51 = vld [vmem:[%s10545_s28 + $0x728] sm:$0xff] }
  0x4b   : > { %v411_v52 = vld [vmem:[%s10545_s28 + $0x740] sm:$0xff]  ;;  %408 = vst [vmem:[%s10553_s29 + $0x390] sm:$0xff] %v407_v50  ;;  %410 = vst [vmem:[%s10553_s29 + $0x398] sm:$0xff] %v409_v51  ;;  %v413_v53 = vld [vmem:[%s10545_s28 + $0x748] sm:$0xff] }
  0x4c   : > { %412 = vst [vmem:[%s10553_s29 + $0x3a0] sm:$0xff] %v411_v52  ;;  %v415_v54 = vld [vmem:[%s10545_s28 + $0x760] sm:$0xff]  ;;  %v417_v55 = vld [vmem:[%s10545_s28 + $0x768] sm:$0xff]  ;;  %414 = vst [vmem:[%s10553_s29 + $0x3a8] sm:$0xff] %v413_v53 }
  0x4d   : > { %416 = vst [vmem:[%s10553_s29 + $0x3b0] sm:$0xff] %v415_v54  ;;  %418 = vst [vmem:[%s10553_s29 + $0x3b8] sm:$0xff] %v417_v55  ;;  %v419_v56 = vld [vmem:[%s10545_s28 + $0x780] sm:$0xff]  ;;  %v421_v57 = vld [vmem:[%s10545_s28 + $0x788] sm:$0xff] }
  0x4e   : > { %v423_v58 = vld [vmem:[%s10545_s28 + $0x7a0] sm:$0xff]  ;;  %420 = vst [vmem:[%s10553_s29 + $0x3c0] sm:$0xff] %v419_v56  ;;  %422 = vst [vmem:[%s10553_s29 + $0x3c8] sm:$0xff] %v421_v57  ;;  %v425_v59 = vld [vmem:[%s10545_s28 + $0x7a8] sm:$0xff] }
  0x4f   : > { %424 = vst [vmem:[%s10553_s29 + $0x3d0] sm:$0xff] %v423_v58  ;;  %v427_v60 = vld [vmem:[%s10545_s28 + $0x7c0] sm:$0xff]  ;;  %v429_v61 = vld [vmem:[%s10545_s28 + $0x7c8] sm:$0xff]  ;;  %426 = vst [vmem:[%s10553_s29 + $0x3d8] sm:$0xff] %v425_v59 }
  0x50   : > { %428 = vst [vmem:[%s10553_s29 + $0x3e0] sm:$0xff] %v427_v60  ;;  %430 = vst [vmem:[%s10553_s29 + $0x3e8] sm:$0xff] %v429_v61  ;;  %v431_v62 = vld [vmem:[%s10545_s28 + $0x7e0] sm:$0xff]  ;;  %v433_v63 = vld [vmem:[%s10545_s28 + $0x7e8] sm:$0xff] }
  0x51   : > { %v435_v0 = vld [vmem:[%s10545_s28 + $0x800] sm:$0xff]  ;;  %432 = vst [vmem:[%s10553_s29 + $0x3f0] sm:$0xff] %v431_v62  ;;  %434 = vst [vmem:[%s10553_s29 + $0x3f8] sm:$0xff] %v433_v63  ;;  %v437_v1 = vld [vmem:[%s10545_s28 + $0x808] sm:$0xff] }
  0x52   : > { %436 = vst [vmem:[%s10553_s29 + $0x400] sm:$0xff] %v435_v0  ;;  %v439_v2 = vld [vmem:[%s10545_s28 + $0x820] sm:$0xff]  ;;  %v441_v3 = vld [vmem:[%s10545_s28 + $0x828] sm:$0xff]  ;;  %438 = vst [vmem:[%s10553_s29 + $0x408] sm:$0xff] %v437_v1 }
  0x53   : > { %440 = vst [vmem:[%s10553_s29 + $0x410] sm:$0xff] %v439_v2  ;;  %442 = vst [vmem:[%s10553_s29 + $0x418] sm:$0xff] %v441_v3  ;;  %v443_v4 = vld [vmem:[%s10545_s28 + $0x840] sm:$0xff]  ;;  %v445_v5 = vld [vmem:[%s10545_s28 + $0x848] sm:$0xff] }
  0x54   : > { %v447_v6 = vld [vmem:[%s10545_s28 + $0x860] sm:$0xff]  ;;  %444 = vst [vmem:[%s10553_s29 + $0x420] sm:$0xff] %v443_v4  ;;  %446 = vst [vmem:[%s10553_s29 + $0x428] sm:$0xff] %v445_v5  ;;  %v449_v7 = vld [vmem:[%s10545_s28 + $0x868] sm:$0xff] }
  0x55   : > { %448 = vst [vmem:[%s10553_s29 + $0x430] sm:$0xff] %v447_v6  ;;  %v451_v8 = vld [vmem:[%s10545_s28 + $0x880] sm:$0xff]  ;;  %v453_v9 = vld [vmem:[%s10545_s28 + $0x888] sm:$0xff]  ;;  %450 = vst [vmem:[%s10553_s29 + $0x438] sm:$0xff] %v449_v7 }
  0x56   : > { %452 = vst [vmem:[%s10553_s29 + $0x440] sm:$0xff] %v451_v8  ;;  %454 = vst [vmem:[%s10553_s29 + $0x448] sm:$0xff] %v453_v9  ;;  %v455_v10 = vld [vmem:[%s10545_s28 + $0x8a0] sm:$0xff]  ;;  %v457_v11 = vld [vmem:[%s10545_s28 + $0x8a8] sm:$0xff] }
  0x57   : > { %v459_v12 = vld [vmem:[%s10545_s28 + $0x8c0] sm:$0xff]  ;;  %456 = vst [vmem:[%s10553_s29 + $0x450] sm:$0xff] %v455_v10  ;;  %458 = vst [vmem:[%s10553_s29 + $0x458] sm:$0xff] %v457_v11  ;;  %v461_v13 = vld [vmem:[%s10545_s28 + $0x8c8] sm:$0xff] }
  0x58   : > { %460 = vst [vmem:[%s10553_s29 + $0x460] sm:$0xff] %v459_v12  ;;  %v463_v14 = vld [vmem:[%s10545_s28 + $0x8e0] sm:$0xff]  ;;  %v465_v15 = vld [vmem:[%s10545_s28 + $0x8e8] sm:$0xff]  ;;  %462 = vst [vmem:[%s10553_s29 + $0x468] sm:$0xff] %v461_v13 }
  0x59   : > { %464 = vst [vmem:[%s10553_s29 + $0x470] sm:$0xff] %v463_v14  ;;  %466 = vst [vmem:[%s10553_s29 + $0x478] sm:$0xff] %v465_v15  ;;  %v467_v16 = vld [vmem:[%s10545_s28 + $0x900] sm:$0xff]  ;;  %v469_v17 = vld [vmem:[%s10545_s28 + $0x908] sm:$0xff] }
  0x5a   : > { %v471_v18 = vld [vmem:[%s10545_s28 + $0x920] sm:$0xff]  ;;  %468 = vst [vmem:[%s10553_s29 + $0x480] sm:$0xff] %v467_v16  ;;  %470 = vst [vmem:[%s10553_s29 + $0x488] sm:$0xff] %v469_v17  ;;  %v473_v19 = vld [vmem:[%s10545_s28 + $0x928] sm:$0xff] }
  0x5b   : > { %472 = vst [vmem:[%s10553_s29 + $0x490] sm:$0xff] %v471_v18  ;;  %v475_v20 = vld [vmem:[%s10545_s28 + $0x940] sm:$0xff]  ;;  %v477_v21 = vld [vmem:[%s10545_s28 + $0x948] sm:$0xff]  ;;  %474 = vst [vmem:[%s10553_s29 + $0x498] sm:$0xff] %v473_v19 }
  0x5c   : > { %476 = vst [vmem:[%s10553_s29 + $0x4a0] sm:$0xff] %v475_v20  ;;  %478 = vst [vmem:[%s10553_s29 + $0x4a8] sm:$0xff] %v477_v21  ;;  %v479_v22 = vld [vmem:[%s10545_s28 + $0x960] sm:$0xff]  ;;  %v481_v23 = vld [vmem:[%s10545_s28 + $0x968] sm:$0xff] }
  0x5d   : > { %v483_v24 = vld [vmem:[%s10545_s28 + $0x980] sm:$0xff]  ;;  %480 = vst [vmem:[%s10553_s29 + $0x4b0] sm:$0xff] %v479_v22  ;;  %482 = vst [vmem:[%s10553_s29 + $0x4b8] sm:$0xff] %v481_v23  ;;  %v485_v25 = vld [vmem:[%s10545_s28 + $0x988] sm:$0xff] }
  0x5e   : > { %484 = vst [vmem:[%s10553_s29 + $0x4c0] sm:$0xff] %v483_v24  ;;  %v487_v26 = vld [vmem:[%s10545_s28 + $0x9a0] sm:$0xff]  ;;  %v489_v27 = vld [vmem:[%s10545_s28 + $0x9a8] sm:$0xff]  ;;  %486 = vst [vmem:[%s10553_s29 + $0x4c8] sm:$0xff] %v485_v25 }
  0x5f   : > { %488 = vst [vmem:[%s10553_s29 + $0x4d0] sm:$0xff] %v487_v26  ;;  %490 = vst [vmem:[%s10553_s29 + $0x4d8] sm:$0xff] %v489_v27  ;;  %v491_v28 = vld [vmem:[%s10545_s28 + $0x9c0] sm:$0xff]  ;;  %v493_v29 = vld [vmem:[%s10545_s28 + $0x9c8] sm:$0xff] }
  0x60   : > { %v495_v30 = vld [vmem:[%s10545_s28 + $0x9e0] sm:$0xff]  ;;  %492 = vst [vmem:[%s10553_s29 + $0x4e0] sm:$0xff] %v491_v28  ;;  %494 = vst [vmem:[%s10553_s29 + $0x4e8] sm:$0xff] %v493_v29  ;;  %v497_v31 = vld [vmem:[%s10545_s28 + $0x9e8] sm:$0xff] }
  0x61   : > { %496 = vst [vmem:[%s10553_s29 + $0x4f0] sm:$0xff] %v495_v30  ;;  %v499_v32 = vld [vmem:[%s10545_s28 + $0xa00] sm:$0xff]  ;;  %v501_v33 = vld [vmem:[%s10545_s28 + $0xa08] sm:$0xff]  ;;  %498 = vst [vmem:[%s10553_s29 + $0x4f8] sm:$0xff] %v497_v31 }
  0x62   : > { %500 = vst [vmem:[%s10553_s29 + $0x500] sm:$0xff] %v499_v32  ;;  %502 = vst [vmem:[%s10553_s29 + $0x508] sm:$0xff] %v501_v33  ;;  %v503_v34 = vld [vmem:[%s10545_s28 + $0xa20] sm:$0xff]  ;;  %v505_v35 = vld [vmem:[%s10545_s28 + $0xa28] sm:$0xff] }
  0x63   : > { %v507_v36 = vld [vmem:[%s10545_s28 + $0xa40] sm:$0xff]  ;;  %504 = vst [vmem:[%s10553_s29 + $0x510] sm:$0xff] %v503_v34  ;;  %506 = vst [vmem:[%s10553_s29 + $0x518] sm:$0xff] %v505_v35  ;;  %v509_v37 = vld [vmem:[%s10545_s28 + $0xa48] sm:$0xff] }
  0x64   : > { %508 = vst [vmem:[%s10553_s29 + $0x520] sm:$0xff] %v507_v36  ;;  %v511_v38 = vld [vmem:[%s10545_s28 + $0xa60] sm:$0xff]  ;;  %v513_v39 = vld [vmem:[%s10545_s28 + $0xa68] sm:$0xff]  ;;  %510 = vst [vmem:[%s10553_s29 + $0x528] sm:$0xff] %v509_v37 }
  0x65   : > { %512 = vst [vmem:[%s10553_s29 + $0x530] sm:$0xff] %v511_v38  ;;  %514 = vst [vmem:[%s10553_s29 + $0x538] sm:$0xff] %v513_v39  ;;  %v515_v40 = vld [vmem:[%s10545_s28 + $0xa80] sm:$0xff]  ;;  %v517_v41 = vld [vmem:[%s10545_s28 + $0xa88] sm:$0xff] }
  0x66   : > { %v519_v42 = vld [vmem:[%s10545_s28 + $0xaa0] sm:$0xff]  ;;  %516 = vst [vmem:[%s10553_s29 + $0x540] sm:$0xff] %v515_v40  ;;  %518 = vst [vmem:[%s10553_s29 + $0x548] sm:$0xff] %v517_v41  ;;  %v521_v43 = vld [vmem:[%s10545_s28 + $0xaa8] sm:$0xff] }
  0x67   : > { %520 = vst [vmem:[%s10553_s29 + $0x550] sm:$0xff] %v519_v42  ;;  %v523_v44 = vld [vmem:[%s10545_s28 + $0xac0] sm:$0xff]  ;;  %v525_v45 = vld [vmem:[%s10545_s28 + $0xac8] sm:$0xff]  ;;  %522 = vst [vmem:[%s10553_s29 + $0x558] sm:$0xff] %v521_v43 }
  0x68   : > { %524 = vst [vmem:[%s10553_s29 + $0x560] sm:$0xff] %v523_v44  ;;  %526 = vst [vmem:[%s10553_s29 + $0x568] sm:$0xff] %v525_v45  ;;  %v527_v46 = vld [vmem:[%s10545_s28 + $0xae0] sm:$0xff]  ;;  %v529_v47 = vld [vmem:[%s10545_s28 + $0xae8] sm:$0xff] }
  0x69   : > { %v531_v48 = vld [vmem:[%s10545_s28 + $0xb00] sm:$0xff]  ;;  %528 = vst [vmem:[%s10553_s29 + $0x570] sm:$0xff] %v527_v46  ;;  %530 = vst [vmem:[%s10553_s29 + $0x578] sm:$0xff] %v529_v47  ;;  %v533_v49 = vld [vmem:[%s10545_s28 + $0xb08] sm:$0xff] }
  0x6a   : > { %532 = vst [vmem:[%s10553_s29 + $0x580] sm:$0xff] %v531_v48  ;;  %v535_v50 = vld [vmem:[%s10545_s28 + $0xb20] sm:$0xff]  ;;  %v537_v51 = vld [vmem:[%s10545_s28 + $0xb28] sm:$0xff]  ;;  %534 = vst [vmem:[%s10553_s29 + $0x588] sm:$0xff] %v533_v49 }
  0x6b   : > { %536 = vst [vmem:[%s10553_s29 + $0x590] sm:$0xff] %v535_v50  ;;  %538 = vst [vmem:[%s10553_s29 + $0x598] sm:$0xff] %v537_v51  ;;  %v539_v52 = vld [vmem:[%s10545_s28 + $0xb40] sm:$0xff]  ;;  %v541_v53 = vld [vmem:[%s10545_s28 + $0xb48] sm:$0xff] }
  0x6c   : > { %v543_v54 = vld [vmem:[%s10545_s28 + $0xb60] sm:$0xff]  ;;  %540 = vst [vmem:[%s10553_s29 + $0x5a0] sm:$0xff] %v539_v52  ;;  %542 = vst [vmem:[%s10553_s29 + $0x5a8] sm:$0xff] %v541_v53  ;;  %v545_v55 = vld [vmem:[%s10545_s28 + $0xb68] sm:$0xff] }
  0x6d   : > { %544 = vst [vmem:[%s10553_s29 + $0x5b0] sm:$0xff] %v543_v54  ;;  %v547_v56 = vld [vmem:[%s10545_s28 + $0xb80] sm:$0xff]  ;;  %v549_v57 = vld [vmem:[%s10545_s28 + $0xb88] sm:$0xff]  ;;  %546 = vst [vmem:[%s10553_s29 + $0x5b8] sm:$0xff] %v545_v55 }
  0x6e   : > { %548 = vst [vmem:[%s10553_s29 + $0x5c0] sm:$0xff] %v547_v56  ;;  %550 = vst [vmem:[%s10553_s29 + $0x5c8] sm:$0xff] %v549_v57  ;;  %v551_v58 = vld [vmem:[%s10545_s28 + $0xba0] sm:$0xff]  ;;  %v553_v59 = vld [vmem:[%s10545_s28 + $0xba8] sm:$0xff] }
  0x6f   : > { %v555_v60 = vld [vmem:[%s10545_s28 + $0xbc0] sm:$0xff]  ;;  %552 = vst [vmem:[%s10553_s29 + $0x5d0] sm:$0xff] %v551_v58  ;;  %554 = vst [vmem:[%s10553_s29 + $0x5d8] sm:$0xff] %v553_v59  ;;  %v557_v61 = vld [vmem:[%s10545_s28 + $0xbc8] sm:$0xff] }
  0x70   : > { %556 = vst [vmem:[%s10553_s29 + $0x5e0] sm:$0xff] %v555_v60  ;;  %v559_v62 = vld [vmem:[%s10545_s28 + $0xbe0] sm:$0xff]  ;;  %v561_v63 = vld [vmem:[%s10545_s28 + $0xbe8] sm:$0xff]  ;;  %558 = vst [vmem:[%s10553_s29 + $0x5e8] sm:$0xff] %v557_v61 }
  0x71   : > { %560 = vst [vmem:[%s10553_s29 + $0x5f0] sm:$0xff] %v559_v62  ;;  %562 = vst [vmem:[%s10553_s29 + $0x5f8] sm:$0xff] %v561_v63  ;;  %v563_v0 = vld [vmem:[%s10545_s28 + $0xc00] sm:$0xff]  ;;  %v565_v1 = vld [vmem:[%s10545_s28 + $0xc08] sm:$0xff] }
  0x72   : > { %v567_v2 = vld [vmem:[%s10545_s28 + $0xc20] sm:$0xff]  ;;  %564 = vst [vmem:[%s10553_s29 + $0x600] sm:$0xff] %v563_v0  ;;  %566 = vst [vmem:[%s10553_s29 + $0x608] sm:$0xff] %v565_v1  ;;  %v569_v3 = vld [vmem:[%s10545_s28 + $0xc28] sm:$0xff] }
  0x73   : > { %568 = vst [vmem:[%s10553_s29 + $0x610] sm:$0xff] %v567_v2  ;;  %v571_v4 = vld [vmem:[%s10545_s28 + $0xc40] sm:$0xff]  ;;  %v573_v5 = vld [vmem:[%s10545_s28 + $0xc48] sm:$0xff]  ;;  %570 = vst [vmem:[%s10553_s29 + $0x618] sm:$0xff] %v569_v3 }
  0x74   : > { %572 = vst [vmem:[%s10553_s29 + $0x620] sm:$0xff] %v571_v4  ;;  %574 = vst [vmem:[%s10553_s29 + $0x628] sm:$0xff] %v573_v5  ;;  %v575_v6 = vld [vmem:[%s10545_s28 + $0xc60] sm:$0xff]  ;;  %v577_v7 = vld [vmem:[%s10545_s28 + $0xc68] sm:$0xff] }
  0x75   : > { %v579_v8 = vld [vmem:[%s10545_s28 + $0xc80] sm:$0xff]  ;;  %576 = vst [vmem:[%s10553_s29 + $0x630] sm:$0xff] %v575_v6  ;;  %578 = vst [vmem:[%s10553_s29 + $0x638] sm:$0xff] %v577_v7  ;;  %v581_v9 = vld [vmem:[%s10545_s28 + $0xc88] sm:$0xff] }
  0x76   : > { %580 = vst [vmem:[%s10553_s29 + $0x640] sm:$0xff] %v579_v8  ;;  %v583_v10 = vld [vmem:[%s10545_s28 + $0xca0] sm:$0xff]  ;;  %v585_v11 = vld [vmem:[%s10545_s28 + $0xca8] sm:$0xff]  ;;  %582 = vst [vmem:[%s10553_s29 + $0x648] sm:$0xff] %v581_v9 }
  0x77   : > { %584 = vst [vmem:[%s10553_s29 + $0x650] sm:$0xff] %v583_v10  ;;  %586 = vst [vmem:[%s10553_s29 + $0x658] sm:$0xff] %v585_v11  ;;  %v587_v12 = vld [vmem:[%s10545_s28 + $0xcc0] sm:$0xff]  ;;  %v589_v13 = vld [vmem:[%s10545_s28 + $0xcc8] sm:$0xff] }
  0x78   : > { %v591_v14 = vld [vmem:[%s10545_s28 + $0xce0] sm:$0xff]  ;;  %588 = vst [vmem:[%s10553_s29 + $0x660] sm:$0xff] %v587_v12  ;;  %590 = vst [vmem:[%s10553_s29 + $0x668] sm:$0xff] %v589_v13  ;;  %v593_v15 = vld [vmem:[%s10545_s28 + $0xce8] sm:$0xff] }
  0x79   : > { %592 = vst [vmem:[%s10553_s29 + $0x670] sm:$0xff] %v591_v14  ;;  %v595_v16 = vld [vmem:[%s10545_s28 + $0xd00] sm:$0xff]  ;;  %v597_v17 = vld [vmem:[%s10545_s28 + $0xd08] sm:$0xff]  ;;  %594 = vst [vmem:[%s10553_s29 + $0x678] sm:$0xff] %v593_v15 }
  0x7a   : > { %596 = vst [vmem:[%s10553_s29 + $0x680] sm:$0xff] %v595_v16  ;;  %598 = vst [vmem:[%s10553_s29 + $0x688] sm:$0xff] %v597_v17  ;;  %v599_v18 = vld [vmem:[%s10545_s28 + $0xd20] sm:$0xff]  ;;  %v601_v19 = vld [vmem:[%s10545_s28 + $0xd28] sm:$0xff] }
  0x7b   : > { %v603_v20 = vld [vmem:[%s10545_s28 + $0xd40] sm:$0xff]  ;;  %600 = vst [vmem:[%s10553_s29 + $0x690] sm:$0xff] %v599_v18  ;;  %602 = vst [vmem:[%s10553_s29 + $0x698] sm:$0xff] %v601_v19  ;;  %v605_v21 = vld [vmem:[%s10545_s28 + $0xd48] sm:$0xff] }
  0x7c   : > { %604 = vst [vmem:[%s10553_s29 + $0x6a0] sm:$0xff] %v603_v20  ;;  %v607_v22 = vld [vmem:[%s10545_s28 + $0xd60] sm:$0xff]  ;;  %v609_v23 = vld [vmem:[%s10545_s28 + $0xd68] sm:$0xff]  ;;  %606 = vst [vmem:[%s10553_s29 + $0x6a8] sm:$0xff] %v605_v21 }
  0x7d   : > { %608 = vst [vmem:[%s10553_s29 + $0x6b0] sm:$0xff] %v607_v22  ;;  %610 = vst [vmem:[%s10553_s29 + $0x6b8] sm:$0xff] %v609_v23  ;;  %v611_v24 = vld [vmem:[%s10545_s28 + $0xd80] sm:$0xff]  ;;  %v613_v25 = vld [vmem:[%s10545_s28 + $0xd88] sm:$0xff] }
  0x7e   : > { %v615_v26 = vld [vmem:[%s10545_s28 + $0xda0] sm:$0xff]  ;;  %612 = vst [vmem:[%s10553_s29 + $0x6c0] sm:$0xff] %v611_v24  ;;  %614 = vst [vmem:[%s10553_s29 + $0x6c8] sm:$0xff] %v613_v25  ;;  %v617_v27 = vld [vmem:[%s10545_s28 + $0xda8] sm:$0xff] }
  0x7f   : > { %616 = vst [vmem:[%s10553_s29 + $0x6d0] sm:$0xff] %v615_v26  ;;  %v619_v28 = vld [vmem:[%s10545_s28 + $0xdc0] sm:$0xff]  ;;  %v621_v29 = vld [vmem:[%s10545_s28 + $0xdc8] sm:$0xff]  ;;  %618 = vst [vmem:[%s10553_s29 + $0x6d8] sm:$0xff] %v617_v27 }
  0x80   : > { %620 = vst [vmem:[%s10553_s29 + $0x6e0] sm:$0xff] %v619_v28  ;;  %622 = vst [vmem:[%s10553_s29 + $0x6e8] sm:$0xff] %v621_v29  ;;  %v623_v30 = vld [vmem:[%s10545_s28 + $0xde0] sm:$0xff]  ;;  %v625_v31 = vld [vmem:[%s10545_s28 + $0xde8] sm:$0xff] }
  0x81   : > { %v627_v32 = vld [vmem:[%s10545_s28 + $0xe00] sm:$0xff]  ;;  %624 = vst [vmem:[%s10553_s29 + $0x6f0] sm:$0xff] %v623_v30  ;;  %626 = vst [vmem:[%s10553_s29 + $0x6f8] sm:$0xff] %v625_v31  ;;  %v629_v33 = vld [vmem:[%s10545_s28 + $0xe08] sm:$0xff] }
  0x82   : > { %628 = vst [vmem:[%s10553_s29 + $0x700] sm:$0xff] %v627_v32  ;;  %v631_v34 = vld [vmem:[%s10545_s28 + $0xe20] sm:$0xff]  ;;  %v633_v35 = vld [vmem:[%s10545_s28 + $0xe28] sm:$0xff]  ;;  %630 = vst [vmem:[%s10553_s29 + $0x708] sm:$0xff] %v629_v33 }
  0x83   : > { %632 = vst [vmem:[%s10553_s29 + $0x710] sm:$0xff] %v631_v34  ;;  %634 = vst [vmem:[%s10553_s29 + $0x718] sm:$0xff] %v633_v35  ;;  %v635_v36 = vld [vmem:[%s10545_s28 + $0xe40] sm:$0xff]  ;;  %v637_v37 = vld [vmem:[%s10545_s28 + $0xe48] sm:$0xff] }
  0x84   : > { %v639_v38 = vld [vmem:[%s10545_s28 + $0xe60] sm:$0xff]  ;;  %636 = vst [vmem:[%s10553_s29 + $0x720] sm:$0xff] %v635_v36  ;;  %638 = vst [vmem:[%s10553_s29 + $0x728] sm:$0xff] %v637_v37  ;;  %v641_v39 = vld [vmem:[%s10545_s28 + $0xe68] sm:$0xff] }
  0x85   : > { %640 = vst [vmem:[%s10553_s29 + $0x730] sm:$0xff] %v639_v38  ;;  %v643_v40 = vld [vmem:[%s10545_s28 + $0xe80] sm:$0xff]  ;;  %v645_v41 = vld [vmem:[%s10545_s28 + $0xe88] sm:$0xff]  ;;  %642 = vst [vmem:[%s10553_s29 + $0x738] sm:$0xff] %v641_v39 }
  0x86   : > { %644 = vst [vmem:[%s10553_s29 + $0x740] sm:$0xff] %v643_v40  ;;  %646 = vst [vmem:[%s10553_s29 + $0x748] sm:$0xff] %v645_v41  ;;  %v647_v42 = vld [vmem:[%s10545_s28 + $0xea0] sm:$0xff]  ;;  %v649_v43 = vld [vmem:[%s10545_s28 + $0xea8] sm:$0xff] }
  0x87   : > { %v651_v44 = vld [vmem:[%s10545_s28 + $0xec0] sm:$0xff]  ;;  %648 = vst [vmem:[%s10553_s29 + $0x750] sm:$0xff] %v647_v42  ;;  %650 = vst [vmem:[%s10553_s29 + $0x758] sm:$0xff] %v649_v43  ;;  %v653_v45 = vld [vmem:[%s10545_s28 + $0xec8] sm:$0xff] }
  0x88   : > { %652 = vst [vmem:[%s10553_s29 + $0x760] sm:$0xff] %v651_v44  ;;  %v655_v46 = vld [vmem:[%s10545_s28 + $0xee0] sm:$0xff]  ;;  %v657_v47 = vld [vmem:[%s10545_s28 + $0xee8] sm:$0xff]  ;;  %654 = vst [vmem:[%s10553_s29 + $0x768] sm:$0xff] %v653_v45 }
  0x89   : > { %656 = vst [vmem:[%s10553_s29 + $0x770] sm:$0xff] %v655_v46  ;;  %658 = vst [vmem:[%s10553_s29 + $0x778] sm:$0xff] %v657_v47  ;;  %v659_v48 = vld [vmem:[%s10545_s28 + $0xf00] sm:$0xff]  ;;  %v661_v49 = vld [vmem:[%s10545_s28 + $0xf08] sm:$0xff] }
  0x8a   : > { %v663_v50 = vld [vmem:[%s10545_s28 + $0xf20] sm:$0xff]  ;;  %660 = vst [vmem:[%s10553_s29 + $0x780] sm:$0xff] %v659_v48  ;;  %662 = vst [vmem:[%s10553_s29 + $0x788] sm:$0xff] %v661_v49  ;;  %v665_v51 = vld [vmem:[%s10545_s28 + $0xf28] sm:$0xff] }
  0x8b   : > { %664 = vst [vmem:[%s10553_s29 + $0x790] sm:$0xff] %v663_v50  ;;  %v667_v52 = vld [vmem:[%s10545_s28 + $0xf40] sm:$0xff]  ;;  %v669_v53 = vld [vmem:[%s10545_s28 + $0xf48] sm:$0xff]  ;;  %666 = vst [vmem:[%s10553_s29 + $0x798] sm:$0xff] %v665_v51 }
  0x8c   : > { %668 = vst [vmem:[%s10553_s29 + $0x7a0] sm:$0xff] %v667_v52  ;;  %670 = vst [vmem:[%s10553_s29 + $0x7a8] sm:$0xff] %v669_v53  ;;  %v671_v54 = vld [vmem:[%s10545_s28 + $0xf60] sm:$0xff]  ;;  %v673_v55 = vld [vmem:[%s10545_s28 + $0xf68] sm:$0xff] }
  0x8d   : > { %v675_v56 = vld [vmem:[%s10545_s28 + $0xf80] sm:$0xff]  ;;  %672 = vst [vmem:[%s10553_s29 + $0x7b0] sm:$0xff] %v671_v54  ;;  %674 = vst [vmem:[%s10553_s29 + $0x7b8] sm:$0xff] %v673_v55  ;;  %v677_v57 = vld [vmem:[%s10545_s28 + $0xf88] sm:$0xff] }
  0x8e   : > { %676 = vst [vmem:[%s10553_s29 + $0x7c0] sm:$0xff] %v675_v56  ;;  %v679_v58 = vld [vmem:[%s10545_s28 + $0xfa0] sm:$0xff]  ;;  %v681_v59 = vld [vmem:[%s10545_s28 + $0xfa8] sm:$0xff]  ;;  %678 = vst [vmem:[%s10553_s29 + $0x7c8] sm:$0xff] %v677_v57 }
  0x8f   : > { %680 = vst [vmem:[%s10553_s29 + $0x7d0] sm:$0xff] %v679_v58  ;;  %682 = vst [vmem:[%s10553_s29 + $0x7d8] sm:$0xff] %v681_v59  ;;  %v683_v60 = vld [vmem:[%s10545_s28 + $0xfc0] sm:$0xff]  ;;  %v685_v61 = vld [vmem:[%s10545_s28 + $0xfc8] sm:$0xff] }
  0x90   : > { %v687_v62 = vld [vmem:[%s10545_s28 + $0xfe0] sm:$0xff]  ;;  %684 = vst [vmem:[%s10553_s29 + $0x7e0] sm:$0xff] %v683_v60  ;;  %686 = vst [vmem:[%s10553_s29 + $0x7e8] sm:$0xff] %v685_v61  ;;  %v689_v63 = vld [vmem:[%s10545_s28 + $0xfe8] sm:$0xff] }
  0x91   : > { %688 = vst [vmem:[%s10553_s29 + $0x7f0] sm:$0xff] %v687_v62  ;;  %v691_v0 = vld [vmem:[%s10545_s28 + $0x1000] sm:$0xff]  ;;  %v693_v1 = vld [vmem:[%s10545_s28 + $0x1008] sm:$0xff]  ;;  %690 = vst [vmem:[%s10553_s29 + $0x7f8] sm:$0xff] %v689_v63 }
  0x92   : > { %692 = vst [vmem:[%s10553_s29 + $0x800] sm:$0xff] %v691_v0  ;;  %694 = vst [vmem:[%s10553_s29 + $0x808] sm:$0xff] %v693_v1  ;;  %v695_v2 = vld [vmem:[%s10545_s28 + $0x1020] sm:$0xff]  ;;  %v697_v3 = vld [vmem:[%s10545_s28 + $0x1028] sm:$0xff] }
  0x93   : > { %v699_v4 = vld [vmem:[%s10545_s28 + $0x1040] sm:$0xff]  ;;  %696 = vst [vmem:[%s10553_s29 + $0x810] sm:$0xff] %v695_v2  ;;  %698 = vst [vmem:[%s10553_s29 + $0x818] sm:$0xff] %v697_v3  ;;  %v701_v5 = vld [vmem:[%s10545_s28 + $0x1048] sm:$0xff] }
  0x94   : > { %700 = vst [vmem:[%s10553_s29 + $0x820] sm:$0xff] %v699_v4  ;;  %v703_v6 = vld [vmem:[%s10545_s28 + $0x1060] sm:$0xff]  ;;  %v705_v7 = vld [vmem:[%s10545_s28 + $0x1068] sm:$0xff]  ;;  %702 = vst [vmem:[%s10553_s29 + $0x828] sm:$0xff] %v701_v5 }
  0x95   : > { %704 = vst [vmem:[%s10553_s29 + $0x830] sm:$0xff] %v703_v6  ;;  %706 = vst [vmem:[%s10553_s29 + $0x838] sm:$0xff] %v705_v7  ;;  %v707_v8 = vld [vmem:[%s10545_s28 + $0x1080] sm:$0xff]  ;;  %v709_v9 = vld [vmem:[%s10545_s28 + $0x1088] sm:$0xff] }
  0x96   : > { %v711_v10 = vld [vmem:[%s10545_s28 + $0x10a0] sm:$0xff]  ;;  %708 = vst [vmem:[%s10553_s29 + $0x840] sm:$0xff] %v707_v8  ;;  %710 = vst [vmem:[%s10553_s29 + $0x848] sm:$0xff] %v709_v9  ;;  %v713_v11 = vld [vmem:[%s10545_s28 + $0x10a8] sm:$0xff] }
  0x97   : > { %712 = vst [vmem:[%s10553_s29 + $0x850] sm:$0xff] %v711_v10  ;;  %v715_v12 = vld [vmem:[%s10545_s28 + $0x10c0] sm:$0xff]  ;;  %v717_v13 = vld [vmem:[%s10545_s28 + $0x10c8] sm:$0xff]  ;;  %714 = vst [vmem:[%s10553_s29 + $0x858] sm:$0xff] %v713_v11 }
  0x98   : > { %716 = vst [vmem:[%s10553_s29 + $0x860] sm:$0xff] %v715_v12  ;;  %718 = vst [vmem:[%s10553_s29 + $0x868] sm:$0xff] %v717_v13  ;;  %v719_v14 = vld [vmem:[%s10545_s28 + $0x10e0] sm:$0xff]  ;;  %v721_v15 = vld [vmem:[%s10545_s28 + $0x10e8] sm:$0xff] }
  0x99   : > { %v723_v16 = vld [vmem:[%s10545_s28 + $0x1100] sm:$0xff]  ;;  %720 = vst [vmem:[%s10553_s29 + $0x870] sm:$0xff] %v719_v14  ;;  %722 = vst [vmem:[%s10553_s29 + $0x878] sm:$0xff] %v721_v15  ;;  %v725_v17 = vld [vmem:[%s10545_s28 + $0x1108] sm:$0xff] }
  0x9a   : > { %724 = vst [vmem:[%s10553_s29 + $0x880] sm:$0xff] %v723_v16  ;;  %v727_v18 = vld [vmem:[%s10545_s28 + $0x1120] sm:$0xff]  ;;  %v729_v19 = vld [vmem:[%s10545_s28 + $0x1128] sm:$0xff]  ;;  %726 = vst [vmem:[%s10553_s29 + $0x888] sm:$0xff] %v725_v17 }
  0x9b   : > { %728 = vst [vmem:[%s10553_s29 + $0x890] sm:$0xff] %v727_v18  ;;  %730 = vst [vmem:[%s10553_s29 + $0x898] sm:$0xff] %v729_v19  ;;  %v731_v20 = vld [vmem:[%s10545_s28 + $0x1140] sm:$0xff]  ;;  %v733_v21 = vld [vmem:[%s10545_s28 + $0x1148] sm:$0xff] }
  0x9c   : > { %v735_v22 = vld [vmem:[%s10545_s28 + $0x1160] sm:$0xff]  ;;  %732 = vst [vmem:[%s10553_s29 + $0x8a0] sm:$0xff] %v731_v20  ;;  %734 = vst [vmem:[%s10553_s29 + $0x8a8] sm:$0xff] %v733_v21  ;;  %v737_v23 = vld [vmem:[%s10545_s28 + $0x1168] sm:$0xff] }
  0x9d   : > { %736 = vst [vmem:[%s10553_s29 + $0x8b0] sm:$0xff] %v735_v22  ;;  %v739_v24 = vld [vmem:[%s10545_s28 + $0x1180] sm:$0xff]  ;;  %v741_v25 = vld [vmem:[%s10545_s28 + $0x1188] sm:$0xff]  ;;  %738 = vst [vmem:[%s10553_s29 + $0x8b8] sm:$0xff] %v737_v23 }
  0x9e   : > { %740 = vst [vmem:[%s10553_s29 + $0x8c0] sm:$0xff] %v739_v24  ;;  %742 = vst [vmem:[%s10553_s29 + $0x8c8] sm:$0xff] %v741_v25  ;;  %v743_v26 = vld [vmem:[%s10545_s28 + $0x11a0] sm:$0xff]  ;;  %v745_v27 = vld [vmem:[%s10545_s28 + $0x11a8] sm:$0xff] }
  0x9f   : > { %v747_v28 = vld [vmem:[%s10545_s28 + $0x11c0] sm:$0xff]  ;;  %744 = vst [vmem:[%s10553_s29 + $0x8d0] sm:$0xff] %v743_v26  ;;  %746 = vst [vmem:[%s10553_s29 + $0x8d8] sm:$0xff] %v745_v27  ;;  %v749_v29 = vld [vmem:[%s10545_s28 + $0x11c8] sm:$0xff] }
  0xa0   : > { %748 = vst [vmem:[%s10553_s29 + $0x8e0] sm:$0xff] %v747_v28  ;;  %v751_v30 = vld [vmem:[%s10545_s28 + $0x11e0] sm:$0xff]  ;;  %v753_v31 = vld [vmem:[%s10545_s28 + $0x11e8] sm:$0xff]  ;;  %750 = vst [vmem:[%s10553_s29 + $0x8e8] sm:$0xff] %v749_v29 }
  0xa1   : > { %752 = vst [vmem:[%s10553_s29 + $0x8f0] sm:$0xff] %v751_v30  ;;  %754 = vst [vmem:[%s10553_s29 + $0x8f8] sm:$0xff] %v753_v31  ;;  %v755_v32 = vld [vmem:[%s10545_s28 + $0x1200] sm:$0xff]  ;;  %v757_v33 = vld [vmem:[%s10545_s28 + $0x1208] sm:$0xff] }
  0xa2   : > { %v759_v34 = vld [vmem:[%s10545_s28 + $0x1220] sm:$0xff]  ;;  %756 = vst [vmem:[%s10553_s29 + $0x900] sm:$0xff] %v755_v32  ;;  %758 = vst [vmem:[%s10553_s29 + $0x908] sm:$0xff] %v757_v33  ;;  %v761_v35 = vld [vmem:[%s10545_s28 + $0x1228] sm:$0xff] }
  0xa3   : > { %760 = vst [vmem:[%s10553_s29 + $0x910] sm:$0xff] %v759_v34  ;;  %v763_v36 = vld [vmem:[%s10545_s28 + $0x1240] sm:$0xff]  ;;  %v765_v37 = vld [vmem:[%s10545_s28 + $0x1248] sm:$0xff]  ;;  %762 = vst [vmem:[%s10553_s29 + $0x918] sm:$0xff] %v761_v35 }
  0xa4   : > { %764 = vst [vmem:[%s10553_s29 + $0x920] sm:$0xff] %v763_v36  ;;  %766 = vst [vmem:[%s10553_s29 + $0x928] sm:$0xff] %v765_v37  ;;  %v767_v38 = vld [vmem:[%s10545_s28 + $0x1260] sm:$0xff]  ;;  %v769_v39 = vld [vmem:[%s10545_s28 + $0x1268] sm:$0xff] }
  0xa5   : > { %v771_v40 = vld [vmem:[%s10545_s28 + $0x1280] sm:$0xff]  ;;  %768 = vst [vmem:[%s10553_s29 + $0x930] sm:$0xff] %v767_v38  ;;  %770 = vst [vmem:[%s10553_s29 + $0x938] sm:$0xff] %v769_v39  ;;  %v773_v41 = vld [vmem:[%s10545_s28 + $0x1288] sm:$0xff] }
  0xa6   : > { %772 = vst [vmem:[%s10553_s29 + $0x940] sm:$0xff] %v771_v40  ;;  %v775_v42 = vld [vmem:[%s10545_s28 + $0x12a0] sm:$0xff]  ;;  %v777_v43 = vld [vmem:[%s10545_s28 + $0x12a8] sm:$0xff]  ;;  %774 = vst [vmem:[%s10553_s29 + $0x948] sm:$0xff] %v773_v41 }
  0xa7   : > { %776 = vst [vmem:[%s10553_s29 + $0x950] sm:$0xff] %v775_v42  ;;  %778 = vst [vmem:[%s10553_s29 + $0x958] sm:$0xff] %v777_v43  ;;  %v779_v44 = vld [vmem:[%s10545_s28 + $0x12c0] sm:$0xff]  ;;  %v781_v45 = vld [vmem:[%s10545_s28 + $0x12c8] sm:$0xff] }
  0xa8   : > { %v783_v46 = vld [vmem:[%s10545_s28 + $0x12e0] sm:$0xff]  ;;  %780 = vst [vmem:[%s10553_s29 + $0x960] sm:$0xff] %v779_v44  ;;  %782 = vst [vmem:[%s10553_s29 + $0x968] sm:$0xff] %v781_v45  ;;  %v785_v47 = vld [vmem:[%s10545_s28 + $0x12e8] sm:$0xff] }
  0xa9   : > { %784 = vst [vmem:[%s10553_s29 + $0x970] sm:$0xff] %v783_v46  ;;  %v787_v48 = vld [vmem:[%s10545_s28 + $0x1300] sm:$0xff]  ;;  %v789_v49 = vld [vmem:[%s10545_s28 + $0x1308] sm:$0xff]  ;;  %786 = vst [vmem:[%s10553_s29 + $0x978] sm:$0xff] %v785_v47 }
  0xaa   : > { %788 = vst [vmem:[%s10553_s29 + $0x980] sm:$0xff] %v787_v48  ;;  %790 = vst [vmem:[%s10553_s29 + $0x988] sm:$0xff] %v789_v49  ;;  %v791_v50 = vld [vmem:[%s10545_s28 + $0x1320] sm:$0xff]  ;;  %v793_v51 = vld [vmem:[%s10545_s28 + $0x1328] sm:$0xff] }
  0xab   : > { %v795_v52 = vld [vmem:[%s10545_s28 + $0x1340] sm:$0xff]  ;;  %792 = vst [vmem:[%s10553_s29 + $0x990] sm:$0xff] %v791_v50  ;;  %794 = vst [vmem:[%s10553_s29 + $0x998] sm:$0xff] %v793_v51  ;;  %v797_v53 = vld [vmem:[%s10545_s28 + $0x1348] sm:$0xff] }
  0xac   : > { %796 = vst [vmem:[%s10553_s29 + $0x9a0] sm:$0xff] %v795_v52  ;;  %v799_v54 = vld [vmem:[%s10545_s28 + $0x1360] sm:$0xff]  ;;  %v801_v55 = vld [vmem:[%s10545_s28 + $0x1368] sm:$0xff]  ;;  %798 = vst [vmem:[%s10553_s29 + $0x9a8] sm:$0xff] %v797_v53 }
  0xad   : > { %800 = vst [vmem:[%s10553_s29 + $0x9b0] sm:$0xff] %v799_v54  ;;  %802 = vst [vmem:[%s10553_s29 + $0x9b8] sm:$0xff] %v801_v55  ;;  %v803_v56 = vld [vmem:[%s10545_s28 + $0x1380] sm:$0xff]  ;;  %v805_v57 = vld [vmem:[%s10545_s28 + $0x1388] sm:$0xff] }
  0xae   : > { %v807_v58 = vld [vmem:[%s10545_s28 + $0x13a0] sm:$0xff]  ;;  %804 = vst [vmem:[%s10553_s29 + $0x9c0] sm:$0xff] %v803_v56  ;;  %806 = vst [vmem:[%s10553_s29 + $0x9c8] sm:$0xff] %v805_v57  ;;  %v809_v59 = vld [vmem:[%s10545_s28 + $0x13a8] sm:$0xff] }
  0xaf   : > { %808 = vst [vmem:[%s10553_s29 + $0x9d0] sm:$0xff] %v807_v58  ;;  %v811_v60 = vld [vmem:[%s10545_s28 + $0x13c0] sm:$0xff]  ;;  %v813_v61 = vld [vmem:[%s10545_s28 + $0x13c8] sm:$0xff]  ;;  %810 = vst [vmem:[%s10553_s29 + $0x9d8] sm:$0xff] %v809_v59 }
  0xb0   : > { %812 = vst [vmem:[%s10553_s29 + $0x9e0] sm:$0xff] %v811_v60  ;;  %814 = vst [vmem:[%s10553_s29 + $0x9e8] sm:$0xff] %v813_v61  ;;  %v815_v62 = vld [vmem:[%s10545_s28 + $0x13e0] sm:$0xff]  ;;  %v817_v63 = vld [vmem:[%s10545_s28 + $0x13e8] sm:$0xff] }
  0xb1   : > { %v819_v0 = vld [vmem:[%s10545_s28 + $0x1400] sm:$0xff]  ;;  %816 = vst [vmem:[%s10553_s29 + $0x9f0] sm:$0xff] %v815_v62  ;;  %818 = vst [vmem:[%s10553_s29 + $0x9f8] sm:$0xff] %v817_v63  ;;  %v821_v1 = vld [vmem:[%s10545_s28 + $0x1408] sm:$0xff] }
  0xb2   : > { %820 = vst [vmem:[%s10553_s29 + $0xa00] sm:$0xff] %v819_v0  ;;  %v823_v2 = vld [vmem:[%s10545_s28 + $0x1420] sm:$0xff]  ;;  %v825_v3 = vld [vmem:[%s10545_s28 + $0x1428] sm:$0xff]  ;;  %822 = vst [vmem:[%s10553_s29 + $0xa08] sm:$0xff] %v821_v1 }
  0xb3   : > { %824 = vst [vmem:[%s10553_s29 + $0xa10] sm:$0xff] %v823_v2  ;;  %826 = vst [vmem:[%s10553_s29 + $0xa18] sm:$0xff] %v825_v3  ;;  %v827_v4 = vld [vmem:[%s10545_s28 + $0x1440] sm:$0xff]  ;;  %v829_v5 = vld [vmem:[%s10545_s28 + $0x1448] sm:$0xff] }
  0xb4   : > { %v831_v6 = vld [vmem:[%s10545_s28 + $0x1460] sm:$0xff]  ;;  %828 = vst [vmem:[%s10553_s29 + $0xa20] sm:$0xff] %v827_v4  ;;  %830 = vst [vmem:[%s10553_s29 + $0xa28] sm:$0xff] %v829_v5  ;;  %v833_v7 = vld [vmem:[%s10545_s28 + $0x1468] sm:$0xff] }
  0xb5   : > { %832 = vst [vmem:[%s10553_s29 + $0xa30] sm:$0xff] %v831_v6  ;;  %v835_v8 = vld [vmem:[%s10545_s28 + $0x1480] sm:$0xff]  ;;  %v837_v9 = vld [vmem:[%s10545_s28 + $0x1488] sm:$0xff]  ;;  %834 = vst [vmem:[%s10553_s29 + $0xa38] sm:$0xff] %v833_v7 }
  0xb6   : > { %836 = vst [vmem:[%s10553_s29 + $0xa40] sm:$0xff] %v835_v8  ;;  %838 = vst [vmem:[%s10553_s29 + $0xa48] sm:$0xff] %v837_v9  ;;  %v839_v10 = vld [vmem:[%s10545_s28 + $0x14a0] sm:$0xff]  ;;  %v841_v11 = vld [vmem:[%s10545_s28 + $0x14a8] sm:$0xff] }
  0xb7   : > { %v843_v12 = vld [vmem:[%s10545_s28 + $0x14c0] sm:$0xff]  ;;  %840 = vst [vmem:[%s10553_s29 + $0xa50] sm:$0xff] %v839_v10  ;;  %842 = vst [vmem:[%s10553_s29 + $0xa58] sm:$0xff] %v841_v11  ;;  %v845_v13 = vld [vmem:[%s10545_s28 + $0x14c8] sm:$0xff] }
  0xb8   : > { %844 = vst [vmem:[%s10553_s29 + $0xa60] sm:$0xff] %v843_v12  ;;  %v847_v14 = vld [vmem:[%s10545_s28 + $0x14e0] sm:$0xff]  ;;  %v849_v15 = vld [vmem:[%s10545_s28 + $0x14e8] sm:$0xff]  ;;  %846 = vst [vmem:[%s10553_s29 + $0xa68] sm:$0xff] %v845_v13 }
  0xb9   : > { %848 = vst [vmem:[%s10553_s29 + $0xa70] sm:$0xff] %v847_v14  ;;  %850 = vst [vmem:[%s10553_s29 + $0xa78] sm:$0xff] %v849_v15  ;;  %v851_v16 = vld [vmem:[%s10545_s28 + $0x1500] sm:$0xff]  ;;  %v853_v17 = vld [vmem:[%s10545_s28 + $0x1508] sm:$0xff] }
  0xba   : > { %v855_v18 = vld [vmem:[%s10545_s28 + $0x1520] sm:$0xff]  ;;  %852 = vst [vmem:[%s10553_s29 + $0xa80] sm:$0xff] %v851_v16  ;;  %854 = vst [vmem:[%s10553_s29 + $0xa88] sm:$0xff] %v853_v17  ;;  %v857_v19 = vld [vmem:[%s10545_s28 + $0x1528] sm:$0xff] }
  0xbb   : > { %856 = vst [vmem:[%s10553_s29 + $0xa90] sm:$0xff] %v855_v18  ;;  %v859_v20 = vld [vmem:[%s10545_s28 + $0x1540] sm:$0xff]  ;;  %v861_v21 = vld [vmem:[%s10545_s28 + $0x1548] sm:$0xff]  ;;  %858 = vst [vmem:[%s10553_s29 + $0xa98] sm:$0xff] %v857_v19 }
  0xbc   : > { %860 = vst [vmem:[%s10553_s29 + $0xaa0] sm:$0xff] %v859_v20  ;;  %862 = vst [vmem:[%s10553_s29 + $0xaa8] sm:$0xff] %v861_v21  ;;  %v863_v22 = vld [vmem:[%s10545_s28 + $0x1560] sm:$0xff]  ;;  %v865_v23 = vld [vmem:[%s10545_s28 + $0x1568] sm:$0xff] }
  0xbd   : > { %v867_v24 = vld [vmem:[%s10545_s28 + $0x1580] sm:$0xff]  ;;  %864 = vst [vmem:[%s10553_s29 + $0xab0] sm:$0xff] %v863_v22  ;;  %866 = vst [vmem:[%s10553_s29 + $0xab8] sm:$0xff] %v865_v23  ;;  %v869_v25 = vld [vmem:[%s10545_s28 + $0x1588] sm:$0xff] }
  0xbe   : > { %868 = vst [vmem:[%s10553_s29 + $0xac0] sm:$0xff] %v867_v24  ;;  %v871_v26 = vld [vmem:[%s10545_s28 + $0x15a0] sm:$0xff]  ;;  %v873_v27 = vld [vmem:[%s10545_s28 + $0x15a8] sm:$0xff]  ;;  %870 = vst [vmem:[%s10553_s29 + $0xac8] sm:$0xff] %v869_v25 }
  0xbf   : > { %872 = vst [vmem:[%s10553_s29 + $0xad0] sm:$0xff] %v871_v26  ;;  %874 = vst [vmem:[%s10553_s29 + $0xad8] sm:$0xff] %v873_v27  ;;  %v875_v28 = vld [vmem:[%s10545_s28 + $0x15c0] sm:$0xff]  ;;  %v877_v29 = vld [vmem:[%s10545_s28 + $0x15c8] sm:$0xff] }
  0xc0   : > { %v879_v30 = vld [vmem:[%s10545_s28 + $0x15e0] sm:$0xff]  ;;  %876 = vst [vmem:[%s10553_s29 + $0xae0] sm:$0xff] %v875_v28  ;;  %878 = vst [vmem:[%s10553_s29 + $0xae8] sm:$0xff] %v877_v29  ;;  %v881_v31 = vld [vmem:[%s10545_s28 + $0x15e8] sm:$0xff] }
  0xc1   : > { %880 = vst [vmem:[%s10553_s29 + $0xaf0] sm:$0xff] %v879_v30  ;;  %v883_v32 = vld [vmem:[%s10545_s28 + $0x1600] sm:$0xff]  ;;  %v885_v33 = vld [vmem:[%s10545_s28 + $0x1608] sm:$0xff]  ;;  %882 = vst [vmem:[%s10553_s29 + $0xaf8] sm:$0xff] %v881_v31 }
  0xc2   : > { %884 = vst [vmem:[%s10553_s29 + $0xb00] sm:$0xff] %v883_v32  ;;  %886 = vst [vmem:[%s10553_s29 + $0xb08] sm:$0xff] %v885_v33  ;;  %v887_v34 = vld [vmem:[%s10545_s28 + $0x1620] sm:$0xff]  ;;  %v889_v35 = vld [vmem:[%s10545_s28 + $0x1628] sm:$0xff] }
  0xc3   : > { %v891_v36 = vld [vmem:[%s10545_s28 + $0x1640] sm:$0xff]  ;;  %888 = vst [vmem:[%s10553_s29 + $0xb10] sm:$0xff] %v887_v34  ;;  %890 = vst [vmem:[%s10553_s29 + $0xb18] sm:$0xff] %v889_v35  ;;  %v893_v37 = vld [vmem:[%s10545_s28 + $0x1648] sm:$0xff] }
  0xc4   : > { %892 = vst [vmem:[%s10553_s29 + $0xb20] sm:$0xff] %v891_v36  ;;  %v895_v38 = vld [vmem:[%s10545_s28 + $0x1660] sm:$0xff]  ;;  %v897_v39 = vld [vmem:[%s10545_s28 + $0x1668] sm:$0xff]  ;;  %894 = vst [vmem:[%s10553_s29 + $0xb28] sm:$0xff] %v893_v37 }
  0xc5   : > { %896 = vst [vmem:[%s10553_s29 + $0xb30] sm:$0xff] %v895_v38  ;;  %898 = vst [vmem:[%s10553_s29 + $0xb38] sm:$0xff] %v897_v39  ;;  %v899_v40 = vld [vmem:[%s10545_s28 + $0x1680] sm:$0xff]  ;;  %v901_v41 = vld [vmem:[%s10545_s28 + $0x1688] sm:$0xff] }
  0xc6   : > { %v903_v42 = vld [vmem:[%s10545_s28 + $0x16a0] sm:$0xff]  ;;  %900 = vst [vmem:[%s10553_s29 + $0xb40] sm:$0xff] %v899_v40  ;;  %902 = vst [vmem:[%s10553_s29 + $0xb48] sm:$0xff] %v901_v41  ;;  %v905_v43 = vld [vmem:[%s10545_s28 + $0x16a8] sm:$0xff] }
  0xc7   : > { %904 = vst [vmem:[%s10553_s29 + $0xb50] sm:$0xff] %v903_v42  ;;  %v907_v44 = vld [vmem:[%s10545_s28 + $0x16c0] sm:$0xff]  ;;  %v909_v45 = vld [vmem:[%s10545_s28 + $0x16c8] sm:$0xff]  ;;  %906 = vst [vmem:[%s10553_s29 + $0xb58] sm:$0xff] %v905_v43 }
  0xc8   : > { %908 = vst [vmem:[%s10553_s29 + $0xb60] sm:$0xff] %v907_v44  ;;  %910 = vst [vmem:[%s10553_s29 + $0xb68] sm:$0xff] %v909_v45  ;;  %v911_v46 = vld [vmem:[%s10545_s28 + $0x16e0] sm:$0xff]  ;;  %v913_v47 = vld [vmem:[%s10545_s28 + $0x16e8] sm:$0xff] }
  0xc9   : > { %v915_v48 = vld [vmem:[%s10545_s28 + $0x1700] sm:$0xff]  ;;  %912 = vst [vmem:[%s10553_s29 + $0xb70] sm:$0xff] %v911_v46  ;;  %914 = vst [vmem:[%s10553_s29 + $0xb78] sm:$0xff] %v913_v47  ;;  %v917_v49 = vld [vmem:[%s10545_s28 + $0x1708] sm:$0xff] }
  0xca   : > { %916 = vst [vmem:[%s10553_s29 + $0xb80] sm:$0xff] %v915_v48  ;;  %v919_v50 = vld [vmem:[%s10545_s28 + $0x1720] sm:$0xff]  ;;  %v921_v51 = vld [vmem:[%s10545_s28 + $0x1728] sm:$0xff]  ;;  %918 = vst [vmem:[%s10553_s29 + $0xb88] sm:$0xff] %v917_v49 }
  0xcb   : > { %920 = vst [vmem:[%s10553_s29 + $0xb90] sm:$0xff] %v919_v50  ;;  %922 = vst [vmem:[%s10553_s29 + $0xb98] sm:$0xff] %v921_v51  ;;  %v923_v52 = vld [vmem:[%s10545_s28 + $0x1740] sm:$0xff]  ;;  %v925_v53 = vld [vmem:[%s10545_s28 + $0x1748] sm:$0xff] }
  0xcc   : > { %v927_v54 = vld [vmem:[%s10545_s28 + $0x1760] sm:$0xff]  ;;  %924 = vst [vmem:[%s10553_s29 + $0xba0] sm:$0xff] %v923_v52  ;;  %926 = vst [vmem:[%s10553_s29 + $0xba8] sm:$0xff] %v925_v53  ;;  %v929_v55 = vld [vmem:[%s10545_s28 + $0x1768] sm:$0xff] }
  0xcd   : > { %928 = vst [vmem:[%s10553_s29 + $0xbb0] sm:$0xff] %v927_v54  ;;  %v931_v56 = vld [vmem:[%s10545_s28 + $0x1780] sm:$0xff]  ;;  %v933_v57 = vld [vmem:[%s10545_s28 + $0x1788] sm:$0xff]  ;;  %930 = vst [vmem:[%s10553_s29 + $0xbb8] sm:$0xff] %v929_v55 }
  0xce   : > { %932 = vst [vmem:[%s10553_s29 + $0xbc0] sm:$0xff] %v931_v56  ;;  %934 = vst [vmem:[%s10553_s29 + $0xbc8] sm:$0xff] %v933_v57  ;;  %v935_v58 = vld [vmem:[%s10545_s28 + $0x17a0] sm:$0xff]  ;;  %v937_v59 = vld [vmem:[%s10545_s28 + $0x17a8] sm:$0xff] }
  0xcf   : > { %v939_v60 = vld [vmem:[%s10545_s28 + $0x17c0] sm:$0xff]  ;;  %936 = vst [vmem:[%s10553_s29 + $0xbd0] sm:$0xff] %v935_v58  ;;  %938 = vst [vmem:[%s10553_s29 + $0xbd8] sm:$0xff] %v937_v59  ;;  %v941_v61 = vld [vmem:[%s10545_s28 + $0x17c8] sm:$0xff] }
  0xd0   : > { %940 = vst [vmem:[%s10553_s29 + $0xbe0] sm:$0xff] %v939_v60  ;;  %v943_v62 = vld [vmem:[%s10545_s28 + $0x17e0] sm:$0xff]  ;;  %v945_v63 = vld [vmem:[%s10545_s28 + $0x17e8] sm:$0xff]  ;;  %942 = vst [vmem:[%s10553_s29 + $0xbe8] sm:$0xff] %v941_v61 }
  0xd1   : > { %944 = vst [vmem:[%s10553_s29 + $0xbf0] sm:$0xff] %v943_v62  ;;  %946 = vst [vmem:[%s10553_s29 + $0xbf8] sm:$0xff] %v945_v63  ;;  %v947_v0 = vld [vmem:[%s10545_s28 + $0x1800] sm:$0xff]  ;;  %v949_v1 = vld [vmem:[%s10545_s28 + $0x1808] sm:$0xff] }
  0xd2   : > { %v951_v2 = vld [vmem:[%s10545_s28 + $0x1820] sm:$0xff]  ;;  %948 = vst [vmem:[%s10553_s29 + $0xc00] sm:$0xff] %v947_v0  ;;  %950 = vst [vmem:[%s10553_s29 + $0xc08] sm:$0xff] %v949_v1  ;;  %v953_v3 = vld [vmem:[%s10545_s28 + $0x1828] sm:$0xff] }
  0xd3   : > { %952 = vst [vmem:[%s10553_s29 + $0xc10] sm:$0xff] %v951_v2  ;;  %v955_v4 = vld [vmem:[%s10545_s28 + $0x1840] sm:$0xff]  ;;  %v957_v5 = vld [vmem:[%s10545_s28 + $0x1848] sm:$0xff]  ;;  %954 = vst [vmem:[%s10553_s29 + $0xc18] sm:$0xff] %v953_v3 }
  0xd4   : > { %956 = vst [vmem:[%s10553_s29 + $0xc20] sm:$0xff] %v955_v4  ;;  %958 = vst [vmem:[%s10553_s29 + $0xc28] sm:$0xff] %v957_v5  ;;  %v959_v6 = vld [vmem:[%s10545_s28 + $0x1860] sm:$0xff]  ;;  %v961_v7 = vld [vmem:[%s10545_s28 + $0x1868] sm:$0xff] }
  0xd5   : > { %v963_v8 = vld [vmem:[%s10545_s28 + $0x1880] sm:$0xff]  ;;  %960 = vst [vmem:[%s10553_s29 + $0xc30] sm:$0xff] %v959_v6  ;;  %962 = vst [vmem:[%s10553_s29 + $0xc38] sm:$0xff] %v961_v7  ;;  %v965_v9 = vld [vmem:[%s10545_s28 + $0x1888] sm:$0xff] }
  0xd6   : > { %964 = vst [vmem:[%s10553_s29 + $0xc40] sm:$0xff] %v963_v8  ;;  %v967_v10 = vld [vmem:[%s10545_s28 + $0x18a0] sm:$0xff]  ;;  %v969_v11 = vld [vmem:[%s10545_s28 + $0x18a8] sm:$0xff]  ;;  %966 = vst [vmem:[%s10553_s29 + $0xc48] sm:$0xff] %v965_v9 }
  0xd7   : > { %968 = vst [vmem:[%s10553_s29 + $0xc50] sm:$0xff] %v967_v10  ;;  %970 = vst [vmem:[%s10553_s29 + $0xc58] sm:$0xff] %v969_v11  ;;  %v971_v12 = vld [vmem:[%s10545_s28 + $0x18c0] sm:$0xff]  ;;  %v973_v13 = vld [vmem:[%s10545_s28 + $0x18c8] sm:$0xff] }
  0xd8   : > { %v975_v14 = vld [vmem:[%s10545_s28 + $0x18e0] sm:$0xff]  ;;  %972 = vst [vmem:[%s10553_s29 + $0xc60] sm:$0xff] %v971_v12  ;;  %974 = vst [vmem:[%s10553_s29 + $0xc68] sm:$0xff] %v973_v13  ;;  %v977_v15 = vld [vmem:[%s10545_s28 + $0x18e8] sm:$0xff] }
  0xd9   : > { %976 = vst [vmem:[%s10553_s29 + $0xc70] sm:$0xff] %v975_v14  ;;  %v979_v16 = vld [vmem:[%s10545_s28 + $0x1900] sm:$0xff]  ;;  %v981_v17 = vld [vmem:[%s10545_s28 + $0x1908] sm:$0xff]  ;;  %978 = vst [vmem:[%s10553_s29 + $0xc78] sm:$0xff] %v977_v15 }
  0xda   : > { %980 = vst [vmem:[%s10553_s29 + $0xc80] sm:$0xff] %v979_v16  ;;  %982 = vst [vmem:[%s10553_s29 + $0xc88] sm:$0xff] %v981_v17  ;;  %v983_v18 = vld [vmem:[%s10545_s28 + $0x1920] sm:$0xff]  ;;  %v985_v19 = vld [vmem:[%s10545_s28 + $0x1928] sm:$0xff] }
  0xdb   : > { %v987_v20 = vld [vmem:[%s10545_s28 + $0x1940] sm:$0xff]  ;;  %984 = vst [vmem:[%s10553_s29 + $0xc90] sm:$0xff] %v983_v18  ;;  %986 = vst [vmem:[%s10553_s29 + $0xc98] sm:$0xff] %v985_v19  ;;  %v989_v21 = vld [vmem:[%s10545_s28 + $0x1948] sm:$0xff] }
  0xdc   : > { %988 = vst [vmem:[%s10553_s29 + $0xca0] sm:$0xff] %v987_v20  ;;  %v991_v22 = vld [vmem:[%s10545_s28 + $0x1960] sm:$0xff]  ;;  %v993_v23 = vld [vmem:[%s10545_s28 + $0x1968] sm:$0xff]  ;;  %990 = vst [vmem:[%s10553_s29 + $0xca8] sm:$0xff] %v989_v21 }
  0xdd   : > { %992 = vst [vmem:[%s10553_s29 + $0xcb0] sm:$0xff] %v991_v22  ;;  %994 = vst [vmem:[%s10553_s29 + $0xcb8] sm:$0xff] %v993_v23  ;;  %v995_v24 = vld [vmem:[%s10545_s28 + $0x1980] sm:$0xff]  ;;  %v997_v25 = vld [vmem:[%s10545_s28 + $0x1988] sm:$0xff] }
  0xde   : > { %v999_v26 = vld [vmem:[%s10545_s28 + $0x19a0] sm:$0xff]  ;;  %996 = vst [vmem:[%s10553_s29 + $0xcc0] sm:$0xff] %v995_v24  ;;  %998 = vst [vmem:[%s10553_s29 + $0xcc8] sm:$0xff] %v997_v25  ;;  %v1001_v27 = vld [vmem:[%s10545_s28 + $0x19a8] sm:$0xff] }
  0xdf   : > { %1000 = vst [vmem:[%s10553_s29 + $0xcd0] sm:$0xff] %v999_v26  ;;  %v1003_v28 = vld [vmem:[%s10545_s28 + $0x19c0] sm:$0xff]  ;;  %v1005_v29 = vld [vmem:[%s10545_s28 + $0x19c8] sm:$0xff]  ;;  %1002 = vst [vmem:[%s10553_s29 + $0xcd8] sm:$0xff] %v1001_v27 }
  0xe0   : > { %1004 = vst [vmem:[%s10553_s29 + $0xce0] sm:$0xff] %v1003_v28  ;;  %1006 = vst [vmem:[%s10553_s29 + $0xce8] sm:$0xff] %v1005_v29  ;;  %v1007_v30 = vld [vmem:[%s10545_s28 + $0x19e0] sm:$0xff]  ;;  %v1009_v31 = vld [vmem:[%s10545_s28 + $0x19e8] sm:$0xff] }
  0xe1   : > { %v1011_v32 = vld [vmem:[%s10545_s28 + $0x1a00] sm:$0xff]  ;;  %1008 = vst [vmem:[%s10553_s29 + $0xcf0] sm:$0xff] %v1007_v30  ;;  %1010 = vst [vmem:[%s10553_s29 + $0xcf8] sm:$0xff] %v1009_v31  ;;  %v1013_v33 = vld [vmem:[%s10545_s28 + $0x1a08] sm:$0xff] }
  0xe2   : > { %1012 = vst [vmem:[%s10553_s29 + $0xd00] sm:$0xff] %v1011_v32  ;;  %v1015_v34 = vld [vmem:[%s10545_s28 + $0x1a20] sm:$0xff]  ;;  %v1017_v35 = vld [vmem:[%s10545_s28 + $0x1a28] sm:$0xff]  ;;  %1014 = vst [vmem:[%s10553_s29 + $0xd08] sm:$0xff] %v1013_v33 }
  0xe3   : > { %1016 = vst [vmem:[%s10553_s29 + $0xd10] sm:$0xff] %v1015_v34  ;;  %1018 = vst [vmem:[%s10553_s29 + $0xd18] sm:$0xff] %v1017_v35  ;;  %v1019_v36 = vld [vmem:[%s10545_s28 + $0x1a40] sm:$0xff]  ;;  %v1021_v37 = vld [vmem:[%s10545_s28 + $0x1a48] sm:$0xff] }
  0xe4   : > { %v1023_v38 = vld [vmem:[%s10545_s28 + $0x1a60] sm:$0xff]  ;;  %1020 = vst [vmem:[%s10553_s29 + $0xd20] sm:$0xff] %v1019_v36  ;;  %1022 = vst [vmem:[%s10553_s29 + $0xd28] sm:$0xff] %v1021_v37  ;;  %v1025_v39 = vld [vmem:[%s10545_s28 + $0x1a68] sm:$0xff] }
  0xe5   : > { %1024 = vst [vmem:[%s10553_s29 + $0xd30] sm:$0xff] %v1023_v38  ;;  %v1027_v40 = vld [vmem:[%s10545_s28 + $0x1a80] sm:$0xff]  ;;  %v1029_v41 = vld [vmem:[%s10545_s28 + $0x1a88] sm:$0xff]  ;;  %1026 = vst [vmem:[%s10553_s29 + $0xd38] sm:$0xff] %v1025_v39 }
  0xe6   : > { %1028 = vst [vmem:[%s10553_s29 + $0xd40] sm:$0xff] %v1027_v40  ;;  %1030 = vst [vmem:[%s10553_s29 + $0xd48] sm:$0xff] %v1029_v41  ;;  %v1031_v42 = vld [vmem:[%s10545_s28 + $0x1aa0] sm:$0xff]  ;;  %v1033_v43 = vld [vmem:[%s10545_s28 + $0x1aa8] sm:$0xff] }
  0xe7   : > { %v1035_v44 = vld [vmem:[%s10545_s28 + $0x1ac0] sm:$0xff]  ;;  %1032 = vst [vmem:[%s10553_s29 + $0xd50] sm:$0xff] %v1031_v42  ;;  %1034 = vst [vmem:[%s10553_s29 + $0xd58] sm:$0xff] %v1033_v43  ;;  %v1037_v45 = vld [vmem:[%s10545_s28 + $0x1ac8] sm:$0xff] }
  0xe8   : > { %1036 = vst [vmem:[%s10553_s29 + $0xd60] sm:$0xff] %v1035_v44  ;;  %v1039_v46 = vld [vmem:[%s10545_s28 + $0x1ae0] sm:$0xff]  ;;  %v1041_v47 = vld [vmem:[%s10545_s28 + $0x1ae8] sm:$0xff]  ;;  %1038 = vst [vmem:[%s10553_s29 + $0xd68] sm:$0xff] %v1037_v45 }
  0xe9   : > { %1040 = vst [vmem:[%s10553_s29 + $0xd70] sm:$0xff] %v1039_v46  ;;  %1042 = vst [vmem:[%s10553_s29 + $0xd78] sm:$0xff] %v1041_v47  ;;  %v1043_v48 = vld [vmem:[%s10545_s28 + $0x1b00] sm:$0xff]  ;;  %v1045_v49 = vld [vmem:[%s10545_s28 + $0x1b08] sm:$0xff] }
  0xea   : > { %v1047_v50 = vld [vmem:[%s10545_s28 + $0x1b20] sm:$0xff]  ;;  %1044 = vst [vmem:[%s10553_s29 + $0xd80] sm:$0xff] %v1043_v48  ;;  %1046 = vst [vmem:[%s10553_s29 + $0xd88] sm:$0xff] %v1045_v49  ;;  %v1049_v51 = vld [vmem:[%s10545_s28 + $0x1b28] sm:$0xff] }
  0xeb   : > { %1048 = vst [vmem:[%s10553_s29 + $0xd90] sm:$0xff] %v1047_v50  ;;  %v1051_v52 = vld [vmem:[%s10545_s28 + $0x1b40] sm:$0xff]  ;;  %v1053_v53 = vld [vmem:[%s10545_s28 + $0x1b48] sm:$0xff]  ;;  %1050 = vst [vmem:[%s10553_s29 + $0xd98] sm:$0xff] %v1049_v51 }
  0xec   : > { %1052 = vst [vmem:[%s10553_s29 + $0xda0] sm:$0xff] %v1051_v52  ;;  %1054 = vst [vmem:[%s10553_s29 + $0xda8] sm:$0xff] %v1053_v53  ;;  %v1055_v54 = vld [vmem:[%s10545_s28 + $0x1b60] sm:$0xff]  ;;  %v1057_v55 = vld [vmem:[%s10545_s28 + $0x1b68] sm:$0xff] }
  0xed   : > { %v1059_v56 = vld [vmem:[%s10545_s28 + $0x1b80] sm:$0xff]  ;;  %1056 = vst [vmem:[%s10553_s29 + $0xdb0] sm:$0xff] %v1055_v54  ;;  %1058 = vst [vmem:[%s10553_s29 + $0xdb8] sm:$0xff] %v1057_v55  ;;  %v1061_v57 = vld [vmem:[%s10545_s28 + $0x1b88] sm:$0xff] }
  0xee   : > { %1060 = vst [vmem:[%s10553_s29 + $0xdc0] sm:$0xff] %v1059_v56  ;;  %v1063_v58 = vld [vmem:[%s10545_s28 + $0x1ba0] sm:$0xff]  ;;  %v1065_v59 = vld [vmem:[%s10545_s28 + $0x1ba8] sm:$0xff]  ;;  %1062 = vst [vmem:[%s10553_s29 + $0xdc8] sm:$0xff] %v1061_v57 }
  0xef   : > { %1064 = vst [vmem:[%s10553_s29 + $0xdd0] sm:$0xff] %v1063_v58  ;;  %1066 = vst [vmem:[%s10553_s29 + $0xdd8] sm:$0xff] %v1065_v59  ;;  %v1067_v60 = vld [vmem:[%s10545_s28 + $0x1bc0] sm:$0xff]  ;;  %v1069_v61 = vld [vmem:[%s10545_s28 + $0x1bc8] sm:$0xff] }
  0xf0   : > { %v1071_v62 = vld [vmem:[%s10545_s28 + $0x1be0] sm:$0xff]  ;;  %1068 = vst [vmem:[%s10553_s29 + $0xde0] sm:$0xff] %v1067_v60  ;;  %1070 = vst [vmem:[%s10553_s29 + $0xde8] sm:$0xff] %v1069_v61  ;;  %v1073_v63 = vld [vmem:[%s10545_s28 + $0x1be8] sm:$0xff] }
  0xf1   : > { %1072 = vst [vmem:[%s10553_s29 + $0xdf0] sm:$0xff] %v1071_v62  ;;  %v1075_v0 = vld [vmem:[%s10545_s28 + $0x1c00] sm:$0xff]  ;;  %v1077_v1 = vld [vmem:[%s10545_s28 + $0x1c08] sm:$0xff]  ;;  %1074 = vst [vmem:[%s10553_s29 + $0xdf8] sm:$0xff] %v1073_v63 }
  0xf2   : > { %1076 = vst [vmem:[%s10553_s29 + $0xe00] sm:$0xff] %v1075_v0  ;;  %1078 = vst [vmem:[%s10553_s29 + $0xe08] sm:$0xff] %v1077_v1  ;;  %v1079_v2 = vld [vmem:[%s10545_s28 + $0x1c20] sm:$0xff]  ;;  %v1081_v3 = vld [vmem:[%s10545_s28 + $0x1c28] sm:$0xff] }
  0xf3   : > { %v1083_v4 = vld [vmem:[%s10545_s28 + $0x1c40] sm:$0xff]  ;;  %1080 = vst [vmem:[%s10553_s29 + $0xe10] sm:$0xff] %v1079_v2  ;;  %1082 = vst [vmem:[%s10553_s29 + $0xe18] sm:$0xff] %v1081_v3  ;;  %v1085_v5 = vld [vmem:[%s10545_s28 + $0x1c48] sm:$0xff] }
  0xf4   : > { %1084 = vst [vmem:[%s10553_s29 + $0xe20] sm:$0xff] %v1083_v4  ;;  %v1087_v6 = vld [vmem:[%s10545_s28 + $0x1c60] sm:$0xff]  ;;  %v1089_v7 = vld [vmem:[%s10545_s28 + $0x1c68] sm:$0xff]  ;;  %1086 = vst [vmem:[%s10553_s29 + $0xe28] sm:$0xff] %v1085_v5 }
  0xf5   : > { %1088 = vst [vmem:[%s10553_s29 + $0xe30] sm:$0xff] %v1087_v6  ;;  %1090 = vst [vmem:[%s10553_s29 + $0xe38] sm:$0xff] %v1089_v7  ;;  %v1091_v8 = vld [vmem:[%s10545_s28 + $0x1c80] sm:$0xff]  ;;  %v1093_v9 = vld [vmem:[%s10545_s28 + $0x1c88] sm:$0xff] }
  0xf6   : > { %v1095_v10 = vld [vmem:[%s10545_s28 + $0x1ca0] sm:$0xff]  ;;  %1092 = vst [vmem:[%s10553_s29 + $0xe40] sm:$0xff] %v1091_v8  ;;  %1094 = vst [vmem:[%s10553_s29 + $0xe48] sm:$0xff] %v1093_v9  ;;  %v1097_v11 = vld [vmem:[%s10545_s28 + $0x1ca8] sm:$0xff] }
  0xf7   : > { %1096 = vst [vmem:[%s10553_s29 + $0xe50] sm:$0xff] %v1095_v10  ;;  %v1099_v12 = vld [vmem:[%s10545_s28 + $0x1cc0] sm:$0xff]  ;;  %v1101_v13 = vld [vmem:[%s10545_s28 + $0x1cc8] sm:$0xff]  ;;  %1098 = vst [vmem:[%s10553_s29 + $0xe58] sm:$0xff] %v1097_v11 }
  0xf8   : > { %1100 = vst [vmem:[%s10553_s29 + $0xe60] sm:$0xff] %v1099_v12  ;;  %1102 = vst [vmem:[%s10553_s29 + $0xe68] sm:$0xff] %v1101_v13  ;;  %v1103_v14 = vld [vmem:[%s10545_s28 + $0x1ce0] sm:$0xff]  ;;  %v1105_v15 = vld [vmem:[%s10545_s28 + $0x1ce8] sm:$0xff] }
  0xf9   : > { %v1107_v16 = vld [vmem:[%s10545_s28 + $0x1d00] sm:$0xff]  ;;  %1104 = vst [vmem:[%s10553_s29 + $0xe70] sm:$0xff] %v1103_v14  ;;  %1106 = vst [vmem:[%s10553_s29 + $0xe78] sm:$0xff] %v1105_v15  ;;  %v1109_v17 = vld [vmem:[%s10545_s28 + $0x1d08] sm:$0xff] }
  0xfa   : > { %1108 = vst [vmem:[%s10553_s29 + $0xe80] sm:$0xff] %v1107_v16  ;;  %v1111_v18 = vld [vmem:[%s10545_s28 + $0x1d20] sm:$0xff]  ;;  %v1113_v19 = vld [vmem:[%s10545_s28 + $0x1d28] sm:$0xff]  ;;  %1110 = vst [vmem:[%s10553_s29 + $0xe88] sm:$0xff] %v1109_v17 }
  0xfb   : > { %1112 = vst [vmem:[%s10553_s29 + $0xe90] sm:$0xff] %v1111_v18  ;;  %1114 = vst [vmem:[%s10553_s29 + $0xe98] sm:$0xff] %v1113_v19  ;;  %v1115_v20 = vld [vmem:[%s10545_s28 + $0x1d40] sm:$0xff]  ;;  %v1117_v21 = vld [vmem:[%s10545_s28 + $0x1d48] sm:$0xff] }
  0xfc   : > { %v1119_v22 = vld [vmem:[%s10545_s28 + $0x1d60] sm:$0xff]  ;;  %1116 = vst [vmem:[%s10553_s29 + $0xea0] sm:$0xff] %v1115_v20  ;;  %1118 = vst [vmem:[%s10553_s29 + $0xea8] sm:$0xff] %v1117_v21  ;;  %v1121_v23 = vld [vmem:[%s10545_s28 + $0x1d68] sm:$0xff] }
  0xfd   : > { %1120 = vst [vmem:[%s10553_s29 + $0xeb0] sm:$0xff] %v1119_v22  ;;  %v1123_v24 = vld [vmem:[%s10545_s28 + $0x1d80] sm:$0xff]  ;;  %v1125_v25 = vld [vmem:[%s10545_s28 + $0x1d88] sm:$0xff]  ;;  %1122 = vst [vmem:[%s10553_s29 + $0xeb8] sm:$0xff] %v1121_v23 }
  0xfe   : > { %1124 = vst [vmem:[%s10553_s29 + $0xec0] sm:$0xff] %v1123_v24  ;;  %1126 = vst [vmem:[%s10553_s29 + $0xec8] sm:$0xff] %v1125_v25  ;;  %v1127_v26 = vld [vmem:[%s10545_s28 + $0x1da0] sm:$0xff]  ;;  %v1129_v27 = vld [vmem:[%s10545_s28 + $0x1da8] sm:$0xff] }
  0xff   : > { %v1131_v28 = vld [vmem:[%s10545_s28 + $0x1dc0] sm:$0xff]  ;;  %1128 = vst [vmem:[%s10553_s29 + $0xed0] sm:$0xff] %v1127_v26  ;;  %1130 = vst [vmem:[%s10553_s29 + $0xed8] sm:$0xff] %v1129_v27  ;;  %v1133_v29 = vld [vmem:[%s10545_s28 + $0x1dc8] sm:$0xff] }
 0x100   : > { %1132 = vst [vmem:[%s10553_s29 + $0xee0] sm:$0xff] %v1131_v28  ;;  %v1135_v30 = vld [vmem:[%s10545_s28 + $0x1de0] sm:$0xff]  ;;  %v1137_v31 = vld [vmem:[%s10545_s28 + $0x1de8] sm:$0xff]  ;;  %1134 = vst [vmem:[%s10553_s29 + $0xee8] sm:$0xff] %v1133_v29 }
 0x101   : > { %1136 = vst [vmem:[%s10553_s29 + $0xef0] sm:$0xff] %v1135_v30  ;;  %1138 = vst [vmem:[%s10553_s29 + $0xef8] sm:$0xff] %v1137_v31  ;;  %v1139_v32 = vld [vmem:[%s10545_s28 + $0x1e00] sm:$0xff]  ;;  %v1141_v33 = vld [vmem:[%s10545_s28 + $0x1e08] sm:$0xff] }
 0x102   : > { %v1143_v34 = vld [vmem:[%s10545_s28 + $0x1e20] sm:$0xff]  ;;  %1140 = vst [vmem:[%s10553_s29 + $0xf00] sm:$0xff] %v1139_v32  ;;  %1142 = vst [vmem:[%s10553_s29 + $0xf08] sm:$0xff] %v1141_v33  ;;  %v1145_v35 = vld [vmem:[%s10545_s28 + $0x1e28] sm:$0xff] }
 0x103   : > { %1144 = vst [vmem:[%s10553_s29 + $0xf10] sm:$0xff] %v1143_v34  ;;  %v1147_v36 = vld [vmem:[%s10545_s28 + $0x1e40] sm:$0xff]  ;;  %v1149_v37 = vld [vmem:[%s10545_s28 + $0x1e48] sm:$0xff]  ;;  %1146 = vst [vmem:[%s10553_s29 + $0xf18] sm:$0xff] %v1145_v35 }
 0x104   : > { %1148 = vst [vmem:[%s10553_s29 + $0xf20] sm:$0xff] %v1147_v36  ;;  %1150 = vst [vmem:[%s10553_s29 + $0xf28] sm:$0xff] %v1149_v37  ;;  %v1151_v38 = vld [vmem:[%s10545_s28 + $0x1e60] sm:$0xff]  ;;  %v1153_v39 = vld [vmem:[%s10545_s28 + $0x1e68] sm:$0xff] }
 0x105   : > { %v1155_v40 = vld [vmem:[%s10545_s28 + $0x1e80] sm:$0xff]  ;;  %1152 = vst [vmem:[%s10553_s29 + $0xf30] sm:$0xff] %v1151_v38  ;;  %1154 = vst [vmem:[%s10553_s29 + $0xf38] sm:$0xff] %v1153_v39  ;;  %v1157_v41 = vld [vmem:[%s10545_s28 + $0x1e88] sm:$0xff] }
 0x106   : > { %1156 = vst [vmem:[%s10553_s29 + $0xf40] sm:$0xff] %v1155_v40  ;;  %v1159_v42 = vld [vmem:[%s10545_s28 + $0x1ea0] sm:$0xff]  ;;  %v1161_v43 = vld [vmem:[%s10545_s28 + $0x1ea8] sm:$0xff]  ;;  %1158 = vst [vmem:[%s10553_s29 + $0xf48] sm:$0xff] %v1157_v41 }
 0x107   : > { %1160 = vst [vmem:[%s10553_s29 + $0xf50] sm:$0xff] %v1159_v42  ;;  %1162 = vst [vmem:[%s10553_s29 + $0xf58] sm:$0xff] %v1161_v43  ;;  %v1163_v44 = vld [vmem:[%s10545_s28 + $0x1ec0] sm:$0xff]  ;;  %v1165_v45 = vld [vmem:[%s10545_s28 + $0x1ec8] sm:$0xff] }
 0x108   : > { %v1167_v46 = vld [vmem:[%s10545_s28 + $0x1ee0] sm:$0xff]  ;;  %1164 = vst [vmem:[%s10553_s29 + $0xf60] sm:$0xff] %v1163_v44  ;;  %1166 = vst [vmem:[%s10553_s29 + $0xf68] sm:$0xff] %v1165_v45  ;;  %v1169_v47 = vld [vmem:[%s10545_s28 + $0x1ee8] sm:$0xff] }
 0x109   : > { %1168 = vst [vmem:[%s10553_s29 + $0xf70] sm:$0xff] %v1167_v46  ;;  %v1171_v48 = vld [vmem:[%s10545_s28 + $0x1f00] sm:$0xff]  ;;  %v1173_v49 = vld [vmem:[%s10545_s28 + $0x1f08] sm:$0xff]  ;;  %1170 = vst [vmem:[%s10553_s29 + $0xf78] sm:$0xff] %v1169_v47 }
 0x10a   : > { %1172 = vst [vmem:[%s10553_s29 + $0xf80] sm:$0xff] %v1171_v48  ;;  %1174 = vst [vmem:[%s10553_s29 + $0xf88] sm:$0xff] %v1173_v49  ;;  %v1175_v50 = vld [vmem:[%s10545_s28 + $0x1f20] sm:$0xff]  ;;  %v1177_v51 = vld [vmem:[%s10545_s28 + $0x1f28] sm:$0xff] }
 0x10b   : > { %v1179_v52 = vld [vmem:[%s10545_s28 + $0x1f40] sm:$0xff]  ;;  %1176 = vst [vmem:[%s10553_s29 + $0xf90] sm:$0xff] %v1175_v50  ;;  %1178 = vst [vmem:[%s10553_s29 + $0xf98] sm:$0xff] %v1177_v51  ;;  %v1181_v53 = vld [vmem:[%s10545_s28 + $0x1f48] sm:$0xff] }
 0x10c   : > { %1180 = vst [vmem:[%s10553_s29 + $0xfa0] sm:$0xff] %v1179_v52  ;;  %v1183_v54 = vld [vmem:[%s10545_s28 + $0x1f60] sm:$0xff]  ;;  %v1185_v55 = vld [vmem:[%s10545_s28 + $0x1f68] sm:$0xff]  ;;  %1182 = vst [vmem:[%s10553_s29 + $0xfa8] sm:$0xff] %v1181_v53 }
 0x10d   : > { %1184 = vst [vmem:[%s10553_s29 + $0xfb0] sm:$0xff] %v1183_v54  ;;  %1186 = vst [vmem:[%s10553_s29 + $0xfb8] sm:$0xff] %v1185_v55  ;;  %v1187_v56 = vld [vmem:[%s10545_s28 + $0x1f80] sm:$0xff]  ;;  %v1189_v57 = vld [vmem:[%s10545_s28 + $0x1f88] sm:$0xff] }
 0x10e   : > { %v1191_v58 = vld [vmem:[%s10545_s28 + $0x1fa0] sm:$0xff]  ;;  %1188 = vst [vmem:[%s10553_s29 + $0xfc0] sm:$0xff] %v1187_v56  ;;  %1190 = vst [vmem:[%s10553_s29 + $0xfc8] sm:$0xff] %v1189_v57  ;;  %v1193_v59 = vld [vmem:[%s10545_s28 + $0x1fa8] sm:$0xff] }
 0x10f   : > { %1192 = vst [vmem:[%s10553_s29 + $0xfd0] sm:$0xff] %v1191_v58  ;;  %v1195_v60 = vld [vmem:[%s10545_s28 + $0x1fc0] sm:$0xff]  ;;  %v1197_v61 = vld [vmem:[%s10545_s28 + $0x1fc8] sm:$0xff]  ;;  %1194 = vst [vmem:[%s10553_s29 + $0xfd8] sm:$0xff] %v1193_v59 }
 0x110   : > { %1196 = vst [vmem:[%s10553_s29 + $0xfe0] sm:$0xff] %v1195_v60  ;;  %1198 = vst [vmem:[%s10553_s29 + $0xfe8] sm:$0xff] %v1197_v61  ;;  %v1199_v62 = vld [vmem:[%s10545_s28 + $0x1fe0] sm:$0xff]  ;;  %v1201_v63 = vld [vmem:[%s10545_s28 + $0x1fe8] sm:$0xff] }
 0x111   : > { %v1203_v0 = vld [vmem:[%s10545_s28 + $0x2000] sm:$0xff]  ;;  %1200 = vst [vmem:[%s10553_s29 + $0xff0] sm:$0xff] %v1199_v62  ;;  %1202 = vst [vmem:[%s10553_s29 + $0xff8] sm:$0xff] %v1201_v63  ;;  %v1205_v1 = vld [vmem:[%s10545_s28 + $0x2008] sm:$0xff] }
 0x112   : > { %1204 = vst [vmem:[%s10553_s29 + $0x1000] sm:$0xff] %v1203_v0  ;;  %v1207_v2 = vld [vmem:[%s10545_s28 + $0x2020] sm:$0xff]  ;;  %v1209_v3 = vld [vmem:[%s10545_s28 + $0x2028] sm:$0xff]  ;;  %1206 = vst [vmem:[%s10553_s29 + $0x1008] sm:$0xff] %v1205_v1 }
 0x113   : > { %1208 = vst [vmem:[%s10553_s29 + $0x1010] sm:$0xff] %v1207_v2  ;;  %1210 = vst [vmem:[%s10553_s29 + $0x1018] sm:$0xff] %v1209_v3  ;;  %v1211_v4 = vld [vmem:[%s10545_s28 + $0x2040] sm:$0xff]  ;;  %v1213_v5 = vld [vmem:[%s10545_s28 + $0x2048] sm:$0xff] }
 0x114   : > { %v1215_v6 = vld [vmem:[%s10545_s28 + $0x2060] sm:$0xff]  ;;  %1212 = vst [vmem:[%s10553_s29 + $0x1020] sm:$0xff] %v1211_v4  ;;  %1214 = vst [vmem:[%s10553_s29 + $0x1028] sm:$0xff] %v1213_v5  ;;  %v1217_v7 = vld [vmem:[%s10545_s28 + $0x2068] sm:$0xff] }
 0x115   : > { %1216 = vst [vmem:[%s10553_s29 + $0x1030] sm:$0xff] %v1215_v6  ;;  %v1219_v8 = vld [vmem:[%s10545_s28 + $0x2080] sm:$0xff]  ;;  %v1221_v9 = vld [vmem:[%s10545_s28 + $0x2088] sm:$0xff]  ;;  %1218 = vst [vmem:[%s10553_s29 + $0x1038] sm:$0xff] %v1217_v7 }
 0x116   : > { %1220 = vst [vmem:[%s10553_s29 + $0x1040] sm:$0xff] %v1219_v8  ;;  %1222 = vst [vmem:[%s10553_s29 + $0x1048] sm:$0xff] %v1221_v9  ;;  %v1223_v10 = vld [vmem:[%s10545_s28 + $0x20a0] sm:$0xff]  ;;  %v1225_v11 = vld [vmem:[%s10545_s28 + $0x20a8] sm:$0xff] }
 0x117   : > { %v1227_v12 = vld [vmem:[%s10545_s28 + $0x20c0] sm:$0xff]  ;;  %1224 = vst [vmem:[%s10553_s29 + $0x1050] sm:$0xff] %v1223_v10  ;;  %1226 = vst [vmem:[%s10553_s29 + $0x1058] sm:$0xff] %v1225_v11  ;;  %v1229_v13 = vld [vmem:[%s10545_s28 + $0x20c8] sm:$0xff] }
 0x118   : > { %1228 = vst [vmem:[%s10553_s29 + $0x1060] sm:$0xff] %v1227_v12  ;;  %v1231_v14 = vld [vmem:[%s10545_s28 + $0x20e0] sm:$0xff]  ;;  %v1233_v15 = vld [vmem:[%s10545_s28 + $0x20e8] sm:$0xff]  ;;  %1230 = vst [vmem:[%s10553_s29 + $0x1068] sm:$0xff] %v1229_v13 }
 0x119   : > { %1232 = vst [vmem:[%s10553_s29 + $0x1070] sm:$0xff] %v1231_v14  ;;  %1234 = vst [vmem:[%s10553_s29 + $0x1078] sm:$0xff] %v1233_v15  ;;  %v1235_v16 = vld [vmem:[%s10545_s28 + $0x2100] sm:$0xff]  ;;  %v1237_v17 = vld [vmem:[%s10545_s28 + $0x2108] sm:$0xff] }
 0x11a   : > { %v1239_v18 = vld [vmem:[%s10545_s28 + $0x2120] sm:$0xff]  ;;  %1236 = vst [vmem:[%s10553_s29 + $0x1080] sm:$0xff] %v1235_v16  ;;  %1238 = vst [vmem:[%s10553_s29 + $0x1088] sm:$0xff] %v1237_v17  ;;  %v1241_v19 = vld [vmem:[%s10545_s28 + $0x2128] sm:$0xff] }
 0x11b   : > { %1240 = vst [vmem:[%s10553_s29 + $0x1090] sm:$0xff] %v1239_v18  ;;  %v1243_v20 = vld [vmem:[%s10545_s28 + $0x2140] sm:$0xff]  ;;  %v1245_v21 = vld [vmem:[%s10545_s28 + $0x2148] sm:$0xff]  ;;  %1242 = vst [vmem:[%s10553_s29 + $0x1098] sm:$0xff] %v1241_v19 }
 0x11c   : > { %1244 = vst [vmem:[%s10553_s29 + $0x10a0] sm:$0xff] %v1243_v20  ;;  %1246 = vst [vmem:[%s10553_s29 + $0x10a8] sm:$0xff] %v1245_v21  ;;  %v1247_v22 = vld [vmem:[%s10545_s28 + $0x2160] sm:$0xff]  ;;  %v1249_v23 = vld [vmem:[%s10545_s28 + $0x2168] sm:$0xff] }
 0x11d   : > { %v1251_v24 = vld [vmem:[%s10545_s28 + $0x2180] sm:$0xff]  ;;  %1248 = vst [vmem:[%s10553_s29 + $0x10b0] sm:$0xff] %v1247_v22  ;;  %1250 = vst [vmem:[%s10553_s29 + $0x10b8] sm:$0xff] %v1249_v23  ;;  %v1253_v25 = vld [vmem:[%s10545_s28 + $0x2188] sm:$0xff] }
 0x11e   : > { %1252 = vst [vmem:[%s10553_s29 + $0x10c0] sm:$0xff] %v1251_v24  ;;  %v1255_v26 = vld [vmem:[%s10545_s28 + $0x21a0] sm:$0xff]  ;;  %v1257_v27 = vld [vmem:[%s10545_s28 + $0x21a8] sm:$0xff]  ;;  %1254 = vst [vmem:[%s10553_s29 + $0x10c8] sm:$0xff] %v1253_v25 }
 0x11f   : > { %1256 = vst [vmem:[%s10553_s29 + $0x10d0] sm:$0xff] %v1255_v26  ;;  %1258 = vst [vmem:[%s10553_s29 + $0x10d8] sm:$0xff] %v1257_v27  ;;  %v1259_v28 = vld [vmem:[%s10545_s28 + $0x21c0] sm:$0xff]  ;;  %v1261_v29 = vld [vmem:[%s10545_s28 + $0x21c8] sm:$0xff] }
 0x120   : > { %v1263_v30 = vld [vmem:[%s10545_s28 + $0x21e0] sm:$0xff]  ;;  %1260 = vst [vmem:[%s10553_s29 + $0x10e0] sm:$0xff] %v1259_v28  ;;  %1262 = vst [vmem:[%s10553_s29 + $0x10e8] sm:$0xff] %v1261_v29  ;;  %v1265_v31 = vld [vmem:[%s10545_s28 + $0x21e8] sm:$0xff] }
 0x121   : > { %1264 = vst [vmem:[%s10553_s29 + $0x10f0] sm:$0xff] %v1263_v30  ;;  %v1267_v32 = vld [vmem:[%s10545_s28 + $0x2200] sm:$0xff]  ;;  %v1269_v33 = vld [vmem:[%s10545_s28 + $0x2208] sm:$0xff]  ;;  %1266 = vst [vmem:[%s10553_s29 + $0x10f8] sm:$0xff] %v1265_v31 }
 0x122   : > { %1268 = vst [vmem:[%s10553_s29 + $0x1100] sm:$0xff] %v1267_v32  ;;  %1270 = vst [vmem:[%s10553_s29 + $0x1108] sm:$0xff] %v1269_v33  ;;  %v1271_v34 = vld [vmem:[%s10545_s28 + $0x2220] sm:$0xff]  ;;  %v1273_v35 = vld [vmem:[%s10545_s28 + $0x2228] sm:$0xff] }
 0x123   : > { %v1275_v36 = vld [vmem:[%s10545_s28 + $0x2240] sm:$0xff]  ;;  %1272 = vst [vmem:[%s10553_s29 + $0x1110] sm:$0xff] %v1271_v34  ;;  %1274 = vst [vmem:[%s10553_s29 + $0x1118] sm:$0xff] %v1273_v35  ;;  %v1277_v37 = vld [vmem:[%s10545_s28 + $0x2248] sm:$0xff] }
 0x124   : > { %1276 = vst [vmem:[%s10553_s29 + $0x1120] sm:$0xff] %v1275_v36  ;;  %v1279_v38 = vld [vmem:[%s10545_s28 + $0x2260] sm:$0xff]  ;;  %v1281_v39 = vld [vmem:[%s10545_s28 + $0x2268] sm:$0xff]  ;;  %1278 = vst [vmem:[%s10553_s29 + $0x1128] sm:$0xff] %v1277_v37 }
 0x125   : > { %1280 = vst [vmem:[%s10553_s29 + $0x1130] sm:$0xff] %v1279_v38  ;;  %1282 = vst [vmem:[%s10553_s29 + $0x1138] sm:$0xff] %v1281_v39  ;;  %v1283_v40 = vld [vmem:[%s10545_s28 + $0x2280] sm:$0xff]  ;;  %v1285_v41 = vld [vmem:[%s10545_s28 + $0x2288] sm:$0xff] }
 0x126   : > { %v1287_v42 = vld [vmem:[%s10545_s28 + $0x22a0] sm:$0xff]  ;;  %1284 = vst [vmem:[%s10553_s29 + $0x1140] sm:$0xff] %v1283_v40  ;;  %1286 = vst [vmem:[%s10553_s29 + $0x1148] sm:$0xff] %v1285_v41  ;;  %v1289_v43 = vld [vmem:[%s10545_s28 + $0x22a8] sm:$0xff] }
 0x127   : > { %1288 = vst [vmem:[%s10553_s29 + $0x1150] sm:$0xff] %v1287_v42  ;;  %v1291_v44 = vld [vmem:[%s10545_s28 + $0x22c0] sm:$0xff]  ;;  %v1293_v45 = vld [vmem:[%s10545_s28 + $0x22c8] sm:$0xff]  ;;  %1290 = vst [vmem:[%s10553_s29 + $0x1158] sm:$0xff] %v1289_v43 }
 0x128   : > { %1292 = vst [vmem:[%s10553_s29 + $0x1160] sm:$0xff] %v1291_v44  ;;  %1294 = vst [vmem:[%s10553_s29 + $0x1168] sm:$0xff] %v1293_v45  ;;  %v1295_v46 = vld [vmem:[%s10545_s28 + $0x22e0] sm:$0xff]  ;;  %v1297_v47 = vld [vmem:[%s10545_s28 + $0x22e8] sm:$0xff] }
 0x129   : > { %v1299_v48 = vld [vmem:[%s10545_s28 + $0x2300] sm:$0xff]  ;;  %1296 = vst [vmem:[%s10553_s29 + $0x1170] sm:$0xff] %v1295_v46  ;;  %1298 = vst [vmem:[%s10553_s29 + $0x1178] sm:$0xff] %v1297_v47  ;;  %v1301_v49 = vld [vmem:[%s10545_s28 + $0x2308] sm:$0xff] }
 0x12a   : > { %1300 = vst [vmem:[%s10553_s29 + $0x1180] sm:$0xff] %v1299_v48  ;;  %v1303_v50 = vld [vmem:[%s10545_s28 + $0x2320] sm:$0xff]  ;;  %v1305_v51 = vld [vmem:[%s10545_s28 + $0x2328] sm:$0xff]  ;;  %1302 = vst [vmem:[%s10553_s29 + $0x1188] sm:$0xff] %v1301_v49 }
 0x12b   : > { %1304 = vst [vmem:[%s10553_s29 + $0x1190] sm:$0xff] %v1303_v50  ;;  %1306 = vst [vmem:[%s10553_s29 + $0x1198] sm:$0xff] %v1305_v51  ;;  %v1307_v52 = vld [vmem:[%s10545_s28 + $0x2340] sm:$0xff]  ;;  %v1309_v53 = vld [vmem:[%s10545_s28 + $0x2348] sm:$0xff] }
 0x12c   : > { %v1311_v54 = vld [vmem:[%s10545_s28 + $0x2360] sm:$0xff]  ;;  %1308 = vst [vmem:[%s10553_s29 + $0x11a0] sm:$0xff] %v1307_v52  ;;  %1310 = vst [vmem:[%s10553_s29 + $0x11a8] sm:$0xff] %v1309_v53  ;;  %v1313_v55 = vld [vmem:[%s10545_s28 + $0x2368] sm:$0xff] }
 0x12d   : > { %1312 = vst [vmem:[%s10553_s29 + $0x11b0] sm:$0xff] %v1311_v54  ;;  %v1315_v56 = vld [vmem:[%s10545_s28 + $0x2380] sm:$0xff]  ;;  %v1317_v57 = vld [vmem:[%s10545_s28 + $0x2388] sm:$0xff]  ;;  %1314 = vst [vmem:[%s10553_s29 + $0x11b8] sm:$0xff] %v1313_v55 }
 0x12e   : > { %1316 = vst [vmem:[%s10553_s29 + $0x11c0] sm:$0xff] %v1315_v56  ;;  %1318 = vst [vmem:[%s10553_s29 + $0x11c8] sm:$0xff] %v1317_v57  ;;  %v1319_v58 = vld [vmem:[%s10545_s28 + $0x23a0] sm:$0xff]  ;;  %v1321_v59 = vld [vmem:[%s10545_s28 + $0x23a8] sm:$0xff] }
 0x12f   : > { %v1323_v60 = vld [vmem:[%s10545_s28 + $0x23c0] sm:$0xff]  ;;  %1320 = vst [vmem:[%s10553_s29 + $0x11d0] sm:$0xff] %v1319_v58  ;;  %1322 = vst [vmem:[%s10553_s29 + $0x11d8] sm:$0xff] %v1321_v59  ;;  %v1325_v61 = vld [vmem:[%s10545_s28 + $0x23c8] sm:$0xff] }
 0x130   : > { %1324 = vst [vmem:[%s10553_s29 + $0x11e0] sm:$0xff] %v1323_v60  ;;  %v1327_v62 = vld [vmem:[%s10545_s28 + $0x23e0] sm:$0xff]  ;;  %v1329_v63 = vld [vmem:[%s10545_s28 + $0x23e8] sm:$0xff]  ;;  %1326 = vst [vmem:[%s10553_s29 + $0x11e8] sm:$0xff] %v1325_v61 }
 0x131   : > { %1328 = vst [vmem:[%s10553_s29 + $0x11f0] sm:$0xff] %v1327_v62  ;;  %1330 = vst [vmem:[%s10553_s29 + $0x11f8] sm:$0xff] %v1329_v63  ;;  %v1331_v0 = vld [vmem:[%s10545_s28 + $0x2400] sm:$0xff]  ;;  %v1333_v1 = vld [vmem:[%s10545_s28 + $0x2408] sm:$0xff] }
 0x132   : > { %v1335_v2 = vld [vmem:[%s10545_s28 + $0x2420] sm:$0xff]  ;;  %1332 = vst [vmem:[%s10553_s29 + $0x1200] sm:$0xff] %v1331_v0  ;;  %1334 = vst [vmem:[%s10553_s29 + $0x1208] sm:$0xff] %v1333_v1  ;;  %v1337_v3 = vld [vmem:[%s10545_s28 + $0x2428] sm:$0xff] }
 0x133   : > { %1336 = vst [vmem:[%s10553_s29 + $0x1210] sm:$0xff] %v1335_v2  ;;  %v1339_v4 = vld [vmem:[%s10545_s28 + $0x2440] sm:$0xff]  ;;  %v1341_v5 = vld [vmem:[%s10545_s28 + $0x2448] sm:$0xff]  ;;  %1338 = vst [vmem:[%s10553_s29 + $0x1218] sm:$0xff] %v1337_v3 }
 0x134   : > { %1340 = vst [vmem:[%s10553_s29 + $0x1220] sm:$0xff] %v1339_v4  ;;  %1342 = vst [vmem:[%s10553_s29 + $0x1228] sm:$0xff] %v1341_v5  ;;  %v1343_v6 = vld [vmem:[%s10545_s28 + $0x2460] sm:$0xff]  ;;  %v1345_v7 = vld [vmem:[%s10545_s28 + $0x2468] sm:$0xff] }
 0x135   : > { %v1347_v8 = vld [vmem:[%s10545_s28 + $0x2480] sm:$0xff]  ;;  %1344 = vst [vmem:[%s10553_s29 + $0x1230] sm:$0xff] %v1343_v6  ;;  %1346 = vst [vmem:[%s10553_s29 + $0x1238] sm:$0xff] %v1345_v7  ;;  %v1349_v9 = vld [vmem:[%s10545_s28 + $0x2488] sm:$0xff] }
 0x136   : > { %1348 = vst [vmem:[%s10553_s29 + $0x1240] sm:$0xff] %v1347_v8  ;;  %v1351_v10 = vld [vmem:[%s10545_s28 + $0x24a0] sm:$0xff]  ;;  %v1353_v11 = vld [vmem:[%s10545_s28 + $0x24a8] sm:$0xff]  ;;  %1350 = vst [vmem:[%s10553_s29 + $0x1248] sm:$0xff] %v1349_v9 }
 0x137   : > { %1352 = vst [vmem:[%s10553_s29 + $0x1250] sm:$0xff] %v1351_v10  ;;  %1354 = vst [vmem:[%s10553_s29 + $0x1258] sm:$0xff] %v1353_v11  ;;  %v1355_v12 = vld [vmem:[%s10545_s28 + $0x24c0] sm:$0xff]  ;;  %v1357_v13 = vld [vmem:[%s10545_s28 + $0x24c8] sm:$0xff] }
 0x138   : > { %v1359_v14 = vld [vmem:[%s10545_s28 + $0x24e0] sm:$0xff]  ;;  %1356 = vst [vmem:[%s10553_s29 + $0x1260] sm:$0xff] %v1355_v12  ;;  %1358 = vst [vmem:[%s10553_s29 + $0x1268] sm:$0xff] %v1357_v13  ;;  %v1361_v15 = vld [vmem:[%s10545_s28 + $0x24e8] sm:$0xff] }
 0x139   : > { %1360 = vst [vmem:[%s10553_s29 + $0x1270] sm:$0xff] %v1359_v14  ;;  %v1363_v16 = vld [vmem:[%s10545_s28 + $0x2500] sm:$0xff]  ;;  %v1365_v17 = vld [vmem:[%s10545_s28 + $0x2508] sm:$0xff]  ;;  %1362 = vst [vmem:[%s10553_s29 + $0x1278] sm:$0xff] %v1361_v15 }
 0x13a   : > { %1364 = vst [vmem:[%s10553_s29 + $0x1280] sm:$0xff] %v1363_v16  ;;  %1366 = vst [vmem:[%s10553_s29 + $0x1288] sm:$0xff] %v1365_v17  ;;  %v1367_v18 = vld [vmem:[%s10545_s28 + $0x2520] sm:$0xff]  ;;  %v1369_v19 = vld [vmem:[%s10545_s28 + $0x2528] sm:$0xff] }
 0x13b   : > { %v1371_v20 = vld [vmem:[%s10545_s28 + $0x2540] sm:$0xff]  ;;  %1368 = vst [vmem:[%s10553_s29 + $0x1290] sm:$0xff] %v1367_v18  ;;  %1370 = vst [vmem:[%s10553_s29 + $0x1298] sm:$0xff] %v1369_v19  ;;  %v1373_v21 = vld [vmem:[%s10545_s28 + $0x2548] sm:$0xff] }
 0x13c   : > { %1372 = vst [vmem:[%s10553_s29 + $0x12a0] sm:$0xff] %v1371_v20  ;;  %v1375_v22 = vld [vmem:[%s10545_s28 + $0x2560] sm:$0xff]  ;;  %v1377_v23 = vld [vmem:[%s10545_s28 + $0x2568] sm:$0xff]  ;;  %1374 = vst [vmem:[%s10553_s29 + $0x12a8] sm:$0xff] %v1373_v21 }
 0x13d   : > { %1376 = vst [vmem:[%s10553_s29 + $0x12b0] sm:$0xff] %v1375_v22  ;;  %1378 = vst [vmem:[%s10553_s29 + $0x12b8] sm:$0xff] %v1377_v23  ;;  %v1379_v24 = vld [vmem:[%s10545_s28 + $0x2580] sm:$0xff]  ;;  %v1381_v25 = vld [vmem:[%s10545_s28 + $0x2588] sm:$0xff] }
 0x13e   : > { %v1383_v26 = vld [vmem:[%s10545_s28 + $0x25a0] sm:$0xff]  ;;  %1380 = vst [vmem:[%s10553_s29 + $0x12c0] sm:$0xff] %v1379_v24  ;;  %1382 = vst [vmem:[%s10553_s29 + $0x12c8] sm:$0xff] %v1381_v25  ;;  %v1385_v27 = vld [vmem:[%s10545_s28 + $0x25a8] sm:$0xff] }
 0x13f   : > { %1384 = vst [vmem:[%s10553_s29 + $0x12d0] sm:$0xff] %v1383_v26  ;;  %v1387_v28 = vld [vmem:[%s10545_s28 + $0x25c0] sm:$0xff]  ;;  %v1389_v29 = vld [vmem:[%s10545_s28 + $0x25c8] sm:$0xff]  ;;  %1386 = vst [vmem:[%s10553_s29 + $0x12d8] sm:$0xff] %v1385_v27 }
 0x140   : > { %1388 = vst [vmem:[%s10553_s29 + $0x12e0] sm:$0xff] %v1387_v28  ;;  %1390 = vst [vmem:[%s10553_s29 + $0x12e8] sm:$0xff] %v1389_v29  ;;  %v1391_v30 = vld [vmem:[%s10545_s28 + $0x25e0] sm:$0xff]  ;;  %v1393_v31 = vld [vmem:[%s10545_s28 + $0x25e8] sm:$0xff] }
 0x141   : > { %v1395_v32 = vld [vmem:[%s10545_s28 + $0x2600] sm:$0xff]  ;;  %1392 = vst [vmem:[%s10553_s29 + $0x12f0] sm:$0xff] %v1391_v30  ;;  %1394 = vst [vmem:[%s10553_s29 + $0x12f8] sm:$0xff] %v1393_v31  ;;  %v1397_v33 = vld [vmem:[%s10545_s28 + $0x2608] sm:$0xff] }
 0x142   : > { %1396 = vst [vmem:[%s10553_s29 + $0x1300] sm:$0xff] %v1395_v32  ;;  %v1399_v34 = vld [vmem:[%s10545_s28 + $0x2620] sm:$0xff]  ;;  %v1401_v35 = vld [vmem:[%s10545_s28 + $0x2628] sm:$0xff]  ;;  %1398 = vst [vmem:[%s10553_s29 + $0x1308] sm:$0xff] %v1397_v33 }
 0x143   : > { %1400 = vst [vmem:[%s10553_s29 + $0x1310] sm:$0xff] %v1399_v34  ;;  %1402 = vst [vmem:[%s10553_s29 + $0x1318] sm:$0xff] %v1401_v35  ;;  %v1403_v36 = vld [vmem:[%s10545_s28 + $0x2640] sm:$0xff]  ;;  %v1405_v37 = vld [vmem:[%s10545_s28 + $0x2648] sm:$0xff] }
 0x144   : > { %v1407_v38 = vld [vmem:[%s10545_s28 + $0x2660] sm:$0xff]  ;;  %1404 = vst [vmem:[%s10553_s29 + $0x1320] sm:$0xff] %v1403_v36  ;;  %1406 = vst [vmem:[%s10553_s29 + $0x1328] sm:$0xff] %v1405_v37  ;;  %v1409_v39 = vld [vmem:[%s10545_s28 + $0x2668] sm:$0xff] }
 0x145   : > { %1408 = vst [vmem:[%s10553_s29 + $0x1330] sm:$0xff] %v1407_v38  ;;  %v1411_v40 = vld [vmem:[%s10545_s28 + $0x2680] sm:$0xff]  ;;  %v1413_v41 = vld [vmem:[%s10545_s28 + $0x2688] sm:$0xff]  ;;  %1410 = vst [vmem:[%s10553_s29 + $0x1338] sm:$0xff] %v1409_v39 }
 0x146   : > { %1412 = vst [vmem:[%s10553_s29 + $0x1340] sm:$0xff] %v1411_v40  ;;  %1414 = vst [vmem:[%s10553_s29 + $0x1348] sm:$0xff] %v1413_v41  ;;  %v1415_v42 = vld [vmem:[%s10545_s28 + $0x26a0] sm:$0xff]  ;;  %v1417_v43 = vld [vmem:[%s10545_s28 + $0x26a8] sm:$0xff] }
 0x147   : > { %v1419_v44 = vld [vmem:[%s10545_s28 + $0x26c0] sm:$0xff]  ;;  %1416 = vst [vmem:[%s10553_s29 + $0x1350] sm:$0xff] %v1415_v42  ;;  %1418 = vst [vmem:[%s10553_s29 + $0x1358] sm:$0xff] %v1417_v43  ;;  %v1421_v45 = vld [vmem:[%s10545_s28 + $0x26c8] sm:$0xff] }
 0x148   : > { %1420 = vst [vmem:[%s10553_s29 + $0x1360] sm:$0xff] %v1419_v44  ;;  %v1423_v46 = vld [vmem:[%s10545_s28 + $0x26e0] sm:$0xff]  ;;  %v1425_v47 = vld [vmem:[%s10545_s28 + $0x26e8] sm:$0xff]  ;;  %1422 = vst [vmem:[%s10553_s29 + $0x1368] sm:$0xff] %v1421_v45 }
 0x149   : > { %1424 = vst [vmem:[%s10553_s29 + $0x1370] sm:$0xff] %v1423_v46  ;;  %1426 = vst [vmem:[%s10553_s29 + $0x1378] sm:$0xff] %v1425_v47  ;;  %v1427_v48 = vld [vmem:[%s10545_s28 + $0x2700] sm:$0xff]  ;;  %v1429_v49 = vld [vmem:[%s10545_s28 + $0x2708] sm:$0xff] }
 0x14a   : > { %v1431_v50 = vld [vmem:[%s10545_s28 + $0x2720] sm:$0xff]  ;;  %1428 = vst [vmem:[%s10553_s29 + $0x1380] sm:$0xff] %v1427_v48  ;;  %1430 = vst [vmem:[%s10553_s29 + $0x1388] sm:$0xff] %v1429_v49  ;;  %v1433_v51 = vld [vmem:[%s10545_s28 + $0x2728] sm:$0xff] }
 0x14b   : > { %1432 = vst [vmem:[%s10553_s29 + $0x1390] sm:$0xff] %v1431_v50  ;;  %v1435_v52 = vld [vmem:[%s10545_s28 + $0x2740] sm:$0xff]  ;;  %v1437_v53 = vld [vmem:[%s10545_s28 + $0x2748] sm:$0xff]  ;;  %1434 = vst [vmem:[%s10553_s29 + $0x1398] sm:$0xff] %v1433_v51 }
 0x14c   : > { %1436 = vst [vmem:[%s10553_s29 + $0x13a0] sm:$0xff] %v1435_v52  ;;  %1438 = vst [vmem:[%s10553_s29 + $0x13a8] sm:$0xff] %v1437_v53  ;;  %v1439_v54 = vld [vmem:[%s10545_s28 + $0x2760] sm:$0xff]  ;;  %v1441_v55 = vld [vmem:[%s10545_s28 + $0x2768] sm:$0xff] }
 0x14d   : > { %v1443_v56 = vld [vmem:[%s10545_s28 + $0x2780] sm:$0xff]  ;;  %1440 = vst [vmem:[%s10553_s29 + $0x13b0] sm:$0xff] %v1439_v54  ;;  %1442 = vst [vmem:[%s10553_s29 + $0x13b8] sm:$0xff] %v1441_v55  ;;  %v1445_v57 = vld [vmem:[%s10545_s28 + $0x2788] sm:$0xff] }
 0x14e   : > { %1444 = vst [vmem:[%s10553_s29 + $0x13c0] sm:$0xff] %v1443_v56  ;;  %v1447_v58 = vld [vmem:[%s10545_s28 + $0x27a0] sm:$0xff]  ;;  %v1449_v59 = vld [vmem:[%s10545_s28 + $0x27a8] sm:$0xff]  ;;  %1446 = vst [vmem:[%s10553_s29 + $0x13c8] sm:$0xff] %v1445_v57 }
 0x14f   : > { %1448 = vst [vmem:[%s10553_s29 + $0x13d0] sm:$0xff] %v1447_v58  ;;  %1450 = vst [vmem:[%s10553_s29 + $0x13d8] sm:$0xff] %v1449_v59  ;;  %v1451_v60 = vld [vmem:[%s10545_s28 + $0x27c0] sm:$0xff]  ;;  %v1453_v61 = vld [vmem:[%s10545_s28 + $0x27c8] sm:$0xff] }
 0x150   : > { %v1455_v62 = vld [vmem:[%s10545_s28 + $0x27e0] sm:$0xff]  ;;  %1452 = vst [vmem:[%s10553_s29 + $0x13e0] sm:$0xff] %v1451_v60  ;;  %1454 = vst [vmem:[%s10553_s29 + $0x13e8] sm:$0xff] %v1453_v61  ;;  %v1457_v63 = vld [vmem:[%s10545_s28 + $0x27e8] sm:$0xff] }
 0x151   : > { %1456 = vst [vmem:[%s10553_s29 + $0x13f0] sm:$0xff] %v1455_v62  ;;  %v1459_v0 = vld [vmem:[%s10545_s28 + $0x2800] sm:$0xff]  ;;  %v1461_v1 = vld [vmem:[%s10545_s28 + $0x2808] sm:$0xff]  ;;  %1458 = vst [vmem:[%s10553_s29 + $0x13f8] sm:$0xff] %v1457_v63 }
 0x152   : > { %1460 = vst [vmem:[%s10553_s29 + $0x1400] sm:$0xff] %v1459_v0  ;;  %1462 = vst [vmem:[%s10553_s29 + $0x1408] sm:$0xff] %v1461_v1  ;;  %v1463_v2 = vld [vmem:[%s10545_s28 + $0x2820] sm:$0xff]  ;;  %v1465_v3 = vld [vmem:[%s10545_s28 + $0x2828] sm:$0xff] }
 0x153   : > { %v1467_v4 = vld [vmem:[%s10545_s28 + $0x2840] sm:$0xff]  ;;  %1464 = vst [vmem:[%s10553_s29 + $0x1410] sm:$0xff] %v1463_v2  ;;  %1466 = vst [vmem:[%s10553_s29 + $0x1418] sm:$0xff] %v1465_v3  ;;  %v1469_v5 = vld [vmem:[%s10545_s28 + $0x2848] sm:$0xff] }
 0x154   : > { %1468 = vst [vmem:[%s10553_s29 + $0x1420] sm:$0xff] %v1467_v4  ;;  %v1471_v6 = vld [vmem:[%s10545_s28 + $0x2860] sm:$0xff]  ;;  %v1473_v7 = vld [vmem:[%s10545_s28 + $0x2868] sm:$0xff]  ;;  %1470 = vst [vmem:[%s10553_s29 + $0x1428] sm:$0xff] %v1469_v5 }
 0x155   : > { %1472 = vst [vmem:[%s10553_s29 + $0x1430] sm:$0xff] %v1471_v6  ;;  %1474 = vst [vmem:[%s10553_s29 + $0x1438] sm:$0xff] %v1473_v7  ;;  %v1475_v8 = vld [vmem:[%s10545_s28 + $0x2880] sm:$0xff]  ;;  %v1477_v9 = vld [vmem:[%s10545_s28 + $0x2888] sm:$0xff] }
 0x156   : > { %v1479_v10 = vld [vmem:[%s10545_s28 + $0x28a0] sm:$0xff]  ;;  %1476 = vst [vmem:[%s10553_s29 + $0x1440] sm:$0xff] %v1475_v8  ;;  %1478 = vst [vmem:[%s10553_s29 + $0x1448] sm:$0xff] %v1477_v9  ;;  %v1481_v11 = vld [vmem:[%s10545_s28 + $0x28a8] sm:$0xff] }
 0x157   : > { %1480 = vst [vmem:[%s10553_s29 + $0x1450] sm:$0xff] %v1479_v10  ;;  %v1483_v12 = vld [vmem:[%s10545_s28 + $0x28c0] sm:$0xff]  ;;  %v1485_v13 = vld [vmem:[%s10545_s28 + $0x28c8] sm:$0xff]  ;;  %1482 = vst [vmem:[%s10553_s29 + $0x1458] sm:$0xff] %v1481_v11 }
 0x158   : > { %1484 = vst [vmem:[%s10553_s29 + $0x1460] sm:$0xff] %v1483_v12  ;;  %1486 = vst [vmem:[%s10553_s29 + $0x1468] sm:$0xff] %v1485_v13  ;;  %v1487_v14 = vld [vmem:[%s10545_s28 + $0x28e0] sm:$0xff]  ;;  %v1489_v15 = vld [vmem:[%s10545_s28 + $0x28e8] sm:$0xff] }
 0x159   : > { %v1491_v16 = vld [vmem:[%s10545_s28 + $0x2900] sm:$0xff]  ;;  %1488 = vst [vmem:[%s10553_s29 + $0x1470] sm:$0xff] %v1487_v14  ;;  %1490 = vst [vmem:[%s10553_s29 + $0x1478] sm:$0xff] %v1489_v15  ;;  %v1493_v17 = vld [vmem:[%s10545_s28 + $0x2908] sm:$0xff] }
 0x15a   : > { %1492 = vst [vmem:[%s10553_s29 + $0x1480] sm:$0xff] %v1491_v16  ;;  %v1495_v18 = vld [vmem:[%s10545_s28 + $0x2920] sm:$0xff]  ;;  %v1497_v19 = vld [vmem:[%s10545_s28 + $0x2928] sm:$0xff]  ;;  %1494 = vst [vmem:[%s10553_s29 + $0x1488] sm:$0xff] %v1493_v17 }
 0x15b   : > { %1496 = vst [vmem:[%s10553_s29 + $0x1490] sm:$0xff] %v1495_v18  ;;  %1498 = vst [vmem:[%s10553_s29 + $0x1498] sm:$0xff] %v1497_v19  ;;  %v1499_v20 = vld [vmem:[%s10545_s28 + $0x2940] sm:$0xff]  ;;  %v1501_v21 = vld [vmem:[%s10545_s28 + $0x2948] sm:$0xff] }
 0x15c   : > { %v1503_v22 = vld [vmem:[%s10545_s28 + $0x2960] sm:$0xff]  ;;  %1500 = vst [vmem:[%s10553_s29 + $0x14a0] sm:$0xff] %v1499_v20  ;;  %1502 = vst [vmem:[%s10553_s29 + $0x14a8] sm:$0xff] %v1501_v21  ;;  %v1505_v23 = vld [vmem:[%s10545_s28 + $0x2968] sm:$0xff] }
 0x15d   : > { %1504 = vst [vmem:[%s10553_s29 + $0x14b0] sm:$0xff] %v1503_v22  ;;  %v1507_v24 = vld [vmem:[%s10545_s28 + $0x2980] sm:$0xff]  ;;  %v1509_v25 = vld [vmem:[%s10545_s28 + $0x2988] sm:$0xff]  ;;  %1506 = vst [vmem:[%s10553_s29 + $0x14b8] sm:$0xff] %v1505_v23 }
 0x15e   : > { %1508 = vst [vmem:[%s10553_s29 + $0x14c0] sm:$0xff] %v1507_v24  ;;  %1510 = vst [vmem:[%s10553_s29 + $0x14c8] sm:$0xff] %v1509_v25  ;;  %v1511_v26 = vld [vmem:[%s10545_s28 + $0x29a0] sm:$0xff]  ;;  %v1513_v27 = vld [vmem:[%s10545_s28 + $0x29a8] sm:$0xff] }
 0x15f   : > { %v1515_v28 = vld [vmem:[%s10545_s28 + $0x29c0] sm:$0xff]  ;;  %1512 = vst [vmem:[%s10553_s29 + $0x14d0] sm:$0xff] %v1511_v26  ;;  %1514 = vst [vmem:[%s10553_s29 + $0x14d8] sm:$0xff] %v1513_v27  ;;  %v1517_v29 = vld [vmem:[%s10545_s28 + $0x29c8] sm:$0xff] }
 0x160   : > { %1516 = vst [vmem:[%s10553_s29 + $0x14e0] sm:$0xff] %v1515_v28  ;;  %v1519_v30 = vld [vmem:[%s10545_s28 + $0x29e0] sm:$0xff]  ;;  %v1521_v31 = vld [vmem:[%s10545_s28 + $0x29e8] sm:$0xff]  ;;  %1518 = vst [vmem:[%s10553_s29 + $0x14e8] sm:$0xff] %v1517_v29 }
 0x161   : > { %1520 = vst [vmem:[%s10553_s29 + $0x14f0] sm:$0xff] %v1519_v30  ;;  %1522 = vst [vmem:[%s10553_s29 + $0x14f8] sm:$0xff] %v1521_v31  ;;  %v1523_v32 = vld [vmem:[%s10545_s28 + $0x2a00] sm:$0xff]  ;;  %v1525_v33 = vld [vmem:[%s10545_s28 + $0x2a08] sm:$0xff] }
 0x162   : > { %v1527_v34 = vld [vmem:[%s10545_s28 + $0x2a20] sm:$0xff]  ;;  %1524 = vst [vmem:[%s10553_s29 + $0x1500] sm:$0xff] %v1523_v32  ;;  %1526 = vst [vmem:[%s10553_s29 + $0x1508] sm:$0xff] %v1525_v33  ;;  %v1529_v35 = vld [vmem:[%s10545_s28 + $0x2a28] sm:$0xff] }
 0x163   : > { %1528 = vst [vmem:[%s10553_s29 + $0x1510] sm:$0xff] %v1527_v34  ;;  %v1531_v36 = vld [vmem:[%s10545_s28 + $0x2a40] sm:$0xff]  ;;  %v1533_v37 = vld [vmem:[%s10545_s28 + $0x2a48] sm:$0xff]  ;;  %1530 = vst [vmem:[%s10553_s29 + $0x1518] sm:$0xff] %v1529_v35 }
 0x164   : > { %1532 = vst [vmem:[%s10553_s29 + $0x1520] sm:$0xff] %v1531_v36  ;;  %1534 = vst [vmem:[%s10553_s29 + $0x1528] sm:$0xff] %v1533_v37  ;;  %v1535_v38 = vld [vmem:[%s10545_s28 + $0x2a60] sm:$0xff]  ;;  %v1537_v39 = vld [vmem:[%s10545_s28 + $0x2a68] sm:$0xff] }
 0x165   : > { %v1539_v40 = vld [vmem:[%s10545_s28 + $0x2a80] sm:$0xff]  ;;  %1536 = vst [vmem:[%s10553_s29 + $0x1530] sm:$0xff] %v1535_v38  ;;  %1538 = vst [vmem:[%s10553_s29 + $0x1538] sm:$0xff] %v1537_v39  ;;  %v1541_v41 = vld [vmem:[%s10545_s28 + $0x2a88] sm:$0xff] }
 0x166   : > { %1540 = vst [vmem:[%s10553_s29 + $0x1540] sm:$0xff] %v1539_v40  ;;  %v1543_v42 = vld [vmem:[%s10545_s28 + $0x2aa0] sm:$0xff]  ;;  %v1545_v43 = vld [vmem:[%s10545_s28 + $0x2aa8] sm:$0xff]  ;;  %1542 = vst [vmem:[%s10553_s29 + $0x1548] sm:$0xff] %v1541_v41 }
 0x167   : > { %1544 = vst [vmem:[%s10553_s29 + $0x1550] sm:$0xff] %v1543_v42  ;;  %1546 = vst [vmem:[%s10553_s29 + $0x1558] sm:$0xff] %v1545_v43  ;;  %v1547_v44 = vld [vmem:[%s10545_s28 + $0x2ac0] sm:$0xff]  ;;  %v1549_v45 = vld [vmem:[%s10545_s28 + $0x2ac8] sm:$0xff] }
 0x168   : > { %v1551_v46 = vld [vmem:[%s10545_s28 + $0x2ae0] sm:$0xff]  ;;  %1548 = vst [vmem:[%s10553_s29 + $0x1560] sm:$0xff] %v1547_v44  ;;  %1550 = vst [vmem:[%s10553_s29 + $0x1568] sm:$0xff] %v1549_v45  ;;  %v1553_v47 = vld [vmem:[%s10545_s28 + $0x2ae8] sm:$0xff] }
 0x169   : > { %1552 = vst [vmem:[%s10553_s29 + $0x1570] sm:$0xff] %v1551_v46  ;;  %v1555_v48 = vld [vmem:[%s10545_s28 + $0x2b00] sm:$0xff]  ;;  %v1557_v49 = vld [vmem:[%s10545_s28 + $0x2b08] sm:$0xff]  ;;  %1554 = vst [vmem:[%s10553_s29 + $0x1578] sm:$0xff] %v1553_v47 }
 0x16a   : > { %1556 = vst [vmem:[%s10553_s29 + $0x1580] sm:$0xff] %v1555_v48  ;;  %1558 = vst [vmem:[%s10553_s29 + $0x1588] sm:$0xff] %v1557_v49  ;;  %v1559_v50 = vld [vmem:[%s10545_s28 + $0x2b20] sm:$0xff]  ;;  %v1561_v51 = vld [vmem:[%s10545_s28 + $0x2b28] sm:$0xff] }
 0x16b   : > { %v1563_v52 = vld [vmem:[%s10545_s28 + $0x2b40] sm:$0xff]  ;;  %1560 = vst [vmem:[%s10553_s29 + $0x1590] sm:$0xff] %v1559_v50  ;;  %1562 = vst [vmem:[%s10553_s29 + $0x1598] sm:$0xff] %v1561_v51  ;;  %v1565_v53 = vld [vmem:[%s10545_s28 + $0x2b48] sm:$0xff] }
 0x16c   : > { %1564 = vst [vmem:[%s10553_s29 + $0x15a0] sm:$0xff] %v1563_v52  ;;  %v1567_v54 = vld [vmem:[%s10545_s28 + $0x2b60] sm:$0xff]  ;;  %v1569_v55 = vld [vmem:[%s10545_s28 + $0x2b68] sm:$0xff]  ;;  %1566 = vst [vmem:[%s10553_s29 + $0x15a8] sm:$0xff] %v1565_v53 }
 0x16d   : > { %1568 = vst [vmem:[%s10553_s29 + $0x15b0] sm:$0xff] %v1567_v54  ;;  %1570 = vst [vmem:[%s10553_s29 + $0x15b8] sm:$0xff] %v1569_v55  ;;  %v1571_v56 = vld [vmem:[%s10545_s28 + $0x2b80] sm:$0xff]  ;;  %v1573_v57 = vld [vmem:[%s10545_s28 + $0x2b88] sm:$0xff] }
 0x16e   : > { %v1575_v58 = vld [vmem:[%s10545_s28 + $0x2ba0] sm:$0xff]  ;;  %1572 = vst [vmem:[%s10553_s29 + $0x15c0] sm:$0xff] %v1571_v56  ;;  %1574 = vst [vmem:[%s10553_s29 + $0x15c8] sm:$0xff] %v1573_v57  ;;  %v1577_v59 = vld [vmem:[%s10545_s28 + $0x2ba8] sm:$0xff] }
 0x16f   : > { %1576 = vst [vmem:[%s10553_s29 + $0x15d0] sm:$0xff] %v1575_v58  ;;  %v1579_v60 = vld [vmem:[%s10545_s28 + $0x2bc0] sm:$0xff]  ;;  %v1581_v61 = vld [vmem:[%s10545_s28 + $0x2bc8] sm:$0xff]  ;;  %1578 = vst [vmem:[%s10553_s29 + $0x15d8] sm:$0xff] %v1577_v59 }
 0x170   : > { %1580 = vst [vmem:[%s10553_s29 + $0x15e0] sm:$0xff] %v1579_v60  ;;  %1582 = vst [vmem:[%s10553_s29 + $0x15e8] sm:$0xff] %v1581_v61  ;;  %v1583_v62 = vld [vmem:[%s10545_s28 + $0x2be0] sm:$0xff]  ;;  %v1585_v63 = vld [vmem:[%s10545_s28 + $0x2be8] sm:$0xff] }
 0x171   : > { %v1587_v0 = vld [vmem:[%s10545_s28 + $0x2c00] sm:$0xff]  ;;  %1584 = vst [vmem:[%s10553_s29 + $0x15f0] sm:$0xff] %v1583_v62  ;;  %1586 = vst [vmem:[%s10553_s29 + $0x15f8] sm:$0xff] %v1585_v63  ;;  %v1589_v1 = vld [vmem:[%s10545_s28 + $0x2c08] sm:$0xff] }
 0x172   : > { %1588 = vst [vmem:[%s10553_s29 + $0x1600] sm:$0xff] %v1587_v0  ;;  %v1591_v2 = vld [vmem:[%s10545_s28 + $0x2c20] sm:$0xff]  ;;  %v1593_v3 = vld [vmem:[%s10545_s28 + $0x2c28] sm:$0xff]  ;;  %1590 = vst [vmem:[%s10553_s29 + $0x1608] sm:$0xff] %v1589_v1 }
 0x173   : > { %1592 = vst [vmem:[%s10553_s29 + $0x1610] sm:$0xff] %v1591_v2  ;;  %1594 = vst [vmem:[%s10553_s29 + $0x1618] sm:$0xff] %v1593_v3  ;;  %v1595_v4 = vld [vmem:[%s10545_s28 + $0x2c40] sm:$0xff]  ;;  %v1597_v5 = vld [vmem:[%s10545_s28 + $0x2c48] sm:$0xff] }
 0x174   : > { %v1599_v6 = vld [vmem:[%s10545_s28 + $0x2c60] sm:$0xff]  ;;  %1596 = vst [vmem:[%s10553_s29 + $0x1620] sm:$0xff] %v1595_v4  ;;  %1598 = vst [vmem:[%s10553_s29 + $0x1628] sm:$0xff] %v1597_v5  ;;  %v1601_v7 = vld [vmem:[%s10545_s28 + $0x2c68] sm:$0xff] }
 0x175   : > { %1600 = vst [vmem:[%s10553_s29 + $0x1630] sm:$0xff] %v1599_v6  ;;  %v1603_v8 = vld [vmem:[%s10545_s28 + $0x2c80] sm:$0xff]  ;;  %v1605_v9 = vld [vmem:[%s10545_s28 + $0x2c88] sm:$0xff]  ;;  %1602 = vst [vmem:[%s10553_s29 + $0x1638] sm:$0xff] %v1601_v7 }
 0x176   : > { %1604 = vst [vmem:[%s10553_s29 + $0x1640] sm:$0xff] %v1603_v8  ;;  %1606 = vst [vmem:[%s10553_s29 + $0x1648] sm:$0xff] %v1605_v9  ;;  %v1607_v10 = vld [vmem:[%s10545_s28 + $0x2ca0] sm:$0xff]  ;;  %v1609_v11 = vld [vmem:[%s10545_s28 + $0x2ca8] sm:$0xff] }
 0x177   : > { %v1611_v12 = vld [vmem:[%s10545_s28 + $0x2cc0] sm:$0xff]  ;;  %1608 = vst [vmem:[%s10553_s29 + $0x1650] sm:$0xff] %v1607_v10  ;;  %1610 = vst [vmem:[%s10553_s29 + $0x1658] sm:$0xff] %v1609_v11  ;;  %v1613_v13 = vld [vmem:[%s10545_s28 + $0x2cc8] sm:$0xff] }
 0x178   : > { %1612 = vst [vmem:[%s10553_s29 + $0x1660] sm:$0xff] %v1611_v12  ;;  %v1615_v14 = vld [vmem:[%s10545_s28 + $0x2ce0] sm:$0xff]  ;;  %v1617_v15 = vld [vmem:[%s10545_s28 + $0x2ce8] sm:$0xff]  ;;  %1614 = vst [vmem:[%s10553_s29 + $0x1668] sm:$0xff] %v1613_v13 }
 0x179   : > { %1616 = vst [vmem:[%s10553_s29 + $0x1670] sm:$0xff] %v1615_v14  ;;  %1618 = vst [vmem:[%s10553_s29 + $0x1678] sm:$0xff] %v1617_v15  ;;  %v1619_v16 = vld [vmem:[%s10545_s28 + $0x2d00] sm:$0xff]  ;;  %v1621_v17 = vld [vmem:[%s10545_s28 + $0x2d08] sm:$0xff] }
 0x17a   : > { %v1623_v18 = vld [vmem:[%s10545_s28 + $0x2d20] sm:$0xff]  ;;  %1620 = vst [vmem:[%s10553_s29 + $0x1680] sm:$0xff] %v1619_v16  ;;  %1622 = vst [vmem:[%s10553_s29 + $0x1688] sm:$0xff] %v1621_v17  ;;  %v1625_v19 = vld [vmem:[%s10545_s28 + $0x2d28] sm:$0xff] }
 0x17b   : > { %1624 = vst [vmem:[%s10553_s29 + $0x1690] sm:$0xff] %v1623_v18  ;;  %v1627_v20 = vld [vmem:[%s10545_s28 + $0x2d40] sm:$0xff]  ;;  %v1629_v21 = vld [vmem:[%s10545_s28 + $0x2d48] sm:$0xff]  ;;  %1626 = vst [vmem:[%s10553_s29 + $0x1698] sm:$0xff] %v1625_v19 }
 0x17c   : > { %1628 = vst [vmem:[%s10553_s29 + $0x16a0] sm:$0xff] %v1627_v20  ;;  %1630 = vst [vmem:[%s10553_s29 + $0x16a8] sm:$0xff] %v1629_v21  ;;  %v1631_v22 = vld [vmem:[%s10545_s28 + $0x2d60] sm:$0xff]  ;;  %v1633_v23 = vld [vmem:[%s10545_s28 + $0x2d68] sm:$0xff] }
 0x17d   : > { %v1635_v24 = vld [vmem:[%s10545_s28 + $0x2d80] sm:$0xff]  ;;  %1632 = vst [vmem:[%s10553_s29 + $0x16b0] sm:$0xff] %v1631_v22  ;;  %1634 = vst [vmem:[%s10553_s29 + $0x16b8] sm:$0xff] %v1633_v23  ;;  %v1637_v25 = vld [vmem:[%s10545_s28 + $0x2d88] sm:$0xff] }
 0x17e   : > { %1636 = vst [vmem:[%s10553_s29 + $0x16c0] sm:$0xff] %v1635_v24  ;;  %v1639_v26 = vld [vmem:[%s10545_s28 + $0x2da0] sm:$0xff]  ;;  %v1641_v27 = vld [vmem:[%s10545_s28 + $0x2da8] sm:$0xff]  ;;  %1638 = vst [vmem:[%s10553_s29 + $0x16c8] sm:$0xff] %v1637_v25 }
 0x17f   : > { %1640 = vst [vmem:[%s10553_s29 + $0x16d0] sm:$0xff] %v1639_v26  ;;  %1642 = vst [vmem:[%s10553_s29 + $0x16d8] sm:$0xff] %v1641_v27  ;;  %v1643_v28 = vld [vmem:[%s10545_s28 + $0x2dc0] sm:$0xff]  ;;  %v1645_v29 = vld [vmem:[%s10545_s28 + $0x2dc8] sm:$0xff] }
 0x180   : > { %v1647_v30 = vld [vmem:[%s10545_s28 + $0x2de0] sm:$0xff]  ;;  %1644 = vst [vmem:[%s10553_s29 + $0x16e0] sm:$0xff] %v1643_v28  ;;  %1646 = vst [vmem:[%s10553_s29 + $0x16e8] sm:$0xff] %v1645_v29  ;;  %v1649_v31 = vld [vmem:[%s10545_s28 + $0x2de8] sm:$0xff] }
 0x181   : > { %1648 = vst [vmem:[%s10553_s29 + $0x16f0] sm:$0xff] %v1647_v30  ;;  %v1651_v32 = vld [vmem:[%s10545_s28 + $0x2e00] sm:$0xff]  ;;  %v1653_v33 = vld [vmem:[%s10545_s28 + $0x2e08] sm:$0xff]  ;;  %1650 = vst [vmem:[%s10553_s29 + $0x16f8] sm:$0xff] %v1649_v31 }
 0x182   : > { %1652 = vst [vmem:[%s10553_s29 + $0x1700] sm:$0xff] %v1651_v32  ;;  %1654 = vst [vmem:[%s10553_s29 + $0x1708] sm:$0xff] %v1653_v33  ;;  %v1655_v34 = vld [vmem:[%s10545_s28 + $0x2e20] sm:$0xff]  ;;  %v1657_v35 = vld [vmem:[%s10545_s28 + $0x2e28] sm:$0xff] }
 0x183   : > { %v1659_v36 = vld [vmem:[%s10545_s28 + $0x2e40] sm:$0xff]  ;;  %1656 = vst [vmem:[%s10553_s29 + $0x1710] sm:$0xff] %v1655_v34  ;;  %1658 = vst [vmem:[%s10553_s29 + $0x1718] sm:$0xff] %v1657_v35  ;;  %v1661_v37 = vld [vmem:[%s10545_s28 + $0x2e48] sm:$0xff] }
 0x184   : > { %1660 = vst [vmem:[%s10553_s29 + $0x1720] sm:$0xff] %v1659_v36  ;;  %v1663_v38 = vld [vmem:[%s10545_s28 + $0x2e60] sm:$0xff]  ;;  %v1665_v39 = vld [vmem:[%s10545_s28 + $0x2e68] sm:$0xff]  ;;  %1662 = vst [vmem:[%s10553_s29 + $0x1728] sm:$0xff] %v1661_v37 }
 0x185   : > { %1664 = vst [vmem:[%s10553_s29 + $0x1730] sm:$0xff] %v1663_v38  ;;  %1666 = vst [vmem:[%s10553_s29 + $0x1738] sm:$0xff] %v1665_v39  ;;  %v1667_v40 = vld [vmem:[%s10545_s28 + $0x2e80] sm:$0xff]  ;;  %v1669_v41 = vld [vmem:[%s10545_s28 + $0x2e88] sm:$0xff] }
 0x186   : > { %v1671_v42 = vld [vmem:[%s10545_s28 + $0x2ea0] sm:$0xff]  ;;  %1668 = vst [vmem:[%s10553_s29 + $0x1740] sm:$0xff] %v1667_v40  ;;  %1670 = vst [vmem:[%s10553_s29 + $0x1748] sm:$0xff] %v1669_v41  ;;  %v1673_v43 = vld [vmem:[%s10545_s28 + $0x2ea8] sm:$0xff] }
 0x187   : > { %1672 = vst [vmem:[%s10553_s29 + $0x1750] sm:$0xff] %v1671_v42  ;;  %v1675_v44 = vld [vmem:[%s10545_s28 + $0x2ec0] sm:$0xff]  ;;  %v1677_v45 = vld [vmem:[%s10545_s28 + $0x2ec8] sm:$0xff]  ;;  %1674 = vst [vmem:[%s10553_s29 + $0x1758] sm:$0xff] %v1673_v43 }
 0x188   : > { %1676 = vst [vmem:[%s10553_s29 + $0x1760] sm:$0xff] %v1675_v44  ;;  %1678 = vst [vmem:[%s10553_s29 + $0x1768] sm:$0xff] %v1677_v45  ;;  %v1679_v46 = vld [vmem:[%s10545_s28 + $0x2ee0] sm:$0xff]  ;;  %v1681_v47 = vld [vmem:[%s10545_s28 + $0x2ee8] sm:$0xff] }
 0x189   : > { %v1683_v48 = vld [vmem:[%s10545_s28 + $0x2f00] sm:$0xff]  ;;  %1680 = vst [vmem:[%s10553_s29 + $0x1770] sm:$0xff] %v1679_v46  ;;  %1682 = vst [vmem:[%s10553_s29 + $0x1778] sm:$0xff] %v1681_v47  ;;  %v1685_v49 = vld [vmem:[%s10545_s28 + $0x2f08] sm:$0xff] }
 0x18a   : > { %1684 = vst [vmem:[%s10553_s29 + $0x1780] sm:$0xff] %v1683_v48  ;;  %v1687_v50 = vld [vmem:[%s10545_s28 + $0x2f20] sm:$0xff]  ;;  %v1689_v51 = vld [vmem:[%s10545_s28 + $0x2f28] sm:$0xff]  ;;  %1686 = vst [vmem:[%s10553_s29 + $0x1788] sm:$0xff] %v1685_v49 }
 0x18b   : > { %1688 = vst [vmem:[%s10553_s29 + $0x1790] sm:$0xff] %v1687_v50  ;;  %1690 = vst [vmem:[%s10553_s29 + $0x1798] sm:$0xff] %v1689_v51  ;;  %v1691_v52 = vld [vmem:[%s10545_s28 + $0x2f40] sm:$0xff]  ;;  %v1693_v53 = vld [vmem:[%s10545_s28 + $0x2f48] sm:$0xff] }
 0x18c   : > { %v1695_v54 = vld [vmem:[%s10545_s28 + $0x2f60] sm:$0xff]  ;;  %1692 = vst [vmem:[%s10553_s29 + $0x17a0] sm:$0xff] %v1691_v52  ;;  %1694 = vst [vmem:[%s10553_s29 + $0x17a8] sm:$0xff] %v1693_v53  ;;  %v1697_v55 = vld [vmem:[%s10545_s28 + $0x2f68] sm:$0xff] }
 0x18d   : > { %1696 = vst [vmem:[%s10553_s29 + $0x17b0] sm:$0xff] %v1695_v54  ;;  %v1699_v56 = vld [vmem:[%s10545_s28 + $0x2f80] sm:$0xff]  ;;  %v1701_v57 = vld [vmem:[%s10545_s28 + $0x2f88] sm:$0xff]  ;;  %1698 = vst [vmem:[%s10553_s29 + $0x17b8] sm:$0xff] %v1697_v55 }
 0x18e   : > { %1700 = vst [vmem:[%s10553_s29 + $0x17c0] sm:$0xff] %v1699_v56  ;;  %1702 = vst [vmem:[%s10553_s29 + $0x17c8] sm:$0xff] %v1701_v57  ;;  %v1703_v58 = vld [vmem:[%s10545_s28 + $0x2fa0] sm:$0xff]  ;;  %v1705_v59 = vld [vmem:[%s10545_s28 + $0x2fa8] sm:$0xff] }
 0x18f   : > { %v1707_v60 = vld [vmem:[%s10545_s28 + $0x2fc0] sm:$0xff]  ;;  %1704 = vst [vmem:[%s10553_s29 + $0x17d0] sm:$0xff] %v1703_v58  ;;  %1706 = vst [vmem:[%s10553_s29 + $0x17d8] sm:$0xff] %v1705_v59  ;;  %v1709_v61 = vld [vmem:[%s10545_s28 + $0x2fc8] sm:$0xff] }
 0x190   : > { %1708 = vst [vmem:[%s10553_s29 + $0x17e0] sm:$0xff] %v1707_v60  ;;  %v1711_v62 = vld [vmem:[%s10545_s28 + $0x2fe0] sm:$0xff]  ;;  %v1713_v63 = vld [vmem:[%s10545_s28 + $0x2fe8] sm:$0xff]  ;;  %1710 = vst [vmem:[%s10553_s29 + $0x17e8] sm:$0xff] %v1709_v61 }
 0x191   : > { %1712 = vst [vmem:[%s10553_s29 + $0x17f0] sm:$0xff] %v1711_v62  ;;  %1714 = vst [vmem:[%s10553_s29 + $0x17f8] sm:$0xff] %v1713_v63  ;;  %v1715_v0 = vld [vmem:[%s10545_s28 + $0x3000] sm:$0xff]  ;;  %v1717_v1 = vld [vmem:[%s10545_s28 + $0x3008] sm:$0xff] }
 0x192   : > { %v1719_v2 = vld [vmem:[%s10545_s28 + $0x3020] sm:$0xff]  ;;  %1716 = vst [vmem:[%s10553_s29 + $0x1800] sm:$0xff] %v1715_v0  ;;  %1718 = vst [vmem:[%s10553_s29 + $0x1808] sm:$0xff] %v1717_v1  ;;  %v1721_v3 = vld [vmem:[%s10545_s28 + $0x3028] sm:$0xff] }
 0x193   : > { %1720 = vst [vmem:[%s10553_s29 + $0x1810] sm:$0xff] %v1719_v2  ;;  %v1723_v4 = vld [vmem:[%s10545_s28 + $0x3040] sm:$0xff]  ;;  %v1725_v5 = vld [vmem:[%s10545_s28 + $0x3048] sm:$0xff]  ;;  %1722 = vst [vmem:[%s10553_s29 + $0x1818] sm:$0xff] %v1721_v3 }
 0x194   : > { %1724 = vst [vmem:[%s10553_s29 + $0x1820] sm:$0xff] %v1723_v4  ;;  %1726 = vst [vmem:[%s10553_s29 + $0x1828] sm:$0xff] %v1725_v5  ;;  %v1727_v6 = vld [vmem:[%s10545_s28 + $0x3060] sm:$0xff]  ;;  %v1729_v7 = vld [vmem:[%s10545_s28 + $0x3068] sm:$0xff] }
 0x195   : > { %v1731_v8 = vld [vmem:[%s10545_s28 + $0x3080] sm:$0xff]  ;;  %1728 = vst [vmem:[%s10553_s29 + $0x1830] sm:$0xff] %v1727_v6  ;;  %1730 = vst [vmem:[%s10553_s29 + $0x1838] sm:$0xff] %v1729_v7  ;;  %v1733_v9 = vld [vmem:[%s10545_s28 + $0x3088] sm:$0xff] }
 0x196   : > { %1732 = vst [vmem:[%s10553_s29 + $0x1840] sm:$0xff] %v1731_v8  ;;  %v1735_v10 = vld [vmem:[%s10545_s28 + $0x30a0] sm:$0xff]  ;;  %v1737_v11 = vld [vmem:[%s10545_s28 + $0x30a8] sm:$0xff]  ;;  %1734 = vst [vmem:[%s10553_s29 + $0x1848] sm:$0xff] %v1733_v9 }
 0x197   : > { %1736 = vst [vmem:[%s10553_s29 + $0x1850] sm:$0xff] %v1735_v10  ;;  %1738 = vst [vmem:[%s10553_s29 + $0x1858] sm:$0xff] %v1737_v11  ;;  %v1739_v12 = vld [vmem:[%s10545_s28 + $0x30c0] sm:$0xff]  ;;  %v1741_v13 = vld [vmem:[%s10545_s28 + $0x30c8] sm:$0xff] }
 0x198   : > { %v1743_v14 = vld [vmem:[%s10545_s28 + $0x30e0] sm:$0xff]  ;;  %1740 = vst [vmem:[%s10553_s29 + $0x1860] sm:$0xff] %v1739_v12  ;;  %1742 = vst [vmem:[%s10553_s29 + $0x1868] sm:$0xff] %v1741_v13  ;;  %v1745_v15 = vld [vmem:[%s10545_s28 + $0x30e8] sm:$0xff] }
 0x199   : > { %1744 = vst [vmem:[%s10553_s29 + $0x1870] sm:$0xff] %v1743_v14  ;;  %1746 = vst [vmem:[%s10553_s29 + $0x1878] sm:$0xff] %v1745_v15 }
 0x19a PF: > { %p8246_p5 = scmp.ge.s32.totalorder %s10480_s17, 1  ;;  %p1768_p6 = scmp.lt.s32.totalorder %s10480_s17, 3 }
 0x19c   : > { %p1769_p7 = pnand %p8246_p5, %p1768_p6 }
 0x19d   : > { %s1775_s30 = sand.u32 (!%p1769_p7), 1, %s10472_s15   ;;  %v2615_v16 = vlaneseq (!%p1769_p7)  ;;  %v10482_v17 = vmov (!%p1769_p7), 1966171168   ;;  %v12125_v20 = vld [vmem:[%s13117_s0] sm:$0xff] (!%p1769_p7)  ;;  %s8248_s15 = sshll.u32 (!%p1769_p7), %s10525_s18, 6  ;;  %vm6744_vm0 = vcmask (!%p1769_p7), 523264  }
 0x19e   : > { %1772 = sbr.rel (%p1769_p7) target bundleno = 1641 (0x669), region = 55  ;;  %v2641_v18 = vunpack.c.l.s4 (!%p1769_p7), %v10482_v17  ;;  %p1815_p8 = scmp.lt.s32.totalorder (!%p1769_p7), %s8248_s15, 127  ;;  %vm8158_vm1 = vcmask (!%p1769_p7), 74752  }
 0x19f   : > { %s9218_s5 = smul.u32 (!%p1769_p7), 6272, %s1775_s30  ;;  %v12120_v19 = vshrl.u32 (!%p1769_p7), %v2615_v16, 7  ;;  %s8247_s26 = sshll.u32 (!%p1769_p7), %s10525_s18, 2 }
 0x1a0   : > { %v2642_v21 = vunpack.c.0.s8 (!%p1769_p7), %v2641_v18  ;;  %p1810_p9 = scmp.lt.s32.totalorder (!%p1769_p7), %s8247_s26, 7  ;;  %p1820_p10 = scmp.lt.s32.totalorder (!%p1769_p7), %s10525_s18, 1 }
 0x1a1   : > { %s12127_s8 = scalar_lea.vmem (!%p1769_p7), [#allocation2], %s9218_s5 }
 0x1a2   : > { %v9245_v22 = vld [vmem:[%s12127_s8 + $0x4] ss:$16 sps:$4 sm:$0xff] (!%p1769_p7)   ;;  %v9247_v23 = vld [vmem:[%s12127_s8 + $0xc] ss:$16 sps:$4 sm:$0xff] (!%p1769_p7)   ;;  %v12132_v24 = vsub.s32 (!%p1769_p7), %v2642_v21, %v12120_v19  ;;  %v9249_v25 = vld [vmem:[%s12127_s8] ss:$16 sps:$4 sm:$0xff] (!%p1769_p7)  }
 0x1a3   : > { %6748 = vmatprep.subr.bf16.mxu0 (!%p1769_p7), %v9245_v22  ;;  %v9250_v26 = vld [vmem:[%s12127_s8 + $0x8] ss:$16 sps:$4 sm:$0xff] (!%p1769_p7)   ;;  %7281 = vmatprep.subr.bf16.mxu1 (!%p1769_p7), %v9247_v23  ;;  %v9251_v27 = vld [vmem:[%s12127_s8 + $0x24] ss:$16 sps:$4 sm:$0xff] (!%p1769_p7)   ;;  %v9253_v29 = vld [vmem:[%s12127_s8 + $0x2c] ss:$16 sps:$4 sm:$0xff] (!%p1769_p7)  }
 0x1a4   : > { %v12139_v28 = vrot.slane (!%p1769_p7), %v12125_v20, %v12132_v24  ;;  %6749 = vmatpush1.bf16.msra.mxu0 (!%p1769_p7), %v9249_v25  ;;  %7282 = vmatpush1.bf16.msra.mxu1 (!%p1769_p7), %v9250_v26  ;;  %v9255_v30 = vld [vmem:[%s12127_s8 + $0x20] ss:$16 sps:$4 sm:$0xff] (!%p1769_p7)   ;;  %v9256_v31 = vld [vmem:[%s12127_s8 + $0x28] ss:$16 sps:$4 sm:$0xff] (!%p1769_p7)   ;;  %v9257_v33 = vld [vmem:[%s12127_s8 + $0x44] ss:$16 sps:$4 sm:$0xff] (!%p1769_p7)  }
 0x1a5   : > { %6750 = vmatprep.subr.bf16.mxu0 %v9251_v27  ;;  %7283 = vmatprep.subr.bf16.mxu1 %v9253_v29  ;;  %v9259_v34 = vld [vmem:[%s12127_s8 + $0x4c] ss:$16 sps:$4 sm:$0xff]   ;;  %v9261_v35 = vld [vmem:[%s12127_s8 + $0x40] ss:$16 sps:$4 sm:$0xff]   ;;  %v9262_v36 = vld [vmem:[%s12127_s8 + $0x48] ss:$16 sps:$4 sm:$0xff]  }
 0x1a6   : > { %v2654_v32 = vcombine.high %v12139_v28, %v12139_v28  ;;  %v9263_v38 = vld [vmem:[%s12127_s8 + $0x64] ss:$16 sps:$4 sm:$0xff]   ;;  %v9265_v39 = vld [vmem:[%s12127_s8 + $0x6c] ss:$16 sps:$4 sm:$0xff]   ;;  %v9267_v40 = vld [vmem:[%s12127_s8 + $0x60] ss:$16 sps:$4 sm:$0xff]  }
 0x1a7   : > { %v9268_v41 = vld [vmem:[%s12127_s8 + $0x68] ss:$16 sps:$4 sm:$0xff]   ;;  %v9269_v42 = vld [vmem:[%s12127_s8 + $0x84] ss:$16 sps:$4 sm:$0xff]   ;;  %v9271_v43 = vld [vmem:[%s12127_s8 + $0x8c] ss:$16 sps:$4 sm:$0xff]  }
 0x1a8   : > { %v12151_v37 = vrot.slane %v2654_v32, %v12132_v24  ;;  %6751 = vmatpush1.bf16.msra.mxu0 %v9255_v30  ;;  %7284 = vmatpush1.bf16.msra.mxu1 %v9256_v31  ;;  %v9273_v44 = vld [vmem:[%s12127_s8 + $0x80] ss:$16 sps:$4 sm:$0xff]   ;;  %v9274_v45 = vld [vmem:[%s12127_s8 + $0x88] ss:$16 sps:$4 sm:$0xff]   ;;  %v9275_v46 = vld [vmem:[%s12127_s8 + $0xa4] ss:$16 sps:$4 sm:$0xff]  }
 0x1a9   : > { %6752 = vmatprep.subr.bf16.mxu0 %v9257_v33  ;;  %7285 = vmatprep.subr.bf16.mxu1 %v9259_v34  ;;  %v9277_v47 = vld [vmem:[%s12127_s8 + $0xac] ss:$16 sps:$4 sm:$0xff]   ;;  %v9279_v48 = vld [vmem:[%s12127_s8 + $0xa0] ss:$16 sps:$4 sm:$0xff]   ;;  %v9280_v49 = vld [vmem:[%s12127_s8 + $0xa8] ss:$16 sps:$4 sm:$0xff]   ;;  %v12213_v34 = vrot.slane %v12139_v28, %v12132_v24 }
 0x1aa   : > { %6780 = vmatprep.mubr.bf16.mxu0 %v12151_v37  ;;  %7313 = vmatprep.mubr.bf16.mxu1 %v12151_v37  ;;  %v9281_v50 = vld [vmem:[%s12127_s8 + $0xc4] ss:$16 sps:$4 sm:$0xff]   ;;  %v9283_v51 = vld [vmem:[%s12127_s8 + $0xcc] ss:$16 sps:$4 sm:$0xff]   ;;  %v9285_v52 = vld [vmem:[%s12127_s8 + $0xc0] ss:$16 sps:$4 sm:$0xff]  }
 0x1ab   : > { %v9286_v53 = vld [vmem:[%s12127_s8 + $0xc8] ss:$16 sps:$4 sm:$0xff]   ;;  %v9287_v54 = vld [vmem:[%s12127_s8 + $0xe4] ss:$16 sps:$4 sm:$0xff]   ;;  %v9289_v55 = vld [vmem:[%s12127_s8 + $0xec] ss:$16 sps:$4 sm:$0xff]  }
 0x1ac   : > { %6753 = vmatpush1.bf16.msra.mxu0 %v9261_v35  ;;  %7286 = vmatpush1.bf16.msra.mxu1 %v9262_v36  ;;  %v9291_v56 = vld [vmem:[%s12127_s8 + $0xe0] ss:$16 sps:$4 sm:$0xff]   ;;  %v9292_v57 = vld [vmem:[%s12127_s8 + $0xe8] ss:$16 sps:$4 sm:$0xff]   ;;  %v9293_v58 = vld [vmem:[%s12127_s8 + $0x104] ss:$16 sps:$4 sm:$0xff]  }
 0x1ad   : > { %6754 = vmatprep.subr.bf16.mxu0 %v9263_v38  ;;  %7287 = vmatprep.subr.bf16.mxu1 %v9265_v39  ;;  %v9295_v59 = vld [vmem:[%s12127_s8 + $0x10c] ss:$16 sps:$4 sm:$0xff]   ;;  %v9297_v60 = vld [vmem:[%s12127_s8 + $0x100] ss:$16 sps:$4 sm:$0xff]   ;;  %v9298_v61 = vld [vmem:[%s12127_s8 + $0x108] ss:$16 sps:$4 sm:$0xff]   ;;  %v2686_v38 = vcombine.high %v12151_v37, %v12151_v37 }
 0x1ae   : > { %v9299_v62 = vld [vmem:[%s12127_s8 + $0x124] ss:$16 sps:$4 sm:$0xff]   ;;  %v9301_v63 = vld [vmem:[%s12127_s8 + $0x12c] ss:$16 sps:$4 sm:$0xff]   ;;  %v9303_v0 = vld [vmem:[%s12127_s8 + $0x120] ss:$16 sps:$4 sm:$0xff]  }
 0x1af   : > { %v9304_v1 = vld [vmem:[%s12127_s8 + $0x128] ss:$16 sps:$4 sm:$0xff]   ;;  %v9305_v2 = vld [vmem:[%s12127_s8 + $0x144] ss:$16 sps:$4 sm:$0xff]   ;;  %v9307_v3 = vld [vmem:[%s12127_s8 + $0x14c] ss:$16 sps:$4 sm:$0xff]  }
 0x1b0   : > { %6755 = vmatpush1.bf16.msra.mxu0 %v9267_v40  ;;  %7288 = vmatpush1.bf16.msra.mxu1 %v9268_v41  ;;  %v9309_v4 = vld [vmem:[%s12127_s8 + $0x140] ss:$16 sps:$4 sm:$0xff]   ;;  %v9310_v5 = vld [vmem:[%s12127_s8 + $0x148] ss:$16 sps:$4 sm:$0xff]   ;;  %v9311_v6 = vld [vmem:[%s12127_s8 + $0x164] ss:$16 sps:$4 sm:$0xff]  }
 0x1b1   : > { %6756 = vmatprep.subr.bf16.mxu0 %v9269_v42  ;;  %7289 = vmatprep.subr.bf16.mxu1 %v9271_v43  ;;  %v9313_v7 = vld [vmem:[%s12127_s8 + $0x16c] ss:$16 sps:$4 sm:$0xff]   ;;  %v9315_v8 = vld [vmem:[%s12127_s8 + $0x160] ss:$16 sps:$4 sm:$0xff]   ;;  %v9316_v9 = vld [vmem:[%s12127_s8 + $0x168] ss:$16 sps:$4 sm:$0xff]  }
 0x1b2   : > { %v9317_v10 = vld [vmem:[%s12127_s8 + $0x184] ss:$16 sps:$4 sm:$0xff]   ;;  %v9319_v11 = vld [vmem:[%s12127_s8 + $0x18c] ss:$16 sps:$4 sm:$0xff]   ;;  %v9321_v12 = vld [vmem:[%s12127_s8 + $0x180] ss:$16 sps:$4 sm:$0xff]  }
 0x1b3   : > { %v9322_v13 = vld [vmem:[%s12127_s8 + $0x188] ss:$16 sps:$4 sm:$0xff]   ;;  %v9323_v14 = vld [vmem:[%s12127_s8 + $0x1a4] ss:$16 sps:$4 sm:$0xff]   ;;  %v9325_v15 = vld [vmem:[%s12127_s8 + $0x1ac] ss:$16 sps:$4 sm:$0xff]  }
 0x1b4   : > { %6757 = vmatpush1.bf16.msra.mxu0 %v9273_v44  ;;  %7290 = vmatpush1.bf16.msra.mxu1 %v9274_v45  ;;  %v9327_v16 = vld [vmem:[%s12127_s8 + $0x1a0] ss:$16 sps:$4 sm:$0xff]   ;;  %v9328_v17 = vld [vmem:[%s12127_s8 + $0x1a8] ss:$16 sps:$4 sm:$0xff]   ;;  %v9329_v18 = vld [vmem:[%s12127_s8 + $0x1c4] ss:$16 sps:$4 sm:$0xff]  }
 0x1b5   : > { %6758 = vmatprep.subr.bf16.mxu0 %v9275_v46  ;;  %7291 = vmatprep.subr.bf16.mxu1 %v9277_v47  ;;  %v9331_v21 = vld [vmem:[%s12127_s8 + $0x1cc] ss:$16 sps:$4 sm:$0xff]   ;;  %v9333_v22 = vld [vmem:[%s12127_s8 + $0x1c0] ss:$16 sps:$4 sm:$0xff]   ;;  %v9334_v23 = vld [vmem:[%s12127_s8 + $0x1c8] ss:$16 sps:$4 sm:$0xff]  }
 0x1b6   : > { %v9335_v25 = vld [vmem:[%s12127_s8 + $0x1e4] ss:$16 sps:$4 sm:$0xff]   ;;  %v9337_v26 = vld [vmem:[%s12127_s8 + $0x1ec] ss:$16 sps:$4 sm:$0xff]   ;;  %v9339_v27 = vld [vmem:[%s12127_s8 + $0x1e0] ss:$16 sps:$4 sm:$0xff]  }
 0x1b7   : > { %v9340_v29 = vld [vmem:[%s12127_s8 + $0x1e8] ss:$16 sps:$4 sm:$0xff]   ;;  %v9343_v30 = vld [vmem:[%s12127_s8 + $0x204] ss:$16 sps:$4 sm:$0xff]   ;;  %v9346_v31 = vld [vmem:[%s12127_s8 + $0x20c] ss:$16 sps:$4 sm:$0xff]  }
 0x1b8   : > { %6759 = vmatpush1.bf16.msra.mxu0 %v9279_v48  ;;  %7292 = vmatpush1.bf16.msra.mxu1 %v9280_v49  ;;  %v9341_v32 = vld [vmem:[%s12127_s8 + $0x200] ss:$16 sps:$4 sm:$0xff]   ;;  %v9344_v33 = vld [vmem:[%s12127_s8 + $0x208] ss:$16 sps:$4 sm:$0xff]   ;;  %v9349_v35 = vld [vmem:[%s12127_s8 + $0x224] ss:$16 sps:$4 sm:$0xff]  }
 0x1b9   : > { %6760 = vmatprep.subr.bf16.mxu0 %v9281_v50  ;;  %7293 = vmatprep.subr.bf16.mxu1 %v9283_v51  ;;  %v9352_v36 = vld [vmem:[%s12127_s8 + $0x22c] ss:$16 sps:$4 sm:$0xff]   ;;  %v9347_v39 = vld [vmem:[%s12127_s8 + $0x220] ss:$16 sps:$4 sm:$0xff]   ;;  %v9350_v28 = vld [vmem:[%s12127_s8 + $0x228] ss:$16 sps:$4 sm:$0xff]  }
 0x1ba   : > { %v9355_v40 = vld [vmem:[%s12127_s8 + $0x244] ss:$16 sps:$4 sm:$0xff]   ;;  %v9358_v41 = vld [vmem:[%s12127_s8 + $0x24c] ss:$16 sps:$4 sm:$0xff]   ;;  %v9353_v37 = vld [vmem:[%s12127_s8 + $0x240] ss:$16 sps:$4 sm:$0xff]  }
 0x1bb   : > { %v9356_v42 = vld [vmem:[%s12127_s8 + $0x248] ss:$16 sps:$4 sm:$0xff]   ;;  %v9361_v43 = vld [vmem:[%s12127_s8 + $0x264] ss:$16 sps:$4 sm:$0xff]   ;;  %v9364_v44 = vld [vmem:[%s12127_s8 + $0x26c] ss:$16 sps:$4 sm:$0xff]  }
 0x1bc   : > { %6761 = vmatpush1.bf16.msra.mxu0 %v9285_v52  ;;  %7294 = vmatpush1.bf16.msra.mxu1 %v9286_v53  ;;  %v9359_v45 = vld [vmem:[%s12127_s8 + $0x260] ss:$16 sps:$4 sm:$0xff]   ;;  %v9362_v46 = vld [vmem:[%s12127_s8 + $0x268] ss:$16 sps:$4 sm:$0xff]   ;;  %v9367_v47 = vld [vmem:[%s12127_s8 + $0x284] ss:$16 sps:$4 sm:$0xff]  }
 0x1bd   : > { %6762 = vmatprep.subr.bf16.mxu0 %v9287_v54  ;;  %7295 = vmatprep.subr.bf16.mxu1 %v9289_v55  ;;  %v9370_v48 = vld [vmem:[%s12127_s8 + $0x28c] ss:$16 sps:$4 sm:$0xff]   ;;  %v9365_v49 = vld [vmem:[%s12127_s8 + $0x280] ss:$16 sps:$4 sm:$0xff]   ;;  %v9368_v50 = vld [vmem:[%s12127_s8 + $0x288] ss:$16 sps:$4 sm:$0xff]  }
 0x1be   : > { %v9373_v51 = vld [vmem:[%s12127_s8 + $0x2a4] ss:$16 sps:$4 sm:$0xff]   ;;  %v9376_v52 = vld [vmem:[%s12127_s8 + $0x2ac] ss:$16 sps:$4 sm:$0xff]   ;;  %v9371_v53 = vld [vmem:[%s12127_s8 + $0x2a0] ss:$16 sps:$4 sm:$0xff]  }
 0x1bf   : > { %v9374_v54 = vld [vmem:[%s12127_s8 + $0x2a8] ss:$16 sps:$4 sm:$0xff]   ;;  %v9379_v55 = vld [vmem:[%s12127_s8 + $0x2c4] ss:$16 sps:$4 sm:$0xff]   ;;  %s13126_s15 = smov (!%p1815_p8, %s8248_s15), 127  ;;  %s13128_s26 = smov (!%p1810_p9, %s8247_s26), 7 }
 0x1c0   : > { %6763 = vmatpush1.bf16.msra.mxu0 %v9291_v56  ;;  %7296 = vmatpush1.bf16.msra.mxu1 %v9292_v57  ;;  %v9382_v56 = vld [vmem:[%s12127_s8 + $0x2cc] ss:$16 sps:$4 sm:$0xff]   ;;  %v9377_v57 = vld [vmem:[%s12127_s8 + $0x2c0] ss:$16 sps:$4 sm:$0xff]   ;;  %s8249_s17 = sshll.u32 %s13126_s15, 2  ;;  %s1812_s29 = scalar_lea.vmem %s13119_s2, %s13128_s26 }
 0x1c1   : > { %6764 = vmatprep.subr.bf16.mxu0 %v9293_v58  ;;  %7297 = vmatprep.subr.bf16.mxu1 %v9295_v59  ;;  %v9380_v58 = vld [vmem:[%s12127_s8 + $0x2c8] ss:$16 sps:$4 sm:$0xff]   ;;  %v9385_v59 = vld [vmem:[%s12127_s8 + $0x2e4] ss:$16 sps:$4 sm:$0xff]   ;;  %s12932_s23 = scalar_lea.vmem %s13120_s3, %s8249_s17  ;;  %s13130_s18 = smov (!%p1820_p10, %s10525_s18), 1 }
 0x1c2   : > { %s8250_s30 = sshll.u32 %s13130_s18, 1 }
 0x1c3   : > { %s1823_s7 = scalar_lea.vmem %s13121_s4, %s8250_s30 }
 0x1c4   : > { %6765 = vmatpush1.bf16.msra.mxu0 %v9297_v60  ;;  %7298 = vmatpush1.bf16.msra.mxu1 %v9298_v61  ;;  %v9388_v60 = vld [vmem:[%s12127_s8 + $0x2ec] ss:$16 sps:$4 sm:$0xff]   ;;  %v9383_v61 = vld [vmem:[%s12127_s8 + $0x2e0] ss:$16 sps:$4 sm:$0xff]  }
 0x1c5   : > { %6766 = vmatprep.subr.bf16.mxu0 %v9299_v62  ;;  %7299 = vmatprep.subr.bf16.mxu1 %v9301_v63  ;;  %v9386_v62 = vld [vmem:[%s12127_s8 + $0x2e8] ss:$16 sps:$4 sm:$0xff]   ;;  %v9391_v63 = vld [vmem:[%s12127_s8 + $0x304] ss:$16 sps:$4 sm:$0xff]  }
 0x1c8   : > { %6767 = vmatpush1.bf16.msra.mxu0 %v9303_v0  ;;  %7300 = vmatpush1.bf16.msra.mxu1 %v9304_v1  ;;  %v9394_v0 = vld [vmem:[%s12127_s8 + $0x30c] ss:$16 sps:$4 sm:$0xff]   ;;  %v9389_v1 = vld [vmem:[%s12127_s8 + $0x300] ss:$16 sps:$4 sm:$0xff]  }
 0x1c9   : > { %6768 = vmatprep.subr.bf16.mxu0 %v9305_v2  ;;  %7301 = vmatprep.subr.bf16.mxu1 %v9307_v3  ;;  %v9392_v2 = vld [vmem:[%s12127_s8 + $0x308] ss:$16 sps:$4 sm:$0xff]   ;;  %v9397_v3 = vld [vmem:[%s12127_s8 + $0x324] ss:$16 sps:$4 sm:$0xff]  }
 0x1cc   : > { %6769 = vmatpush1.bf16.msra.mxu0 %v9309_v4  ;;  %7302 = vmatpush1.bf16.msra.mxu1 %v9310_v5  ;;  %v9400_v4 = vld [vmem:[%s12127_s8 + $0x32c] ss:$16 sps:$4 sm:$0xff]   ;;  %v9395_v5 = vld [vmem:[%s12127_s8 + $0x320] ss:$16 sps:$4 sm:$0xff]  }
 0x1cd   : > { %6770 = vmatprep.subr.bf16.mxu0 %v9311_v6  ;;  %7303 = vmatprep.subr.bf16.mxu1 %v9313_v7  ;;  %v9398_v6 = vld [vmem:[%s12127_s8 + $0x328] ss:$16 sps:$4 sm:$0xff]   ;;  %v9403_v7 = vld [vmem:[%s12127_s8 + $0x344] ss:$16 sps:$4 sm:$0xff]  }
 0x1d0   : > { %6771 = vmatpush1.bf16.msra.mxu0 %v9315_v8  ;;  %7304 = vmatpush1.bf16.msra.mxu1 %v9316_v9  ;;  %v9406_v8 = vld [vmem:[%s12127_s8 + $0x34c] ss:$16 sps:$4 sm:$0xff]   ;;  %v9401_v9 = vld [vmem:[%s12127_s8 + $0x340] ss:$16 sps:$4 sm:$0xff]  }
 0x1d1   : > { %6772 = vmatprep.subr.bf16.mxu0 %v9317_v10  ;;  %7305 = vmatprep.subr.bf16.mxu1 %v9319_v11  ;;  %v9404_v10 = vld [vmem:[%s12127_s8 + $0x348] ss:$16 sps:$4 sm:$0xff]   ;;  %v9409_v11 = vld [vmem:[%s12127_s8 + $0x364] ss:$16 sps:$4 sm:$0xff]  }
 0x1d4   : > { %6773 = vmatpush1.bf16.msra.mxu0 %v9321_v12  ;;  %7306 = vmatpush1.bf16.msra.mxu1 %v9322_v13  ;;  %v9412_v12 = vld [vmem:[%s12127_s8 + $0x36c] ss:$16 sps:$4 sm:$0xff]   ;;  %v9407_v13 = vld [vmem:[%s12127_s8 + $0x360] ss:$16 sps:$4 sm:$0xff]  }
 0x1d5   : > { %6774 = vmatprep.subr.bf16.mxu0 %v9323_v14  ;;  %7307 = vmatprep.subr.bf16.mxu1 %v9325_v15  ;;  %v9410_v14 = vld [vmem:[%s12127_s8 + $0x368] ss:$16 sps:$4 sm:$0xff]   ;;  %v9415_v15 = vld [vmem:[%s12127_s8 + $0x384] ss:$16 sps:$4 sm:$0xff]  }
 0x1d8   : > { %6775 = vmatpush1.bf16.msra.mxu0 %v9327_v16  ;;  %7308 = vmatpush1.bf16.msra.mxu1 %v9328_v17  ;;  %v9418_v16 = vld [vmem:[%s12127_s8 + $0x38c] ss:$16 sps:$4 sm:$0xff]   ;;  %v9413_v17 = vld [vmem:[%s12127_s8 + $0x380] ss:$16 sps:$4 sm:$0xff]  }
 0x1d9   : > { %6776 = vmatprep.subr.bf16.mxu0 %v9329_v18  ;;  %7309 = vmatprep.subr.bf16.mxu1 %v9331_v21  ;;  %v9416_v18 = vld [vmem:[%s12127_s8 + $0x388] ss:$16 sps:$4 sm:$0xff]   ;;  %v9421_v21 = vld [vmem:[%s12127_s8 + $0x3a4] ss:$16 sps:$4 sm:$0xff]  }
 0x1dc   : > { %6777 = vmatpush1.bf16.msra.mxu0 %v9333_v22  ;;  %7310 = vmatpush1.bf16.msra.mxu1 %v9334_v23  ;;  %v9424_v22 = vld [vmem:[%s12127_s8 + $0x3ac] ss:$16 sps:$4 sm:$0xff]   ;;  %v9419_v23 = vld [vmem:[%s12127_s8 + $0x3a0] ss:$16 sps:$4 sm:$0xff]  }
 0x1dd   : > { %6778 = vmatprep.subr.bf16.mxu0 %v9335_v25  ;;  %7311 = vmatprep.subr.bf16.mxu1 %v9337_v26  ;;  %v9422_v25 = vld [vmem:[%s12127_s8 + $0x3a8] ss:$16 sps:$4 sm:$0xff]   ;;  %v9427_v26 = vld [vmem:[%s12127_s8 + $0x3c4] ss:$16 sps:$4 sm:$0xff]  }
 0x1e0   : > { %6779 = vmatpush1.bf16.msra.mxu0 %v9339_v27  ;;  %7312 = vmatpush1.bf16.msra.mxu1 %v9340_v29  ;;  %v9430_v27 = vld [vmem:[%s12127_s8 + $0x3cc] ss:$16 sps:$4 sm:$0xff]   ;;  %v2639_v29 = vcombine.high %v12125_v20, %v12125_v20  ;;  %v9439_v20 = vld [vmem:[%s12127_s8 + $0x404] ss:$16 sps:$4 sm:$0xff]  }
 0x1e1   : > { %6789 = vmatprep.subr.bf16.mxu0 %v9343_v30  ;;  %7322 = vmatprep.subr.bf16.mxu1 %v9346_v31  ;;  %v9425_v30 = vld [vmem:[%s12127_s8 + $0x3c0] ss:$16 sps:$4 sm:$0xff]   ;;  %v9428_v31 = vld [vmem:[%s12127_s8 + $0x3c8] ss:$16 sps:$4 sm:$0xff]  }
 0x1e3   : > { %6781 = vmatmul.mubr.bf16.vlgmr.msra.gmra.mrb[0].mxu0 %v12213_v34  ;;  %7314 = vmatmul.mubr.bf16.vlgmr.msra.gmra.mrb[0].mxu1 %v12213_v34 }
 0x1e4   : > { %6790 = vmatpush1.bf16.msra.mxu0 %v9341_v32  ;;  %7323 = vmatpush1.bf16.msra.mxu1 %v9344_v33  ;;  %v9433_v32 = vld [vmem:[%s12127_s8 + $0x3e4] ss:$16 sps:$4 sm:$0xff]   ;;  %v9436_v33 = vld [vmem:[%s12127_s8 + $0x3ec] ss:$16 sps:$4 sm:$0xff]  }
 0x1e5   : > { %6791 = vmatprep.subr.bf16.mxu0 %v9349_v35  ;;  %7324 = vmatprep.subr.bf16.mxu1 %v9352_v36  ;;  %v12280_v35 = vrot.slane %v2639_v29, %v12132_v24  ;;  %v9431_v36 = vld [vmem:[%s12127_s8 + $0x3e0] ss:$16 sps:$4 sm:$0xff]   ;;  %v9512_v29 = vld [vmem:[%s12127_s8 + $0x588] ss:$16 sps:$4 sm:$0xff]  }
 0x1e6   : > { %6821 = vmatprep.mubr.bf16.mxu0 %v2686_v38  ;;  %7354 = vmatprep.mubr.bf16.mxu1 %v2686_v38  ;;  %v9434_v38 = vld [vmem:[%s12127_s8 + $0x3e8] ss:$16 sps:$4 sm:$0xff]  }
 0x1e8   : > { %6792 = vmatpush1.bf16.msra.mxu0 %v9347_v39  ;;  %7325 = vmatpush1.bf16.msra.mxu1 %v9350_v28  ;;  %v9442_v39 = vld [vmem:[%s12127_s8 + $0x40c] ss:$16 sps:$4 sm:$0xff]   ;;  %v2655_v28 = vcombine.high %v12280_v35, %v12280_v35 }
 0x1e9   : > { %6793 = vmatprep.subr.bf16.mxu0 %v9355_v40  ;;  %7326 = vmatprep.subr.bf16.mxu1 %v9358_v41  ;;  %v9437_v40 = vld [vmem:[%s12127_s8 + $0x400] ss:$16 sps:$4 sm:$0xff]   ;;  %v9440_v41 = vld [vmem:[%s12127_s8 + $0x408] ss:$16 sps:$4 sm:$0xff]  }
 0x1ec   : > { %6794 = vmatpush1.bf16.msra.mxu0 %v9353_v37  ;;  %7327 = vmatpush1.bf16.msra.mxu1 %v9356_v42  ;;  %v2684_v37 = vcombine.high %v12213_v34, %v12213_v34  ;;  %v9445_v42 = vld [vmem:[%s12127_s8 + $0x424] ss:$16 sps:$4 sm:$0xff]  }
 0x1ed   : > { %6795 = vmatprep.subr.bf16.mxu0 %v9361_v43  ;;  %7328 = vmatprep.subr.bf16.mxu1 %v9364_v44  ;;  %v9448_v43 = vld [vmem:[%s12127_s8 + $0x42c] ss:$16 sps:$4 sm:$0xff]   ;;  %v12295_v44 = vrot.slane %v2655_v28, %v12132_v24  ;;  %v9451_v34 = vld [vmem:[%s12127_s8 + $0x444] ss:$16 sps:$4 sm:$0xff]  }
 0x1ee   : > { %v9529_v28 = vld [vmem:[%s12127_s8 + $0x5e4] ss:$16 sps:$4 sm:$0xff]  }
 0x1f0   : > { %6796 = vmatpush1.bf16.msra.mxu0 %v9359_v45  ;;  %7329 = vmatpush1.bf16.msra.mxu1 %v9362_v46  ;;  %v9443_v45 = vld [vmem:[%s12127_s8 + $0x420] ss:$16 sps:$4 sm:$0xff]   ;;  %v9446_v46 = vld [vmem:[%s12127_s8 + $0x428] ss:$16 sps:$4 sm:$0xff]  }
 0x1f1   : > { %6797 = vmatprep.subr.bf16.mxu0 %v9367_v47  ;;  %7330 = vmatprep.subr.bf16.mxu1 %v9370_v48  ;;  %v9454_v47 = vld [vmem:[%s12127_s8 + $0x44c] ss:$16 sps:$4 sm:$0xff]   ;;  %v9449_v48 = vld [vmem:[%s12127_s8 + $0x440] ss:$16 sps:$4 sm:$0xff]  }
 0x1f4   : > { %6798 = vmatpush1.bf16.msra.mxu0 %v9365_v49  ;;  %7331 = vmatpush1.bf16.msra.mxu1 %v9368_v50  ;;  %v9452_v49 = vld [vmem:[%s12127_s8 + $0x448] ss:$16 sps:$4 sm:$0xff]   ;;  %v9457_v50 = vld [vmem:[%s12127_s8 + $0x464] ss:$16 sps:$4 sm:$0xff]  }
 0x1f5   : > { %6799 = vmatprep.subr.bf16.mxu0 %v9373_v51  ;;  %7332 = vmatprep.subr.bf16.mxu1 %v9376_v52  ;;  %v9460_v51 = vld [vmem:[%s12127_s8 + $0x46c] ss:$16 sps:$4 sm:$0xff]   ;;  %v9455_v52 = vld [vmem:[%s12127_s8 + $0x460] ss:$16 sps:$4 sm:$0xff]  }
 0x1f8   : > { %6800 = vmatpush1.bf16.msra.mxu0 %v9371_v53  ;;  %7333 = vmatpush1.bf16.msra.mxu1 %v9374_v54  ;;  %v9458_v53 = vld [vmem:[%s12127_s8 + $0x468] ss:$16 sps:$4 sm:$0xff]   ;;  %v9463_v54 = vld [vmem:[%s12127_s8 + $0x484] ss:$16 sps:$4 sm:$0xff]  }
 0x1f9   : > { %6801 = vmatprep.subr.bf16.mxu0 %v9379_v55  ;;  %7334 = vmatprep.subr.bf16.mxu1 %v9382_v56  ;;  %v9466_v55 = vld [vmem:[%s12127_s8 + $0x48c] ss:$16 sps:$4 sm:$0xff]   ;;  %v9461_v56 = vld [vmem:[%s12127_s8 + $0x480] ss:$16 sps:$4 sm:$0xff]  }
 0x1fc   : > { %6802 = vmatpush1.bf16.msra.mxu0 %v9377_v57  ;;  %7335 = vmatpush1.bf16.msra.mxu1 %v9380_v58  ;;  %v9464_v57 = vld [vmem:[%s12127_s8 + $0x488] ss:$16 sps:$4 sm:$0xff]   ;;  %v9469_v58 = vld [vmem:[%s12127_s8 + $0x4a4] ss:$16 sps:$4 sm:$0xff]  }
 0x1fd   : > { %6803 = vmatprep.subr.bf16.mxu0 %v9385_v59  ;;  %7336 = vmatprep.subr.bf16.mxu1 %v9388_v60  ;;  %v9472_v59 = vld [vmem:[%s12127_s8 + $0x4ac] ss:$16 sps:$4 sm:$0xff]   ;;  %v9467_v60 = vld [vmem:[%s12127_s8 + $0x4a0] ss:$16 sps:$4 sm:$0xff]  }
 0x200   : > { %6804 = vmatpush1.bf16.msra.mxu0 %v9383_v61  ;;  %7337 = vmatpush1.bf16.msra.mxu1 %v9386_v62  ;;  %v9470_v61 = vld [vmem:[%s12127_s8 + $0x4a8] ss:$16 sps:$4 sm:$0xff]   ;;  %v9475_v62 = vld [vmem:[%s12127_s8 + $0x4c4] ss:$16 sps:$4 sm:$0xff]  }
 0x201   : > { %6805 = vmatprep.subr.bf16.mxu0 %v9391_v63  ;;  %7338 = vmatprep.subr.bf16.mxu1 %v9394_v0  ;;  %v9478_v63 = vld [vmem:[%s12127_s8 + $0x4cc] ss:$16 sps:$4 sm:$0xff]   ;;  %v9473_v0 = vld [vmem:[%s12127_s8 + $0x4c0] ss:$16 sps:$4 sm:$0xff]  }
 0x204   : > { %6806 = vmatpush1.bf16.msra.mxu0 %v9389_v1  ;;  %7339 = vmatpush1.bf16.msra.mxu1 %v9392_v2  ;;  %v9476_v1 = vld [vmem:[%s12127_s8 + $0x4c8] ss:$16 sps:$4 sm:$0xff]   ;;  %v9481_v2 = vld [vmem:[%s12127_s8 + $0x4e4] ss:$16 sps:$4 sm:$0xff]  }
 0x205   : > { %6807 = vmatprep.subr.bf16.mxu0 %v9397_v3  ;;  %7340 = vmatprep.subr.bf16.mxu1 %v9400_v4  ;;  %v9484_v3 = vld [vmem:[%s12127_s8 + $0x4ec] ss:$16 sps:$4 sm:$0xff]   ;;  %v9479_v4 = vld [vmem:[%s12127_s8 + $0x4e0] ss:$16 sps:$4 sm:$0xff]  }
 0x208   : > { %6808 = vmatpush1.bf16.msra.mxu0 %v9395_v5  ;;  %7341 = vmatpush1.bf16.msra.mxu1 %v9398_v6  ;;  %v9482_v5 = vld [vmem:[%s12127_s8 + $0x4e8] ss:$16 sps:$4 sm:$0xff]   ;;  %v9487_v6 = vld [vmem:[%s12127_s8 + $0x504] ss:$16 sps:$4 sm:$0xff]  }
 0x209   : > { %6809 = vmatprep.subr.bf16.mxu0 %v9403_v7  ;;  %7342 = vmatprep.subr.bf16.mxu1 %v9406_v8  ;;  %v9490_v7 = vld [vmem:[%s12127_s8 + $0x50c] ss:$16 sps:$4 sm:$0xff]   ;;  %v9485_v8 = vld [vmem:[%s12127_s8 + $0x500] ss:$16 sps:$4 sm:$0xff]  }
 0x20c   : > { %6810 = vmatpush1.bf16.msra.mxu0 %v9401_v9  ;;  %7343 = vmatpush1.bf16.msra.mxu1 %v9404_v10  ;;  %v9488_v9 = vld [vmem:[%s12127_s8 + $0x508] ss:$16 sps:$4 sm:$0xff]   ;;  %v9493_v10 = vld [vmem:[%s12127_s8 + $0x524] ss:$16 sps:$4 sm:$0xff]  }
 0x20d   : > { %6811 = vmatprep.subr.bf16.mxu0 %v9409_v11  ;;  %7344 = vmatprep.subr.bf16.mxu1 %v9412_v12  ;;  %v9496_v11 = vld [vmem:[%s12127_s8 + $0x52c] ss:$16 sps:$4 sm:$0xff]   ;;  %v9491_v12 = vld [vmem:[%s12127_s8 + $0x520] ss:$16 sps:$4 sm:$0xff]  }
 0x210   : > { %6812 = vmatpush1.bf16.msra.mxu0 %v9407_v13  ;;  %7345 = vmatpush1.bf16.msra.mxu1 %v9410_v14  ;;  %v9494_v13 = vld [vmem:[%s12127_s8 + $0x528] ss:$16 sps:$4 sm:$0xff]   ;;  %v9499_v14 = vld [vmem:[%s12127_s8 + $0x544] ss:$16 sps:$4 sm:$0xff]  }
 0x211   : > { %6813 = vmatprep.subr.bf16.mxu0 %v9415_v15  ;;  %7346 = vmatprep.subr.bf16.mxu1 %v9418_v16  ;;  %v9502_v15 = vld [vmem:[%s12127_s8 + $0x54c] ss:$16 sps:$4 sm:$0xff]   ;;  %v9497_v16 = vld [vmem:[%s12127_s8 + $0x540] ss:$16 sps:$4 sm:$0xff]  }
 0x214   : > { %6814 = vmatpush1.bf16.msra.mxu0 %v9413_v17  ;;  %7347 = vmatpush1.bf16.msra.mxu1 %v9416_v18  ;;  %v9500_v17 = vld [vmem:[%s12127_s8 + $0x548] ss:$16 sps:$4 sm:$0xff]   ;;  %v9505_v18 = vld [vmem:[%s12127_s8 + $0x564] ss:$16 sps:$4 sm:$0xff]  }
 0x215   : > { %6815 = vmatprep.subr.bf16.mxu0 %v9421_v21  ;;  %7348 = vmatprep.subr.bf16.mxu1 %v9424_v22  ;;  %v9508_v21 = vld [vmem:[%s12127_s8 + $0x56c] ss:$16 sps:$4 sm:$0xff]   ;;  %v9503_v22 = vld [vmem:[%s12127_s8 + $0x560] ss:$16 sps:$4 sm:$0xff]  }
 0x218   : > { %6816 = vmatpush1.bf16.msra.mxu0 %v9419_v23  ;;  %7349 = vmatpush1.bf16.msra.mxu1 %v9422_v25  ;;  %v9506_v23 = vld [vmem:[%s12127_s8 + $0x568] ss:$16 sps:$4 sm:$0xff]   ;;  %v9511_v25 = vld [vmem:[%s12127_s8 + $0x584] ss:$16 sps:$4 sm:$0xff]  }
 0x219   : > { %6817 = vmatprep.subr.bf16.mxu0 %v9427_v26  ;;  %7350 = vmatprep.subr.bf16.mxu1 %v9430_v27  ;;  %v9514_v26 = vld [vmem:[%s12127_s8 + $0x58c] ss:$16 sps:$4 sm:$0xff]   ;;  %v9509_v27 = vld [vmem:[%s12127_s8 + $0x580] ss:$16 sps:$4 sm:$0xff]  }
 0x21c   : > { %6818 = vmatpush1.bf16.msra.mxu0 %v9425_v30  ;;  %7351 = vmatpush1.bf16.msra.mxu1 %v9428_v31  ;;  %v9517_v30 = vld [vmem:[%s12127_s8 + $0x5a4] ss:$16 sps:$4 sm:$0xff]   ;;  %v9520_v31 = vld [vmem:[%s12127_s8 + $0x5ac] ss:$16 sps:$4 sm:$0xff]  }
 0x21d   : > { %6819 = vmatprep.subr.bf16.mxu0 %v9433_v32  ;;  %7352 = vmatprep.subr.bf16.mxu1 %v9436_v33  ;;  %v9515_v32 = vld [vmem:[%s12127_s8 + $0x5a0] ss:$16 sps:$4 sm:$0xff]   ;;  %v9518_v33 = vld [vmem:[%s12127_s8 + $0x5a8] ss:$16 sps:$4 sm:$0xff]  }
 0x220   : > { %6820 = vmatpush1.bf16.msra.mxu0 %v9431_v36  ;;  %7353 = vmatpush1.bf16.msra.mxu1 %v9434_v38  ;;  %v9523_v36 = vld [vmem:[%s12127_s8 + $0x5c4] ss:$16 sps:$4 sm:$0xff]   ;;  %v9526_v38 = vld [vmem:[%s12127_s8 + $0x5cc] ss:$16 sps:$4 sm:$0xff]  }
 0x221   : > { %6830 = vmatprep.subr.bf16.mxu0 %v9439_v20  ;;  %7363 = vmatprep.subr.bf16.mxu1 %v9442_v39  ;;  %v9521_v20 = vld [vmem:[%s12127_s8 + $0x5c0] ss:$16 sps:$4 sm:$0xff]   ;;  %v9524_v39 = vld [vmem:[%s12127_s8 + $0x5c8] ss:$16 sps:$4 sm:$0xff]  }
 0x223   : > { %6822 = vmatmul.mubr.bf16.vlgmr.msra.gmra.mrb[0].mxu0 %v2684_v37  ;;  %7355 = vmatmul.mubr.bf16.vlgmr.msra.gmra.mrb[0].mxu1 %v2684_v37  ;;  %v9530_v37 = vld [vmem:[%s12127_s8 + $0x5e8] ss:$16 sps:$4 sm:$0xff]  }
 0x224   : > { %6831 = vmatpush1.bf16.msra.mxu0 %v9437_v40  ;;  %7364 = vmatpush1.bf16.msra.mxu1 %v9440_v41  ;;  %v9532_v40 = vld [vmem:[%s12127_s8 + $0x5ec] ss:$16 sps:$4 sm:$0xff]   ;;  %v9527_v41 = vld [vmem:[%s12127_s8 + $0x5e0] ss:$16 sps:$4 sm:$0xff]  }
 0x225   : > { %6832 = vmatprep.subr.bf16.mxu0 %v9445_v42  ;;  %7365 = vmatprep.subr.bf16.mxu1 %v9448_v43  ;;  %v9536_v42 = vld [vmem:[%s12127_s8 + $0x604] ss:$16 sps:$4 sm:$0xff]   ;;  %v9539_v43 = vld [vmem:[%s12127_s8 + $0x60c] ss:$16 sps:$4 sm:$0xff]  }
 0x226   : > { %6862 = vmatprep.mubr.bf16.mxu0 %v12295_v44  ;;  %7395 = vmatprep.mubr.bf16.mxu1 %v12295_v44 }
 0x228   : > { %6833 = vmatpush1.bf16.msra.mxu0 %v9443_v45  ;;  %7366 = vmatpush1.bf16.msra.mxu1 %v9446_v46  ;;  %v9534_v45 = vld [vmem:[%s12127_s8 + $0x600] ss:$16 sps:$4 sm:$0xff]   ;;  %v9537_v46 = vld [vmem:[%s12127_s8 + $0x608] ss:$16 sps:$4 sm:$0xff]  }
 0x229   : > { %6834 = vmatprep.subr.bf16.mxu0 %v9451_v34  ;;  %7367 = vmatprep.subr.bf16.mxu1 %v9454_v47  ;;  %v12363_v34 = vrot.slane %v12280_v35, %v12132_v24  ;;  %v9542_v47 = vld [vmem:[%s12127_s8 + $0x624] ss:$16 sps:$4 sm:$0xff]   ;;  %v9543_v35 = vld [vmem:[%s12127_s8 + $0x628] ss:$16 sps:$4 sm:$0xff]  }
 0x22c   : > { %6835 = vmatpush1.bf16.msra.mxu0 %v9449_v48  ;;  %7368 = vmatpush1.bf16.msra.mxu1 %v9452_v49  ;;  %v9545_v48 = vld [vmem:[%s12127_s8 + $0x62c] ss:$16 sps:$4 sm:$0xff]   ;;  %v2687_v49 = vcombine.high %v12295_v44, %v12295_v44  ;;  %v9546_v44 = vld [vmem:[%s12127_s8 + $0x640] ss:$16 sps:$4 sm:$0xff]  }
 0x22d   : > { %6836 = vmatprep.subr.bf16.mxu0 %v9457_v50  ;;  %7369 = vmatprep.subr.bf16.mxu1 %v9460_v51  ;;  %v9540_v50 = vld [vmem:[%s12127_s8 + $0x620] ss:$16 sps:$4 sm:$0xff]   ;;  %v9548_v51 = vld [vmem:[%s12127_s8 + $0x644] ss:$16 sps:$4 sm:$0xff]  }
 0x230   : > { %6837 = vmatpush1.bf16.msra.mxu0 %v9455_v52  ;;  %7370 = vmatpush1.bf16.msra.mxu1 %v9458_v53  ;;  %v9551_v52 = vld [vmem:[%s12127_s8 + $0x64c] ss:$16 sps:$4 sm:$0xff]   ;;  %v9549_v53 = vld [vmem:[%s12127_s8 + $0x648] ss:$16 sps:$4 sm:$0xff]  }
 0x231   : > { %6838 = vmatprep.subr.bf16.mxu0 %v9463_v54  ;;  %7371 = vmatprep.subr.bf16.mxu1 %v9466_v55  ;;  %v9554_v54 = vld [vmem:[%s12127_s8 + $0x664] ss:$16 sps:$4 sm:$0xff]   ;;  %v9557_v55 = vld [vmem:[%s12127_s8 + $0x66c] ss:$16 sps:$4 sm:$0xff]  }
 0x234   : > { %6839 = vmatpush1.bf16.msra.mxu0 %v9461_v56  ;;  %7372 = vmatpush1.bf16.msra.mxu1 %v9464_v57  ;;  %v9552_v56 = vld [vmem:[%s12127_s8 + $0x660] ss:$16 sps:$4 sm:$0xff]   ;;  %v9555_v57 = vld [vmem:[%s12127_s8 + $0x668] ss:$16 sps:$4 sm:$0xff]  }
 0x235   : > { %6840 = vmatprep.subr.bf16.mxu0 %v9469_v58  ;;  %7373 = vmatprep.subr.bf16.mxu1 %v9472_v59  ;;  %v9560_v58 = vld [vmem:[%s12127_s8 + $0x684] ss:$16 sps:$4 sm:$0xff]   ;;  %v9563_v59 = vld [vmem:[%s12127_s8 + $0x68c] ss:$16 sps:$4 sm:$0xff]  }
 0x238   : > { %6841 = vmatpush1.bf16.msra.mxu0 %v9467_v60  ;;  %7374 = vmatpush1.bf16.msra.mxu1 %v9470_v61  ;;  %v9558_v60 = vld [vmem:[%s12127_s8 + $0x680] ss:$16 sps:$4 sm:$0xff]   ;;  %v9561_v61 = vld [vmem:[%s12127_s8 + $0x688] ss:$16 sps:$4 sm:$0xff]  }
 0x239   : > { %6842 = vmatprep.subr.bf16.mxu0 %v9475_v62  ;;  %7375 = vmatprep.subr.bf16.mxu1 %v9478_v63  ;;  %v9566_v62 = vld [vmem:[%s12127_s8 + $0x6a4] ss:$16 sps:$4 sm:$0xff]   ;;  %v9569_v63 = vld [vmem:[%s12127_s8 + $0x6ac] ss:$16 sps:$4 sm:$0xff]  }
 0x23c   : > { %6843 = vmatpush1.bf16.msra.mxu0 %v9473_v0  ;;  %7376 = vmatpush1.bf16.msra.mxu1 %v9476_v1  ;;  %v9564_v0 = vld [vmem:[%s12127_s8 + $0x6a0] ss:$16 sps:$4 sm:$0xff]   ;;  %v9567_v1 = vld [vmem:[%s12127_s8 + $0x6a8] ss:$16 sps:$4 sm:$0xff]  }
 0x23d   : > { %6844 = vmatprep.subr.bf16.mxu0 %v9481_v2  ;;  %7377 = vmatprep.subr.bf16.mxu1 %v9484_v3  ;;  %v9572_v2 = vld [vmem:[%s12127_s8 + $0x6c4] ss:$16 sps:$4 sm:$0xff]   ;;  %v9575_v3 = vld [vmem:[%s12127_s8 + $0x6cc] ss:$16 sps:$4 sm:$0xff]  }
 0x240   : > { %6845 = vmatpush1.bf16.msra.mxu0 %v9479_v4  ;;  %7378 = vmatpush1.bf16.msra.mxu1 %v9482_v5  ;;  %v9570_v4 = vld [vmem:[%s12127_s8 + $0x6c0] ss:$16 sps:$4 sm:$0xff]   ;;  %v9573_v5 = vld [vmem:[%s12127_s8 + $0x6c8] ss:$16 sps:$4 sm:$0xff]  }
 0x241   : > { %6846 = vmatprep.subr.bf16.mxu0 %v9487_v6  ;;  %7379 = vmatprep.subr.bf16.mxu1 %v9490_v7  ;;  %v9578_v6 = vld [vmem:[%s12127_s8 + $0x6e4] ss:$16 sps:$4 sm:$0xff]   ;;  %v9581_v7 = vld [vmem:[%s12127_s8 + $0x6ec] ss:$16 sps:$4 sm:$0xff]  }
 0x244   : > { %6847 = vmatpush1.bf16.msra.mxu0 %v9485_v8  ;;  %7380 = vmatpush1.bf16.msra.mxu1 %v9488_v9  ;;  %v9576_v8 = vld [vmem:[%s12127_s8 + $0x6e0] ss:$16 sps:$4 sm:$0xff]   ;;  %v9579_v9 = vld [vmem:[%s12127_s8 + $0x6e8] ss:$16 sps:$4 sm:$0xff]  }
 0x245   : > { %6848 = vmatprep.subr.bf16.mxu0 %v9493_v10  ;;  %7381 = vmatprep.subr.bf16.mxu1 %v9496_v11  ;;  %v9584_v10 = vld [vmem:[%s12127_s8 + $0x704] ss:$16 sps:$4 sm:$0xff]   ;;  %v9587_v11 = vld [vmem:[%s12127_s8 + $0x70c] ss:$16 sps:$4 sm:$0xff]  }
 0x248   : > { %6849 = vmatpush1.bf16.msra.mxu0 %v9491_v12  ;;  %7382 = vmatpush1.bf16.msra.mxu1 %v9494_v13  ;;  %v9582_v12 = vld [vmem:[%s12127_s8 + $0x700] ss:$16 sps:$4 sm:$0xff]   ;;  %v9585_v13 = vld [vmem:[%s12127_s8 + $0x708] ss:$16 sps:$4 sm:$0xff]  }
 0x249   : > { %6850 = vmatprep.subr.bf16.mxu0 %v9499_v14  ;;  %7383 = vmatprep.subr.bf16.mxu1 %v9502_v15  ;;  %v9590_v14 = vld [vmem:[%s12127_s8 + $0x724] ss:$16 sps:$4 sm:$0xff]   ;;  %v9593_v15 = vld [vmem:[%s12127_s8 + $0x72c] ss:$16 sps:$4 sm:$0xff]  }
 0x24c   : > { %6851 = vmatpush1.bf16.msra.mxu0 %v9497_v16  ;;  %7384 = vmatpush1.bf16.msra.mxu1 %v9500_v17  ;;  %v9588_v16 = vld [vmem:[%s12127_s8 + $0x720] ss:$16 sps:$4 sm:$0xff]   ;;  %v9591_v17 = vld [vmem:[%s12127_s8 + $0x728] ss:$16 sps:$4 sm:$0xff]  }
 0x24d   : > { %6852 = vmatprep.subr.bf16.mxu0 %v9505_v18  ;;  %7385 = vmatprep.subr.bf16.mxu1 %v9508_v21  ;;  %v9596_v18 = vld [vmem:[%s12127_s8 + $0x744] ss:$16 sps:$4 sm:$0xff]   ;;  %v9599_v21 = vld [vmem:[%s12127_s8 + $0x74c] ss:$16 sps:$4 sm:$0xff]  }
 0x250   : > { %6853 = vmatpush1.bf16.msra.mxu0 %v9503_v22  ;;  %7386 = vmatpush1.bf16.msra.mxu1 %v9506_v23  ;;  %v9594_v22 = vld [vmem:[%s12127_s8 + $0x740] ss:$16 sps:$4 sm:$0xff]   ;;  %v9597_v23 = vld [vmem:[%s12127_s8 + $0x748] ss:$16 sps:$4 sm:$0xff]  }
 0x251   : > { %6854 = vmatprep.subr.bf16.mxu0 %v9511_v25  ;;  %7387 = vmatprep.subr.bf16.mxu1 %v9514_v26  ;;  %v9602_v25 = vld [vmem:[%s12127_s8 + $0x764] ss:$16 sps:$4 sm:$0xff]   ;;  %v9605_v26 = vld [vmem:[%s12127_s8 + $0x76c] ss:$16 sps:$4 sm:$0xff]  }
 0x254   : > { %6855 = vmatpush1.bf16.msra.mxu0 %v9509_v27  ;;  %7388 = vmatpush1.bf16.msra.mxu1 %v9512_v29  ;;  %v9600_v27 = vld [vmem:[%s12127_s8 + $0x760] ss:$16 sps:$4 sm:$0xff]   ;;  %v9603_v29 = vld [vmem:[%s12127_s8 + $0x768] ss:$16 sps:$4 sm:$0xff]  }
 0x255   : > { %6856 = vmatprep.subr.bf16.mxu0 %v9517_v30  ;;  %7389 = vmatprep.subr.bf16.mxu1 %v9520_v31  ;;  %v9608_v30 = vld [vmem:[%s12127_s8 + $0x784] ss:$16 sps:$4 sm:$0xff]   ;;  %v9611_v31 = vld [vmem:[%s12127_s8 + $0x78c] ss:$16 sps:$4 sm:$0xff]  }
 0x258   : > { %6857 = vmatpush1.bf16.msra.mxu0 %v9515_v32  ;;  %7390 = vmatpush1.bf16.msra.mxu1 %v9518_v33  ;;  %v9606_v32 = vld [vmem:[%s12127_s8 + $0x780] ss:$16 sps:$4 sm:$0xff]   ;;  %v9609_v33 = vld [vmem:[%s12127_s8 + $0x788] ss:$16 sps:$4 sm:$0xff]  }
 0x259   : > { %6858 = vmatprep.subr.bf16.mxu0 %v9523_v36  ;;  %7391 = vmatprep.subr.bf16.mxu1 %v9526_v38  ;;  %v9614_v36 = vld [vmem:[%s12127_s8 + $0x7a4] ss:$16 sps:$4 sm:$0xff]   ;;  %v9617_v38 = vld [vmem:[%s12127_s8 + $0x7ac] ss:$16 sps:$4 sm:$0xff]  }
 0x25c   : > { %6859 = vmatpush1.bf16.msra.mxu0 %v9521_v20  ;;  %7392 = vmatpush1.bf16.msra.mxu1 %v9524_v39  ;;  %v9612_v20 = vld [vmem:[%s12127_s8 + $0x7a0] ss:$16 sps:$4 sm:$0xff]   ;;  %v9615_v39 = vld [vmem:[%s12127_s8 + $0x7a8] ss:$16 sps:$4 sm:$0xff]  }
 0x25d   : > { %6860 = vmatprep.subr.bf16.mxu0 %v9529_v28  ;;  %7393 = vmatprep.subr.bf16.mxu1 %v9532_v40  ;;  %v9620_v28 = vld [vmem:[%s12127_s8 + $0x7c4] ss:$16 sps:$4 sm:$0xff]   ;;  %v9623_v40 = vld [vmem:[%s12127_s8 + $0x7cc] ss:$16 sps:$4 sm:$0xff]  }
 0x260   : > { %6861 = vmatpush1.bf16.msra.mxu0 %v9527_v41  ;;  %7394 = vmatpush1.bf16.msra.mxu1 %v9530_v37  ;;  %v9618_v41 = vld [vmem:[%s12127_s8 + $0x7c0] ss:$16 sps:$4 sm:$0xff]   ;;  %v12427_v37 = vld.sshfl [vmem:[%s13117_s0 + $0x8] sm:$0xff pattern:$0x75316420] }
 0x261   : > { %6871 = vmatprep.subr.bf16.mxu0 %v9536_v42  ;;  %7404 = vmatprep.subr.bf16.mxu1 %v9539_v43  ;;  %v9621_v42 = vld [vmem:[%s12127_s8 + $0x7c8] ss:$16 sps:$4 sm:$0xff]   ;;  %v9626_v43 = vld [vmem:[%s12127_s8 + $0x7e4] ss:$16 sps:$4 sm:$0xff]  }
 0x263   : > { %6863 = vmatmul.mubr.bf16.vlgmr.msra.gmra.mrb[0].mxu0 %v12363_v34  ;;  %7396 = vmatmul.mubr.bf16.vlgmr.msra.gmra.mrb[0].mxu1 %v12363_v34 }
 0x264   : > { %6872 = vmatpush1.bf16.msra.mxu0 %v9534_v45  ;;  %7405 = vmatpush1.bf16.msra.mxu1 %v9537_v46  ;;  %v9629_v45 = vld [vmem:[%s12127_s8 + $0x7ec] ss:$16 sps:$4 sm:$0xff]   ;;  %v9624_v46 = vld [vmem:[%s12127_s8 + $0x7e0] ss:$16 sps:$4 sm:$0xff]  }
 0x265   : > { %6873 = vmatprep.subr.bf16.mxu0 %v9542_v47  ;;  %7406 = vmatprep.subr.bf16.mxu1 %v9545_v48  ;;  %v9627_v47 = vld [vmem:[%s12127_s8 + $0x7e8] ss:$16 sps:$4 sm:$0xff]   ;;  %v9632_v48 = vld [vmem:[%s12127_s8 + $0x804] ss:$16 sps:$4 sm:$0xff]  }
 0x266   : > { %6903 = vmatprep.mubr.bf16.mxu0 %v2687_v49  ;;  %7436 = vmatprep.mubr.bf16.mxu1 %v2687_v49  ;;  %v9635_v49 = vld [vmem:[%s12127_s8 + $0x80c] ss:$16 sps:$4 sm:$0xff]  }
 0x268   : > { %6874 = vmatpush1.bf16.msra.mxu0 %v9540_v50  ;;  %7407 = vmatpush1.bf16.msra.mxu1 %v9543_v35  ;;  %v2703_v50 = vcombine.high %v12427_v37, %v12427_v37  ;;  %v9630_v35 = vld [vmem:[%s12127_s8 + $0x800] ss:$16 sps:$4 sm:$0xff]  }
 0x269   : > { %6875 = vmatprep.subr.bf16.mxu0 %v9548_v51  ;;  %7408 = vmatprep.subr.bf16.mxu1 %v9551_v52  ;;  %v2685_v51 = vcombine.high %v12363_v34, %v12363_v34  ;;  %v9633_v52 = vld [vmem:[%s12127_s8 + $0x808] ss:$16 sps:$4 sm:$0xff]   ;;  %v9636_v34 = vld [vmem:[%s12127_s8 + $0x820] ss:$16 sps:$4 sm:$0xff]  }
 0x26c   : > { %6876 = vmatpush1.bf16.msra.mxu0 %v9546_v44  ;;  %7409 = vmatpush1.bf16.msra.mxu1 %v9549_v53  ;;  %v9638_v44 = vld [vmem:[%s12127_s8 + $0x824] ss:$16 sps:$4 sm:$0xff]   ;;  %v9641_v53 = vld [vmem:[%s12127_s8 + $0x82c] ss:$16 sps:$4 sm:$0xff]  }
 0x26d   : > { %6877 = vmatprep.subr.bf16.mxu0 %v9554_v54  ;;  %7410 = vmatprep.subr.bf16.mxu1 %v9557_v55  ;;  %v12445_v54 = vrot.slane %v2703_v50, %v12132_v24  ;;  %v9639_v55 = vld [vmem:[%s12127_s8 + $0x828] ss:$16 sps:$4 sm:$0xff]   ;;  %v9722_v50 = vld [vmem:[%s12127_s8 + $0x9e4] ss:$16 sps:$4 sm:$0xff]  }
 0x270   : > { %6878 = vmatpush1.bf16.msra.mxu0 %v9552_v56  ;;  %7411 = vmatpush1.bf16.msra.mxu1 %v9555_v57  ;;  %v9644_v56 = vld [vmem:[%s12127_s8 + $0x844] ss:$16 sps:$4 sm:$0xff]   ;;  %v9647_v57 = vld [vmem:[%s12127_s8 + $0x84c] ss:$16 sps:$4 sm:$0xff]  }
 0x271   : > { %6879 = vmatprep.subr.bf16.mxu0 %v9560_v58  ;;  %7412 = vmatprep.subr.bf16.mxu1 %v9563_v59  ;;  %v9642_v58 = vld [vmem:[%s12127_s8 + $0x840] ss:$16 sps:$4 sm:$0xff]   ;;  %v9645_v59 = vld [vmem:[%s12127_s8 + $0x848] ss:$16 sps:$4 sm:$0xff]  }
 0x274   : > { %6880 = vmatpush1.bf16.msra.mxu0 %v9558_v60  ;;  %7413 = vmatpush1.bf16.msra.mxu1 %v9561_v61  ;;  %v9650_v60 = vld [vmem:[%s12127_s8 + $0x864] ss:$16 sps:$4 sm:$0xff]   ;;  %v9653_v61 = vld [vmem:[%s12127_s8 + $0x86c] ss:$16 sps:$4 sm:$0xff]  }
 0x275   : > { %6881 = vmatprep.subr.bf16.mxu0 %v9566_v62  ;;  %7414 = vmatprep.subr.bf16.mxu1 %v9569_v63  ;;  %v9648_v62 = vld [vmem:[%s12127_s8 + $0x860] ss:$16 sps:$4 sm:$0xff]   ;;  %v9651_v63 = vld [vmem:[%s12127_s8 + $0x868] ss:$16 sps:$4 sm:$0xff]  }
 0x278   : > { %6882 = vmatpush1.bf16.msra.mxu0 %v9564_v0  ;;  %7415 = vmatpush1.bf16.msra.mxu1 %v9567_v1  ;;  %v9656_v0 = vld [vmem:[%s12127_s8 + $0x884] ss:$16 sps:$4 sm:$0xff]   ;;  %v9659_v1 = vld [vmem:[%s12127_s8 + $0x88c] ss:$16 sps:$4 sm:$0xff]  }
 0x279   : > { %6883 = vmatprep.subr.bf16.mxu0 %v9572_v2  ;;  %7416 = vmatprep.subr.bf16.mxu1 %v9575_v3  ;;  %v9654_v2 = vld [vmem:[%s12127_s8 + $0x880] ss:$16 sps:$4 sm:$0xff]   ;;  %v9657_v3 = vld [vmem:[%s12127_s8 + $0x888] ss:$16 sps:$4 sm:$0xff]  }
 0x27c   : > { %6884 = vmatpush1.bf16.msra.mxu0 %v9570_v4  ;;  %7417 = vmatpush1.bf16.msra.mxu1 %v9573_v5  ;;  %v9662_v4 = vld [vmem:[%s12127_s8 + $0x8a4] ss:$16 sps:$4 sm:$0xff]   ;;  %v9665_v5 = vld [vmem:[%s12127_s8 + $0x8ac] ss:$16 sps:$4 sm:$0xff]  }
 0x27d   : > { %6885 = vmatprep.subr.bf16.mxu0 %v9578_v6  ;;  %7418 = vmatprep.subr.bf16.mxu1 %v9581_v7  ;;  %v9660_v6 = vld [vmem:[%s12127_s8 + $0x8a0] ss:$16 sps:$4 sm:$0xff]   ;;  %v9663_v7 = vld [vmem:[%s12127_s8 + $0x8a8] ss:$16 sps:$4 sm:$0xff]  }
 0x280   : > { %6886 = vmatpush1.bf16.msra.mxu0 %v9576_v8  ;;  %7419 = vmatpush1.bf16.msra.mxu1 %v9579_v9  ;;  %v9668_v8 = vld [vmem:[%s12127_s8 + $0x8c4] ss:$16 sps:$4 sm:$0xff]   ;;  %v9671_v9 = vld [vmem:[%s12127_s8 + $0x8cc] ss:$16 sps:$4 sm:$0xff]  }
 0x281   : > { %6887 = vmatprep.subr.bf16.mxu0 %v9584_v10  ;;  %7420 = vmatprep.subr.bf16.mxu1 %v9587_v11  ;;  %v9666_v10 = vld [vmem:[%s12127_s8 + $0x8c0] ss:$16 sps:$4 sm:$0xff]   ;;  %v9669_v11 = vld [vmem:[%s12127_s8 + $0x8c8] ss:$16 sps:$4 sm:$0xff]  }
 0x284   : > { %6888 = vmatpush1.bf16.msra.mxu0 %v9582_v12  ;;  %7421 = vmatpush1.bf16.msra.mxu1 %v9585_v13  ;;  %v9674_v12 = vld [vmem:[%s12127_s8 + $0x8e4] ss:$16 sps:$4 sm:$0xff]   ;;  %v9677_v13 = vld [vmem:[%s12127_s8 + $0x8ec] ss:$16 sps:$4 sm:$0xff]  }
 0x285   : > { %6889 = vmatprep.subr.bf16.mxu0 %v9590_v14  ;;  %7422 = vmatprep.subr.bf16.mxu1 %v9593_v15  ;;  %v9672_v14 = vld [vmem:[%s12127_s8 + $0x8e0] ss:$16 sps:$4 sm:$0xff]   ;;  %v9675_v15 = vld [vmem:[%s12127_s8 + $0x8e8] ss:$16 sps:$4 sm:$0xff]  }
 0x288   : > { %6890 = vmatpush1.bf16.msra.mxu0 %v9588_v16  ;;  %7423 = vmatpush1.bf16.msra.mxu1 %v9591_v17  ;;  %v9680_v16 = vld [vmem:[%s12127_s8 + $0x904] ss:$16 sps:$4 sm:$0xff]   ;;  %v9683_v17 = vld [vmem:[%s12127_s8 + $0x90c] ss:$16 sps:$4 sm:$0xff]  }
 0x289   : > { %6891 = vmatprep.subr.bf16.mxu0 %v9596_v18  ;;  %7424 = vmatprep.subr.bf16.mxu1 %v9599_v21  ;;  %v9678_v18 = vld [vmem:[%s12127_s8 + $0x900] ss:$16 sps:$4 sm:$0xff]   ;;  %v9681_v21 = vld [vmem:[%s12127_s8 + $0x908] ss:$16 sps:$4 sm:$0xff]  }
 0x28c   : > { %6892 = vmatpush1.bf16.msra.mxu0 %v9594_v22  ;;  %7425 = vmatpush1.bf16.msra.mxu1 %v9597_v23  ;;  %v9686_v22 = vld [vmem:[%s12127_s8 + $0x924] ss:$16 sps:$4 sm:$0xff]   ;;  %v9689_v23 = vld [vmem:[%s12127_s8 + $0x92c] ss:$16 sps:$4 sm:$0xff]  }
 0x28d   : > { %6893 = vmatprep.subr.bf16.mxu0 %v9602_v25  ;;  %7426 = vmatprep.subr.bf16.mxu1 %v9605_v26  ;;  %v9684_v25 = vld [vmem:[%s12127_s8 + $0x920] ss:$16 sps:$4 sm:$0xff]   ;;  %v9687_v26 = vld [vmem:[%s12127_s8 + $0x928] ss:$16 sps:$4 sm:$0xff]  }
 0x290   : > { %6894 = vmatpush1.bf16.msra.mxu0 %v9600_v27  ;;  %7427 = vmatpush1.bf16.msra.mxu1 %v9603_v29  ;;  %v9692_v27 = vld [vmem:[%s12127_s8 + $0x944] ss:$16 sps:$4 sm:$0xff]   ;;  %v9695_v29 = vld [vmem:[%s12127_s8 + $0x94c] ss:$16 sps:$4 sm:$0xff]  }
 0x291   : > { %6895 = vmatprep.subr.bf16.mxu0 %v9608_v30  ;;  %7428 = vmatprep.subr.bf16.mxu1 %v9611_v31  ;;  %v9690_v30 = vld [vmem:[%s12127_s8 + $0x940] ss:$16 sps:$4 sm:$0xff]   ;;  %v9693_v31 = vld [vmem:[%s12127_s8 + $0x948] ss:$16 sps:$4 sm:$0xff]  }
 0x294   : > { %6896 = vmatpush1.bf16.msra.mxu0 %v9606_v32  ;;  %7429 = vmatpush1.bf16.msra.mxu1 %v9609_v33  ;;  %v9698_v32 = vld [vmem:[%s12127_s8 + $0x964] ss:$16 sps:$4 sm:$0xff]   ;;  %v9701_v33 = vld [vmem:[%s12127_s8 + $0x96c] ss:$16 sps:$4 sm:$0xff]  }
 0x295   : > { %6897 = vmatprep.subr.bf16.mxu0 %v9614_v36  ;;  %7430 = vmatprep.subr.bf16.mxu1 %v9617_v38  ;;  %v9696_v36 = vld [vmem:[%s12127_s8 + $0x960] ss:$16 sps:$4 sm:$0xff]   ;;  %v9699_v38 = vld [vmem:[%s12127_s8 + $0x968] ss:$16 sps:$4 sm:$0xff]  }
 0x298   : > { %6898 = vmatpush1.bf16.msra.mxu0 %v9612_v20  ;;  %7431 = vmatpush1.bf16.msra.mxu1 %v9615_v39  ;;  %v9704_v20 = vld [vmem:[%s12127_s8 + $0x984] ss:$16 sps:$4 sm:$0xff]   ;;  %v9707_v39 = vld [vmem:[%s12127_s8 + $0x98c] ss:$16 sps:$4 sm:$0xff]  }
 0x299   : > { %6899 = vmatprep.subr.bf16.mxu0 %v9620_v28  ;;  %7432 = vmatprep.subr.bf16.mxu1 %v9623_v40  ;;  %v9702_v28 = vld [vmem:[%s12127_s8 + $0x980] ss:$16 sps:$4 sm:$0xff]   ;;  %v9705_v40 = vld [vmem:[%s12127_s8 + $0x988] ss:$16 sps:$4 sm:$0xff]  }
 0x29c   : > { %6900 = vmatpush1.bf16.msra.mxu0 %v9618_v41  ;;  %7433 = vmatpush1.bf16.msra.mxu1 %v9621_v42  ;;  %v9710_v41 = vld [vmem:[%s12127_s8 + $0x9a4] ss:$16 sps:$4 sm:$0xff]   ;;  %v9713_v42 = vld [vmem:[%s12127_s8 + $0x9ac] ss:$16 sps:$4 sm:$0xff]  }
 0x29d   : > { %6901 = vmatprep.subr.bf16.mxu0 %v9626_v43  ;;  %7434 = vmatprep.subr.bf16.mxu1 %v9629_v45  ;;  %v9708_v43 = vld [vmem:[%s12127_s8 + $0x9a0] ss:$16 sps:$4 sm:$0xff]   ;;  %v9711_v45 = vld [vmem:[%s12127_s8 + $0x9a8] ss:$16 sps:$4 sm:$0xff]  }
 0x2a0   : > { %6902 = vmatpush1.bf16.msra.mxu0 %v9624_v46  ;;  %7435 = vmatpush1.bf16.msra.mxu1 %v9627_v47  ;;  %v9716_v46 = vld [vmem:[%s12127_s8 + $0x9c4] ss:$16 sps:$4 sm:$0xff]   ;;  %v9719_v47 = vld [vmem:[%s12127_s8 + $0x9cc] ss:$16 sps:$4 sm:$0xff]  }
 0x2a1   : > { %6912 = vmatprep.subr.bf16.mxu0 %v9632_v48  ;;  %7445 = vmatprep.subr.bf16.mxu1 %v9635_v49  ;;  %v9714_v48 = vld [vmem:[%s12127_s8 + $0x9c0] ss:$16 sps:$4 sm:$0xff]   ;;  %v9717_v49 = vld [vmem:[%s12127_s8 + $0x9c8] ss:$16 sps:$4 sm:$0xff]  }
 0x2a3   : > { %6904 = vmatmul.mubr.bf16.vlgmr.msra.gmra.mrb[0].mxu0 %v2685_v51  ;;  %7437 = vmatmul.mubr.bf16.vlgmr.msra.gmra.mrb[0].mxu1 %v2685_v51  ;;  %v9720_v51 = vld [vmem:[%s12127_s8 + $0x9e0] ss:$16 sps:$4 sm:$0xff]  }
 0x2a4   : > { %6913 = vmatpush1.bf16.msra.mxu0 %v9630_v35  ;;  %7446 = vmatpush1.bf16.msra.mxu1 %v9633_v52  ;;  %v9725_v35 = vld [vmem:[%s12127_s8 + $0x9ec] ss:$16 sps:$4 sm:$0xff]   ;;  %v9723_v52 = vld [vmem:[%s12127_s8 + $0x9e8] ss:$16 sps:$4 sm:$0xff]  }
 0x2a5   : > { %6914 = vmatprep.subr.bf16.mxu0 %v9638_v44  ;;  %7447 = vmatprep.subr.bf16.mxu1 %v9641_v53  ;;  %v9728_v44 = vld [vmem:[%s12127_s8 + $0xa04] ss:$16 sps:$4 sm:$0xff]   ;;  %v9731_v53 = vld [vmem:[%s12127_s8 + $0xa0c] ss:$16 sps:$4 sm:$0xff]  }
 0x2a6   : > { %6944 = vmatprep.mubr.bf16.mxu0 %v12445_v54  ;;  %7477 = vmatprep.mubr.bf16.mxu1 %v12445_v54 }
 0x2a8   : > { %6915 = vmatpush1.bf16.msra.mxu0 %v9636_v34  ;;  %7448 = vmatpush1.bf16.msra.mxu1 %v9639_v55  ;;  %v12511_v34 = vrot.slane %v12427_v37, %v12132_v24  ;;  %v9726_v55 = vld [vmem:[%s12127_s8 + $0xa00] ss:$16 sps:$4 sm:$0xff]  }
 0x2a9   : > { %6916 = vmatprep.subr.bf16.mxu0 %v9644_v56  ;;  %7449 = vmatprep.subr.bf16.mxu1 %v9647_v57  ;;  %v9729_v56 = vld [vmem:[%s12127_s8 + $0xa08] ss:$16 sps:$4 sm:$0xff]   ;;  %v9734_v57 = vld [vmem:[%s12127_s8 + $0xa24] ss:$16 sps:$4 sm:$0xff]   ;;  %v9732_v37 = vld [vmem:[%s12127_s8 + $0xa20] ss:$16 sps:$4 sm:$0xff]  }
 0x2ac   : > { %6917 = vmatpush1.bf16.msra.mxu0 %v9642_v58  ;;  %7450 = vmatpush1.bf16.msra.mxu1 %v9645_v59  ;;  %v9737_v58 = vld [vmem:[%s12127_s8 + $0xa2c] ss:$16 sps:$4 sm:$0xff]   ;;  %v2735_v59 = vcombine.high %v12445_v54, %v12445_v54  ;;  %v9738_v54 = vld [vmem:[%s12127_s8 + $0xa40] ss:$16 sps:$4 sm:$0xff]  }
 0x2ad   : > { %6918 = vmatprep.subr.bf16.mxu0 %v9650_v60  ;;  %7451 = vmatprep.subr.bf16.mxu1 %v9653_v61  ;;  %v9735_v60 = vld [vmem:[%s12127_s8 + $0xa28] ss:$16 sps:$4 sm:$0xff]   ;;  %v9740_v61 = vld [vmem:[%s12127_s8 + $0xa44] ss:$16 sps:$4 sm:$0xff]  }
 0x2b0   : > { %6919 = vmatpush1.bf16.msra.mxu0 %v9648_v62  ;;  %7452 = vmatpush1.bf16.msra.mxu1 %v9651_v63  ;;  %v9743_v62 = vld [vmem:[%s12127_s8 + $0xa4c] ss:$16 sps:$4 sm:$0xff]   ;;  %v9741_v63 = vld [vmem:[%s12127_s8 + $0xa48] ss:$16 sps:$4 sm:$0xff]  }
 0x2b1   : > { %6920 = vmatprep.subr.bf16.mxu0 %v9656_v0  ;;  %7453 = vmatprep.subr.bf16.mxu1 %v9659_v1  ;;  %v9746_v0 = vld [vmem:[%s12127_s8 + $0xa64] ss:$16 sps:$4 sm:$0xff]   ;;  %v9749_v1 = vld [vmem:[%s12127_s8 + $0xa6c] ss:$16 sps:$4 sm:$0xff]  }
 0x2b4   : > { %6921 = vmatpush1.bf16.msra.mxu0 %v9654_v2  ;;  %7454 = vmatpush1.bf16.msra.mxu1 %v9657_v3  ;;  %v9744_v2 = vld [vmem:[%s12127_s8 + $0xa60] ss:$16 sps:$4 sm:$0xff]   ;;  %v9747_v3 = vld [vmem:[%s12127_s8 + $0xa68] ss:$16 sps:$4 sm:$0xff]  }
 0x2b5   : > { %6922 = vmatprep.subr.bf16.mxu0 %v9662_v4  ;;  %7455 = vmatprep.subr.bf16.mxu1 %v9665_v5  ;;  %v9752_v4 = vld [vmem:[%s12127_s8 + $0xa84] ss:$16 sps:$4 sm:$0xff]   ;;  %v9755_v5 = vld [vmem:[%s12127_s8 + $0xa8c] ss:$16 sps:$4 sm:$0xff]  }
 0x2b8   : > { %6923 = vmatpush1.bf16.msra.mxu0 %v9660_v6  ;;  %7456 = vmatpush1.bf16.msra.mxu1 %v9663_v7  ;;  %v9750_v6 = vld [vmem:[%s12127_s8 + $0xa80] ss:$16 sps:$4 sm:$0xff]   ;;  %v9753_v7 = vld [vmem:[%s12127_s8 + $0xa88] ss:$16 sps:$4 sm:$0xff]  }
 0x2b9   : > { %6924 = vmatprep.subr.bf16.mxu0 %v9668_v8  ;;  %7457 = vmatprep.subr.bf16.mxu1 %v9671_v9  ;;  %v9758_v8 = vld [vmem:[%s12127_s8 + $0xaa4] ss:$16 sps:$4 sm:$0xff]   ;;  %v9761_v9 = vld [vmem:[%s12127_s8 + $0xaac] ss:$16 sps:$4 sm:$0xff]  }
 0x2bc   : > { %6925 = vmatpush1.bf16.msra.mxu0 %v9666_v10  ;;  %7458 = vmatpush1.bf16.msra.mxu1 %v9669_v11  ;;  %v9756_v10 = vld [vmem:[%s12127_s8 + $0xaa0] ss:$16 sps:$4 sm:$0xff]   ;;  %v9759_v11 = vld [vmem:[%s12127_s8 + $0xaa8] ss:$16 sps:$4 sm:$0xff]  }
 0x2bd   : > { %6926 = vmatprep.subr.bf16.mxu0 %v9674_v12  ;;  %7459 = vmatprep.subr.bf16.mxu1 %v9677_v13  ;;  %v9764_v12 = vld [vmem:[%s12127_s8 + $0xac4] ss:$16 sps:$4 sm:$0xff]   ;;  %v9767_v13 = vld [vmem:[%s12127_s8 + $0xacc] ss:$16 sps:$4 sm:$0xff]  }
 0x2c0   : > { %6927 = vmatpush1.bf16.msra.mxu0 %v9672_v14  ;;  %7460 = vmatpush1.bf16.msra.mxu1 %v9675_v15  ;;  %v9762_v14 = vld [vmem:[%s12127_s8 + $0xac0] ss:$16 sps:$4 sm:$0xff]   ;;  %v9765_v15 = vld [vmem:[%s12127_s8 + $0xac8] ss:$16 sps:$4 sm:$0xff]  }
 0x2c1   : > { %6928 = vmatprep.subr.bf16.mxu0 %v9680_v16  ;;  %7461 = vmatprep.subr.bf16.mxu1 %v9683_v17  ;;  %v9770_v16 = vld [vmem:[%s12127_s8 + $0xae4] ss:$16 sps:$4 sm:$0xff]   ;;  %v9773_v17 = vld [vmem:[%s12127_s8 + $0xaec] ss:$16 sps:$4 sm:$0xff]  }
 0x2c4   : > { %6929 = vmatpush1.bf16.msra.mxu0 %v9678_v18  ;;  %7462 = vmatpush1.bf16.msra.mxu1 %v9681_v21  ;;  %v9768_v18 = vld [vmem:[%s12127_s8 + $0xae0] ss:$16 sps:$4 sm:$0xff]   ;;  %v9771_v21 = vld [vmem:[%s12127_s8 + $0xae8] ss:$16 sps:$4 sm:$0xff]  }
 0x2c5   : > { %6930 = vmatprep.subr.bf16.mxu0 %v9686_v22  ;;  %7463 = vmatprep.subr.bf16.mxu1 %v9689_v23  ;;  %v9776_v22 = vld [vmem:[%s12127_s8 + $0xb04] ss:$16 sps:$4 sm:$0xff]   ;;  %v9779_v23 = vld [vmem:[%s12127_s8 + $0xb0c] ss:$16 sps:$4 sm:$0xff]  }
 0x2c8   : > { %6931 = vmatpush1.bf16.msra.mxu0 %v9684_v25  ;;  %7464 = vmatpush1.bf16.msra.mxu1 %v9687_v26  ;;  %v9774_v25 = vld [vmem:[%s12127_s8 + $0xb00] ss:$16 sps:$4 sm:$0xff]   ;;  %v9777_v26 = vld [vmem:[%s12127_s8 + $0xb08] ss:$16 sps:$4 sm:$0xff]  }
 0x2c9   : > { %6932 = vmatprep.subr.bf16.mxu0 %v9692_v27  ;;  %7465 = vmatprep.subr.bf16.mxu1 %v9695_v29  ;;  %v9782_v27 = vld [vmem:[%s12127_s8 + $0xb24] ss:$16 sps:$4 sm:$0xff]   ;;  %v9785_v29 = vld [vmem:[%s12127_s8 + $0xb2c] ss:$16 sps:$4 sm:$0xff]  }
 0x2cc   : > { %6933 = vmatpush1.bf16.msra.mxu0 %v9690_v30  ;;  %7466 = vmatpush1.bf16.msra.mxu1 %v9693_v31  ;;  %v9780_v30 = vld [vmem:[%s12127_s8 + $0xb20] ss:$16 sps:$4 sm:$0xff]   ;;  %v9783_v31 = vld [vmem:[%s12127_s8 + $0xb28] ss:$16 sps:$4 sm:$0xff]  }
 0x2cd   : > { %6934 = vmatprep.subr.bf16.mxu0 %v9698_v32  ;;  %7467 = vmatprep.subr.bf16.mxu1 %v9701_v33  ;;  %v9788_v32 = vld [vmem:[%s12127_s8 + $0xb44] ss:$16 sps:$4 sm:$0xff]   ;;  %v9791_v33 = vld [vmem:[%s12127_s8 + $0xb4c] ss:$16 sps:$4 sm:$0xff]  }
 0x2d0   : > { %6935 = vmatpush1.bf16.msra.mxu0 %v9696_v36  ;;  %7468 = vmatpush1.bf16.msra.mxu1 %v9699_v38  ;;  %v9786_v36 = vld [vmem:[%s12127_s8 + $0xb40] ss:$16 sps:$4 sm:$0xff]   ;;  %v9789_v38 = vld [vmem:[%s12127_s8 + $0xb48] ss:$16 sps:$4 sm:$0xff]  }
 0x2d1   : > { %6936 = vmatprep.subr.bf16.mxu0 %v9704_v20  ;;  %7469 = vmatprep.subr.bf16.mxu1 %v9707_v39  ;;  %v9794_v20 = vld [vmem:[%s12127_s8 + $0xb64] ss:$16 sps:$4 sm:$0xff]   ;;  %v9797_v39 = vld [vmem:[%s12127_s8 + $0xb6c] ss:$16 sps:$4 sm:$0xff]  }
 0x2d4   : > { %6937 = vmatpush1.bf16.msra.mxu0 %v9702_v28  ;;  %7470 = vmatpush1.bf16.msra.mxu1 %v9705_v40  ;;  %v9792_v28 = vld [vmem:[%s12127_s8 + $0xb60] ss:$16 sps:$4 sm:$0xff]   ;;  %v9795_v40 = vld [vmem:[%s12127_s8 + $0xb68] ss:$16 sps:$4 sm:$0xff]  }
 0x2d5   : > { %6938 = vmatprep.subr.bf16.mxu0 %v9710_v41  ;;  %7471 = vmatprep.subr.bf16.mxu1 %v9713_v42  ;;  %v9800_v41 = vld [vmem:[%s12127_s8 + $0xb84] ss:$16 sps:$4 sm:$0xff]   ;;  %v9803_v42 = vld [vmem:[%s12127_s8 + $0xb8c] ss:$16 sps:$4 sm:$0xff]  }
 0x2d8   : > { %6939 = vmatpush1.bf16.msra.mxu0 %v9708_v43  ;;  %7472 = vmatpush1.bf16.msra.mxu1 %v9711_v45  ;;  %v9798_v43 = vld [vmem:[%s12127_s8 + $0xb80] ss:$16 sps:$4 sm:$0xff]   ;;  %v9801_v45 = vld [vmem:[%s12127_s8 + $0xb88] ss:$16 sps:$4 sm:$0xff]  }
 0x2d9   : > { %6940 = vmatprep.subr.bf16.mxu0 %v9716_v46  ;;  %7473 = vmatprep.subr.bf16.mxu1 %v9719_v47  ;;  %v9806_v46 = vld [vmem:[%s12127_s8 + $0xba4] ss:$16 sps:$4 sm:$0xff]   ;;  %v9809_v47 = vld [vmem:[%s12127_s8 + $0xbac] ss:$16 sps:$4 sm:$0xff]  }
 0x2dc   : > { %6941 = vmatpush1.bf16.msra.mxu0 %v9714_v48  ;;  %7474 = vmatpush1.bf16.msra.mxu1 %v9717_v49  ;;  %v9804_v48 = vld [vmem:[%s12127_s8 + $0xba0] ss:$16 sps:$4 sm:$0xff]   ;;  %v9807_v49 = vld [vmem:[%s12127_s8 + $0xba8] ss:$16 sps:$4 sm:$0xff]  }
 0x2dd   : > { %6942 = vmatprep.subr.bf16.mxu0 %v9722_v50  ;;  %7475 = vmatprep.subr.bf16.mxu1 %v9725_v35  ;;  %v9812_v50 = vld [vmem:[%s12127_s8 + $0xbc4] ss:$16 sps:$4 sm:$0xff]   ;;  %v9815_v35 = vld [vmem:[%s12127_s8 + $0xbcc] ss:$16 sps:$4 sm:$0xff]  }
 0x2e0   : > { %6943 = vmatpush1.bf16.msra.mxu0 %v9720_v51  ;;  %7476 = vmatpush1.bf16.msra.mxu1 %v9723_v52  ;;  %v10456_v51 = vld [vmem:[%s13117_s0 + $0x8] sm:$0xff] }
 0x2e1   : > { %6953 = vmatprep.subr.bf16.mxu0 %v9728_v44  ;;  %7486 = vmatprep.subr.bf16.mxu1 %v9731_v53  ;;  %v2688_v52 = vcombine.high %v10456_v51, %v10456_v51  ;;  %v9810_v44 = vld [vmem:[%s12127_s8 + $0xbc0] ss:$16 sps:$4 sm:$0xff]   ;;  %v9813_v53 = vld [vmem:[%s12127_s8 + $0xbc8] ss:$16 sps:$4 sm:$0xff]  }
 0x2e2   : > { %v9894_v51 = vld [vmem:[%s12127_s8 + $0xd80] ss:$16 sps:$4 sm:$0xff]  }
 0x2e3   : > { %6945 = vmatmul.mubr.bf16.vlgmr.msra.gmra.mrb[0].mxu0 %v12511_v34  ;;  %7478 = vmatmul.mubr.bf16.vlgmr.msra.gmra.mrb[0].mxu1 %v12511_v34 }
 0x2e4   : > { %6954 = vmatpush1.bf16.msra.mxu0 %v9726_v55  ;;  %7487 = vmatpush1.bf16.msra.mxu1 %v9729_v56  ;;  %v9818_v55 = vld [vmem:[%s12127_s8 + $0xbe4] ss:$16 sps:$4 sm:$0xff]   ;;  %v9821_v56 = vld [vmem:[%s12127_s8 + $0xbec] ss:$16 sps:$4 sm:$0xff]  }
 0x2e5   : > { %6955 = vmatprep.subr.bf16.mxu0 %v9734_v57  ;;  %7488 = vmatprep.subr.bf16.mxu1 %v9737_v58  ;;  %v12581_v57 = vrot.slane %v2688_v52, %v12132_v24  ;;  %v9816_v58 = vld [vmem:[%s12127_s8 + $0xbe0] ss:$16 sps:$4 sm:$0xff]   ;;  %v9897_v52 = vld [vmem:[%s12127_s8 + $0xd88] ss:$16 sps:$4 sm:$0xff]  }
 0x2e6   : > { %6985 = vmatprep.mubr.bf16.mxu0 %v2735_v59  ;;  %7518 = vmatprep.mubr.bf16.mxu1 %v2735_v59  ;;  %v9819_v59 = vld [vmem:[%s12127_s8 + $0xbe8] ss:$16 sps:$4 sm:$0xff]  }
 0x2e8   : > { %6956 = vmatpush1.bf16.msra.mxu0 %v9732_v37  ;;  %7489 = vmatpush1.bf16.msra.mxu1 %v9735_v60  ;;  %v9824_v37 = vld [vmem:[%s12127_s8 + $0xc04] ss:$16 sps:$4 sm:$0xff]   ;;  %v9827_v60 = vld [vmem:[%s12127_s8 + $0xc0c] ss:$16 sps:$4 sm:$0xff]  }
 0x2e9   : > { %6957 = vmatprep.subr.bf16.mxu0 %v9740_v61  ;;  %7490 = vmatprep.subr.bf16.mxu1 %v9743_v62  ;;  %v2704_v61 = vcombine.high %v12581_v57, %v12581_v57  ;;  %v2733_v62 = vcombine.high %v12511_v34, %v12511_v34  ;;  %v9828_v34 = vld [vmem:[%s12127_s8 + $0xc20] ss:$16 sps:$4 sm:$0xff]  }
 0x2ec   : > { %6958 = vmatpush1.bf16.msra.mxu0 %v9738_v54  ;;  %7491 = vmatpush1.bf16.msra.mxu1 %v9741_v63  ;;  %v9822_v54 = vld [vmem:[%s12127_s8 + $0xc00] ss:$16 sps:$4 sm:$0xff]   ;;  %v9825_v63 = vld [vmem:[%s12127_s8 + $0xc08] ss:$16 sps:$4 sm:$0xff]  }
 0x2ed   : > { %6959 = vmatprep.subr.bf16.mxu0 %v9746_v0  ;;  %7492 = vmatprep.subr.bf16.mxu1 %v9749_v1  ;;  %v9830_v0 = vld [vmem:[%s12127_s8 + $0xc24] ss:$16 sps:$4 sm:$0xff]   ;;  %v9833_v1 = vld [vmem:[%s12127_s8 + $0xc2c] ss:$16 sps:$4 sm:$0xff]  }
 0x2f0   : > { %6960 = vmatpush1.bf16.msra.mxu0 %v9744_v2  ;;  %7493 = vmatpush1.bf16.msra.mxu1 %v9747_v3  ;;  %v12596_v2 = vrot.slane %v2704_v61, %v12132_v24  ;;  %v9831_v3 = vld [vmem:[%s12127_s8 + $0xc28] ss:$16 sps:$4 sm:$0xff]   ;;  %v9914_v61 = vld [vmem:[%s12127_s8 + $0xde4] ss:$16 sps:$4 sm:$0xff]  }
 0x2f1   : > { %6961 = vmatprep.subr.bf16.mxu0 %v9752_v4  ;;  %7494 = vmatprep.subr.bf16.mxu1 %v9755_v5  ;;  %v9836_v4 = vld [vmem:[%s12127_s8 + $0xc44] ss:$16 sps:$4 sm:$0xff]   ;;  %v9839_v5 = vld [vmem:[%s12127_s8 + $0xc4c] ss:$16 sps:$4 sm:$0xff]  }
 0x2f4   : > { %6962 = vmatpush1.bf16.msra.mxu0 %v9750_v6  ;;  %7495 = vmatpush1.bf16.msra.mxu1 %v9753_v7  ;;  %v9834_v6 = vld [vmem:[%s12127_s8 + $0xc40] ss:$16 sps:$4 sm:$0xff]   ;;  %v9837_v7 = vld [vmem:[%s12127_s8 + $0xc48] ss:$16 sps:$4 sm:$0xff]  }
 0x2f5   : > { %6963 = vmatprep.subr.bf16.mxu0 %v9758_v8  ;;  %7496 = vmatprep.subr.bf16.mxu1 %v9761_v9  ;;  %v9842_v8 = vld [vmem:[%s12127_s8 + $0xc64] ss:$16 sps:$4 sm:$0xff]   ;;  %v9845_v9 = vld [vmem:[%s12127_s8 + $0xc6c] ss:$16 sps:$4 sm:$0xff]  }
 0x2f8   : > { %6964 = vmatpush1.bf16.msra.mxu0 %v9756_v10  ;;  %7497 = vmatpush1.bf16.msra.mxu1 %v9759_v11  ;;  %v9840_v10 = vld [vmem:[%s12127_s8 + $0xc60] ss:$16 sps:$4 sm:$0xff]   ;;  %v9843_v11 = vld [vmem:[%s12127_s8 + $0xc68] ss:$16 sps:$4 sm:$0xff]  }
 0x2f9   : > { %6965 = vmatprep.subr.bf16.mxu0 %v9764_v12  ;;  %7498 = vmatprep.subr.bf16.mxu1 %v9767_v13  ;;  %v9848_v12 = vld [vmem:[%s12127_s8 + $0xc84] ss:$16 sps:$4 sm:$0xff]   ;;  %v9851_v13 = vld [vmem:[%s12127_s8 + $0xc8c] ss:$16 sps:$4 sm:$0xff]  }
 0x2fc   : > { %6966 = vmatpush1.bf16.msra.mxu0 %v9762_v14  ;;  %7499 = vmatpush1.bf16.msra.mxu1 %v9765_v15  ;;  %v9846_v14 = vld [vmem:[%s12127_s8 + $0xc80] ss:$16 sps:$4 sm:$0xff]   ;;  %v9849_v15 = vld [vmem:[%s12127_s8 + $0xc88] ss:$16 sps:$4 sm:$0xff]  }
 0x2fd   : > { %6967 = vmatprep.subr.bf16.mxu0 %v9770_v16  ;;  %7500 = vmatprep.subr.bf16.mxu1 %v9773_v17  ;;  %v9854_v16 = vld [vmem:[%s12127_s8 + $0xca4] ss:$16 sps:$4 sm:$0xff]   ;;  %v9857_v17 = vld [vmem:[%s12127_s8 + $0xcac] ss:$16 sps:$4 sm:$0xff]  }
 0x300   : > { %6968 = vmatpush1.bf16.msra.mxu0 %v9768_v18  ;;  %7501 = vmatpush1.bf16.msra.mxu1 %v9771_v21  ;;  %v9852_v18 = vld [vmem:[%s12127_s8 + $0xca0] ss:$16 sps:$4 sm:$0xff]   ;;  %v9855_v21 = vld [vmem:[%s12127_s8 + $0xca8] ss:$16 sps:$4 sm:$0xff]  }
 0x301   : > { %6969 = vmatprep.subr.bf16.mxu0 %v9776_v22  ;;  %7502 = vmatprep.subr.bf16.mxu1 %v9779_v23  ;;  %v9860_v22 = vld [vmem:[%s12127_s8 + $0xcc4] ss:$16 sps:$4 sm:$0xff]   ;;  %v9863_v23 = vld [vmem:[%s12127_s8 + $0xccc] ss:$16 sps:$4 sm:$0xff]  }
 0x304   : > { %6970 = vmatpush1.bf16.msra.mxu0 %v9774_v25  ;;  %7503 = vmatpush1.bf16.msra.mxu1 %v9777_v26  ;;  %v9858_v25 = vld [vmem:[%s12127_s8 + $0xcc0] ss:$16 sps:$4 sm:$0xff]   ;;  %v9861_v26 = vld [vmem:[%s12127_s8 + $0xcc8] ss:$16 sps:$4 sm:$0xff]  }
 0x305   : > { %6971 = vmatprep.subr.bf16.mxu0 %v9782_v27  ;;  %7504 = vmatprep.subr.bf16.mxu1 %v9785_v29  ;;  %v9866_v27 = vld [vmem:[%s12127_s8 + $0xce4] ss:$16 sps:$4 sm:$0xff]   ;;  %v9869_v29 = vld [vmem:[%s12127_s8 + $0xcec] ss:$16 sps:$4 sm:$0xff]  }
 0x308   : > { %6972 = vmatpush1.bf16.msra.mxu0 %v9780_v30  ;;  %7505 = vmatpush1.bf16.msra.mxu1 %v9783_v31  ;;  %v9864_v30 = vld [vmem:[%s12127_s8 + $0xce0] ss:$16 sps:$4 sm:$0xff]   ;;  %v9867_v31 = vld [vmem:[%s12127_s8 + $0xce8] ss:$16 sps:$4 sm:$0xff]  }
 0x309   : > { %6973 = vmatprep.subr.bf16.mxu0 %v9788_v32  ;;  %7506 = vmatprep.subr.bf16.mxu1 %v9791_v33  ;;  %v9872_v32 = vld [vmem:[%s12127_s8 + $0xd04] ss:$16 sps:$4 sm:$0xff]   ;;  %v9875_v33 = vld [vmem:[%s12127_s8 + $0xd0c] ss:$16 sps:$4 sm:$0xff]  }
 0x30c   : > { %6974 = vmatpush1.bf16.msra.mxu0 %v9786_v36  ;;  %7507 = vmatpush1.bf16.msra.mxu1 %v9789_v38  ;;  %v9870_v36 = vld [vmem:[%s12127_s8 + $0xd00] ss:$16 sps:$4 sm:$0xff]   ;;  %v9873_v38 = vld [vmem:[%s12127_s8 + $0xd08] ss:$16 sps:$4 sm:$0xff]  }
 0x30d   : > { %6975 = vmatprep.subr.bf16.mxu0 %v9794_v20  ;;  %7508 = vmatprep.subr.bf16.mxu1 %v9797_v39  ;;  %v9878_v20 = vld [vmem:[%s12127_s8 + $0xd24] ss:$16 sps:$4 sm:$0xff]   ;;  %v9881_v39 = vld [vmem:[%s12127_s8 + $0xd2c] ss:$16 sps:$4 sm:$0xff]  }
 0x310   : > { %6976 = vmatpush1.bf16.msra.mxu0 %v9792_v28  ;;  %7509 = vmatpush1.bf16.msra.mxu1 %v9795_v40  ;;  %v9876_v28 = vld [vmem:[%s12127_s8 + $0xd20] ss:$16 sps:$4 sm:$0xff]   ;;  %v9879_v40 = vld [vmem:[%s12127_s8 + $0xd28] ss:$16 sps:$4 sm:$0xff]  }
 0x311   : > { %6977 = vmatprep.subr.bf16.mxu0 %v9800_v41  ;;  %7510 = vmatprep.subr.bf16.mxu1 %v9803_v42  ;;  %v9884_v41 = vld [vmem:[%s12127_s8 + $0xd44] ss:$16 sps:$4 sm:$0xff]   ;;  %v9887_v42 = vld [vmem:[%s12127_s8 + $0xd4c] ss:$16 sps:$4 sm:$0xff]  }
 0x314   : > { %6978 = vmatpush1.bf16.msra.mxu0 %v9798_v43  ;;  %7511 = vmatpush1.bf16.msra.mxu1 %v9801_v45  ;;  %v9882_v43 = vld [vmem:[%s12127_s8 + $0xd40] ss:$16 sps:$4 sm:$0xff]   ;;  %v9885_v45 = vld [vmem:[%s12127_s8 + $0xd48] ss:$16 sps:$4 sm:$0xff]  }
 0x315   : > { %6979 = vmatprep.subr.bf16.mxu0 %v9806_v46  ;;  %7512 = vmatprep.subr.bf16.mxu1 %v9809_v47  ;;  %v9890_v46 = vld [vmem:[%s12127_s8 + $0xd64] ss:$16 sps:$4 sm:$0xff]   ;;  %v9893_v47 = vld [vmem:[%s12127_s8 + $0xd6c] ss:$16 sps:$4 sm:$0xff]  }
 0x318   : > { %6980 = vmatpush1.bf16.msra.mxu0 %v9804_v48  ;;  %7513 = vmatpush1.bf16.msra.mxu1 %v9807_v49  ;;  %v9888_v48 = vld [vmem:[%s12127_s8 + $0xd60] ss:$16 sps:$4 sm:$0xff]   ;;  %v9891_v49 = vld [vmem:[%s12127_s8 + $0xd68] ss:$16 sps:$4 sm:$0xff]  }
 0x319   : > { %6981 = vmatprep.subr.bf16.mxu0 %v9812_v50  ;;  %7514 = vmatprep.subr.bf16.mxu1 %v9815_v35  ;;  %v9896_v50 = vld [vmem:[%s12127_s8 + $0xd84] ss:$16 sps:$4 sm:$0xff]   ;;  %v9899_v35 = vld [vmem:[%s12127_s8 + $0xd8c] ss:$16 sps:$4 sm:$0xff]  }
 0x31c   : > { %6982 = vmatpush1.bf16.msra.mxu0 %v9810_v44  ;;  %7515 = vmatpush1.bf16.msra.mxu1 %v9813_v53  ;;  %v9902_v44 = vld [vmem:[%s12127_s8 + $0xda4] ss:$16 sps:$4 sm:$0xff]   ;;  %v9905_v53 = vld [vmem:[%s12127_s8 + $0xdac] ss:$16 sps:$4 sm:$0xff]  }
 0x31d   : > { %6983 = vmatprep.subr.bf16.mxu0 %v9818_v55  ;;  %7516 = vmatprep.subr.bf16.mxu1 %v9821_v56  ;;  %v9900_v55 = vld [vmem:[%s12127_s8 + $0xda0] ss:$16 sps:$4 sm:$0xff]   ;;  %v9903_v56 = vld [vmem:[%s12127_s8 + $0xda8] ss:$16 sps:$4 sm:$0xff]  }
 0x320   : > { %6984 = vmatpush1.bf16.msra.mxu0 %v9816_v58  ;;  %7517 = vmatpush1.bf16.msra.mxu1 %v9819_v59  ;;  %v9908_v58 = vld [vmem:[%s12127_s8 + $0xdc4] ss:$16 sps:$4 sm:$0xff]   ;;  %v9911_v59 = vld [vmem:[%s12127_s8 + $0xdcc] ss:$16 sps:$4 sm:$0xff]  }
 0x321   : > { %6994 = vmatprep.subr.bf16.mxu0 %v9824_v37  ;;  %7527 = vmatprep.subr.bf16.mxu1 %v9827_v60  ;;  %v9906_v37 = vld [vmem:[%s12127_s8 + $0xdc0] ss:$16 sps:$4 sm:$0xff]   ;;  %v9909_v60 = vld [vmem:[%s12127_s8 + $0xdc8] ss:$16 sps:$4 sm:$0xff]  }
 0x323   : > { %6986 = vmatmul.mubr.bf16.vlgmr.msra.gmra.mrb[0].mxu0 %v2733_v62  ;;  %7519 = vmatmul.mubr.bf16.vlgmr.msra.gmra.mrb[0].mxu1 %v2733_v62  ;;  %v9917_v62 = vld [vmem:[%s12127_s8 + $0xdec] ss:$16 sps:$4 sm:$0xff]  }
 0x324   : > { %6995 = vmatpush1.bf16.msra.mxu0 %v9822_v54  ;;  %7528 = vmatpush1.bf16.msra.mxu1 %v9825_v63  ;;  %v9912_v54 = vld [vmem:[%s12127_s8 + $0xde0] ss:$16 sps:$4 sm:$0xff]   ;;  %v9915_v63 = vld [vmem:[%s12127_s8 + $0xde8] ss:$16 sps:$4 sm:$0xff]  }
 0x325   : > { %6996 = vmatprep.subr.bf16.mxu0 %v9830_v0  ;;  %7529 = vmatprep.subr.bf16.mxu1 %v9833_v1  ;;  %v9921_v0 = vld [vmem:[%s12127_s8 + $0xe04] ss:$16 sps:$4 sm:$0xff]   ;;  %v9924_v1 = vld [vmem:[%s12127_s8 + $0xe0c] ss:$16 sps:$4 sm:$0xff]  }
 0x326   : > { %7026 = vmatprep.mubr.bf16.mxu0 %v12596_v2  ;;  %7559 = vmatprep.mubr.bf16.mxu1 %v12596_v2 }
 0x328   : > { %6997 = vmatpush1.bf16.msra.mxu0 %v9828_v34  ;;  %7530 = vmatpush1.bf16.msra.mxu1 %v9831_v3  ;;  %v12662_v34 = vrot.slane %v12581_v57, %v12132_v24  ;;  %v9919_v3 = vld [vmem:[%s12127_s8 + $0xe00] ss:$16 sps:$4 sm:$0xff]  }
 0x329   : > { %6998 = vmatprep.subr.bf16.mxu0 %v9836_v4  ;;  %7531 = vmatprep.subr.bf16.mxu1 %v9839_v5  ;;  %v9922_v4 = vld [vmem:[%s12127_s8 + $0xe08] ss:$16 sps:$4 sm:$0xff]   ;;  %v9927_v5 = vld [vmem:[%s12127_s8 + $0xe24] ss:$16 sps:$4 sm:$0xff]   ;;  %v9925_v57 = vld [vmem:[%s12127_s8 + $0xe20] ss:$16 sps:$4 sm:$0xff]  }
 0x32c   : > { %6999 = vmatpush1.bf16.msra.mxu0 %v9834_v6  ;;  %7532 = vmatpush1.bf16.msra.mxu1 %v9837_v7  ;;  %v9930_v6 = vld [vmem:[%s12127_s8 + $0xe2c] ss:$16 sps:$4 sm:$0xff]   ;;  %v2736_v7 = vcombine.high %v12596_v2, %v12596_v2  ;;  %v9931_v2 = vld [vmem:[%s12127_s8 + $0xe40] ss:$16 sps:$4 sm:$0xff]  }
 0x32d   : > { %7000 = vmatprep.subr.bf16.mxu0 %v9842_v8  ;;  %7533 = vmatprep.subr.bf16.mxu1 %v9845_v9  ;;  %v9928_v8 = vld [vmem:[%s12127_s8 + $0xe28] ss:$16 sps:$4 sm:$0xff]   ;;  %v9933_v9 = vld [vmem:[%s12127_s8 + $0xe44] ss:$16 sps:$4 sm:$0xff]  }
 0x330   : > { %7001 = vmatpush1.bf16.msra.mxu0 %v9840_v10  ;;  %7534 = vmatpush1.bf16.msra.mxu1 %v9843_v11  ;;  %v9936_v10 = vld [vmem:[%s12127_s8 + $0xe4c] ss:$16 sps:$4 sm:$0xff]   ;;  %v9934_v11 = vld [vmem:[%s12127_s8 + $0xe48] ss:$16 sps:$4 sm:$0xff]  }
 0x331   : > { %7002 = vmatprep.subr.bf16.mxu0 %v9848_v12  ;;  %7535 = vmatprep.subr.bf16.mxu1 %v9851_v13  ;;  %v9939_v12 = vld [vmem:[%s12127_s8 + $0xe64] ss:$16 sps:$4 sm:$0xff]   ;;  %v9942_v13 = vld [vmem:[%s12127_s8 + $0xe6c] ss:$16 sps:$4 sm:$0xff]  }
 0x334   : > { %7003 = vmatpush1.bf16.msra.mxu0 %v9846_v14  ;;  %7536 = vmatpush1.bf16.msra.mxu1 %v9849_v15  ;;  %v9937_v14 = vld [vmem:[%s12127_s8 + $0xe60] ss:$16 sps:$4 sm:$0xff]   ;;  %v9940_v15 = vld [vmem:[%s12127_s8 + $0xe68] ss:$16 sps:$4 sm:$0xff]  }
 0x335   : > { %7004 = vmatprep.subr.bf16.mxu0 %v9854_v16  ;;  %7537 = vmatprep.subr.bf16.mxu1 %v9857_v17  ;;  %v9945_v16 = vld [vmem:[%s12127_s8 + $0xe84] ss:$16 sps:$4 sm:$0xff]   ;;  %v9948_v17 = vld [vmem:[%s12127_s8 + $0xe8c] ss:$16 sps:$4 sm:$0xff]  }
 0x338   : > { %7005 = vmatpush1.bf16.msra.mxu0 %v9852_v18  ;;  %7538 = vmatpush1.bf16.msra.mxu1 %v9855_v21  ;;  %v9943_v18 = vld [vmem:[%s12127_s8 + $0xe80] ss:$16 sps:$4 sm:$0xff]   ;;  %v9946_v21 = vld [vmem:[%s12127_s8 + $0xe88] ss:$16 sps:$4 sm:$0xff]  }
 0x339   : > { %7006 = vmatprep.subr.bf16.mxu0 %v9860_v22  ;;  %7539 = vmatprep.subr.bf16.mxu1 %v9863_v23  ;;  %v9951_v22 = vld [vmem:[%s12127_s8 + $0xea4] ss:$16 sps:$4 sm:$0xff]   ;;  %v9954_v23 = vld [vmem:[%s12127_s8 + $0xeac] ss:$16 sps:$4 sm:$0xff]  }
 0x33c   : > { %7007 = vmatpush1.bf16.msra.mxu0 %v9858_v25  ;;  %7540 = vmatpush1.bf16.msra.mxu1 %v9861_v26  ;;  %v9949_v25 = vld [vmem:[%s12127_s8 + $0xea0] ss:$16 sps:$4 sm:$0xff]   ;;  %v9952_v26 = vld [vmem:[%s12127_s8 + $0xea8] ss:$16 sps:$4 sm:$0xff]  }
 0x33d   : > { %7008 = vmatprep.subr.bf16.mxu0 %v9866_v27  ;;  %7541 = vmatprep.subr.bf16.mxu1 %v9869_v29  ;;  %v9957_v27 = vld [vmem:[%s12127_s8 + $0xec4] ss:$16 sps:$4 sm:$0xff]   ;;  %v9960_v29 = vld [vmem:[%s12127_s8 + $0xecc] ss:$16 sps:$4 sm:$0xff]  }
 0x340   : > { %7009 = vmatpush1.bf16.msra.mxu0 %v9864_v30  ;;  %7542 = vmatpush1.bf16.msra.mxu1 %v9867_v31  ;;  %v9955_v30 = vld [vmem:[%s12127_s8 + $0xec0] ss:$16 sps:$4 sm:$0xff]   ;;  %v9958_v31 = vld [vmem:[%s12127_s8 + $0xec8] ss:$16 sps:$4 sm:$0xff]  }
 0x341   : > { %7010 = vmatprep.subr.bf16.mxu0 %v9872_v32  ;;  %7543 = vmatprep.subr.bf16.mxu1 %v9875_v33  ;;  %v9963_v32 = vld [vmem:[%s12127_s8 + $0xee4] ss:$16 sps:$4 sm:$0xff]   ;;  %v9966_v33 = vld [vmem:[%s12127_s8 + $0xeec] ss:$16 sps:$4 sm:$0xff]  }
 0x344   : > { %7011 = vmatpush1.bf16.msra.mxu0 %v9870_v36  ;;  %7544 = vmatpush1.bf16.msra.mxu1 %v9873_v38  ;;  %v9961_v36 = vld [vmem:[%s12127_s8 + $0xee0] ss:$16 sps:$4 sm:$0xff]   ;;  %v9964_v38 = vld [vmem:[%s12127_s8 + $0xee8] ss:$16 sps:$4 sm:$0xff]  }
 0x345   : > { %7012 = vmatprep.subr.bf16.mxu0 %v9878_v20  ;;  %7545 = vmatprep.subr.bf16.mxu1 %v9881_v39  ;;  %v9969_v20 = vld [vmem:[%s12127_s8 + $0xf04] ss:$16 sps:$4 sm:$0xff]   ;;  %v9972_v39 = vld [vmem:[%s12127_s8 + $0xf0c] ss:$16 sps:$4 sm:$0xff]  }
 0x348   : > { %7013 = vmatpush1.bf16.msra.mxu0 %v9876_v28  ;;  %7546 = vmatpush1.bf16.msra.mxu1 %v9879_v40  ;;  %v9967_v28 = vld [vmem:[%s12127_s8 + $0xf00] ss:$16 sps:$4 sm:$0xff]   ;;  %v9970_v40 = vld [vmem:[%s12127_s8 + $0xf08] ss:$16 sps:$4 sm:$0xff]  }
 0x349   : > { %7014 = vmatprep.subr.bf16.mxu0 %v9884_v41  ;;  %7547 = vmatprep.subr.bf16.mxu1 %v9887_v42  ;;  %v9975_v41 = vld [vmem:[%s12127_s8 + $0xf24] ss:$16 sps:$4 sm:$0xff]   ;;  %v9978_v42 = vld [vmem:[%s12127_s8 + $0xf2c] ss:$16 sps:$4 sm:$0xff]  }
 0x34c   : > { %7015 = vmatpush1.bf16.msra.mxu0 %v9882_v43  ;;  %7548 = vmatpush1.bf16.msra.mxu1 %v9885_v45  ;;  %v9973_v43 = vld [vmem:[%s12127_s8 + $0xf20] ss:$16 sps:$4 sm:$0xff]   ;;  %v9976_v45 = vld [vmem:[%s12127_s8 + $0xf28] ss:$16 sps:$4 sm:$0xff]  }
 0x34d   : > { %7016 = vmatprep.subr.bf16.mxu0 %v9890_v46  ;;  %7549 = vmatprep.subr.bf16.mxu1 %v9893_v47  ;;  %v9981_v46 = vld [vmem:[%s12127_s8 + $0xf44] ss:$16 sps:$4 sm:$0xff]   ;;  %v9984_v47 = vld [vmem:[%s12127_s8 + $0xf4c] ss:$16 sps:$4 sm:$0xff]  }
 0x350   : > { %7017 = vmatpush1.bf16.msra.mxu0 %v9888_v48  ;;  %7550 = vmatpush1.bf16.msra.mxu1 %v9891_v49  ;;  %v9979_v48 = vld [vmem:[%s12127_s8 + $0xf40] ss:$16 sps:$4 sm:$0xff]   ;;  %v9982_v49 = vld [vmem:[%s12127_s8 + $0xf48] ss:$16 sps:$4 sm:$0xff]  }
 0x351   : > { %7018 = vmatprep.subr.bf16.mxu0 %v9896_v50  ;;  %7551 = vmatprep.subr.bf16.mxu1 %v9899_v35  ;;  %v9987_v50 = vld [vmem:[%s12127_s8 + $0xf64] ss:$16 sps:$4 sm:$0xff]   ;;  %v9990_v35 = vld [vmem:[%s12127_s8 + $0xf6c] ss:$16 sps:$4 sm:$0xff]  }
 0x354   : > { %7019 = vmatpush1.bf16.msra.mxu0 %v9894_v51  ;;  %7552 = vmatpush1.bf16.msra.mxu1 %v9897_v52  ;;  %v9985_v51 = vld [vmem:[%s12127_s8 + $0xf60] ss:$16 sps:$4 sm:$0xff]   ;;  %v9988_v52 = vld [vmem:[%s12127_s8 + $0xf68] ss:$16 sps:$4 sm:$0xff]  }
 0x355   : > { %7020 = vmatprep.subr.bf16.mxu0 %v9902_v44  ;;  %7553 = vmatprep.subr.bf16.mxu1 %v9905_v53  ;;  %v9993_v44 = vld [vmem:[%s12127_s8 + $0xf84] ss:$16 sps:$4 sm:$0xff]   ;;  %v9996_v53 = vld [vmem:[%s12127_s8 + $0xf8c] ss:$16 sps:$4 sm:$0xff]  }
 0x358   : > { %7021 = vmatpush1.bf16.msra.mxu0 %v9900_v55  ;;  %7554 = vmatpush1.bf16.msra.mxu1 %v9903_v56  ;;  %v9991_v55 = vld [vmem:[%s12127_s8 + $0xf80] ss:$16 sps:$4 sm:$0xff]   ;;  %v9994_v56 = vld [vmem:[%s12127_s8 + $0xf88] ss:$16 sps:$4 sm:$0xff]  }
 0x359   : > { %7022 = vmatprep.subr.bf16.mxu0 %v9908_v58  ;;  %7555 = vmatprep.subr.bf16.mxu1 %v9911_v59  ;;  %v9999_v58 = vld [vmem:[%s12127_s8 + $0xfa4] ss:$16 sps:$4 sm:$0xff]   ;;  %v10002_v59 = vld [vmem:[%s12127_s8 + $0xfac] ss:$16 sps:$4 sm:$0xff]  }
 0x35c   : > { %7023 = vmatpush1.bf16.msra.mxu0 %v9906_v37  ;;  %7556 = vmatpush1.bf16.msra.mxu1 %v9909_v60  ;;  %v9997_v37 = vld [vmem:[%s12127_s8 + $0xfa0] ss:$16 sps:$4 sm:$0xff]   ;;  %v10000_v60 = vld [vmem:[%s12127_s8 + $0xfa8] ss:$16 sps:$4 sm:$0xff]  }
 0x35d   : > { %7024 = vmatprep.subr.bf16.mxu0 %v9914_v61  ;;  %7557 = vmatprep.subr.bf16.mxu1 %v9917_v62  ;;  %v10005_v61 = vld [vmem:[%s12127_s8 + $0xfc4] ss:$16 sps:$4 sm:$0xff]   ;;  %v10008_v62 = vld [vmem:[%s12127_s8 + $0xfcc] ss:$16 sps:$4 sm:$0xff]  }
 0x360   : > { %7025 = vmatpush1.bf16.msra.mxu0 %v9912_v54  ;;  %7558 = vmatpush1.bf16.msra.mxu1 %v9915_v63  ;;  %v12727_v54 = vld [vmem:[%s13117_s0 + $0x10] sm:$0xff] }
 0x361   : > { %7035 = vmatprep.subr.bf16.mxu0 %v9921_v0  ;;  %7568 = vmatprep.subr.bf16.mxu1 %v9924_v1  ;;  %v10003_v63 = vld [vmem:[%s12127_s8 + $0xfc0] ss:$16 sps:$4 sm:$0xff]   ;;  %v10006_v0 = vld [vmem:[%s12127_s8 + $0xfc8] ss:$16 sps:$4 sm:$0xff]   ;;  %v10011_v1 = vld [vmem:[%s12127_s8 + $0xfe4] ss:$16 sps:$4 sm:$0xff]  }
 0x363   : > { %7027 = vmatmul.mubr.bf16.vlgmr.msra.gmra.mrb[0].mxu0 %v12662_v34  ;;  %7560 = vmatmul.mubr.bf16.vlgmr.msra.gmra.mrb[0].mxu1 %v12662_v34 }
 0x364   : > { %7036 = vmatpush1.bf16.msra.mxu0 %v9919_v3  ;;  %7569 = vmatpush1.bf16.msra.mxu1 %v9922_v4  ;;  %v10014_v3 = vld [vmem:[%s12127_s8 + $0xfec] ss:$16 sps:$4 sm:$0xff]   ;;  %v12735_v4 = vrot.slane %v12727_v54, %v12132_v24 }
 0x365   : > { %7037 = vmatprep.subr.bf16.mxu0 %v9927_v5  ;;  %7570 = vmatprep.subr.bf16.mxu1 %v9930_v6  ;;  %v10009_v5 = vld [vmem:[%s12127_s8 + $0xfe0] ss:$16 sps:$4 sm:$0xff]   ;;  %v10012_v6 = vld [vmem:[%s12127_s8 + $0xfe8] ss:$16 sps:$4 sm:$0xff]  }
 0x366   : > { %7067 = vmatprep.mubr.bf16.mxu0 %v2736_v7  ;;  %7600 = vmatprep.mubr.bf16.mxu1 %v2736_v7  ;;  %v10017_v7 = vld [vmem:[%s12127_s8 + $0x1004] ss:$16 sps:$4 sm:$0xff]  }
 0x368   : > { %7038 = vmatpush1.bf16.msra.mxu0 %v9925_v57  ;;  %7571 = vmatpush1.bf16.msra.mxu1 %v9928_v8  ;;  %v10020_v57 = vld [vmem:[%s12127_s8 + $0x100c] ss:$16 sps:$4 sm:$0xff]   ;;  %v2752_v8 = vcombine.high %v12735_v4, %v12735_v4 }
 0x369   : > { %7039 = vmatprep.subr.bf16.mxu0 %v9933_v9  ;;  %7572 = vmatprep.subr.bf16.mxu1 %v9936_v10  ;;  %v2734_v9 = vcombine.high %v12662_v34, %v12662_v34  ;;  %v10015_v10 = vld [vmem:[%s12127_s8 + $0x1000] ss:$16 sps:$4 sm:$0xff]  }
 0x36a   : > { %v10021_v34 = vld [vmem:[%s12127_s8 + $0x1020] ss:$16 sps:$4 sm:$0xff]  }
 0x36c   : > { %7040 = vmatpush1.bf16.msra.mxu0 %v9931_v2  ;;  %7573 = vmatpush1.bf16.msra.mxu1 %v9934_v11  ;;  %v10018_v2 = vld [vmem:[%s12127_s8 + $0x1008] ss:$16 sps:$4 sm:$0xff]   ;;  %v10023_v11 = vld [vmem:[%s12127_s8 + $0x1024] ss:$16 sps:$4 sm:$0xff]  }
 0x36d   : > { %7041 = vmatprep.subr.bf16.mxu0 %v9939_v12  ;;  %7574 = vmatprep.subr.bf16.mxu1 %v9942_v13  ;;  %v10026_v12 = vld [vmem:[%s12127_s8 + $0x102c] ss:$16 sps:$4 sm:$0xff]   ;;  %v12750_v13 = vrot.slane %v2752_v8, %v12132_v24  ;;  %v10102_v8 = vld [vmem:[%s12127_s8 + $0x11c8] ss:$16 sps:$4 sm:$0xff]  }
 0x370   : > { %7042 = vmatpush1.bf16.msra.mxu0 %v9937_v14  ;;  %7575 = vmatpush1.bf16.msra.mxu1 %v9940_v15  ;;  %v10024_v14 = vld [vmem:[%s12127_s8 + $0x1028] ss:$16 sps:$4 sm:$0xff]   ;;  %v10029_v15 = vld [vmem:[%s12127_s8 + $0x1044] ss:$16 sps:$4 sm:$0xff]  }
 0x371   : > { %7043 = vmatprep.subr.bf16.mxu0 %v9945_v16  ;;  %7576 = vmatprep.subr.bf16.mxu1 %v9948_v17  ;;  %v10032_v16 = vld [vmem:[%s12127_s8 + $0x104c] ss:$16 sps:$4 sm:$0xff]   ;;  %v10027_v17 = vld [vmem:[%s12127_s8 + $0x1040] ss:$16 sps:$4 sm:$0xff]  }
 0x374   : > { %7044 = vmatpush1.bf16.msra.mxu0 %v9943_v18  ;;  %7577 = vmatpush1.bf16.msra.mxu1 %v9946_v21  ;;  %v10030_v18 = vld [vmem:[%s12127_s8 + $0x1048] ss:$16 sps:$4 sm:$0xff]   ;;  %v10035_v21 = vld [vmem:[%s12127_s8 + $0x1064] ss:$16 sps:$4 sm:$0xff]  }
 0x375   : > { %7045 = vmatprep.subr.bf16.mxu0 %v9951_v22  ;;  %7578 = vmatprep.subr.bf16.mxu1 %v9954_v23  ;;  %v10038_v22 = vld [vmem:[%s12127_s8 + $0x106c] ss:$16 sps:$4 sm:$0xff]   ;;  %v10033_v23 = vld [vmem:[%s12127_s8 + $0x1060] ss:$16 sps:$4 sm:$0xff]  }
 0x378   : > { %7046 = vmatpush1.bf16.msra.mxu0 %v9949_v25  ;;  %7579 = vmatpush1.bf16.msra.mxu1 %v9952_v26  ;;  %v10036_v25 = vld [vmem:[%s12127_s8 + $0x1068] ss:$16 sps:$4 sm:$0xff]   ;;  %v10041_v26 = vld [vmem:[%s12127_s8 + $0x1084] ss:$16 sps:$4 sm:$0xff]  }
 0x379   : > { %7047 = vmatprep.subr.bf16.mxu0 %v9957_v27  ;;  %7580 = vmatprep.subr.bf16.mxu1 %v9960_v29  ;;  %v10044_v27 = vld [vmem:[%s12127_s8 + $0x108c] ss:$16 sps:$4 sm:$0xff]   ;;  %v10039_v29 = vld [vmem:[%s12127_s8 + $0x1080] ss:$16 sps:$4 sm:$0xff]  }
 0x37c   : > { %7048 = vmatpush1.bf16.msra.mxu0 %v9955_v30  ;;  %7581 = vmatpush1.bf16.msra.mxu1 %v9958_v31  ;;  %v10042_v30 = vld [vmem:[%s12127_s8 + $0x1088] ss:$16 sps:$4 sm:$0xff]   ;;  %v10047_v31 = vld [vmem:[%s12127_s8 + $0x10a4] ss:$16 sps:$4 sm:$0xff]  }
 0x37d   : > { %7049 = vmatprep.subr.bf16.mxu0 %v9963_v32  ;;  %7582 = vmatprep.subr.bf16.mxu1 %v9966_v33  ;;  %v10050_v32 = vld [vmem:[%s12127_s8 + $0x10ac] ss:$16 sps:$4 sm:$0xff]   ;;  %v10045_v33 = vld [vmem:[%s12127_s8 + $0x10a0] ss:$16 sps:$4 sm:$0xff]  }
 0x380   : > { %7050 = vmatpush1.bf16.msra.mxu0 %v9961_v36  ;;  %7583 = vmatpush1.bf16.msra.mxu1 %v9964_v38  ;;  %v10048_v36 = vld [vmem:[%s12127_s8 + $0x10a8] ss:$16 sps:$4 sm:$0xff]   ;;  %v10053_v38 = vld [vmem:[%s12127_s8 + $0x10c4] ss:$16 sps:$4 sm:$0xff]  }
 0x381   : > { %7051 = vmatprep.subr.bf16.mxu0 %v9969_v20  ;;  %7584 = vmatprep.subr.bf16.mxu1 %v9972_v39  ;;  %v10056_v20 = vld [vmem:[%s12127_s8 + $0x10cc] ss:$16 sps:$4 sm:$0xff]   ;;  %v10051_v39 = vld [vmem:[%s12127_s8 + $0x10c0] ss:$16 sps:$4 sm:$0xff]  }
 0x384   : > { %7052 = vmatpush1.bf16.msra.mxu0 %v9967_v28  ;;  %7585 = vmatpush1.bf16.msra.mxu1 %v9970_v40  ;;  %v10054_v28 = vld [vmem:[%s12127_s8 + $0x10c8] ss:$16 sps:$4 sm:$0xff]   ;;  %v10059_v40 = vld [vmem:[%s12127_s8 + $0x10e4] ss:$16 sps:$4 sm:$0xff]  }
 0x385   : > { %7053 = vmatprep.subr.bf16.mxu0 %v9975_v41  ;;  %7586 = vmatprep.subr.bf16.mxu1 %v9978_v42  ;;  %v10062_v41 = vld [vmem:[%s12127_s8 + $0x10ec] ss:$16 sps:$4 sm:$0xff]   ;;  %v10057_v42 = vld [vmem:[%s12127_s8 + $0x10e0] ss:$16 sps:$4 sm:$0xff]  }
 0x388   : > { %7054 = vmatpush1.bf16.msra.mxu0 %v9973_v43  ;;  %7587 = vmatpush1.bf16.msra.mxu1 %v9976_v45  ;;  %v10060_v43 = vld [vmem:[%s12127_s8 + $0x10e8] ss:$16 sps:$4 sm:$0xff]   ;;  %v10065_v45 = vld [vmem:[%s12127_s8 + $0x1104] ss:$16 sps:$4 sm:$0xff]  }
 0x389   : > { %7055 = vmatprep.subr.bf16.mxu0 %v9981_v46  ;;  %7588 = vmatprep.subr.bf16.mxu1 %v9984_v47  ;;  %v10068_v46 = vld [vmem:[%s12127_s8 + $0x110c] ss:$16 sps:$4 sm:$0xff]   ;;  %v10063_v47 = vld [vmem:[%s12127_s8 + $0x1100] ss:$16 sps:$4 sm:$0xff]  }
 0x38c   : > { %7056 = vmatpush1.bf16.msra.mxu0 %v9979_v48  ;;  %7589 = vmatpush1.bf16.msra.mxu1 %v9982_v49  ;;  %v10066_v48 = vld [vmem:[%s12127_s8 + $0x1108] ss:$16 sps:$4 sm:$0xff]   ;;  %v10071_v49 = vld [vmem:[%s12127_s8 + $0x1124] ss:$16 sps:$4 sm:$0xff]  }
 0x38d   : > { %7057 = vmatprep.subr.bf16.mxu0 %v9987_v50  ;;  %7590 = vmatprep.subr.bf16.mxu1 %v9990_v35  ;;  %v10074_v50 = vld [vmem:[%s12127_s8 + $0x112c] ss:$16 sps:$4 sm:$0xff]   ;;  %v10069_v35 = vld [vmem:[%s12127_s8 + $0x1120] ss:$16 sps:$4 sm:$0xff]  }
 0x390   : > { %7058 = vmatpush1.bf16.msra.mxu0 %v9985_v51  ;;  %7591 = vmatpush1.bf16.msra.mxu1 %v9988_v52  ;;  %v10072_v51 = vld [vmem:[%s12127_s8 + $0x1128] ss:$16 sps:$4 sm:$0xff]   ;;  %v10077_v52 = vld [vmem:[%s12127_s8 + $0x1144] ss:$16 sps:$4 sm:$0xff]  }
 0x391   : > { %7059 = vmatprep.subr.bf16.mxu0 %v9993_v44  ;;  %7592 = vmatprep.subr.bf16.mxu1 %v9996_v53  ;;  %v10080_v44 = vld [vmem:[%s12127_s8 + $0x114c] ss:$16 sps:$4 sm:$0xff]   ;;  %v10075_v53 = vld [vmem:[%s12127_s8 + $0x1140] ss:$16 sps:$4 sm:$0xff]  }
 0x394   : > { %7060 = vmatpush1.bf16.msra.mxu0 %v9991_v55  ;;  %7593 = vmatpush1.bf16.msra.mxu1 %v9994_v56  ;;  %v10078_v55 = vld [vmem:[%s12127_s8 + $0x1148] ss:$16 sps:$4 sm:$0xff]   ;;  %v10083_v56 = vld [vmem:[%s12127_s8 + $0x1164] ss:$16 sps:$4 sm:$0xff]  }
 0x395   : > { %7061 = vmatprep.subr.bf16.mxu0 %v9999_v58  ;;  %7594 = vmatprep.subr.bf16.mxu1 %v10002_v59  ;;  %v10086_v58 = vld [vmem:[%s12127_s8 + $0x116c] ss:$16 sps:$4 sm:$0xff]   ;;  %v10081_v59 = vld [vmem:[%s12127_s8 + $0x1160] ss:$16 sps:$4 sm:$0xff]  }
 0x398   : > { %7062 = vmatpush1.bf16.msra.mxu0 %v9997_v37  ;;  %7595 = vmatpush1.bf16.msra.mxu1 %v10000_v60  ;;  %v10084_v37 = vld [vmem:[%s12127_s8 + $0x1168] ss:$16 sps:$4 sm:$0xff]   ;;  %v10089_v60 = vld [vmem:[%s12127_s8 + $0x1184] ss:$16 sps:$4 sm:$0xff]  }
 0x399   : > { %7063 = vmatprep.subr.bf16.mxu0 %v10005_v61  ;;  %7596 = vmatprep.subr.bf16.mxu1 %v10008_v62  ;;  %v10092_v61 = vld [vmem:[%s12127_s8 + $0x118c] ss:$16 sps:$4 sm:$0xff]   ;;  %v10087_v62 = vld [vmem:[%s12127_s8 + $0x1180] ss:$16 sps:$4 sm:$0xff]  }
 0x39c   : > { %7064 = vmatpush1.bf16.msra.mxu0 %v10003_v63  ;;  %7597 = vmatpush1.bf16.msra.mxu1 %v10006_v0  ;;  %v10090_v63 = vld [vmem:[%s12127_s8 + $0x1188] ss:$16 sps:$4 sm:$0xff]   ;;  %v10095_v0 = vld [vmem:[%s12127_s8 + $0x11a4] ss:$16 sps:$4 sm:$0xff]  }
 0x39d   : > { %7065 = vmatprep.subr.bf16.mxu0 %v10011_v1  ;;  %7598 = vmatprep.subr.bf16.mxu1 %v10014_v3  ;;  %v10098_v1 = vld [vmem:[%s12127_s8 + $0x11ac] ss:$16 sps:$4 sm:$0xff]   ;;  %v10093_v3 = vld [vmem:[%s12127_s8 + $0x11a0] ss:$16 sps:$4 sm:$0xff]  }
 0x3a0   : > { %7066 = vmatpush1.bf16.msra.mxu0 %v10009_v5  ;;  %7599 = vmatpush1.bf16.msra.mxu1 %v10012_v6  ;;  %v10096_v5 = vld [vmem:[%s12127_s8 + $0x11a8] ss:$16 sps:$4 sm:$0xff]   ;;  %v10101_v6 = vld [vmem:[%s12127_s8 + $0x11c4] ss:$16 sps:$4 sm:$0xff]  }
 0x3a1   : > { %7076 = vmatprep.subr.bf16.mxu0 %v10017_v7  ;;  %7609 = vmatprep.subr.bf16.mxu1 %v10020_v57  ;;  %v10104_v7 = vld [vmem:[%s12127_s8 + $0x11cc] ss:$16 sps:$4 sm:$0xff]   ;;  %v10099_v57 = vld [vmem:[%s12127_s8 + $0x11c0] ss:$16 sps:$4 sm:$0xff]  }
 0x3a3   : > { %7068 = vmatmul.mubr.bf16.vlgmr.msra.gmra.mrb[0].mxu0 %v2734_v9  ;;  %7601 = vmatmul.mubr.bf16.vlgmr.msra.gmra.mrb[0].mxu1 %v2734_v9  ;;  %v10107_v9 = vld [vmem:[%s12127_s8 + $0x11e4] ss:$16 sps:$4 sm:$0xff]  }
 0x3a4   : > { %7077 = vmatpush1.bf16.msra.mxu0 %v10015_v10  ;;  %7610 = vmatpush1.bf16.msra.mxu1 %v10018_v2  ;;  %v10110_v10 = vld [vmem:[%s12127_s8 + $0x11ec] ss:$16 sps:$4 sm:$0xff]   ;;  %v10105_v2 = vld [vmem:[%s12127_s8 + $0x11e0] ss:$16 sps:$4 sm:$0xff]  }
 0x3a5   : > { %7078 = vmatprep.subr.bf16.mxu0 %v10023_v11  ;;  %7611 = vmatprep.subr.bf16.mxu1 %v10026_v12  ;;  %v10108_v11 = vld [vmem:[%s12127_s8 + $0x11e8] ss:$16 sps:$4 sm:$0xff]   ;;  %v10113_v12 = vld [vmem:[%s12127_s8 + $0x1204] ss:$16 sps:$4 sm:$0xff]  }
 0x3a6   : > { %7108 = vmatprep.mubr.bf16.mxu0 %v12750_v13  ;;  %7641 = vmatprep.mubr.bf16.mxu1 %v12750_v13 }
 0x3a8   : > { %7079 = vmatpush1.bf16.msra.mxu0 %v10021_v34  ;;  %7612 = vmatpush1.bf16.msra.mxu1 %v10024_v14  ;;  %v10116_v34 = vld [vmem:[%s12127_s8 + $0x120c] ss:$16 sps:$4 sm:$0xff]   ;;  %v12816_v14 = vrot.slane %v12735_v4, %v12132_v24  ;;  %v10117_v4 = vld [vmem:[%s12127_s8 + $0x1220] ss:$16 sps:$4 sm:$0xff]  }
 0x3a9   : > { %7080 = vmatprep.subr.bf16.mxu0 %v10029_v15  ;;  %7613 = vmatprep.subr.bf16.mxu1 %v10032_v16  ;;  %v10111_v15 = vld [vmem:[%s12127_s8 + $0x1200] ss:$16 sps:$4 sm:$0xff]   ;;  %v10114_v16 = vld [vmem:[%s12127_s8 + $0x1208] ss:$16 sps:$4 sm:$0xff]  }
 0x3ac   : > { %7081 = vmatpush1.bf16.msra.mxu0 %v10027_v17  ;;  %7614 = vmatpush1.bf16.msra.mxu1 %v10030_v18  ;;  %v10119_v17 = vld [vmem:[%s12127_s8 + $0x1224] ss:$16 sps:$4 sm:$0xff]   ;;  %v10122_v18 = vld [vmem:[%s12127_s8 + $0x122c] ss:$16 sps:$4 sm:$0xff]  }
 0x3ad   : > { %7082 = vmatprep.subr.bf16.mxu0 %v10035_v21  ;;  %7615 = vmatprep.subr.bf16.mxu1 %v10038_v22  ;;  %v2784_v21 = vcombine.high %v12750_v13, %v12750_v13  ;;  %v10120_v22 = vld [vmem:[%s12127_s8 + $0x1228] ss:$16 sps:$4 sm:$0xff]   ;;  %v10123_v13 = vld [vmem:[%s12127_s8 + $0x1240] ss:$16 sps:$4 sm:$0xff]  }
 0x3b0   : > { %7083 = vmatpush1.bf16.msra.mxu0 %v10033_v23  ;;  %7616 = vmatpush1.bf16.msra.mxu1 %v10036_v25  ;;  %v10125_v23 = vld [vmem:[%s12127_s8 + $0x1244] ss:$16 sps:$4 sm:$0xff]   ;;  %v10128_v25 = vld [vmem:[%s12127_s8 + $0x124c] ss:$16 sps:$4 sm:$0xff]  }
 0x3b1   : > { %7084 = vmatprep.subr.bf16.mxu0 %v10041_v26  ;;  %7617 = vmatprep.subr.bf16.mxu1 %v10044_v27  ;;  %v10126_v26 = vld [vmem:[%s12127_s8 + $0x1248] ss:$16 sps:$4 sm:$0xff]   ;;  %v10131_v27 = vld [vmem:[%s12127_s8 + $0x1264] ss:$16 sps:$4 sm:$0xff]  }
 0x3b4   : > { %7085 = vmatpush1.bf16.msra.mxu0 %v10039_v29  ;;  %7618 = vmatpush1.bf16.msra.mxu1 %v10042_v30  ;;  %v10134_v29 = vld [vmem:[%s12127_s8 + $0x126c] ss:$16 sps:$4 sm:$0xff]   ;;  %v10129_v30 = vld [vmem:[%s12127_s8 + $0x1260] ss:$16 sps:$4 sm:$0xff]  }
 0x3b5   : > { %7086 = vmatprep.subr.bf16.mxu0 %v10047_v31  ;;  %7619 = vmatprep.subr.bf16.mxu1 %v10050_v32  ;;  %v10132_v31 = vld [vmem:[%s12127_s8 + $0x1268] ss:$16 sps:$4 sm:$0xff]   ;;  %v10137_v32 = vld [vmem:[%s12127_s8 + $0x1284] ss:$16 sps:$4 sm:$0xff]  }
 0x3b8   : > { %7087 = vmatpush1.bf16.msra.mxu0 %v10045_v33  ;;  %7620 = vmatpush1.bf16.msra.mxu1 %v10048_v36  ;;  %v10140_v33 = vld [vmem:[%s12127_s8 + $0x128c] ss:$16 sps:$4 sm:$0xff]   ;;  %v10135_v36 = vld [vmem:[%s12127_s8 + $0x1280] ss:$16 sps:$4 sm:$0xff]  }
 0x3b9   : > { %7088 = vmatprep.subr.bf16.mxu0 %v10053_v38  ;;  %7621 = vmatprep.subr.bf16.mxu1 %v10056_v20  ;;  %v10138_v38 = vld [vmem:[%s12127_s8 + $0x1288] ss:$16 sps:$4 sm:$0xff]   ;;  %v10143_v20 = vld [vmem:[%s12127_s8 + $0x12a4] ss:$16 sps:$4 sm:$0xff]  }
 0x3bc   : > { %7089 = vmatpush1.bf16.msra.mxu0 %v10051_v39  ;;  %7622 = vmatpush1.bf16.msra.mxu1 %v10054_v28  ;;  %v10146_v39 = vld [vmem:[%s12127_s8 + $0x12ac] ss:$16 sps:$4 sm:$0xff]   ;;  %v10141_v28 = vld [vmem:[%s12127_s8 + $0x12a0] ss:$16 sps:$4 sm:$0xff]  }
 0x3bd   : > { %7090 = vmatprep.subr.bf16.mxu0 %v10059_v40  ;;  %7623 = vmatprep.subr.bf16.mxu1 %v10062_v41  ;;  %v10144_v40 = vld [vmem:[%s12127_s8 + $0x12a8] ss:$16 sps:$4 sm:$0xff]   ;;  %v10149_v41 = vld [vmem:[%s12127_s8 + $0x12c4] ss:$16 sps:$4 sm:$0xff]  }
 0x3c0   : > { %7091 = vmatpush1.bf16.msra.mxu0 %v10057_v42  ;;  %7624 = vmatpush1.bf16.msra.mxu1 %v10060_v43  ;;  %v10152_v42 = vld [vmem:[%s12127_s8 + $0x12cc] ss:$16 sps:$4 sm:$0xff]   ;;  %v10147_v43 = vld [vmem:[%s12127_s8 + $0x12c0] ss:$16 sps:$4 sm:$0xff]  }
 0x3c1   : > { %7092 = vmatprep.subr.bf16.mxu0 %v10065_v45  ;;  %7625 = vmatprep.subr.bf16.mxu1 %v10068_v46  ;;  %v10150_v45 = vld [vmem:[%s12127_s8 + $0x12c8] ss:$16 sps:$4 sm:$0xff]   ;;  %v10155_v46 = vld [vmem:[%s12127_s8 + $0x12e4] ss:$16 sps:$4 sm:$0xff]  }
 0x3c4   : > { %7093 = vmatpush1.bf16.msra.mxu0 %v10063_v47  ;;  %7626 = vmatpush1.bf16.msra.mxu1 %v10066_v48  ;;  %v10158_v47 = vld [vmem:[%s12127_s8 + $0x12ec] ss:$16 sps:$4 sm:$0xff]   ;;  %v10153_v48 = vld [vmem:[%s12127_s8 + $0x12e0] ss:$16 sps:$4 sm:$0xff]  }
 0x3c5   : > { %7094 = vmatprep.subr.bf16.mxu0 %v10071_v49  ;;  %7627 = vmatprep.subr.bf16.mxu1 %v10074_v50  ;;  %v10156_v49 = vld [vmem:[%s12127_s8 + $0x12e8] ss:$16 sps:$4 sm:$0xff]   ;;  %v10161_v50 = vld [vmem:[%s12127_s8 + $0x1304] ss:$16 sps:$4 sm:$0xff]  }
 0x3c8   : > { %7095 = vmatpush1.bf16.msra.mxu0 %v10069_v35  ;;  %7628 = vmatpush1.bf16.msra.mxu1 %v10072_v51  ;;  %v10164_v35 = vld [vmem:[%s12127_s8 + $0x130c] ss:$16 sps:$4 sm:$0xff]   ;;  %v10159_v51 = vld [vmem:[%s12127_s8 + $0x1300] ss:$16 sps:$4 sm:$0xff]  }
 0x3c9   : > { %7096 = vmatprep.subr.bf16.mxu0 %v10077_v52  ;;  %7629 = vmatprep.subr.bf16.mxu1 %v10080_v44  ;;  %v10162_v52 = vld [vmem:[%s12127_s8 + $0x1308] ss:$16 sps:$4 sm:$0xff]   ;;  %v10167_v44 = vld [vmem:[%s12127_s8 + $0x1324] ss:$16 sps:$4 sm:$0xff]  }
 0x3cc   : > { %7097 = vmatpush1.bf16.msra.mxu0 %v10075_v53  ;;  %7630 = vmatpush1.bf16.msra.mxu1 %v10078_v55  ;;  %v10170_v53 = vld [vmem:[%s12127_s8 + $0x132c] ss:$16 sps:$4 sm:$0xff]   ;;  %v10165_v55 = vld [vmem:[%s12127_s8 + $0x1320] ss:$16 sps:$4 sm:$0xff]  }
 0x3cd   : > { %7098 = vmatprep.subr.bf16.mxu0 %v10083_v56  ;;  %7631 = vmatprep.subr.bf16.mxu1 %v10086_v58  ;;  %v10168_v56 = vld [vmem:[%s12127_s8 + $0x1328] ss:$16 sps:$4 sm:$0xff]   ;;  %v10173_v58 = vld [vmem:[%s12127_s8 + $0x1344] ss:$16 sps:$4 sm:$0xff]  }
 0x3d0   : > { %7099 = vmatpush1.bf16.msra.mxu0 %v10081_v59  ;;  %7632 = vmatpush1.bf16.msra.mxu1 %v10084_v37  ;;  %v10176_v59 = vld [vmem:[%s12127_s8 + $0x134c] ss:$16 sps:$4 sm:$0xff]   ;;  %v10171_v37 = vld [vmem:[%s12127_s8 + $0x1340] ss:$16 sps:$4 sm:$0xff]  }
 0x3d1   : > { %7100 = vmatprep.subr.bf16.mxu0 %v10089_v60  ;;  %7633 = vmatprep.subr.bf16.mxu1 %v10092_v61  ;;  %v10174_v60 = vld [vmem:[%s12127_s8 + $0x1348] ss:$16 sps:$4 sm:$0xff]   ;;  %v10179_v61 = vld [vmem:[%s12127_s8 + $0x1364] ss:$16 sps:$4 sm:$0xff]  }
 0x3d4   : > { %7101 = vmatpush1.bf16.msra.mxu0 %v10087_v62  ;;  %7634 = vmatpush1.bf16.msra.mxu1 %v10090_v63  ;;  %v10182_v62 = vld [vmem:[%s12127_s8 + $0x136c] ss:$16 sps:$4 sm:$0xff]   ;;  %v10177_v63 = vld [vmem:[%s12127_s8 + $0x1360] ss:$16 sps:$4 sm:$0xff]  }
 0x3d5   : > { %7102 = vmatprep.subr.bf16.mxu0 %v10095_v0  ;;  %7635 = vmatprep.subr.bf16.mxu1 %v10098_v1  ;;  %v10180_v0 = vld [vmem:[%s12127_s8 + $0x1368] ss:$16 sps:$4 sm:$0xff]   ;;  %v10185_v1 = vld [vmem:[%s12127_s8 + $0x1384] ss:$16 sps:$4 sm:$0xff]  }
 0x3d8   : > { %7103 = vmatpush1.bf16.msra.mxu0 %v10093_v3  ;;  %7636 = vmatpush1.bf16.msra.mxu1 %v10096_v5  ;;  %v10188_v3 = vld [vmem:[%s12127_s8 + $0x138c] ss:$16 sps:$4 sm:$0xff]   ;;  %v10183_v5 = vld [vmem:[%s12127_s8 + $0x1380] ss:$16 sps:$4 sm:$0xff]  }
 0x3d9   : > { %7104 = vmatprep.subr.bf16.mxu0 %v10101_v6  ;;  %7637 = vmatprep.subr.bf16.mxu1 %v10104_v7  ;;  %v10186_v6 = vld [vmem:[%s12127_s8 + $0x1388] ss:$16 sps:$4 sm:$0xff]   ;;  %v10191_v7 = vld [vmem:[%s12127_s8 + $0x13a4] ss:$16 sps:$4 sm:$0xff]  }
 0x3dc   : > { %7105 = vmatpush1.bf16.msra.mxu0 %v10099_v57  ;;  %7638 = vmatpush1.bf16.msra.mxu1 %v10102_v8  ;;  %v10194_v57 = vld [vmem:[%s12127_s8 + $0x13ac] ss:$16 sps:$4 sm:$0xff]   ;;  %v10189_v8 = vld [vmem:[%s12127_s8 + $0x13a0] ss:$16 sps:$4 sm:$0xff]  }
 0x3dd   : > { %7106 = vmatprep.subr.bf16.mxu0 %v10107_v9  ;;  %7639 = vmatprep.subr.bf16.mxu1 %v10110_v10  ;;  %v10192_v9 = vld [vmem:[%s12127_s8 + $0x13a8] ss:$16 sps:$4 sm:$0xff]   ;;  %v10197_v10 = vld [vmem:[%s12127_s8 + $0x13c4] ss:$16 sps:$4 sm:$0xff]  }
 0x3e0   : > { %7107 = vmatpush1.bf16.msra.mxu0 %v10105_v2  ;;  %7640 = vmatpush1.bf16.msra.mxu1 %v10108_v11  ;;  %v10200_v2 = vld [vmem:[%s12127_s8 + $0x13cc] ss:$16 sps:$4 sm:$0xff]   ;;  %v2737_v11 = vcombine.high %v12727_v54, %v12727_v54  ;;  %v10201_v54 = vld [vmem:[%s12127_s8 + $0x13e0] ss:$16 sps:$4 sm:$0xff]  }
 0x3e1   : > { %7117 = vmatprep.subr.bf16.mxu0 %v10113_v12  ;;  %7650 = vmatprep.subr.bf16.mxu1 %v10116_v34  ;;  %v10195_v12 = vld [vmem:[%s12127_s8 + $0x13c0] ss:$16 sps:$4 sm:$0xff]   ;;  %v10198_v34 = vld [vmem:[%s12127_s8 + $0x13c8] ss:$16 sps:$4 sm:$0xff]  }
 0x3e3   : > { %7109 = vmatmul.mubr.bf16.vlgmr.msra.gmra.mrb[0].mxu0 %v12816_v14  ;;  %7642 = vmatmul.mubr.bf16.vlgmr.msra.gmra.mrb[0].mxu1 %v12816_v14 }
 0x3e4   : > { %7118 = vmatpush1.bf16.msra.mxu0 %v10111_v15  ;;  %7651 = vmatpush1.bf16.msra.mxu1 %v10114_v16  ;;  %v10203_v15 = vld [vmem:[%s12127_s8 + $0x13e4] ss:$16 sps:$4 sm:$0xff]   ;;  %v10206_v16 = vld [vmem:[%s12127_s8 + $0x13ec] ss:$16 sps:$4 sm:$0xff]  }
 0x3e5   : > { %7119 = vmatprep.subr.bf16.mxu0 %v10119_v17  ;;  %7652 = vmatprep.subr.bf16.mxu1 %v10122_v18  ;;  %v12885_v17 = vrot.slane %v2737_v11, %v12132_v24  ;;  %v10204_v18 = vld [vmem:[%s12127_s8 + $0x13e8] ss:$16 sps:$4 sm:$0xff]  }
 0x3e6   : > { %7149 = vmatprep.mubr.bf16.mxu0 %v2784_v21  ;;  %7682 = vmatprep.mubr.bf16.mxu1 %v2784_v21  ;;  %v10209_v21 = vld [vmem:[%s12127_s8 + $0x1404] ss:$16 sps:$4 sm:$0xff]   ;;  %v10282_v11 = vld [vmem:[%s12127_s8 + $0x1588] ss:$16 sps:$4 sm:$0xff]  }
 0x3e8   : > { %7120 = vmatpush1.bf16.msra.mxu0 %v10117_v4  ;;  %7653 = vmatpush1.bf16.msra.mxu1 %v10120_v22  ;;  %v10212_v4 = vld [vmem:[%s12127_s8 + $0x140c] ss:$16 sps:$4 sm:$0xff]   ;;  %v2753_v22 = vcombine.high %v12885_v17, %v12885_v17 }
 0x3e9   : > { %7121 = vmatprep.subr.bf16.mxu0 %v10125_v23  ;;  %7654 = vmatprep.subr.bf16.mxu1 %v10128_v25  ;;  %v2782_v23 = vcombine.high %v12816_v14, %v12816_v14  ;;  %v10207_v25 = vld [vmem:[%s12127_s8 + $0x1400] ss:$16 sps:$4 sm:$0xff]  }
 0x3ea   : > { %v10213_v14 = vld [vmem:[%s12127_s8 + $0x1420] ss:$16 sps:$4 sm:$0xff]  }
 0x3ec   : > { %7122 = vmatpush1.bf16.msra.mxu0 %v10123_v13  ;;  %7655 = vmatpush1.bf16.msra.mxu1 %v10126_v26  ;;  %v10210_v13 = vld [vmem:[%s12127_s8 + $0x1408] ss:$16 sps:$4 sm:$0xff]   ;;  %v10215_v26 = vld [vmem:[%s12127_s8 + $0x1424] ss:$16 sps:$4 sm:$0xff]  }
 0x3ed   : > { %7123 = vmatprep.subr.bf16.mxu0 %v10131_v27  ;;  %7656 = vmatprep.subr.bf16.mxu1 %v10134_v29  ;;  %v10218_v27 = vld [vmem:[%s12127_s8 + $0x142c] ss:$16 sps:$4 sm:$0xff]   ;;  %v12900_v29 = vrot.slane %v2753_v22, %v12132_v24  ;;  %v10299_v22 = vld [vmem:[%s12127_s8 + $0x15e4] ss:$16 sps:$4 sm:$0xff]  }
 0x3f0   : > { %7124 = vmatpush1.bf16.msra.mxu0 %v10129_v30  ;;  %7657 = vmatpush1.bf16.msra.mxu1 %v10132_v31  ;;  %v10216_v30 = vld [vmem:[%s12127_s8 + $0x1428] ss:$16 sps:$4 sm:$0xff]   ;;  %v10221_v31 = vld [vmem:[%s12127_s8 + $0x1444] ss:$16 sps:$4 sm:$0xff]  }
 0x3f1   : > { %7125 = vmatprep.subr.bf16.mxu0 %v10137_v32  ;;  %7658 = vmatprep.subr.bf16.mxu1 %v10140_v33  ;;  %v10224_v32 = vld [vmem:[%s12127_s8 + $0x144c] ss:$16 sps:$4 sm:$0xff]   ;;  %v10219_v33 = vld [vmem:[%s12127_s8 + $0x1440] ss:$16 sps:$4 sm:$0xff]  }
 0x3f4   : > { %7126 = vmatpush1.bf16.msra.mxu0 %v10135_v36  ;;  %7659 = vmatpush1.bf16.msra.mxu1 %v10138_v38  ;;  %v10222_v36 = vld [vmem:[%s12127_s8 + $0x1448] ss:$16 sps:$4 sm:$0xff]   ;;  %v10227_v38 = vld [vmem:[%s12127_s8 + $0x1464] ss:$16 sps:$4 sm:$0xff]  }
 0x3f5   : > { %7127 = vmatprep.subr.bf16.mxu0 %v10143_v20  ;;  %7660 = vmatprep.subr.bf16.mxu1 %v10146_v39  ;;  %v10230_v20 = vld [vmem:[%s12127_s8 + $0x146c] ss:$16 sps:$4 sm:$0xff]   ;;  %v10225_v39 = vld [vmem:[%s12127_s8 + $0x1460] ss:$16 sps:$4 sm:$0xff]  }
 0x3f8   : > { %7128 = vmatpush1.bf16.msra.mxu0 %v10141_v28  ;;  %7661 = vmatpush1.bf16.msra.mxu1 %v10144_v40  ;;  %v10228_v28 = vld [vmem:[%s12127_s8 + $0x1468] ss:$16 sps:$4 sm:$0xff]   ;;  %v10233_v40 = vld [vmem:[%s12127_s8 + $0x1484] ss:$16 sps:$4 sm:$0xff]  }
 0x3f9   : > { %7129 = vmatprep.subr.bf16.mxu0 %v10149_v41  ;;  %7662 = vmatprep.subr.bf16.mxu1 %v10152_v42  ;;  %v10236_v41 = vld [vmem:[%s12127_s8 + $0x148c] ss:$16 sps:$4 sm:$0xff]   ;;  %v10231_v42 = vld [vmem:[%s12127_s8 + $0x1480] ss:$16 sps:$4 sm:$0xff]  }
 0x3fc   : > { %7130 = vmatpush1.bf16.msra.mxu0 %v10147_v43  ;;  %7663 = vmatpush1.bf16.msra.mxu1 %v10150_v45  ;;  %v10234_v43 = vld [vmem:[%s12127_s8 + $0x1488] ss:$16 sps:$4 sm:$0xff]   ;;  %v10239_v45 = vld [vmem:[%s12127_s8 + $0x14a4] ss:$16 sps:$4 sm:$0xff]  }
 0x3fd   : > { %7131 = vmatprep.subr.bf16.mxu0 %v10155_v46  ;;  %7664 = vmatprep.subr.bf16.mxu1 %v10158_v47  ;;  %v10242_v46 = vld [vmem:[%s12127_s8 + $0x14ac] ss:$16 sps:$4 sm:$0xff]   ;;  %v10237_v47 = vld [vmem:[%s12127_s8 + $0x14a0] ss:$16 sps:$4 sm:$0xff]  }
 0x400   : > { %7132 = vmatpush1.bf16.msra.mxu0 %v10153_v48  ;;  %7665 = vmatpush1.bf16.msra.mxu1 %v10156_v49  ;;  %v10240_v48 = vld [vmem:[%s12127_s8 + $0x14a8] ss:$16 sps:$4 sm:$0xff]   ;;  %v10245_v49 = vld [vmem:[%s12127_s8 + $0x14c4] ss:$16 sps:$4 sm:$0xff]  }
 0x401   : > { %7133 = vmatprep.subr.bf16.mxu0 %v10161_v50  ;;  %7666 = vmatprep.subr.bf16.mxu1 %v10164_v35  ;;  %v10248_v50 = vld [vmem:[%s12127_s8 + $0x14cc] ss:$16 sps:$4 sm:$0xff]   ;;  %v10243_v35 = vld [vmem:[%s12127_s8 + $0x14c0] ss:$16 sps:$4 sm:$0xff]  }
 0x404   : > { %7134 = vmatpush1.bf16.msra.mxu0 %v10159_v51  ;;  %7667 = vmatpush1.bf16.msra.mxu1 %v10162_v52  ;;  %v10246_v51 = vld [vmem:[%s12127_s8 + $0x14c8] ss:$16 sps:$4 sm:$0xff]   ;;  %v10251_v52 = vld [vmem:[%s12127_s8 + $0x14e4] ss:$16 sps:$4 sm:$0xff]  }
 0x405   : > { %7135 = vmatprep.subr.bf16.mxu0 %v10167_v44  ;;  %7668 = vmatprep.subr.bf16.mxu1 %v10170_v53  ;;  %v10254_v44 = vld [vmem:[%s12127_s8 + $0x14ec] ss:$16 sps:$4 sm:$0xff]   ;;  %v10249_v53 = vld [vmem:[%s12127_s8 + $0x14e0] ss:$16 sps:$4 sm:$0xff]  }
 0x408   : > { %7136 = vmatpush1.bf16.msra.mxu0 %v10165_v55  ;;  %7669 = vmatpush1.bf16.msra.mxu1 %v10168_v56  ;;  %v10252_v55 = vld [vmem:[%s12127_s8 + $0x14e8] ss:$16 sps:$4 sm:$0xff]   ;;  %v10257_v56 = vld [vmem:[%s12127_s8 + $0x1504] ss:$16 sps:$4 sm:$0xff]  }
 0x409   : > { %7137 = vmatprep.subr.bf16.mxu0 %v10173_v58  ;;  %7670 = vmatprep.subr.bf16.mxu1 %v10176_v59  ;;  %v10260_v58 = vld [vmem:[%s12127_s8 + $0x150c] ss:$16 sps:$4 sm:$0xff]   ;;  %v10255_v59 = vld [vmem:[%s12127_s8 + $0x1500] ss:$16 sps:$4 sm:$0xff]  }
 0x40c   : > { %7138 = vmatpush1.bf16.msra.mxu0 %v10171_v37  ;;  %7671 = vmatpush1.bf16.msra.mxu1 %v10174_v60  ;;  %v10258_v37 = vld [vmem:[%s12127_s8 + $0x1508] ss:$16 sps:$4 sm:$0xff]   ;;  %v10263_v60 = vld [vmem:[%s12127_s8 + $0x1524] ss:$16 sps:$4 sm:$0xff]  }
 0x40d   : > { %7139 = vmatprep.subr.bf16.mxu0 %v10179_v61  ;;  %7672 = vmatprep.subr.bf16.mxu1 %v10182_v62  ;;  %v10266_v61 = vld [vmem:[%s12127_s8 + $0x152c] ss:$16 sps:$4 sm:$0xff]   ;;  %v10261_v62 = vld [vmem:[%s12127_s8 + $0x1520] ss:$16 sps:$4 sm:$0xff]  }
 0x410   : > { %7140 = vmatpush1.bf16.msra.mxu0 %v10177_v63  ;;  %7673 = vmatpush1.bf16.msra.mxu1 %v10180_v0  ;;  %v10264_v63 = vld [vmem:[%s12127_s8 + $0x1528] ss:$16 sps:$4 sm:$0xff]   ;;  %v10269_v0 = vld [vmem:[%s12127_s8 + $0x1544] ss:$16 sps:$4 sm:$0xff]  }
 0x411   : > { %7141 = vmatprep.subr.bf16.mxu0 %v10185_v1  ;;  %7674 = vmatprep.subr.bf16.mxu1 %v10188_v3  ;;  %v10272_v1 = vld [vmem:[%s12127_s8 + $0x154c] ss:$16 sps:$4 sm:$0xff]   ;;  %v10267_v3 = vld [vmem:[%s12127_s8 + $0x1540] ss:$16 sps:$4 sm:$0xff]  }
 0x414   : > { %7142 = vmatpush1.bf16.msra.mxu0 %v10183_v5  ;;  %7675 = vmatpush1.bf16.msra.mxu1 %v10186_v6  ;;  %v10270_v5 = vld [vmem:[%s12127_s8 + $0x1548] ss:$16 sps:$4 sm:$0xff]   ;;  %v10275_v6 = vld [vmem:[%s12127_s8 + $0x1564] ss:$16 sps:$4 sm:$0xff]  }
 0x415   : > { %7143 = vmatprep.subr.bf16.mxu0 %v10191_v7  ;;  %7676 = vmatprep.subr.bf16.mxu1 %v10194_v57  ;;  %v10278_v7 = vld [vmem:[%s12127_s8 + $0x156c] ss:$16 sps:$4 sm:$0xff]   ;;  %v10273_v57 = vld [vmem:[%s12127_s8 + $0x1560] ss:$16 sps:$4 sm:$0xff]  }
 0x418   : > { %7144 = vmatpush1.bf16.msra.mxu0 %v10189_v8  ;;  %7677 = vmatpush1.bf16.msra.mxu1 %v10192_v9  ;;  %v10276_v8 = vld [vmem:[%s12127_s8 + $0x1568] ss:$16 sps:$4 sm:$0xff]   ;;  %v10281_v9 = vld [vmem:[%s12127_s8 + $0x1584] ss:$16 sps:$4 sm:$0xff]  }
 0x419   : > { %7145 = vmatprep.subr.bf16.mxu0 %v10197_v10  ;;  %7678 = vmatprep.subr.bf16.mxu1 %v10200_v2  ;;  %v10284_v10 = vld [vmem:[%s12127_s8 + $0x158c] ss:$16 sps:$4 sm:$0xff]   ;;  %v10279_v2 = vld [vmem:[%s12127_s8 + $0x1580] ss:$16 sps:$4 sm:$0xff]  }
 0x41c   : > { %7146 = vmatpush1.bf16.msra.mxu0 %v10195_v12  ;;  %7679 = vmatpush1.bf16.msra.mxu1 %v10198_v34  ;;  %v10287_v12 = vld [vmem:[%s12127_s8 + $0x15a4] ss:$16 sps:$4 sm:$0xff]   ;;  %v10290_v34 = vld [vmem:[%s12127_s8 + $0x15ac] ss:$16 sps:$4 sm:$0xff]  }
 0x41d   : > { %7147 = vmatprep.subr.bf16.mxu0 %v10203_v15  ;;  %7680 = vmatprep.subr.bf16.mxu1 %v10206_v16  ;;  %v10285_v15 = vld [vmem:[%s12127_s8 + $0x15a0] ss:$16 sps:$4 sm:$0xff]   ;;  %v10288_v16 = vld [vmem:[%s12127_s8 + $0x15a8] ss:$16 sps:$4 sm:$0xff]  }
 0x420   : > { %7148 = vmatpush1.bf16.msra.mxu0 %v10201_v54  ;;  %7681 = vmatpush1.bf16.msra.mxu1 %v10204_v18  ;;  %v10293_v54 = vld [vmem:[%s12127_s8 + $0x15c4] ss:$16 sps:$4 sm:$0xff]   ;;  %v10296_v18 = vld [vmem:[%s12127_s8 + $0x15cc] ss:$16 sps:$4 sm:$0xff]  }
 0x421   : > { %7158 = vmatprep.subr.bf16.mxu0 %v10209_v21  ;;  %7691 = vmatprep.subr.bf16.mxu1 %v10212_v4  ;;  %v10291_v21 = vld [vmem:[%s12127_s8 + $0x15c0] ss:$16 sps:$4 sm:$0xff]   ;;  %v10294_v4 = vld [vmem:[%s12127_s8 + $0x15c8] ss:$16 sps:$4 sm:$0xff]  }
 0x423   : > { %7150 = vmatmul.mubr.bf16.vlgmr.msra.gmra.mrb[0].mxu0 %v2782_v23  ;;  %7683 = vmatmul.mubr.bf16.vlgmr.msra.gmra.mrb[0].mxu1 %v2782_v23  ;;  %v10302_v23 = vld [vmem:[%s12127_s8 + $0x15ec] ss:$16 sps:$4 sm:$0xff]  }
 0x424   : > { %7159 = vmatpush1.bf16.msra.mxu0 %v10207_v25  ;;  %7692 = vmatpush1.bf16.msra.mxu1 %v10210_v13  ;;  %v10297_v25 = vld [vmem:[%s12127_s8 + $0x15e0] ss:$16 sps:$4 sm:$0xff]   ;;  %v10300_v13 = vld [vmem:[%s12127_s8 + $0x15e8] ss:$16 sps:$4 sm:$0xff]  }
 0x425   : > { %7160 = vmatprep.subr.bf16.mxu0 %v10215_v26  ;;  %7693 = vmatprep.subr.bf16.mxu1 %v10218_v27  ;;  %v10306_v26 = vld [vmem:[%s12127_s8 + $0x1604] ss:$16 sps:$4 sm:$0xff]   ;;  %v10309_v27 = vld [vmem:[%s12127_s8 + $0x160c] ss:$16 sps:$4 sm:$0xff]  }
 0x426   : > { %7190 = vmatprep.mubr.bf16.mxu0 %v12900_v29  ;;  %7723 = vmatprep.mubr.bf16.mxu1 %v12900_v29 }
 0x428   : > { %7161 = vmatpush1.bf16.msra.mxu0 %v10213_v14  ;;  %7694 = vmatpush1.bf16.msra.mxu1 %v10216_v30  ;;  %v12972_v14 = vrot.slane %v12885_v17, %v12132_v24  ;;  %v10304_v30 = vld [vmem:[%s12127_s8 + $0x1600] ss:$16 sps:$4 sm:$0xff]  }
 0x429   : > { %7162 = vmatprep.subr.bf16.mxu0 %v10221_v31  ;;  %7695 = vmatprep.subr.bf16.mxu1 %v10224_v32  ;;  %v10307_v31 = vld [vmem:[%s12127_s8 + $0x1608] ss:$16 sps:$4 sm:$0xff]   ;;  %v10312_v32 = vld [vmem:[%s12127_s8 + $0x1624] ss:$16 sps:$4 sm:$0xff]   ;;  %v10310_v17 = vld [vmem:[%s12127_s8 + $0x1620] ss:$16 sps:$4 sm:$0xff]  }
 0x42c   : > { %7163 = vmatpush1.bf16.msra.mxu0 %v10219_v33  ;;  %7696 = vmatpush1.bf16.msra.mxu1 %v10222_v36  ;;  %v10315_v33 = vld [vmem:[%s12127_s8 + $0x162c] ss:$16 sps:$4 sm:$0xff]   ;;  %v2785_v36 = vcombine.high %v12900_v29, %v12900_v29  ;;  %v10316_v29 = vld [vmem:[%s12127_s8 + $0x1640] ss:$16 sps:$4 sm:$0xff]  }
 0x42d   : > { %7164 = vmatprep.subr.bf16.mxu0 %v10227_v38  ;;  %7697 = vmatprep.subr.bf16.mxu1 %v10230_v20  ;;  %v10313_v38 = vld [vmem:[%s12127_s8 + $0x1628] ss:$16 sps:$4 sm:$0xff]   ;;  %v10318_v20 = vld [vmem:[%s12127_s8 + $0x1644] ss:$16 sps:$4 sm:$0xff]  }
 0x430   : > { %7165 = vmatpush1.bf16.msra.mxu0 %v10225_v39  ;;  %7698 = vmatpush1.bf16.msra.mxu1 %v10228_v28  ;;  %v10321_v39 = vld [vmem:[%s12127_s8 + $0x164c] ss:$16 sps:$4 sm:$0xff]   ;;  %v10319_v28 = vld [vmem:[%s12127_s8 + $0x1648] ss:$16 sps:$4 sm:$0xff]  }
 0x431   : > { %7166 = vmatprep.subr.bf16.mxu0 %v10233_v40  ;;  %7699 = vmatprep.subr.bf16.mxu1 %v10236_v41  ;;  %v10324_v40 = vld [vmem:[%s12127_s8 + $0x1664] ss:$16 sps:$4 sm:$0xff]   ;;  %v10327_v41 = vld [vmem:[%s12127_s8 + $0x166c] ss:$16 sps:$4 sm:$0xff]  }
 0x434   : > { %7167 = vmatpush1.bf16.msra.mxu0 %v10231_v42  ;;  %7700 = vmatpush1.bf16.msra.mxu1 %v10234_v43  ;;  %v10322_v42 = vld [vmem:[%s12127_s8 + $0x1660] ss:$16 sps:$4 sm:$0xff]   ;;  %v10325_v43 = vld [vmem:[%s12127_s8 + $0x1668] ss:$16 sps:$4 sm:$0xff]  }
 0x435   : > { %7168 = vmatprep.subr.bf16.mxu0 %v10239_v45  ;;  %7701 = vmatprep.subr.bf16.mxu1 %v10242_v46  ;;  %v10330_v45 = vld [vmem:[%s12127_s8 + $0x1684] ss:$16 sps:$4 sm:$0xff]   ;;  %v10333_v46 = vld [vmem:[%s12127_s8 + $0x168c] ss:$16 sps:$4 sm:$0xff]  }
 0x438   : > { %7169 = vmatpush1.bf16.msra.mxu0 %v10237_v47  ;;  %7702 = vmatpush1.bf16.msra.mxu1 %v10240_v48  ;;  %v10328_v47 = vld [vmem:[%s12127_s8 + $0x1680] ss:$16 sps:$4 sm:$0xff]   ;;  %v10331_v48 = vld [vmem:[%s12127_s8 + $0x1688] ss:$16 sps:$4 sm:$0xff]  }
 0x439   : > { %7170 = vmatprep.subr.bf16.mxu0 %v10245_v49  ;;  %7703 = vmatprep.subr.bf16.mxu1 %v10248_v50  ;;  %v10336_v49 = vld [vmem:[%s12127_s8 + $0x16a4] ss:$16 sps:$4 sm:$0xff]   ;;  %v10339_v50 = vld [vmem:[%s12127_s8 + $0x16ac] ss:$16 sps:$4 sm:$0xff]  }
 0x43c   : > { %7171 = vmatpush1.bf16.msra.mxu0 %v10243_v35  ;;  %7704 = vmatpush1.bf16.msra.mxu1 %v10246_v51  ;;  %v10334_v35 = vld [vmem:[%s12127_s8 + $0x16a0] ss:$16 sps:$4 sm:$0xff]   ;;  %v10337_v51 = vld [vmem:[%s12127_s8 + $0x16a8] ss:$16 sps:$4 sm:$0xff]  }
 0x43d   : > { %7172 = vmatprep.subr.bf16.mxu0 %v10251_v52  ;;  %7705 = vmatprep.subr.bf16.mxu1 %v10254_v44  ;;  %v10342_v52 = vld [vmem:[%s12127_s8 + $0x16c4] ss:$16 sps:$4 sm:$0xff]   ;;  %v10345_v44 = vld [vmem:[%s12127_s8 + $0x16cc] ss:$16 sps:$4 sm:$0xff]  }
 0x440   : > { %7173 = vmatpush1.bf16.msra.mxu0 %v10249_v53  ;;  %7706 = vmatpush1.bf16.msra.mxu1 %v10252_v55  ;;  %v10340_v53 = vld [vmem:[%s12127_s8 + $0x16c0] ss:$16 sps:$4 sm:$0xff]   ;;  %v10343_v55 = vld [vmem:[%s12127_s8 + $0x16c8] ss:$16 sps:$4 sm:$0xff]  }
 0x441   : > { %7174 = vmatprep.subr.bf16.mxu0 %v10257_v56  ;;  %7707 = vmatprep.subr.bf16.mxu1 %v10260_v58  ;;  %v10348_v56 = vld [vmem:[%s12127_s8 + $0x16e4] ss:$16 sps:$4 sm:$0xff]   ;;  %v10351_v58 = vld [vmem:[%s12127_s8 + $0x16ec] ss:$16 sps:$4 sm:$0xff]  }
 0x444   : > { %7175 = vmatpush1.bf16.msra.mxu0 %v10255_v59  ;;  %7708 = vmatpush1.bf16.msra.mxu1 %v10258_v37  ;;  %v10346_v59 = vld [vmem:[%s12127_s8 + $0x16e0] ss:$16 sps:$4 sm:$0xff]   ;;  %v10349_v37 = vld [vmem:[%s12127_s8 + $0x16e8] ss:$16 sps:$4 sm:$0xff]  }
 0x445   : > { %7176 = vmatprep.subr.bf16.mxu0 %v10263_v60  ;;  %7709 = vmatprep.subr.bf16.mxu1 %v10266_v61  ;;  %v10354_v60 = vld [vmem:[%s12127_s8 + $0x1704] ss:$16 sps:$4 sm:$0xff]   ;;  %v10357_v61 = vld [vmem:[%s12127_s8 + $0x170c] ss:$16 sps:$4 sm:$0xff]  }
 0x448   : > { %7177 = vmatpush1.bf16.msra.mxu0 %v10261_v62  ;;  %7710 = vmatpush1.bf16.msra.mxu1 %v10264_v63  ;;  %v10352_v62 = vld [vmem:[%s12127_s8 + $0x1700] ss:$16 sps:$4 sm:$0xff]   ;;  %v10355_v63 = vld [vmem:[%s12127_s8 + $0x1708] ss:$16 sps:$4 sm:$0xff]  }
 0x449   : > { %7178 = vmatprep.subr.bf16.mxu0 %v10269_v0  ;;  %7711 = vmatprep.subr.bf16.mxu1 %v10272_v1  ;;  %v10360_v0 = vld [vmem:[%s12127_s8 + $0x1724] ss:$16 sps:$4 sm:$0xff]   ;;  %v10363_v1 = vld [vmem:[%s12127_s8 + $0x172c] ss:$16 sps:$4 sm:$0xff]  }
 0x44c   : > { %7179 = vmatpush1.bf16.msra.mxu0 %v10267_v3  ;;  %7712 = vmatpush1.bf16.msra.mxu1 %v10270_v5  ;;  %v10358_v3 = vld [vmem:[%s12127_s8 + $0x1720] ss:$16 sps:$4 sm:$0xff]   ;;  %v10361_v5 = vld [vmem:[%s12127_s8 + $0x1728] ss:$16 sps:$4 sm:$0xff]  }
 0x44d   : > { %7180 = vmatprep.subr.bf16.mxu0 %v10275_v6  ;;  %7713 = vmatprep.subr.bf16.mxu1 %v10278_v7  ;;  %v10366_v6 = vld [vmem:[%s12127_s8 + $0x1744] ss:$16 sps:$4 sm:$0xff]   ;;  %v10369_v7 = vld [vmem:[%s12127_s8 + $0x174c] ss:$16 sps:$4 sm:$0xff]  }
 0x450   : > { %7181 = vmatpush1.bf16.msra.mxu0 %v10273_v57  ;;  %7714 = vmatpush1.bf16.msra.mxu1 %v10276_v8  ;;  %v10364_v57 = vld [vmem:[%s12127_s8 + $0x1740] ss:$16 sps:$4 sm:$0xff]   ;;  %v10367_v8 = vld [vmem:[%s12127_s8 + $0x1748] ss:$16 sps:$4 sm:$0xff]  }
 0x451   : > { %7182 = vmatprep.subr.bf16.mxu0 %v10281_v9  ;;  %7715 = vmatprep.subr.bf16.mxu1 %v10284_v10  ;;  %v10372_v9 = vld [vmem:[%s12127_s8 + $0x1764] ss:$16 sps:$4 sm:$0xff]   ;;  %v10375_v10 = vld [vmem:[%s12127_s8 + $0x176c] ss:$16 sps:$4 sm:$0xff]  }
 0x454   : > { %7183 = vmatpush1.bf16.msra.mxu0 %v10279_v2  ;;  %7716 = vmatpush1.bf16.msra.mxu1 %v10282_v11  ;;  %v10370_v2 = vld [vmem:[%s12127_s8 + $0x1760] ss:$16 sps:$4 sm:$0xff]   ;;  %v10373_v11 = vld [vmem:[%s12127_s8 + $0x1768] ss:$16 sps:$4 sm:$0xff]  }
 0x455   : > { %7184 = vmatprep.subr.bf16.mxu0 %v10287_v12  ;;  %7717 = vmatprep.subr.bf16.mxu1 %v10290_v34  ;;  %v10378_v12 = vld [vmem:[%s12127_s8 + $0x1784] ss:$16 sps:$4 sm:$0xff]   ;;  %v10381_v34 = vld [vmem:[%s12127_s8 + $0x178c] ss:$16 sps:$4 sm:$0xff]  }
 0x458   : > { %7185 = vmatpush1.bf16.msra.mxu0 %v10285_v15  ;;  %7718 = vmatpush1.bf16.msra.mxu1 %v10288_v16  ;;  %v10376_v15 = vld [vmem:[%s12127_s8 + $0x1780] ss:$16 sps:$4 sm:$0xff]   ;;  %v10379_v16 = vld [vmem:[%s12127_s8 + $0x1788] ss:$16 sps:$4 sm:$0xff]  }
 0x459   : > { %7186 = vmatprep.subr.bf16.mxu0 %v10293_v54  ;;  %7719 = vmatprep.subr.bf16.mxu1 %v10296_v18  ;;  %v10384_v54 = vld [vmem:[%s12127_s8 + $0x17a4] ss:$16 sps:$4 sm:$0xff]   ;;  %v10387_v18 = vld [vmem:[%s12127_s8 + $0x17ac] ss:$16 sps:$4 sm:$0xff]  }
 0x45c   : > { %7187 = vmatpush1.bf16.msra.mxu0 %v10291_v21  ;;  %7720 = vmatpush1.bf16.msra.mxu1 %v10294_v4  ;;  %v10382_v21 = vld [vmem:[%s12127_s8 + $0x17a0] ss:$16 sps:$4 sm:$0xff]   ;;  %v10385_v4 = vld [vmem:[%s12127_s8 + $0x17a8] ss:$16 sps:$4 sm:$0xff]  }
 0x45d   : > { %7188 = vmatprep.subr.bf16.mxu0 %v10299_v22  ;;  %7721 = vmatprep.subr.bf16.mxu1 %v10302_v23  ;;  %v10390_v22 = vld [vmem:[%s12127_s8 + $0x17c4] ss:$16 sps:$4 sm:$0xff]   ;;  %v10393_v23 = vld [vmem:[%s12127_s8 + $0x17cc] ss:$16 sps:$4 sm:$0xff]  }
 0x460   : > { %7189 = vmatpush1.bf16.msra.mxu0 %v10297_v25  ;;  %7722 = vmatpush1.bf16.msra.mxu1 %v10300_v13  ;;  %v10388_v25 = vld [vmem:[%s12127_s8 + $0x17c0] ss:$16 sps:$4 sm:$0xff]   ;;  %v10391_v13 = vld [vmem:[%s12127_s8 + $0x17c8] ss:$16 sps:$4 sm:$0xff]  }
 0x461   : > { %7199 = vmatprep.subr.bf16.mxu0 %v10306_v26  ;;  %7732 = vmatprep.subr.bf16.mxu1 %v10309_v27  ;;  %v10396_v26 = vld [vmem:[%s12127_s8 + $0x17e4] ss:$16 sps:$4 sm:$0xff]   ;;  %v10399_v27 = vld [vmem:[%s12127_s8 + $0x17ec] ss:$16 sps:$4 sm:$0xff]  }
 0x463   : > { %7191 = vmatmul.mubr.bf16.vlgmr.msra.gmra.mrb[0].mxu0 %v12972_v14  ;;  %7724 = vmatmul.mubr.bf16.vlgmr.msra.gmra.mrb[0].mxu1 %v12972_v14 }
 0x464   : > { %7200 = vmatpush1.bf16.msra.mxu0 %v10304_v30  ;;  %7733 = vmatpush1.bf16.msra.mxu1 %v10307_v31  ;;  %v10394_v30 = vld [vmem:[%s12127_s8 + $0x17e0] ss:$16 sps:$4 sm:$0xff]   ;;  %v10397_v31 = vld [vmem:[%s12127_s8 + $0x17e8] ss:$16 sps:$4 sm:$0xff]  }
 0x465   : > { %7201 = vmatprep.subr.bf16.mxu0 %v10312_v32  ;;  %7734 = vmatprep.subr.bf16.mxu1 %v10315_v33  ;;  %v10402_v32 = vld [vmem:[%s12127_s8 + $0x1804] ss:$16 sps:$4 sm:$0xff]   ;;  %v10405_v33 = vld [vmem:[%s12127_s8 + $0x180c] ss:$16 sps:$4 sm:$0xff]  }
 0x466   : > { %7231 = vmatprep.mubr.bf16.mxu0 %v2785_v36  ;;  %7764 = vmatprep.mubr.bf16.mxu1 %v2785_v36  ;;  %v2783_v36 = vcombine.high %v12972_v14, %v12972_v14  ;;  %v10409_v14 = vld [vmem:[%s12127_s8 + $0x1828] ss:$16 sps:$4 sm:$0xff]  }
 0x468   : > { %7202 = vmatpush1.bf16.msra.mxu0 %v10310_v17  ;;  %7735 = vmatpush1.bf16.msra.mxu1 %v10313_v38  ;;  %v10400_v17 = vld [vmem:[%s12127_s8 + $0x1800] ss:$16 sps:$4 sm:$0xff]   ;;  %v10403_v38 = vld [vmem:[%s12127_s8 + $0x1808] ss:$16 sps:$4 sm:$0xff]  }
 0x469   : > { %7203 = vmatprep.subr.bf16.mxu0 %v10318_v20  ;;  %7736 = vmatprep.subr.bf16.mxu1 %v10321_v39  ;;  %v10408_v20 = vld [vmem:[%s12127_s8 + $0x1824] ss:$16 sps:$4 sm:$0xff]   ;;  %v10411_v39 = vld [vmem:[%s12127_s8 + $0x182c] ss:$16 sps:$4 sm:$0xff]  }
 0x46c   : > { %7204 = vmatpush1.bf16.msra.mxu0 %v10316_v29  ;;  %7737 = vmatpush1.bf16.msra.mxu1 %v10319_v28  ;;  %v10406_v29 = vld [vmem:[%s12127_s8 + $0x1820] ss:$16 sps:$4 sm:$0xff]   ;;  %v10414_v28 = vld [vmem:[%s12127_s8 + $0x1844] ss:$16 sps:$4 sm:$0xff]  }
 0x46d   : > { %7205 = vmatprep.subr.bf16.mxu0 %v10324_v40  ;;  %7738 = vmatprep.subr.bf16.mxu1 %v10327_v41  ;;  %v10417_v40 = vld [vmem:[%s12127_s8 + $0x184c] ss:$16 sps:$4 sm:$0xff]   ;;  %v10483_v41 = vmov 0  }
 0x470   : > { %7206 = vmatpush1.bf16.msra.mxu0 %v10322_v42  ;;  %7739 = vmatpush1.bf16.msra.mxu1 %v10325_v43  ;;  %v10412_v42 = vld [vmem:[%s12127_s8 + $0x1840] ss:$16 sps:$4 sm:$0xff]   ;;  %v10415_v43 = vld [vmem:[%s12127_s8 + $0x1848] ss:$16 sps:$4 sm:$0xff]  }
 0x471   : > { %7207 = vmatprep.subr.bf16.mxu0 %v10330_v45  ;;  %7740 = vmatprep.subr.bf16.mxu1 %v10333_v46  ;;  %v10420_v45 = vld [vmem:[%s12127_s8 + $0x1864] ss:$16 sps:$4 sm:$0xff]   ;;  %v10423_v46 = vld [vmem:[%s12127_s8 + $0x186c] ss:$16 sps:$4 sm:$0xff]  }
 0x474   : > { %7208 = vmatpush1.bf16.msra.mxu0 %v10328_v47  ;;  %7741 = vmatpush1.bf16.msra.mxu1 %v10331_v48  ;;  %v10418_v47 = vld [vmem:[%s12127_s8 + $0x1860] ss:$16 sps:$4 sm:$0xff]   ;;  %v10421_v48 = vld [vmem:[%s12127_s8 + $0x1868] ss:$16 sps:$4 sm:$0xff]  }
 0x475   : > { %7209 = vmatprep.subr.bf16.mxu0 %v10336_v49  ;;  %7742 = vmatprep.subr.bf16.mxu1 %v10339_v50  ;;  %v8251_v49 = vld.sshfl [vmem:[%s13117_s0 + $0x18] sm:$0x1 pattern:$0x75316420]  ;;  %v10424_v50 = vld [vmem:[%s12932_s23 + $0x40] sm:$0xff]  }
 0x478   : > { %7210 = vmatpush1.bf16.msra.mxu0 %v10334_v35  ;;  %7743 = vmatpush1.bf16.msra.mxu1 %v10337_v51  ;;  %v10425_v35 = vld [vmem:[%s12932_s23 + $0xc0] sm:$0xff]   ;;  %v2799_v51 = vrot.slane %v8251_v49, %v12132_v24  ;;  %v10430_v24 = vld [vmem:[%s12932_s23 + $0x8] sm:$0xff]  }
 0x479   : > { %7211 = vmatprep.subr.bf16.mxu0 %v10342_v52  ;;  %7744 = vmatprep.subr.bf16.mxu1 %v10345_v44  ;;  %v10426_v52 = vld [vmem:[%s12932_s23] sm:$0xff]  }
 0x47a   : > { %v10427_v44 = vld [vmem:[%s12932_s23 + $0x80] sm:$0xff]  }
 0x47c   : > { %7212 = vmatpush1.bf16.msra.mxu0 %v10340_v53  ;;  %7745 = vmatpush1.bf16.msra.mxu1 %v10343_v55  ;;  %v10428_v53 = vld [vmem:[%s12932_s23 + $0x48] sm:$0xff]  }
 0x47d   : > { %7213 = vmatprep.subr.bf16.mxu0 %v10348_v56  ;;  %7746 = vmatprep.subr.bf16.mxu1 %v10351_v58  ;;  %v10429_v55 = vld [vmem:[%s12932_s23 + $0xc8] sm:$0xff]   ;;  %v10432_v58 = vld [vmem:[%s12932_s23 + $0x50] sm:$0xff]  }
 0x47e   : > { %v10431_v56 = vld [vmem:[%s12932_s23 + $0x88] sm:$0xff]  }
 0x480   : > { %7214 = vmatpush1.bf16.msra.mxu0 %v10346_v59  ;;  %7747 = vmatpush1.bf16.msra.mxu1 %v10349_v37  ;;  %v10433_v59 = vld [vmem:[%s12932_s23 + $0xd0] sm:$0xff]  }
 0x481   : > { %7215 = vmatprep.subr.bf16.mxu0 %v10354_v60  ;;  %7748 = vmatprep.subr.bf16.mxu1 %v10357_v61  ;;  %v10434_v37 = vld [vmem:[%s12932_s23 + $0x10] sm:$0xff]   ;;  %v10436_v61 = vld [vmem:[%s12932_s23 + $0x58] sm:$0xff]  }
 0x482   : > { %v10435_v60 = vld [vmem:[%s12932_s23 + $0x90] sm:$0xff]  }
 0x484   : > { %7216 = vmatpush1.bf16.msra.mxu0 %v10352_v62  ;;  %7749 = vmatpush1.bf16.msra.mxu1 %v10355_v63  ;;  %v10437_v62 = vld [vmem:[%s12932_s23 + $0xd8] sm:$0xff]  }
 0x485   : > { %7217 = vmatprep.subr.bf16.mxu0 %v10360_v0  ;;  %7750 = vmatprep.subr.bf16.mxu1 %v10363_v1  ;;  %v10438_v63 = vld [vmem:[%s12932_s23 + $0x18] sm:$0xff]   ;;  %v10440_v1 = vld [vmem:[%s12932_s23 + $0x60] sm:$0xff]  }
 0x486   : > { %v10439_v0 = vld [vmem:[%s12932_s23 + $0x98] sm:$0xff]  }
 0x488   : > { %7218 = vmatpush1.bf16.msra.mxu0 %v10358_v3  ;;  %7751 = vmatpush1.bf16.msra.mxu1 %v10361_v5  ;;  %v10441_v3 = vld [vmem:[%s12932_s23 + $0xe0] sm:$0xff]  }
 0x489   : > { %7219 = vmatprep.subr.bf16.mxu0 %v10366_v6  ;;  %7752 = vmatprep.subr.bf16.mxu1 %v10369_v7  ;;  %v10442_v5 = vld [vmem:[%s12932_s23 + $0x20] sm:$0xff]   ;;  %v10444_v7 = vld [vmem:[%s12932_s23 + $0x68] sm:$0xff]  }
 0x48a   : > { %v10443_v6 = vld [vmem:[%s12932_s23 + $0xa0] sm:$0xff]  }
 0x48c   : > { %7220 = vmatpush1.bf16.msra.mxu0 %v10364_v57  ;;  %7753 = vmatpush1.bf16.msra.mxu1 %v10367_v8  ;;  %v10445_v57 = vld [vmem:[%s12932_s23 + $0xe8] sm:$0xff]  }
 0x48d   : > { %7221 = vmatprep.subr.bf16.mxu0 %v10372_v9  ;;  %7754 = vmatprep.subr.bf16.mxu1 %v10375_v10  ;;  %v10446_v8 = vld [vmem:[%s12932_s23 + $0x28] sm:$0xff]   ;;  %v10448_v10 = vld [vmem:[%s12932_s23 + $0x70] sm:$0xff]  }
 0x48e   : > { %v10447_v9 = vld [vmem:[%s12932_s23 + $0xa8] sm:$0xff]  }
 0x490   : > { %7222 = vmatpush1.bf16.msra.mxu0 %v10370_v2  ;;  %7755 = vmatpush1.bf16.msra.mxu1 %v10373_v11  ;;  %v10449_v2 = vld [vmem:[%s12932_s23 + $0xf0] sm:$0xff]  }
 0x491   : > { %7223 = vmatprep.subr.bf16.mxu0 %v10378_v12  ;;  %7756 = vmatprep.subr.bf16.mxu1 %v10381_v34  ;;  %v10450_v11 = vld [vmem:[%s12932_s23 + $0x30] sm:$0xff]   ;;  %v10452_v34 = vld [vmem:[%s12932_s23 + $0x78] sm:$0xff]  }
 0x492   : > { %v10451_v12 = vld [vmem:[%s12932_s23 + $0xb0] sm:$0xff]  }
 0x494   : > { %7224 = vmatpush1.bf16.msra.mxu0 %v10376_v15  ;;  %7757 = vmatpush1.bf16.msra.mxu1 %v10379_v16  ;;  %v10453_v15 = vld [vmem:[%s12932_s23 + $0xf8] sm:$0xff]  }
 0x495   : > { %7225 = vmatprep.subr.bf16.mxu0 %v10384_v54  ;;  %7758 = vmatprep.subr.bf16.mxu1 %v10387_v18  ;;  %v10454_v16 = vld [vmem:[%s12932_s23 + $0x38] sm:$0xff]   ;;  %v2617_v18 = vsub.s32 0, %v12120_v19 }
 0x496   : > { %v10455_v54 = vld [vmem:[%s12932_s23 + $0xb8] sm:$0xff]  }
 0x498   : > { %7226 = vmatpush1.bf16.msra.mxu0 %v10382_v21  ;;  %7759 = vmatpush1.bf16.msra.mxu1 %v10385_v4  ;;  %v2625_v21 = vsub.s32 2, %v12120_v19  ;;  %v2613_v4 = vld [vmem:[%s1812_s29] sm:$0xf] }
 0x499   : > { %7227 = vmatprep.subr.bf16.mxu0 %v10390_v22  ;;  %7760 = vmatprep.subr.bf16.mxu1 %v10393_v23  ;;  %v2621_v22 = vsub.s32 1, %v12120_v19  ;;  %v2629_v23 = vsub.s32 3, %v12120_v19 }
 0x49c   : > { %7228 = vmatpush1.bf16.msra.mxu0 %v10388_v25  ;;  %7761 = vmatpush1.bf16.msra.mxu1 %v10391_v13  ;;  %v2618_v25 = vrot.slane %v2613_v4, %v2617_v18  ;;  %v2626_v13 = vrot.slane %v2613_v4, %v2625_v21 }
 0x49d   : > { %7229 = vmatprep.subr.bf16.mxu0 %v10396_v26  ;;  %7762 = vmatprep.subr.bf16.mxu1 %v10399_v27  ;;  %v2622_v26 = vrot.slane %v2613_v4, %v2621_v22  ;;  %v2630_v27 = vrot.slane %v2613_v4, %v2629_v23 }
 0x4a0   : > { %7230 = vmatpush1.bf16.msra.mxu0 %v10394_v30  ;;  %7763 = vmatpush1.bf16.msra.mxu1 %v10397_v31 }
 0x4a1   : > { %7240 = vmatprep.subr.bf16.mxu0 %v10402_v32  ;;  %7773 = vmatprep.subr.bf16.mxu1 %v10405_v33 }
 0x4a3   : > { %7232 = vmatmul.mubr.bf16.vlgmr.msra.gmra.mrb[0].mxu0 %v2783_v36  ;;  %7765 = vmatmul.mubr.bf16.vlgmr.msra.gmra.mrb[0].mxu1 %v2783_v36 }
 0x4a4   : > { %7241 = vmatpush1.bf16.msra.mxu0 %v10400_v17  ;;  %7774 = vmatpush1.bf16.msra.mxu1 %v10403_v38 }
 0x4a5   : > { %7242 = vmatprep.subr.bf16.mxu0 %v10408_v20  ;;  %7775 = vmatprep.subr.bf16.mxu1 %v10411_v39 }
 0x4a6   : > { %7272 = vmatprep.mubr.bf16.mxu0 %v10483_v41  ;;  %7805 = vmatprep.mubr.bf16.mxu1 %v10483_v41 }
 0x4a8   : > { %7243 = vmatpush1.bf16.msra.mxu0 %v10406_v29  ;;  %7776 = vmatpush1.bf16.msra.mxu1 %v10409_v14 }
 0x4a9   : > { %7244 = vmatprep.subr.bf16.mxu0 %v10414_v28  ;;  %7777 = vmatprep.subr.bf16.mxu1 %v10417_v40 }
 0x4ac   : > { %7245 = vmatpush1.bf16.msra.mxu0 %v10412_v42  ;;  %7778 = vmatpush1.bf16.msra.mxu1 %v10415_v43 }
 0x4ad   : > { %7246 = vmatprep.subr.bf16.mxu0 %v10420_v45  ;;  %7779 = vmatprep.subr.bf16.mxu1 %v10423_v46 }
 0x4b0   : > { %7247 = vmatpush1.bf16.msra.mxu0 %v10418_v47  ;;  %7780 = vmatpush1.bf16.msra.mxu1 %v10421_v48 }
 0x4b1   : > { %9073 = vmatprep.subr.bf16.mxu0 %v10424_v50  ;;  %9095 = vmatprep.subr.bf16.mxu1 %v10425_v35 }
 0x4b3   : > { %9036 = vmatmul.mubr.msk.bf16.vlgmr.msra.gmra.mrb[0].mxu0 %vm6744_vm0, %v2799_v51  ;;  %9037 = vmatmul.mubr.msk.bf16.vlgmr.msra.gmra.mrb[0].mxu1 %vm6744_vm0, %v2799_v51 }
 0x4b4   : > { %9074 = vmatpush3.bf16.msra.mxu0 %v10426_v52  ;;  %9096 = vmatpush3.bf16.msra.mxu1 %v10427_v44 }
 0x4b5   : > { %9075 = vmatprep.subr.bf16.mxu0 %v10428_v53  ;;  %9097 = vmatprep.subr.bf16.mxu1 %v10429_v55 }
 0x4b8   : > { %9076 = vmatpush3.bf16.msra.mxu0 %v10430_v24  ;;  %9098 = vmatpush3.bf16.msra.mxu1 %v10431_v56 }
 0x4b9   : > { %9077 = vmatprep.subr.bf16.mxu0 %v10432_v58  ;;  %9099 = vmatprep.subr.bf16.mxu1 %v10433_v59 }
 0x4bc   : > { %9078 = vmatpush3.bf16.msra.mxu0 %v10434_v37  ;;  %9100 = vmatpush3.bf16.msra.mxu1 %v10435_v60 }
 0x4bd   : > { %9079 = vmatprep.subr.bf16.mxu0 %v10436_v61  ;;  %9101 = vmatprep.subr.bf16.mxu1 %v10437_v62 }
 0x4c0   : > { %9080 = vmatpush3.bf16.msra.mxu0 %v10438_v63  ;;  %9102 = vmatpush3.bf16.msra.mxu1 %v10439_v0 }
 0x4c1   : > { %9081 = vmatprep.subr.bf16.mxu0 %v10440_v1  ;;  %9103 = vmatprep.subr.bf16.mxu1 %v10441_v3 }
 0x4c4   : > { %9082 = vmatpush3.bf16.msra.mxu0 %v10442_v5  ;;  %9104 = vmatpush3.bf16.msra.mxu1 %v10443_v6 }
 0x4c5   : > { %9083 = vmatprep.subr.bf16.mxu0 %v10444_v7  ;;  %9105 = vmatprep.subr.bf16.mxu1 %v10445_v57 }
 0x4c8   : > { %9084 = vmatpush3.bf16.msra.mxu0 %v10446_v8  ;;  %9106 = vmatpush3.bf16.msra.mxu1 %v10447_v9 }
 0x4c9   : > { %9085 = vmatprep.subr.bf16.mxu0 %v10448_v10  ;;  %9107 = vmatprep.subr.bf16.mxu1 %v10449_v2 }
 0x4cc   : > { %9086 = vmatpush3.bf16.msra.mxu0 %v10450_v11  ;;  %9108 = vmatpush3.bf16.msra.mxu1 %v10451_v12 }
 0x4cd   : > { %9087 = vmatprep.subr.bf16.mxu0 %v10452_v34  ;;  %9109 = vmatprep.subr.bf16.mxu1 %v10453_v15 }
 0x4d0   : > { %9088 = vmatpush3.bf16.msra.mxu0 %v10454_v16  ;;  %9110 = vmatpush3.bf16.msra.mxu1 %v10455_v54 }
 0x586   : > { %v7274_v30 = vpop.f32.mrb[0].mxu0  ;;  %v7807_v31 = vpop.f32.mrb[0].mxu1 }
 0x587   : > { %v9117_v32 = vadd.f32 %v7274_v30, %v2618_v25  ;;  %v9119_v33 = vadd.f32 %v7807_v31, %v2626_v13  ;;  %v7276_v36 = vpop.f32.mrb[1].mxu0  ;;  %v7809_v17 = vpop.f32.mrb[1].mxu1 }
 0x588   : > { %v9118_v38 = vadd.f32 %v7276_v36, %v2622_v26  ;;  %v9120_v20 = vadd.f32 %v7809_v17, %v2630_v27  ;;  %v7278_v39 = vpop.f32.mrb[2].mxu0  ;;  %v7811_v29 = vpop.f32.mrb[2].mxu1 }
 0x589   : > { %v7814_v14 = vmax.f32 %v9117_v32, 0.0  ;;  %v7816_v28 = vmax.f32 %v9119_v33, 0.0  ;;  %v7279_v40 = vpop.f32.mrb[3].mxu0  ;;  %v7812_v19 = vpop.f32.mrb[3].mxu1 }
 0x58a   : > { %v7815_v41 = vmax.f32 %v9118_v38, 0.0  ;;  %v7817_v42 = vmax.f32 %v9120_v20, 0.0 }
 0x58b   : > { %v7818_v46 = vpack.c.bf16 %v7814_v14, %v7814_v14  ;;  %v7820_v47 = vpack.c.bf16 %v7816_v28, %v7816_v28 }
 0x58c   : > { %v7819_v43 = vpack.c.bf16 %v7815_v41, %v7815_v41  ;;  %v7821_v45 = vpack.c.bf16 %v7817_v42, %v7817_v42 }
 0x58e   : > { %8110 = vmatprep.mubr.bf16.mxu0 %v7819_v43  ;;  %8150 = vmatprep.mubr.bf16.mxu1 %v7821_v45 }
 0x58f   : > { %8111 = vmatmul.mubr.bf16.vlgmr.msra.gmra.mrb[4].mxu0 %v7818_v46  ;;  %8151 = vmatmul.mubr.bf16.vlgmr.msra.gmra.mrb[4].mxu1 %v7820_v47 }
 0x662   : > { %v9089_v48 = vpop.f32.mrb[4].mxu0  ;;  %v9111_v49 = vpop.f32.mrb[4].mxu1 }
 0x663   : > { %v9090_v50 = vpop.f32.mrb[5].mxu0  ;;  %v9112_v35 = vpop.f32.mrb[5].mxu1 }
 0x664   : > { %v9091_v51 = vadd.f32 %v9090_v50, %v9089_v48  ;;  %v9113_v52 = vadd.f32 %v9112_v35, %v9111_v49  ;;  %v9092_v44 = vpop.f32.mrb[6].mxu0  ;;  %v9114_v53 = vpop.f32.mrb[6].mxu1 }
 0x665   : > { %v9093_v55 = vpop.f32.mrb[7].mxu0  ;;  %v9115_v24 = vpop.f32.mrb[7].mxu1 }
 0x666   : > { %v8153_v56 = vadd.f32 %v9113_v52, %v9091_v51 }
 0x668   : > { %8159 = vst.msk [vmem:[%s1823_s7] sm:$0x3] %vm8158_vm1, %v8153_v56 }
 0x669 PF: > { %p11_p11 = scmp.ge.s32.totalorder %s10528_s19, 4   ;;  %s13122_s15 = smov %s10476_s16 }
 0x66a   : > { %s13123_s16 = smov %s10537_s22  ;;  %s13124_s17 = smov %s10528_s19 }
 0x66b   :  { %13 = sbr.rel (!%p11_p11) target bundleno = 2 (0x2), region = 100 }

</bundles_post_ra>
